<compile_context>
chip_gen: v5e
topology: v5e:2x2
jax: 0.10.0
libtpu: 0.0.40
codegen_flags: <defaults>
</compile_context>

<pallas_src>
import functools

import jax
import jax.numpy as jnp
from jax.experimental import pallas as pl
from jax.experimental.pallas import tpu as pltpu

LN_EPS = 1e-5       # nn.Transformer layer_norm_eps default
SLAB_WIDTH = 128    # lane width of the packed parameter slab


# ------------------------------ fused kernel ------------------------------- #

def _fused_transformer_kernel(src_ref, tgt_ref, slab_ref, o_ref, *,
                              layout, num_layers, num_heads, B, Ss, St, D):
    H = num_heads
    Dh = D // H

    # -- static-slice accessors into the parameter slab (zero runtime cost) --- #
    def wblock(name):                       # full-width weight block (in_dim, 128)
        off, r, _ = layout[name]
        return slab_ref[off:off + r, :]

    def vrow_full(name):                    # (1, 128) zero-padded vector
        off, _, _ = layout[name]
        return slab_ref[off:off + 1, :]

    def vrow(name):                         # (1, c) vector at its true width
        off, _, c = layout[name]
        return slab_ref[off:off + 1, :c]

    def linear(x, wname, bname, full=False):
        # x: (rows, in_dim). Weight columns are zero-padded to 128 lanes, so the
        # matmul is always lane-dense; slice the valid columns afterwards.
        _, _, wc = layout[wname]
        y = jnp.dot(x, wblock(wname), preferred_element_type=jnp.float32)
        y = y + vrow_full(bname)
        return y if full else y[:, :wc]

    def layernorm(x, gname, bname):
        mu = jnp.mean(x, axis=-1, keepdims=True)
        var = jnp.mean((x - mu) ** 2, axis=-1, keepdims=True)   # biased (PyTorch)
        return (x - mu) * jax.lax.rsqrt(var + LN_EPS) * vrow(gname) + vrow(bname)

    def mha(q, k, v, Sq, Sk):
        # q: (B*Sq, D), k/v: (B*Sk, D); q already scaled by 1/sqrt(Dh).
        # Per-batch, per-head scores/softmax/PV; heads merged by lane concat so
        # the output projection can be a single stacked matmul outside.
        ctx_parts = []
        for b in range(B):
            qb = q[b * Sq:(b + 1) * Sq, :]
            kb = k[b * Sk:(b + 1) * Sk, :]
            vb = v[b * Sk:(b + 1) * Sk, :]
            heads = []
            for h in range(H):
                lo, hi = h * Dh, (h + 1) * Dh
                s = jax.lax.dot_general(qb[:, lo:hi], kb[:, lo:hi],
                                        (((1,), (1,)), ((), ())),
                                        preferred_element_type=jnp.float32)  # (Sq, Sk)
                s = s - jnp.max(s, axis=-1, keepdims=True)
                e = jnp.exp(s)
                inv = pl.reciprocal(jnp.sum(e, axis=-1, keepdims=True), approx=True)
                pr = e * inv
                heads.append(jnp.dot(pr, vb[:, lo:hi],
                                     preferred_element_type=jnp.float32))    # (Sq, Dh)
            ctx_parts.append(jnp.concatenate(heads, axis=1))                 # (Sq, D)
        return jnp.concatenate(ctx_parts, axis=0)                            # (B*Sq, D)

    def enc_layer(x, l):
        qkv = linear(x, ("enc", l, "wqkv"), ("enc", l, "bqkv"))              # (Ns, 3D)
        ctx = mha(qkv[:, :D], qkv[:, D:2 * D], qkv[:, 2 * D:3 * D], Ss, Ss)
        attn = linear(ctx, ("enc", l, "wo"), ("enc", l, "bo"))
        x = layernorm(x + attn, ("enc", l, "ln1_g"), ("enc", l, "ln1_b"))
        hid = jnp.maximum(linear(x, ("enc", l, "w1"), ("enc", l, "b1")), 0.0)
        ff = linear(hid, ("enc", l, "w2"), ("enc", l, "b2"))
        return layernorm(x + ff, ("enc", l, "ln2_g"), ("enc", l, "ln2_b"))

    def dec_layer(x, mem, l):
        qkv = linear(x, ("dec", l, "sa_wqkv"), ("dec", l, "sa_bqkv"))
        ctx = mha(qkv[:, :D], qkv[:, D:2 * D], qkv[:, 2 * D:3 * D], St, St)
        attn = linear(ctx, ("dec", l, "sa_wo"), ("dec", l, "sa_bo"))
        x = layernorm(x + attn, ("dec", l, "ln1_g"), ("dec", l, "ln1_b"))
        q = linear(x, ("dec", l, "ca_wq"), ("dec", l, "ca_bq"))              # scaled Q
        kv = linear(mem, ("dec", l, "ca_wkv"), ("dec", l, "ca_bkv"))         # (Ns, 2D)
        ctx = mha(q, kv[:, :D], kv[:, D:2 * D], St, Ss)
        attn = linear(ctx, ("dec", l, "ca_wo"), ("dec", l, "ca_bo"))
        x = layernorm(x + attn, ("dec", l, "ln2_g"), ("dec", l, "ln2_b"))
        hid = jnp.maximum(linear(x, ("dec", l, "w1"), ("dec", l, "b1")), 0.0)
        ff = linear(hid, ("dec", l, "w2"), ("dec", l, "b2"))
        return layernorm(x + ff, ("dec", l, "ln3_g"), ("dec", l, "ln3_b"))

    # ----------------------- batch-stacked forward pass ---------------------- #
    mem = src_ref[...]                                        # (B*Ss, D)
    for l in range(num_layers):
        mem = enc_layer(mem, l)
    mem = layernorm(mem, ("enc_norm_g",), ("enc_norm_b",))    # encoder final norm

    out = tgt_ref[...]                                        # (B*St, D)
    for l in range(num_layers):
        out = dec_layer(out, mem, l)
    out = layernorm(out, ("dec_norm_g",), ("dec_norm_b",))    # decoder final norm

    # Lane-dense store: out_w / out_b are zero-padded to 128 lanes in the slab,
    # so the whole (B*St, 128) slab is written unmasked; wrapper slices 8 lanes.
    o_ref[...] = linear(out, ("out_w",), ("out_b",), full=True)


def time_series_transformer_forward(slab, src, tgt, *, layout, num_layers,
                                     num_heads, output_size):
    B, Ss, D = src.shape
    St = tgt.shape[1]
    kernel = functools.partial(
        _fused_transformer_kernel,
        layout=layout, num_layers=num_layers, num_heads=num_heads,
        B=B, Ss=Ss, St=St, D=D)
    vmem = pl.BlockSpec(memory_space=pltpu.MemorySpace.VMEM)
    out = pl.pallas_call(
        kernel,
        out_shape=jax.ShapeDtypeStruct((B * St, SLAB_WIDTH), jnp.float32),
        in_specs=[vmem, vmem, vmem],
        out_specs=vmem,
    )(src.reshape(B * Ss, D), tgt.reshape(B * St, D), slab)
    return out[:, :output_size].reshape(B, St, output_size)


# ------------------------- parameter init & packing ------------------------- #

def _dense(key, fan_in, fan_out):
    kw, kb = jax.random.split(key)
    w = jax.random.normal(kw, (fan_in, fan_out), jnp.float32) * 0.02
    b = jax.random.normal(kb, (fan_out,), jnp.float32) * 0.02
    return w, b


def _attn_params(key, d_model):
    ks = jax.random.split(key, 4)
    wq, bq = _dense(ks[0], d_model, d_model)
    wk, bk = _dense(ks[1], d_model, d_model)
    wv, bv = _dense(ks[2], d_model, d_model)
    wo, bo = _dense(ks[3], d_model, d_model)
    return dict(wq=wq, bq=bq, wk=wk, bk=bk, wv=wv, bv=bv, wo=wo, bo=bo)


def _enc_layer_params(key, d_model, dim_ff):
    ks = jax.random.split(key, 3)
    w1, b1 = _dense(ks[1], d_model, dim_ff)
    w2, b2 = _dense(ks[2], dim_ff, d_model)
    return dict(
        self_attn=_attn_params(ks[0], d_model),
        w1=w1, b1=b1, w2=w2, b2=b2,
        ln1_g=jnp.ones((d_model,), jnp.float32), ln1_b=jnp.zeros((d_model,), jnp.float32),
        ln2_g=jnp.ones((d_model,), jnp.float32), ln2_b=jnp.zeros((d_model,), jnp.float32),
    )


def _dec_layer_params(key, d_model, dim_ff):
    ks = jax.random.split(key, 4)
    w1, b1 = _dense(ks[2], d_model, dim_ff)
    w2, b2 = _dense(ks[3], dim_ff, d_model)
    return dict(
        self_attn=_attn_params(ks[0], d_model),
        cross_attn=_attn_params(ks[1], d_model),
        w1=w1, b1=b1, w2=w2, b2=b2,
        ln1_g=jnp.ones((d_model,), jnp.float32), ln1_b=jnp.zeros((d_model,), jnp.float32),
        ln2_g=jnp.ones((d_model,), jnp.float32), ln2_b=jnp.zeros((d_model,), jnp.float32),
        ln3_g=jnp.ones((d_model,), jnp.float32), ln3_b=jnp.zeros((d_model,), jnp.float32),
    )


def init_params(key, d_model, num_layers, dim_ff, output_size):
    keys = jax.random.split(key, 2 * num_layers + 1)
    enc_layers = [_enc_layer_params(keys[i], d_model, dim_ff) for i in range(num_layers)]
    dec_layers = [_dec_layer_params(keys[num_layers + i], d_model, dim_ff)
                  for i in range(num_layers)]
    out_w, out_b = _dense(keys[-1], d_model, output_size)
    return dict(
        enc_layers=enc_layers,
        dec_layers=dec_layers,
        enc_norm_g=jnp.ones((d_model,), jnp.float32),
        enc_norm_b=jnp.zeros((d_model,), jnp.float32),
        dec_norm_g=jnp.ones((d_model,), jnp.float32),
        dec_norm_b=jnp.zeros((d_model,), jnp.float32),
        out_w=out_w, out_b=out_b,
    )


def pack_params(raw, num_heads):
    """Pack all parameters into ONE f32 slab of shape (rows, 128).

    - Q|K|V (and cross-attn K|V) projections are fused; 1/sqrt(Dh) is folded
      into the Q projection weights and bias.
    - Every tensor is zero-padded to 128 lanes; matrices are placed first so
      their row offsets stay 8-sublane aligned, vectors (1 row each) follow.
    - Returns (slab, layout) where layout[key] = (row_offset, rows, valid_cols)
      with pure-Python ints (static, closed over by the kernel).
    """
    d_model = raw["enc_norm_g"].shape[0]
    dh = d_model // num_heads
    scale = 1.0 / float(dh) ** 0.5

    mats, vecs = [], []

    def add(key, arr):
        arr = jnp.asarray(arr, jnp.float32)
        if arr.ndim == 1:
            vecs.append((key, arr.reshape(1, -1)))
        else:
            mats.append((key, arr))

    for l, lp in enumerate(raw["enc_layers"]):
        a = lp["self_attn"]
        add(("enc", l, "wqkv"), jnp.concatenate([a["wq"] * scale, a["wk"], a["wv"]], axis=1))
        add(("enc", l, "bqkv"), jnp.concatenate([a["bq"] * scale, a["bk"], a["bv"]], axis=0))
        add(("enc", l, "wo"), a["wo"])
        add(("enc", l, "bo"), a["bo"])
        add(("enc", l, "w1"), lp["w1"])
        add(("enc", l, "b1"), lp["b1"])
        add(("enc", l, "w2"), lp["w2"])
        add(("enc", l, "b2"), lp["b2"])
        for n in ("ln1_g", "ln1_b", "ln2_g", "ln2_b"):
            add(("enc", l, n), lp[n])

    for l, lp in enumerate(raw["dec_layers"]):
        sa = lp["self_attn"]
        ca = lp["cross_attn"]
        add(("dec", l, "sa_wqkv"), jnp.concatenate([sa["wq"] * scale, sa["wk"], sa["wv"]], axis=1))
        add(("dec", l, "sa_bqkv"), jnp.concatenate([sa["bq"] * scale, sa["bk"], sa["bv"]], axis=0))
        add(("dec", l, "sa_wo"), sa["wo"])
        add(("dec", l, "sa_bo"), sa["bo"])
        add(("dec", l, "ca_wq"), ca["wq"] * scale)
        add(("dec", l, "ca_bq"), ca["bq"] * scale)
        add(("dec", l, "ca_wkv"), jnp.concatenate([ca["wk"], ca["wv"]], axis=1))
        add(("dec", l, "ca_bkv"), jnp.concatenate([ca["bk"], ca["bv"]], axis=0))
        add(("dec", l, "ca_wo"), ca["wo"])
        add(("dec", l, "ca_bo"), ca["bo"])
        add(("dec", l, "w1"), lp["w1"])
        add(("dec", l, "b1"), lp["b1"])
        add(("dec", l, "w2"), lp["w2"])
        add(("dec", l, "b2"), lp["b2"])
        for n in ("ln1_g", "ln1_b", "ln2_g", "ln2_b", "ln3_g", "ln3_b"):
            add(("dec", l, n), lp[n])

    add(("enc_norm_g",), raw["enc_norm_g"])
    add(("enc_norm_b",), raw["enc_norm_b"])
    add(("dec_norm_g",), raw["dec_norm_g"])
    add(("dec_norm_b",), raw["dec_norm_b"])
    add(("out_w",), raw["out_w"])
    add(("out_b",), raw["out_b"])

    layout = {}
    blocks = []
    off = 0
    for key, arr in mats + vecs:          # matrices first -> 8-aligned row offsets
        r, c = arr.shape
        assert c <= SLAB_WIDTH
        layout[key] = (off, r, c)
        blocks.append(jnp.pad(arr, ((0, 0), (0, SLAB_WIDTH - c))))
        off += r
    pad = (-off) % 8
    if pad:
        blocks.append(jnp.zeros((pad, SLAB_WIDTH), jnp.float32))
    slab = jnp.concatenate(blocks, axis=0)
    return slab, layout


# --------------------------- pure-JAX reference ----------------------------- #

def _reference_forward(raw, src, tgt, num_heads):
    def ln(x, g, b):
        mu = jnp.mean(x, axis=-1, keepdims=True)
        var = jnp.mean((x - mu) ** 2, axis=-1, keepdims=True)
        return (x - mu) / jnp.sqrt(var + LN_EPS) * g + b

    def mha(xq, xkv, a):
        B, Sq, D = xq.shape
        Sk = xkv.shape[1]
        H = num_heads
        Dh = D // H
        scale = 1.0 / float(Dh) ** 0.5
        q = (xq @ a["wq"] + a["bq"]).reshape(B, Sq, H, Dh).transpose(0, 2, 1, 3)
        k = (xkv @ a["wk"] + a["bk"]).reshape(B, Sk, H, Dh).transpose(0, 2, 1, 3)
        v = (xkv @ a["wv"] + a["bv"]).reshape(B, Sk, H, Dh).transpose(0, 2, 1, 3)
        s = jnp.einsum("bhqd,bhkd->bhqk", q, k) * scale
        p = jax.nn.softmax(s, axis=-1)
        o = jnp.einsum("bhqk,bhkd->bhqd", p, v).transpose(0, 2, 1, 3).reshape(B, Sq, D)
        return o @ a["wo"] + a["bo"]

    def enc_layer(x, lp):
        x = ln(x + mha(x, x, lp["self_attn"]), lp["ln1_g"], lp["ln1_b"])
        ff = jnp.maximum(x @ lp["w1"] + lp["b1"], 0.0) @ lp["w2"] + lp["b2"]
        return ln(x + ff, lp["ln2_g"], lp["ln2_b"])

    def dec_layer(x, mem, lp):
        x = ln(x + mha(x, x, lp["self_attn"]), lp["ln1_g"], lp["ln1_b"])
        x = ln(x + mha(x, mem, lp["cross_attn"]), lp["ln2_g"], lp["ln2_b"])
        ff = jnp.maximum(x @ lp["w1"] + lp["b1"], 0.0) @ lp["w2"] + lp["b2"]
        return ln(x + ff, lp["ln3_g"], lp["ln3_b"])

    mem = src
    for lp in raw["enc_layers"]:
        mem = enc_layer(mem, lp)
    mem = ln(mem, raw["enc_norm_g"], raw["enc_norm_b"])
    out = tgt
    for lp in raw["dec_layers"]:
        out = dec_layer(out, mem, lp)
    out = ln(out, raw["dec_norm_g"], raw["dec_norm_b"])
    return out @ raw["out_w"] + raw["out_b"]


# ---------------------------------- main ----------------------------------- #

if __name__ == "__main__":
    # Module hyperparameters (small): d_model=32, layers=2, heads=4, ff=64, out=8
    D_MODEL, NUM_LAYERS, NUM_HEADS, DIM_FF, OUT_SIZE = 32, 2, 4, 64, 8
    B, S_SRC, S_TGT = 2, 10, 8

    key = jax.random.PRNGKey(0)
    k_src, k_tgt, k_par = jax.random.split(key, 3)
    src = jax.random.normal(k_src, (B, S_SRC, D_MODEL), jnp.float32)
    tgt = jax.random.normal(k_tgt, (B, S_TGT, D_MODEL), jnp.float32)

    raw_params = init_params(k_par, D_MODEL, NUM_LAYERS, DIM_FF, OUT_SIZE)
    slab, layout = pack_params(raw_params, NUM_HEADS)

    fwd = jax.jit(functools.partial(
        time_series_transformer_forward,
        layout=layout, num_layers=NUM_LAYERS, num_heads=NUM_HEADS,
        output_size=OUT_SIZE))
    out = jax.block_until_ready(fwd(slab, src, tgt))

    assert out.shape == (B, S_TGT, OUT_SIZE), out.shape
    assert bool(jnp.all(jnp.isfinite(out)))

    ref = _reference_forward(raw_params, src, tgt, NUM_HEADS)
    max_err = float(jnp.max(jnp.abs(out - ref)))
    assert max_err < 2e-3, f"kernel/reference mismatch: {max_err}"

    print("KERNEL_OK")
</pallas_src>

<mosaic_0001>
module attributes {stable_mosaic.version = 11 : i64} {
  func.func @_fused_transformer_kernel(%arg0: memref<20x32xf32, #tpu.memory_space<vmem>>, %arg1: memref<16x32xf32, #tpu.memory_space<vmem>>, %arg2: memref<912x128xf32, #tpu.memory_space<vmem>>, %arg3: memref<16x128xf32, #tpu.memory_space<vmem>>) attributes {dimension_semantics = [], scalar_prefetch = 0 : i64, scratch_operands = 0 : i64, tpu.core_type = #tpu.core_type<tc>} {
    %c0 = arith.constant 0 : index
    %c0_0 = arith.constant 0 : index
    %0 = vector.load %arg0[%c0, %c0_0] : memref<20x32xf32, #tpu.memory_space<vmem>>, vector<20x32xf32>
    %c0_1 = arith.constant 0 : index
    %c0_2 = arith.constant 0 : index
    %1 = vector.load %arg2[%c0_1, %c0_2] : memref<912x128xf32, #tpu.memory_space<vmem>>, vector<32x128xf32>
    %cst = arith.constant dense<0.000000e+00> : vector<20x128xf32>
    %2 = tpu.matmul %0, %1, %cst {dimension_numbers = #tpu.dot_dimension_numbers<[1], [0], [0], [1], [0, 0, 1, 1], [], []>} : vector<20x32xf32>, vector<32x128xf32>, vector<20x128xf32> -> vector<20x128xf32>
    %c864 = arith.constant 864 : index
    %c0_3 = arith.constant 0 : index
    %3 = vector.load %arg2[%c864, %c0_3] : memref<912x128xf32, #tpu.memory_space<vmem>>, vector<1x128xf32>
    %4 = vector.broadcast %3 : vector<1x128xf32> to vector<20x128xf32>
    %5 = arith.addf %2, %4 : vector<20x128xf32>
    %6 = vector.extract_strided_slice %5 {offsets = [0, 0], sizes = [20, 96], strides = [1, 1]} : vector<20x128xf32> to vector<20x96xf32>
    %7 = vector.extract_strided_slice %6 {offsets = [0, 0], sizes = [20, 32], strides = [1, 1]} : vector<20x96xf32> to vector<20x32xf32>
    %8 = vector.extract_strided_slice %6 {offsets = [0, 32], sizes = [20, 32], strides = [1, 1]} : vector<20x96xf32> to vector<20x32xf32>
    %9 = vector.extract_strided_slice %6 {offsets = [0, 64], sizes = [20, 32], strides = [1, 1]} : vector<20x96xf32> to vector<20x32xf32>
    %10 = vector.extract_strided_slice %7 {offsets = [0, 0], sizes = [10, 32], strides = [1, 1]} : vector<20x32xf32> to vector<10x32xf32>
    %11 = vector.extract_strided_slice %8 {offsets = [0, 0], sizes = [10, 32], strides = [1, 1]} : vector<20x32xf32> to vector<10x32xf32>
    %12 = vector.extract_strided_slice %9 {offsets = [0, 0], sizes = [10, 32], strides = [1, 1]} : vector<20x32xf32> to vector<10x32xf32>
    %13 = vector.extract_strided_slice %10 {offsets = [0, 0], sizes = [10, 8], strides = [1, 1]} : vector<10x32xf32> to vector<10x8xf32>
    %14 = vector.extract_strided_slice %11 {offsets = [0, 0], sizes = [10, 8], strides = [1, 1]} : vector<10x32xf32> to vector<10x8xf32>
    %cst_4 = arith.constant dense<0.000000e+00> : vector<10x10xf32>
    %15 = tpu.matmul %13, %14, %cst_4 {dimension_numbers = #tpu.dot_dimension_numbers<[1], [1], [0], [0], [0, 0, 1, 0], [], []>} : vector<10x8xf32>, vector<10x8xf32>, vector<10x10xf32> -> vector<10x10xf32>
    %cst_5 = arith.constant dense<0xFF800000> : vector<10xf32>
    %16 = vector.multi_reduction <maximumf>, %15, %cst_5 [1] : vector<10x10xf32> to vector<10xf32>
    %17 = vector.shape_cast %16 : vector<10xf32> to vector<10x1xf32>
    %18 = vector.broadcast %17 : vector<10x1xf32> to vector<10x10xf32>
    %19 = arith.subf %15, %18 : vector<10x10xf32>
    %20 = math.exp %19 : vector<10x10xf32>
    %cst_6 = arith.constant dense<0.000000e+00> : vector<10xf32>
    %21 = vector.multi_reduction <add>, %20, %cst_6 [1] : vector<10x10xf32> to vector<10xf32>
    %22 = vector.shape_cast %21 : vector<10xf32> to vector<10x1xf32>
    %23 = tpu.reciprocal %22 {approx = true} : vector<10x1xf32> -> vector<10x1xf32>
    %24 = vector.broadcast %23 : vector<10x1xf32> to vector<10x10xf32>
    %25 = arith.mulf %20, %24 : vector<10x10xf32>
    %26 = vector.extract_strided_slice %12 {offsets = [0, 0], sizes = [10, 8], strides = [1, 1]} : vector<10x32xf32> to vector<10x8xf32>
    %cst_7 = arith.constant dense<0.000000e+00> : vector<10x8xf32>
    %27 = tpu.matmul %25, %26, %cst_7 {dimension_numbers = #tpu.dot_dimension_numbers<[1], [0], [0], [1], [0, 0, 1, 1], [], []>} : vector<10x10xf32>, vector<10x8xf32>, vector<10x8xf32> -> vector<10x8xf32>
    %28 = vector.extract_strided_slice %10 {offsets = [0, 8], sizes = [10, 8], strides = [1, 1]} : vector<10x32xf32> to vector<10x8xf32>
    %29 = vector.extract_strided_slice %11 {offsets = [0, 8], sizes = [10, 8], strides = [1, 1]} : vector<10x32xf32> to vector<10x8xf32>
    %cst_8 = arith.constant dense<0.000000e+00> : vector<10x10xf32>
    %30 = tpu.matmul %28, %29, %cst_8 {dimension_numbers = #tpu.dot_dimension_numbers<[1], [1], [0], [0], [0, 0, 1, 0], [], []>} : vector<10x8xf32>, vector<10x8xf32>, vector<10x10xf32> -> vector<10x10xf32>
    %cst_9 = arith.constant dense<0xFF800000> : vector<10xf32>
    %31 = vector.multi_reduction <maximumf>, %30, %cst_9 [1] : vector<10x10xf32> to vector<10xf32>
    %32 = vector.shape_cast %31 : vector<10xf32> to vector<10x1xf32>
    %33 = vector.broadcast %32 : vector<10x1xf32> to vector<10x10xf32>
    %34 = arith.subf %30, %33 : vector<10x10xf32>
    %35 = math.exp %34 : vector<10x10xf32>
    %cst_10 = arith.constant dense<0.000000e+00> : vector<10xf32>
    %36 = vector.multi_reduction <add>, %35, %cst_10 [1] : vector<10x10xf32> to vector<10xf32>
    %37 = vector.shape_cast %36 : vector<10xf32> to vector<10x1xf32>
    %38 = tpu.reciprocal %37 {approx = true} : vector<10x1xf32> -> vector<10x1xf32>
    %39 = vector.broadcast %38 : vector<10x1xf32> to vector<10x10xf32>
    %40 = arith.mulf %35, %39 : vector<10x10xf32>
    %41 = vector.extract_strided_slice %12 {offsets = [0, 8], sizes = [10, 8], strides = [1, 1]} : vector<10x32xf32> to vector<10x8xf32>
    %cst_11 = arith.constant dense<0.000000e+00> : vector<10x8xf32>
    %42 = tpu.matmul %40, %41, %cst_11 {dimension_numbers = #tpu.dot_dimension_numbers<[1], [0], [0], [1], [0, 0, 1, 1], [], []>} : vector<10x10xf32>, vector<10x8xf32>, vector<10x8xf32> -> vector<10x8xf32>
    %43 = vector.extract_strided_slice %10 {offsets = [0, 16], sizes = [10, 8], strides = [1, 1]} : vector<10x32xf32> to vector<10x8xf32>
    %44 = vector.extract_strided_slice %11 {offsets = [0, 16], sizes = [10, 8], strides = [1, 1]} : vector<10x32xf32> to vector<10x8xf32>
    %cst_12 = arith.constant dense<0.000000e+00> : vector<10x10xf32>
    %45 = tpu.matmul %43, %44, %cst_12 {dimension_numbers = #tpu.dot_dimension_numbers<[1], [1], [0], [0], [0, 0, 1, 0], [], []>} : vector<10x8xf32>, vector<10x8xf32>, vector<10x10xf32> -> vector<10x10xf32>
    %cst_13 = arith.constant dense<0xFF800000> : vector<10xf32>
    %46 = vector.multi_reduction <maximumf>, %45, %cst_13 [1] : vector<10x10xf32> to vector<10xf32>
    %47 = vector.shape_cast %46 : vector<10xf32> to vector<10x1xf32>
    %48 = vector.broadcast %47 : vector<10x1xf32> to vector<10x10xf32>
    %49 = arith.subf %45, %48 : vector<10x10xf32>
    %50 = math.exp %49 : vector<10x10xf32>
    %cst_14 = arith.constant dense<0.000000e+00> : vector<10xf32>
    %51 = vector.multi_reduction <add>, %50, %cst_14 [1] : vector<10x10xf32> to vector<10xf32>
    %52 = vector.shape_cast %51 : vector<10xf32> to vector<10x1xf32>
    %53 = tpu.reciprocal %52 {approx = true} : vector<10x1xf32> -> vector<10x1xf32>
    %54 = vector.broadcast %53 : vector<10x1xf32> to vector<10x10xf32>
    %55 = arith.mulf %50, %54 : vector<10x10xf32>
    %56 = vector.extract_strided_slice %12 {offsets = [0, 16], sizes = [10, 8], strides = [1, 1]} : vector<10x32xf32> to vector<10x8xf32>
    %cst_15 = arith.constant dense<0.000000e+00> : vector<10x8xf32>
    %57 = tpu.matmul %55, %56, %cst_15 {dimension_numbers = #tpu.dot_dimension_numbers<[1], [0], [0], [1], [0, 0, 1, 1], [], []>} : vector<10x10xf32>, vector<10x8xf32>, vector<10x8xf32> -> vector<10x8xf32>
    %58 = vector.extract_strided_slice %10 {offsets = [0, 24], sizes = [10, 8], strides = [1, 1]} : vector<10x32xf32> to vector<10x8xf32>
    %59 = vector.extract_strided_slice %11 {offsets = [0, 24], sizes = [10, 8], strides = [1, 1]} : vector<10x32xf32> to vector<10x8xf32>
    %cst_16 = arith.constant dense<0.000000e+00> : vector<10x10xf32>
    %60 = tpu.matmul %58, %59, %cst_16 {dimension_numbers = #tpu.dot_dimension_numbers<[1], [1], [0], [0], [0, 0, 1, 0], [], []>} : vector<10x8xf32>, vector<10x8xf32>, vector<10x10xf32> -> vector<10x10xf32>
    %cst_17 = arith.constant dense<0xFF800000> : vector<10xf32>
    %61 = vector.multi_reduction <maximumf>, %60, %cst_17 [1] : vector<10x10xf32> to vector<10xf32>
    %62 = vector.shape_cast %61 : vector<10xf32> to vector<10x1xf32>
    %63 = vector.broadcast %62 : vector<10x1xf32> to vector<10x10xf32>
    %64 = arith.subf %60, %63 : vector<10x10xf32>
    %65 = math.exp %64 : vector<10x10xf32>
    %cst_18 = arith.constant dense<0.000000e+00> : vector<10xf32>
    %66 = vector.multi_reduction <add>, %65, %cst_18 [1] : vector<10x10xf32> to vector<10xf32>
    %67 = vector.shape_cast %66 : vector<10xf32> to vector<10x1xf32>
    %68 = tpu.reciprocal %67 {approx = true} : vector<10x1xf32> -> vector<10x1xf32>
    %69 = vector.broadcast %68 : vector<10x1xf32> to vector<10x10xf32>
    %70 = arith.mulf %65, %69 : vector<10x10xf32>
    %71 = vector.extract_strided_slice %12 {offsets = [0, 24], sizes = [10, 8], strides = [1, 1]} : vector<10x32xf32> to vector<10x8xf32>
    %cst_19 = arith.constant dense<0.000000e+00> : vector<10x8xf32>
    %72 = tpu.matmul %70, %71, %cst_19 {dimension_numbers = #tpu.dot_dimension_numbers<[1], [0], [0], [1], [0, 0, 1, 1], [], []>} : vector<10x10xf32>, vector<10x8xf32>, vector<10x8xf32> -> vector<10x8xf32>
    %73 = tpu.concatenate %27, %42, %57, %72 in 1 : vector<10x8xf32>, vector<10x8xf32>, vector<10x8xf32>, vector<10x8xf32> -> vector<10x32xf32>
    %74 = vector.extract_strided_slice %7 {offsets = [10, 0], sizes = [10, 32], strides = [1, 1]} : vector<20x32xf32> to vector<10x32xf32>
    %75 = vector.extract_strided_slice %8 {offsets = [10, 0], sizes = [10, 32], strides = [1, 1]} : vector<20x32xf32> to vector<10x32xf32>
    %76 = vector.extract_strided_slice %9 {offsets = [10, 0], sizes = [10, 32], strides = [1, 1]} : vector<20x32xf32> to vector<10x32xf32>
    %77 = vector.extract_strided_slice %74 {offsets = [0, 0], sizes = [10, 8], strides = [1, 1]} : vector<10x32xf32> to vector<10x8xf32>
    %78 = vector.extract_strided_slice %75 {offsets = [0, 0], sizes = [10, 8], strides = [1, 1]} : vector<10x32xf32> to vector<10x8xf32>
    %cst_20 = arith.constant dense<0.000000e+00> : vector<10x10xf32>
    %79 = tpu.matmul %77, %78, %cst_20 {dimension_numbers = #tpu.dot_dimension_numbers<[1], [1], [0], [0], [0, 0, 1, 0], [], []>} : vector<10x8xf32>, vector<10x8xf32>, vector<10x10xf32> -> vector<10x10xf32>
    %cst_21 = arith.constant dense<0xFF800000> : vector<10xf32>
    %80 = vector.multi_reduction <maximumf>, %79, %cst_21 [1] : vector<10x10xf32> to vector<10xf32>
    %81 = vector.shape_cast %80 : vector<10xf32> to vector<10x1xf32>
    %82 = vector.broadcast %81 : vector<10x1xf32> to vector<10x10xf32>
    %83 = arith.subf %79, %82 : vector<10x10xf32>
    %84 = math.exp %83 : vector<10x10xf32>
    %cst_22 = arith.constant dense<0.000000e+00> : vector<10xf32>
    %85 = vector.multi_reduction <add>, %84, %cst_22 [1] : vector<10x10xf32> to vector<10xf32>
    %86 = vector.shape_cast %85 : vector<10xf32> to vector<10x1xf32>
    %87 = tpu.reciprocal %86 {approx = true} : vector<10x1xf32> -> vector<10x1xf32>
    %88 = vector.broadcast %87 : vector<10x1xf32> to vector<10x10xf32>
    %89 = arith.mulf %84, %88 : vector<10x10xf32>
    %90 = vector.extract_strided_slice %76 {offsets = [0, 0], sizes = [10, 8], strides = [1, 1]} : vector<10x32xf32> to vector<10x8xf32>
    %cst_23 = arith.constant dense<0.000000e+00> : vector<10x8xf32>
    %91 = tpu.matmul %89, %90, %cst_23 {dimension_numbers = #tpu.dot_dimension_numbers<[1], [0], [0], [1], [0, 0, 1, 1], [], []>} : vector<10x10xf32>, vector<10x8xf32>, vector<10x8xf32> -> vector<10x8xf32>
    %92 = vector.extract_strided_slice %74 {offsets = [0, 8], sizes = [10, 8], strides = [1, 1]} : vector<10x32xf32> to vector<10x8xf32>
    %93 = vector.extract_strided_slice %75 {offsets = [0, 8], sizes = [10, 8], strides = [1, 1]} : vector<10x32xf32> to vector<10x8xf32>
    %cst_24 = arith.constant dense<0.000000e+00> : vector<10x10xf32>
    %94 = tpu.matmul %92, %93, %cst_24 {dimension_numbers = #tpu.dot_dimension_numbers<[1], [1], [0], [0], [0, 0, 1, 0], [], []>} : vector<10x8xf32>, vector<10x8xf32>, vector<10x10xf32> -> vector<10x10xf32>
    %cst_25 = arith.constant dense<0xFF800000> : vector<10xf32>
    %95 = vector.multi_reduction <maximumf>, %94, %cst_25 [1] : vector<10x10xf32> to vector<10xf32>
    %96 = vector.shape_cast %95 : vector<10xf32> to vector<10x1xf32>
    %97 = vector.broadcast %96 : vector<10x1xf32> to vector<10x10xf32>
    %98 = arith.subf %94, %97 : vector<10x10xf32>
    %99 = math.exp %98 : vector<10x10xf32>
    %cst_26 = arith.constant dense<0.000000e+00> : vector<10xf32>
    %100 = vector.multi_reduction <add>, %99, %cst_26 [1] : vector<10x10xf32> to vector<10xf32>
    %101 = vector.shape_cast %100 : vector<10xf32> to vector<10x1xf32>
    %102 = tpu.reciprocal %101 {approx = true} : vector<10x1xf32> -> vector<10x1xf32>
    %103 = vector.broadcast %102 : vector<10x1xf32> to vector<10x10xf32>
    %104 = arith.mulf %99, %103 : vector<10x10xf32>
    %105 = vector.extract_strided_slice %76 {offsets = [0, 8], sizes = [10, 8], strides = [1, 1]} : vector<10x32xf32> to vector<10x8xf32>
    %cst_27 = arith.constant dense<0.000000e+00> : vector<10x8xf32>
    %106 = tpu.matmul %104, %105, %cst_27 {dimension_numbers = #tpu.dot_dimension_numbers<[1], [0], [0], [1], [0, 0, 1, 1], [], []>} : vector<10x10xf32>, vector<10x8xf32>, vector<10x8xf32> -> vector<10x8xf32>
    %107 = vector.extract_strided_slice %74 {offsets = [0, 16], sizes = [10, 8], strides = [1, 1]} : vector<10x32xf32> to vector<10x8xf32>
    %108 = vector.extract_strided_slice %75 {offsets = [0, 16], sizes = [10, 8], strides = [1, 1]} : vector<10x32xf32> to vector<10x8xf32>
    %cst_28 = arith.constant dense<0.000000e+00> : vector<10x10xf32>
    %109 = tpu.matmul %107, %108, %cst_28 {dimension_numbers = #tpu.dot_dimension_numbers<[1], [1], [0], [0], [0, 0, 1, 0], [], []>} : vector<10x8xf32>, vector<10x8xf32>, vector<10x10xf32> -> vector<10x10xf32>
    %cst_29 = arith.constant dense<0xFF800000> : vector<10xf32>
    %110 = vector.multi_reduction <maximumf>, %109, %cst_29 [1] : vector<10x10xf32> to vector<10xf32>
    %111 = vector.shape_cast %110 : vector<10xf32> to vector<10x1xf32>
    %112 = vector.broadcast %111 : vector<10x1xf32> to vector<10x10xf32>
    %113 = arith.subf %109, %112 : vector<10x10xf32>
    %114 = math.exp %113 : vector<10x10xf32>
    %cst_30 = arith.constant dense<0.000000e+00> : vector<10xf32>
    %115 = vector.multi_reduction <add>, %114, %cst_30 [1] : vector<10x10xf32> to vector<10xf32>
    %116 = vector.shape_cast %115 : vector<10xf32> to vector<10x1xf32>
    %117 = tpu.reciprocal %116 {approx = true} : vector<10x1xf32> -> vector<10x1xf32>
    %118 = vector.broadcast %117 : vector<10x1xf32> to vector<10x10xf32>
    %119 = arith.mulf %114, %118 : vector<10x10xf32>
    %120 = vector.extract_strided_slice %76 {offsets = [0, 16], sizes = [10, 8], strides = [1, 1]} : vector<10x32xf32> to vector<10x8xf32>
    %cst_31 = arith.constant dense<0.000000e+00> : vector<10x8xf32>
    %121 = tpu.matmul %119, %120, %cst_31 {dimension_numbers = #tpu.dot_dimension_numbers<[1], [0], [0], [1], [0, 0, 1, 1], [], []>} : vector<10x10xf32>, vector<10x8xf32>, vector<10x8xf32> -> vector<10x8xf32>
    %122 = vector.extract_strided_slice %74 {offsets = [0, 24], sizes = [10, 8], strides = [1, 1]} : vector<10x32xf32> to vector<10x8xf32>
    %123 = vector.extract_strided_slice %75 {offsets = [0, 24], sizes = [10, 8], strides = [1, 1]} : vector<10x32xf32> to vector<10x8xf32>
    %cst_32 = arith.constant dense<0.000000e+00> : vector<10x10xf32>
    %124 = tpu.matmul %122, %123, %cst_32 {dimension_numbers = #tpu.dot_dimension_numbers<[1], [1], [0], [0], [0, 0, 1, 0], [], []>} : vector<10x8xf32>, vector<10x8xf32>, vector<10x10xf32> -> vector<10x10xf32>
    %cst_33 = arith.constant dense<0xFF800000> : vector<10xf32>
    %125 = vector.multi_reduction <maximumf>, %124, %cst_33 [1] : vector<10x10xf32> to vector<10xf32>
    %126 = vector.shape_cast %125 : vector<10xf32> to vector<10x1xf32>
    %127 = vector.broadcast %126 : vector<10x1xf32> to vector<10x10xf32>
    %128 = arith.subf %124, %127 : vector<10x10xf32>
    %129 = math.exp %128 : vector<10x10xf32>
    %cst_34 = arith.constant dense<0.000000e+00> : vector<10xf32>
    %130 = vector.multi_reduction <add>, %129, %cst_34 [1] : vector<10x10xf32> to vector<10xf32>
    %131 = vector.shape_cast %130 : vector<10xf32> to vector<10x1xf32>
    %132 = tpu.reciprocal %131 {approx = true} : vector<10x1xf32> -> vector<10x1xf32>
    %133 = vector.broadcast %132 : vector<10x1xf32> to vector<10x10xf32>
    %134 = arith.mulf %129, %133 : vector<10x10xf32>
    %135 = vector.extract_strided_slice %76 {offsets = [0, 24], sizes = [10, 8], strides = [1, 1]} : vector<10x32xf32> to vector<10x8xf32>
    %cst_35 = arith.constant dense<0.000000e+00> : vector<10x8xf32>
    %136 = tpu.matmul %134, %135, %cst_35 {dimension_numbers = #tpu.dot_dimension_numbers<[1], [0], [0], [1], [0, 0, 1, 1], [], []>} : vector<10x10xf32>, vector<10x8xf32>, vector<10x8xf32> -> vector<10x8xf32>
    %137 = tpu.concatenate %91, %106, %121, %136 in 1 : vector<10x8xf32>, vector<10x8xf32>, vector<10x8xf32>, vector<10x8xf32> -> vector<10x32xf32>
    %138 = tpu.concatenate %73, %137 in 0 : vector<10x32xf32>, vector<10x32xf32> -> vector<20x32xf32>
    %c32 = arith.constant 32 : index
    %c0_36 = arith.constant 0 : index
    %139 = vector.load %arg2[%c32, %c0_36] : memref<912x128xf32, #tpu.memory_space<vmem>>, vector<32x128xf32>
    %cst_37 = arith.constant dense<0.000000e+00> : vector<20x128xf32>
    %140 = tpu.matmul %138, %139, %cst_37 {dimension_numbers = #tpu.dot_dimension_numbers<[1], [0], [0], [1], [0, 0, 1, 1], [], []>} : vector<20x32xf32>, vector<32x128xf32>, vector<20x128xf32> -> vector<20x128xf32>
    %c865 = arith.constant 865 : index
    %c0_38 = arith.constant 0 : index
    %141 = vector.load %arg2[%c865, %c0_38] : memref<912x128xf32, #tpu.memory_space<vmem>>, vector<1x128xf32>
    %142 = vector.broadcast %141 : vector<1x128xf32> to vector<20x128xf32>
    %143 = arith.addf %140, %142 : vector<20x128xf32>
    %144 = vector.extract_strided_slice %143 {offsets = [0, 0], sizes = [20, 32], strides = [1, 1]} : vector<20x128xf32> to vector<20x32xf32>
    %145 = arith.addf %0, %144 : vector<20x32xf32>
    %cst_39 = arith.constant dense<0.000000e+00> : vector<20xf32>
    %146 = vector.multi_reduction <add>, %145, %cst_39 [1] : vector<20x32xf32> to vector<20xf32>
    %147 = vector.shape_cast %146 : vector<20xf32> to vector<20x1xf32>
    %cst_40 = arith.constant 3.200000e+01 : f32
    %148 = vector.broadcast %cst_40 : f32 to vector<20x1xf32>
    %149 = arith.divf %147, %148 : vector<20x1xf32>
    %150 = vector.broadcast %149 : vector<20x1xf32> to vector<20x32xf32>
    %151 = arith.subf %145, %150 : vector<20x32xf32>
    %152 = arith.mulf %151, %151 : vector<20x32xf32>
    %cst_41 = arith.constant dense<0.000000e+00> : vector<20xf32>
    %153 = vector.multi_reduction <add>, %152, %cst_41 [1] : vector<20x32xf32> to vector<20xf32>
    %154 = vector.shape_cast %153 : vector<20xf32> to vector<20x1xf32>
    %cst_42 = arith.constant 3.200000e+01 : f32
    %155 = vector.broadcast %cst_42 : f32 to vector<20x1xf32>
    %156 = arith.divf %154, %155 : vector<20x1xf32>
    %157 = vector.broadcast %149 : vector<20x1xf32> to vector<20x32xf32>
    %158 = arith.subf %145, %157 : vector<20x32xf32>
    %cst_43 = arith.constant 9.99999974E-6 : f32
    %159 = vector.broadcast %cst_43 : f32 to vector<20x1xf32>
    %160 = arith.addf %156, %159 : vector<20x1xf32>
    %161 = math.rsqrt %160 : vector<20x1xf32>
    %162 = vector.broadcast %161 : vector<20x1xf32> to vector<20x32xf32>
    %163 = arith.mulf %158, %162 : vector<20x32xf32>
    %c868 = arith.constant 868 : index
    %c0_44 = arith.constant 0 : index
    %164 = vector.load %arg2[%c868, %c0_44] : memref<912x128xf32, #tpu.memory_space<vmem>>, vector<1x32xf32>
    %165 = vector.broadcast %164 : vector<1x32xf32> to vector<20x32xf32>
    %166 = arith.mulf %163, %165 : vector<20x32xf32>
    %c869 = arith.constant 869 : index
    %c0_45 = arith.constant 0 : index
    %167 = vector.load %arg2[%c869, %c0_45] : memref<912x128xf32, #tpu.memory_space<vmem>>, vector<1x32xf32>
    %168 = vector.broadcast %167 : vector<1x32xf32> to vector<20x32xf32>
    %169 = arith.addf %166, %168 : vector<20x32xf32>
    %c64 = arith.constant 64 : index
    %c0_46 = arith.constant 0 : index
    %170 = vector.load %arg2[%c64, %c0_46] : memref<912x128xf32, #tpu.memory_space<vmem>>, vector<32x128xf32>
    %cst_47 = arith.constant dense<0.000000e+00> : vector<20x128xf32>
    %171 = tpu.matmul %169, %170, %cst_47 {dimension_numbers = #tpu.dot_dimension_numbers<[1], [0], [0], [1], [0, 0, 1, 1], [], []>} : vector<20x32xf32>, vector<32x128xf32>, vector<20x128xf32> -> vector<20x128xf32>
    %c866 = arith.constant 866 : index
    %c0_48 = arith.constant 0 : index
    %172 = vector.load %arg2[%c866, %c0_48] : memref<912x128xf32, #tpu.memory_space<vmem>>, vector<1x128xf32>
    %173 = vector.broadcast %172 : vector<1x128xf32> to vector<20x128xf32>
    %174 = arith.addf %171, %173 : vector<20x128xf32>
    %175 = vector.extract_strided_slice %174 {offsets = [0, 0], sizes = [20, 64], strides = [1, 1]} : vector<20x128xf32> to vector<20x64xf32>
    %cst_49 = arith.constant 0.000000e+00 : f32
    %176 = vector.broadcast %cst_49 : f32 to vector<20x64xf32>
    %177 = arith.maximumf %175, %176 : vector<20x64xf32>
    %c96 = arith.constant 96 : index
    %c0_50 = arith.constant 0 : index
    %178 = vector.load %arg2[%c96, %c0_50] : memref<912x128xf32, #tpu.memory_space<vmem>>, vector<64x128xf32>
    %cst_51 = arith.constant dense<0.000000e+00> : vector<20x128xf32>
    %179 = tpu.matmul %177, %178, %cst_51 {dimension_numbers = #tpu.dot_dimension_numbers<[1], [0], [0], [1], [0, 0, 1, 1], [], []>} : vector<20x64xf32>, vector<64x128xf32>, vector<20x128xf32> -> vector<20x128xf32>
    %c867 = arith.constant 867 : index
    %c0_52 = arith.constant 0 : index
    %180 = vector.load %arg2[%c867, %c0_52] : memref<912x128xf32, #tpu.memory_space<vmem>>, vector<1x128xf32>
    %181 = vector.broadcast %180 : vector<1x128xf32> to vector<20x128xf32>
    %182 = arith.addf %179, %181 : vector<20x128xf32>
    %183 = vector.extract_strided_slice %182 {offsets = [0, 0], sizes = [20, 32], strides = [1, 1]} : vector<20x128xf32> to vector<20x32xf32>
    %184 = arith.addf %169, %183 : vector<20x32xf32>
    %cst_53 = arith.constant dense<0.000000e+00> : vector<20xf32>
    %185 = vector.multi_reduction <add>, %184, %cst_53 [1] : vector<20x32xf32> to vector<20xf32>
    %186 = vector.shape_cast %185 : vector<20xf32> to vector<20x1xf32>
    %cst_54 = arith.constant 3.200000e+01 : f32
    %187 = vector.broadcast %cst_54 : f32 to vector<20x1xf32>
    %188 = arith.divf %186, %187 : vector<20x1xf32>
    %189 = vector.broadcast %188 : vector<20x1xf32> to vector<20x32xf32>
    %190 = arith.subf %184, %189 : vector<20x32xf32>
    %191 = arith.mulf %190, %190 : vector<20x32xf32>
    %cst_55 = arith.constant dense<0.000000e+00> : vector<20xf32>
    %192 = vector.multi_reduction <add>, %191, %cst_55 [1] : vector<20x32xf32> to vector<20xf32>
    %193 = vector.shape_cast %192 : vector<20xf32> to vector<20x1xf32>
    %cst_56 = arith.constant 3.200000e+01 : f32
    %194 = vector.broadcast %cst_56 : f32 to vector<20x1xf32>
    %195 = arith.divf %193, %194 : vector<20x1xf32>
    %196 = vector.broadcast %188 : vector<20x1xf32> to vector<20x32xf32>
    %197 = arith.subf %184, %196 : vector<20x32xf32>
    %cst_57 = arith.constant 9.99999974E-6 : f32
    %198 = vector.broadcast %cst_57 : f32 to vector<20x1xf32>
    %199 = arith.addf %195, %198 : vector<20x1xf32>
    %200 = math.rsqrt %199 : vector<20x1xf32>
    %201 = vector.broadcast %200 : vector<20x1xf32> to vector<20x32xf32>
    %202 = arith.mulf %197, %201 : vector<20x32xf32>
    %c870 = arith.constant 870 : index
    %c0_58 = arith.constant 0 : index
    %203 = vector.load %arg2[%c870, %c0_58] : memref<912x128xf32, #tpu.memory_space<vmem>>, vector<1x32xf32>
    %204 = vector.broadcast %203 : vector<1x32xf32> to vector<20x32xf32>
    %205 = arith.mulf %202, %204 : vector<20x32xf32>
    %c871 = arith.constant 871 : index
    %c0_59 = arith.constant 0 : index
    %206 = vector.load %arg2[%c871, %c0_59] : memref<912x128xf32, #tpu.memory_space<vmem>>, vector<1x32xf32>
    %207 = vector.broadcast %206 : vector<1x32xf32> to vector<20x32xf32>
    %208 = arith.addf %205, %207 : vector<20x32xf32>
    %c160 = arith.constant 160 : index
    %c0_60 = arith.constant 0 : index
    %209 = vector.load %arg2[%c160, %c0_60] : memref<912x128xf32, #tpu.memory_space<vmem>>, vector<32x128xf32>
    %cst_61 = arith.constant dense<0.000000e+00> : vector<20x128xf32>
    %210 = tpu.matmul %208, %209, %cst_61 {dimension_numbers = #tpu.dot_dimension_numbers<[1], [0], [0], [1], [0, 0, 1, 1], [], []>} : vector<20x32xf32>, vector<32x128xf32>, vector<20x128xf32> -> vector<20x128xf32>
    %c872 = arith.constant 872 : index
    %c0_62 = arith.constant 0 : index
    %211 = vector.load %arg2[%c872, %c0_62] : memref<912x128xf32, #tpu.memory_space<vmem>>, vector<1x128xf32>
    %212 = vector.broadcast %211 : vector<1x128xf32> to vector<20x128xf32>
    %213 = arith.addf %210, %212 : vector<20x128xf32>
    %214 = vector.extract_strided_slice %213 {offsets = [0, 0], sizes = [20, 96], strides = [1, 1]} : vector<20x128xf32> to vector<20x96xf32>
    %215 = vector.extract_strided_slice %214 {offsets = [0, 0], sizes = [20, 32], strides = [1, 1]} : vector<20x96xf32> to vector<20x32xf32>
    %216 = vector.extract_strided_slice %214 {offsets = [0, 32], sizes = [20, 32], strides = [1, 1]} : vector<20x96xf32> to vector<20x32xf32>
    %217 = vector.extract_strided_slice %214 {offsets = [0, 64], sizes = [20, 32], strides = [1, 1]} : vector<20x96xf32> to vector<20x32xf32>
    %218 = vector.extract_strided_slice %215 {offsets = [0, 0], sizes = [10, 32], strides = [1, 1]} : vector<20x32xf32> to vector<10x32xf32>
    %219 = vector.extract_strided_slice %216 {offsets = [0, 0], sizes = [10, 32], strides = [1, 1]} : vector<20x32xf32> to vector<10x32xf32>
    %220 = vector.extract_strided_slice %217 {offsets = [0, 0], sizes = [10, 32], strides = [1, 1]} : vector<20x32xf32> to vector<10x32xf32>
    %221 = vector.extract_strided_slice %218 {offsets = [0, 0], sizes = [10, 8], strides = [1, 1]} : vector<10x32xf32> to vector<10x8xf32>
    %222 = vector.extract_strided_slice %219 {offsets = [0, 0], sizes = [10, 8], strides = [1, 1]} : vector<10x32xf32> to vector<10x8xf32>
    %cst_63 = arith.constant dense<0.000000e+00> : vector<10x10xf32>
    %223 = tpu.matmul %221, %222, %cst_63 {dimension_numbers = #tpu.dot_dimension_numbers<[1], [1], [0], [0], [0, 0, 1, 0], [], []>} : vector<10x8xf32>, vector<10x8xf32>, vector<10x10xf32> -> vector<10x10xf32>
    %cst_64 = arith.constant dense<0xFF800000> : vector<10xf32>
    %224 = vector.multi_reduction <maximumf>, %223, %cst_64 [1] : vector<10x10xf32> to vector<10xf32>
    %225 = vector.shape_cast %224 : vector<10xf32> to vector<10x1xf32>
    %226 = vector.broadcast %225 : vector<10x1xf32> to vector<10x10xf32>
    %227 = arith.subf %223, %226 : vector<10x10xf32>
    %228 = math.exp %227 : vector<10x10xf32>
    %cst_65 = arith.constant dense<0.000000e+00> : vector<10xf32>
    %229 = vector.multi_reduction <add>, %228, %cst_65 [1] : vector<10x10xf32> to vector<10xf32>
    %230 = vector.shape_cast %229 : vector<10xf32> to vector<10x1xf32>
    %231 = tpu.reciprocal %230 {approx = true} : vector<10x1xf32> -> vector<10x1xf32>
    %232 = vector.broadcast %231 : vector<10x1xf32> to vector<10x10xf32>
    %233 = arith.mulf %228, %232 : vector<10x10xf32>
    %234 = vector.extract_strided_slice %220 {offsets = [0, 0], sizes = [10, 8], strides = [1, 1]} : vector<10x32xf32> to vector<10x8xf32>
    %cst_66 = arith.constant dense<0.000000e+00> : vector<10x8xf32>
    %235 = tpu.matmul %233, %234, %cst_66 {dimension_numbers = #tpu.dot_dimension_numbers<[1], [0], [0], [1], [0, 0, 1, 1], [], []>} : vector<10x10xf32>, vector<10x8xf32>, vector<10x8xf32> -> vector<10x8xf32>
    %236 = vector.extract_strided_slice %218 {offsets = [0, 8], sizes = [10, 8], strides = [1, 1]} : vector<10x32xf32> to vector<10x8xf32>
    %237 = vector.extract_strided_slice %219 {offsets = [0, 8], sizes = [10, 8], strides = [1, 1]} : vector<10x32xf32> to vector<10x8xf32>
    %cst_67 = arith.constant dense<0.000000e+00> : vector<10x10xf32>
    %238 = tpu.matmul %236, %237, %cst_67 {dimension_numbers = #tpu.dot_dimension_numbers<[1], [1], [0], [0], [0, 0, 1, 0], [], []>} : vector<10x8xf32>, vector<10x8xf32>, vector<10x10xf32> -> vector<10x10xf32>
    %cst_68 = arith.constant dense<0xFF800000> : vector<10xf32>
    %239 = vector.multi_reduction <maximumf>, %238, %cst_68 [1] : vector<10x10xf32> to vector<10xf32>
    %240 = vector.shape_cast %239 : vector<10xf32> to vector<10x1xf32>
    %241 = vector.broadcast %240 : vector<10x1xf32> to vector<10x10xf32>
    %242 = arith.subf %238, %241 : vector<10x10xf32>
    %243 = math.exp %242 : vector<10x10xf32>
    %cst_69 = arith.constant dense<0.000000e+00> : vector<10xf32>
    %244 = vector.multi_reduction <add>, %243, %cst_69 [1] : vector<10x10xf32> to vector<10xf32>
    %245 = vector.shape_cast %244 : vector<10xf32> to vector<10x1xf32>
    %246 = tpu.reciprocal %245 {approx = true} : vector<10x1xf32> -> vector<10x1xf32>
    %247 = vector.broadcast %246 : vector<10x1xf32> to vector<10x10xf32>
    %248 = arith.mulf %243, %247 : vector<10x10xf32>
    %249 = vector.extract_strided_slice %220 {offsets = [0, 8], sizes = [10, 8], strides = [1, 1]} : vector<10x32xf32> to vector<10x8xf32>
    %cst_70 = arith.constant dense<0.000000e+00> : vector<10x8xf32>
    %250 = tpu.matmul %248, %249, %cst_70 {dimension_numbers = #tpu.dot_dimension_numbers<[1], [0], [0], [1], [0, 0, 1, 1], [], []>} : vector<10x10xf32>, vector<10x8xf32>, vector<10x8xf32> -> vector<10x8xf32>
    %251 = vector.extract_strided_slice %218 {offsets = [0, 16], sizes = [10, 8], strides = [1, 1]} : vector<10x32xf32> to vector<10x8xf32>
    %252 = vector.extract_strided_slice %219 {offsets = [0, 16], sizes = [10, 8], strides = [1, 1]} : vector<10x32xf32> to vector<10x8xf32>
    %cst_71 = arith.constant dense<0.000000e+00> : vector<10x10xf32>
    %253 = tpu.matmul %251, %252, %cst_71 {dimension_numbers = #tpu.dot_dimension_numbers<[1], [1], [0], [0], [0, 0, 1, 0], [], []>} : vector<10x8xf32>, vector<10x8xf32>, vector<10x10xf32> -> vector<10x10xf32>
    %cst_72 = arith.constant dense<0xFF800000> : vector<10xf32>
    %254 = vector.multi_reduction <maximumf>, %253, %cst_72 [1] : vector<10x10xf32> to vector<10xf32>
    %255 = vector.shape_cast %254 : vector<10xf32> to vector<10x1xf32>
    %256 = vector.broadcast %255 : vector<10x1xf32> to vector<10x10xf32>
    %257 = arith.subf %253, %256 : vector<10x10xf32>
    %258 = math.exp %257 : vector<10x10xf32>
    %cst_73 = arith.constant dense<0.000000e+00> : vector<10xf32>
    %259 = vector.multi_reduction <add>, %258, %cst_73 [1] : vector<10x10xf32> to vector<10xf32>
    %260 = vector.shape_cast %259 : vector<10xf32> to vector<10x1xf32>
    %261 = tpu.reciprocal %260 {approx = true} : vector<10x1xf32> -> vector<10x1xf32>
    %262 = vector.broadcast %261 : vector<10x1xf32> to vector<10x10xf32>
    %263 = arith.mulf %258, %262 : vector<10x10xf32>
    %264 = vector.extract_strided_slice %220 {offsets = [0, 16], sizes = [10, 8], strides = [1, 1]} : vector<10x32xf32> to vector<10x8xf32>
    %cst_74 = arith.constant dense<0.000000e+00> : vector<10x8xf32>
    %265 = tpu.matmul %263, %264, %cst_74 {dimension_numbers = #tpu.dot_dimension_numbers<[1], [0], [0], [1], [0, 0, 1, 1], [], []>} : vector<10x10xf32>, vector<10x8xf32>, vector<10x8xf32> -> vector<10x8xf32>
    %266 = vector.extract_strided_slice %218 {offsets = [0, 24], sizes = [10, 8], strides = [1, 1]} : vector<10x32xf32> to vector<10x8xf32>
    %267 = vector.extract_strided_slice %219 {offsets = [0, 24], sizes = [10, 8], strides = [1, 1]} : vector<10x32xf32> to vector<10x8xf32>
    %cst_75 = arith.constant dense<0.000000e+00> : vector<10x10xf32>
    %268 = tpu.matmul %266, %267, %cst_75 {dimension_numbers = #tpu.dot_dimension_numbers<[1], [1], [0], [0], [0, 0, 1, 0], [], []>} : vector<10x8xf32>, vector<10x8xf32>, vector<10x10xf32> -> vector<10x10xf32>
    %cst_76 = arith.constant dense<0xFF800000> : vector<10xf32>
    %269 = vector.multi_reduction <maximumf>, %268, %cst_76 [1] : vector<10x10xf32> to vector<10xf32>
    %270 = vector.shape_cast %269 : vector<10xf32> to vector<10x1xf32>
    %271 = vector.broadcast %270 : vector<10x1xf32> to vector<10x10xf32>
    %272 = arith.subf %268, %271 : vector<10x10xf32>
    %273 = math.exp %272 : vector<10x10xf32>
    %cst_77 = arith.constant dense<0.000000e+00> : vector<10xf32>
    %274 = vector.multi_reduction <add>, %273, %cst_77 [1] : vector<10x10xf32> to vector<10xf32>
    %275 = vector.shape_cast %274 : vector<10xf32> to vector<10x1xf32>
    %276 = tpu.reciprocal %275 {approx = true} : vector<10x1xf32> -> vector<10x1xf32>
    %277 = vector.broadcast %276 : vector<10x1xf32> to vector<10x10xf32>
    %278 = arith.mulf %273, %277 : vector<10x10xf32>
    %279 = vector.extract_strided_slice %220 {offsets = [0, 24], sizes = [10, 8], strides = [1, 1]} : vector<10x32xf32> to vector<10x8xf32>
    %cst_78 = arith.constant dense<0.000000e+00> : vector<10x8xf32>
    %280 = tpu.matmul %278, %279, %cst_78 {dimension_numbers = #tpu.dot_dimension_numbers<[1], [0], [0], [1], [0, 0, 1, 1], [], []>} : vector<10x10xf32>, vector<10x8xf32>, vector<10x8xf32> -> vector<10x8xf32>
    %281 = tpu.concatenate %235, %250, %265, %280 in 1 : vector<10x8xf32>, vector<10x8xf32>, vector<10x8xf32>, vector<10x8xf32> -> vector<10x32xf32>
    %282 = vector.extract_strided_slice %215 {offsets = [10, 0], sizes = [10, 32], strides = [1, 1]} : vector<20x32xf32> to vector<10x32xf32>
    %283 = vector.extract_strided_slice %216 {offsets = [10, 0], sizes = [10, 32], strides = [1, 1]} : vector<20x32xf32> to vector<10x32xf32>
    %284 = vector.extract_strided_slice %217 {offsets = [10, 0], sizes = [10, 32], strides = [1, 1]} : vector<20x32xf32> to vector<10x32xf32>
    %285 = vector.extract_strided_slice %282 {offsets = [0, 0], sizes = [10, 8], strides = [1, 1]} : vector<10x32xf32> to vector<10x8xf32>
    %286 = vector.extract_strided_slice %283 {offsets = [0, 0], sizes = [10, 8], strides = [1, 1]} : vector<10x32xf32> to vector<10x8xf32>
    %cst_79 = arith.constant dense<0.000000e+00> : vector<10x10xf32>
    %287 = tpu.matmul %285, %286, %cst_79 {dimension_numbers = #tpu.dot_dimension_numbers<[1], [1], [0], [0], [0, 0, 1, 0], [], []>} : vector<10x8xf32>, vector<10x8xf32>, vector<10x10xf32> -> vector<10x10xf32>
    %cst_80 = arith.constant dense<0xFF800000> : vector<10xf32>
    %288 = vector.multi_reduction <maximumf>, %287, %cst_80 [1] : vector<10x10xf32> to vector<10xf32>
    %289 = vector.shape_cast %288 : vector<10xf32> to vector<10x1xf32>
    %290 = vector.broadcast %289 : vector<10x1xf32> to vector<10x10xf32>
    %291 = arith.subf %287, %290 : vector<10x10xf32>
    %292 = math.exp %291 : vector<10x10xf32>
    %cst_81 = arith.constant dense<0.000000e+00> : vector<10xf32>
    %293 = vector.multi_reduction <add>, %292, %cst_81 [1] : vector<10x10xf32> to vector<10xf32>
    %294 = vector.shape_cast %293 : vector<10xf32> to vector<10x1xf32>
    %295 = tpu.reciprocal %294 {approx = true} : vector<10x1xf32> -> vector<10x1xf32>
    %296 = vector.broadcast %295 : vector<10x1xf32> to vector<10x10xf32>
    %297 = arith.mulf %292, %296 : vector<10x10xf32>
    %298 = vector.extract_strided_slice %284 {offsets = [0, 0], sizes = [10, 8], strides = [1, 1]} : vector<10x32xf32> to vector<10x8xf32>
    %cst_82 = arith.constant dense<0.000000e+00> : vector<10x8xf32>
    %299 = tpu.matmul %297, %298, %cst_82 {dimension_numbers = #tpu.dot_dimension_numbers<[1], [0], [0], [1], [0, 0, 1, 1], [], []>} : vector<10x10xf32>, vector<10x8xf32>, vector<10x8xf32> -> vector<10x8xf32>
    %300 = vector.extract_strided_slice %282 {offsets = [0, 8], sizes = [10, 8], strides = [1, 1]} : vector<10x32xf32> to vector<10x8xf32>
    %301 = vector.extract_strided_slice %283 {offsets = [0, 8], sizes = [10, 8], strides = [1, 1]} : vector<10x32xf32> to vector<10x8xf32>
    %cst_83 = arith.constant dense<0.000000e+00> : vector<10x10xf32>
    %302 = tpu.matmul %300, %301, %cst_83 {dimension_numbers = #tpu.dot_dimension_numbers<[1], [1], [0], [0], [0, 0, 1, 0], [], []>} : vector<10x8xf32>, vector<10x8xf32>, vector<10x10xf32> -> vector<10x10xf32>
    %cst_84 = arith.constant dense<0xFF800000> : vector<10xf32>
    %303 = vector.multi_reduction <maximumf>, %302, %cst_84 [1] : vector<10x10xf32> to vector<10xf32>
    %304 = vector.shape_cast %303 : vector<10xf32> to vector<10x1xf32>
    %305 = vector.broadcast %304 : vector<10x1xf32> to vector<10x10xf32>
    %306 = arith.subf %302, %305 : vector<10x10xf32>
    %307 = math.exp %306 : vector<10x10xf32>
    %cst_85 = arith.constant dense<0.000000e+00> : vector<10xf32>
    %308 = vector.multi_reduction <add>, %307, %cst_85 [1] : vector<10x10xf32> to vector<10xf32>
    %309 = vector.shape_cast %308 : vector<10xf32> to vector<10x1xf32>
    %310 = tpu.reciprocal %309 {approx = true} : vector<10x1xf32> -> vector<10x1xf32>
    %311 = vector.broadcast %310 : vector<10x1xf32> to vector<10x10xf32>
    %312 = arith.mulf %307, %311 : vector<10x10xf32>
    %313 = vector.extract_strided_slice %284 {offsets = [0, 8], sizes = [10, 8], strides = [1, 1]} : vector<10x32xf32> to vector<10x8xf32>
    %cst_86 = arith.constant dense<0.000000e+00> : vector<10x8xf32>
    %314 = tpu.matmul %312, %313, %cst_86 {dimension_numbers = #tpu.dot_dimension_numbers<[1], [0], [0], [1], [0, 0, 1, 1], [], []>} : vector<10x10xf32>, vector<10x8xf32>, vector<10x8xf32> -> vector<10x8xf32>
    %315 = vector.extract_strided_slice %282 {offsets = [0, 16], sizes = [10, 8], strides = [1, 1]} : vector<10x32xf32> to vector<10x8xf32>
    %316 = vector.extract_strided_slice %283 {offsets = [0, 16], sizes = [10, 8], strides = [1, 1]} : vector<10x32xf32> to vector<10x8xf32>
    %cst_87 = arith.constant dense<0.000000e+00> : vector<10x10xf32>
    %317 = tpu.matmul %315, %316, %cst_87 {dimension_numbers = #tpu.dot_dimension_numbers<[1], [1], [0], [0], [0, 0, 1, 0], [], []>} : vector<10x8xf32>, vector<10x8xf32>, vector<10x10xf32> -> vector<10x10xf32>
    %cst_88 = arith.constant dense<0xFF800000> : vector<10xf32>
    %318 = vector.multi_reduction <maximumf>, %317, %cst_88 [1] : vector<10x10xf32> to vector<10xf32>
    %319 = vector.shape_cast %318 : vector<10xf32> to vector<10x1xf32>
    %320 = vector.broadcast %319 : vector<10x1xf32> to vector<10x10xf32>
    %321 = arith.subf %317, %320 : vector<10x10xf32>
    %322 = math.exp %321 : vector<10x10xf32>
    %cst_89 = arith.constant dense<0.000000e+00> : vector<10xf32>
    %323 = vector.multi_reduction <add>, %322, %cst_89 [1] : vector<10x10xf32> to vector<10xf32>
    %324 = vector.shape_cast %323 : vector<10xf32> to vector<10x1xf32>
    %325 = tpu.reciprocal %324 {approx = true} : vector<10x1xf32> -> vector<10x1xf32>
    %326 = vector.broadcast %325 : vector<10x1xf32> to vector<10x10xf32>
    %327 = arith.mulf %322, %326 : vector<10x10xf32>
    %328 = vector.extract_strided_slice %284 {offsets = [0, 16], sizes = [10, 8], strides = [1, 1]} : vector<10x32xf32> to vector<10x8xf32>
    %cst_90 = arith.constant dense<0.000000e+00> : vector<10x8xf32>
    %329 = tpu.matmul %327, %328, %cst_90 {dimension_numbers = #tpu.dot_dimension_numbers<[1], [0], [0], [1], [0, 0, 1, 1], [], []>} : vector<10x10xf32>, vector<10x8xf32>, vector<10x8xf32> -> vector<10x8xf32>
    %330 = vector.extract_strided_slice %282 {offsets = [0, 24], sizes = [10, 8], strides = [1, 1]} : vector<10x32xf32> to vector<10x8xf32>
    %331 = vector.extract_strided_slice %283 {offsets = [0, 24], sizes = [10, 8], strides = [1, 1]} : vector<10x32xf32> to vector<10x8xf32>
    %cst_91 = arith.constant dense<0.000000e+00> : vector<10x10xf32>
    %332 = tpu.matmul %330, %331, %cst_91 {dimension_numbers = #tpu.dot_dimension_numbers<[1], [1], [0], [0], [0, 0, 1, 0], [], []>} : vector<10x8xf32>, vector<10x8xf32>, vector<10x10xf32> -> vector<10x10xf32>
    %cst_92 = arith.constant dense<0xFF800000> : vector<10xf32>
    %333 = vector.multi_reduction <maximumf>, %332, %cst_92 [1] : vector<10x10xf32> to vector<10xf32>
    %334 = vector.shape_cast %333 : vector<10xf32> to vector<10x1xf32>
    %335 = vector.broadcast %334 : vector<10x1xf32> to vector<10x10xf32>
    %336 = arith.subf %332, %335 : vector<10x10xf32>
    %337 = math.exp %336 : vector<10x10xf32>
    %cst_93 = arith.constant dense<0.000000e+00> : vector<10xf32>
    %338 = vector.multi_reduction <add>, %337, %cst_93 [1] : vector<10x10xf32> to vector<10xf32>
    %339 = vector.shape_cast %338 : vector<10xf32> to vector<10x1xf32>
    %340 = tpu.reciprocal %339 {approx = true} : vector<10x1xf32> -> vector<10x1xf32>
    %341 = vector.broadcast %340 : vector<10x1xf32> to vector<10x10xf32>
    %342 = arith.mulf %337, %341 : vector<10x10xf32>
    %343 = vector.extract_strided_slice %284 {offsets = [0, 24], sizes = [10, 8], strides = [1, 1]} : vector<10x32xf32> to vector<10x8xf32>
    %cst_94 = arith.constant dense<0.000000e+00> : vector<10x8xf32>
    %344 = tpu.matmul %342, %343, %cst_94 {dimension_numbers = #tpu.dot_dimension_numbers<[1], [0], [0], [1], [0, 0, 1, 1], [], []>} : vector<10x10xf32>, vector<10x8xf32>, vector<10x8xf32> -> vector<10x8xf32>
    %345 = tpu.concatenate %299, %314, %329, %344 in 1 : vector<10x8xf32>, vector<10x8xf32>, vector<10x8xf32>, vector<10x8xf32> -> vector<10x32xf32>
    %346 = tpu.concatenate %281, %345 in 0 : vector<10x32xf32>, vector<10x32xf32> -> vector<20x32xf32>
    %c192 = arith.constant 192 : index
    %c0_95 = arith.constant 0 : index
    %347 = vector.load %arg2[%c192, %c0_95] : memref<912x128xf32, #tpu.memory_space<vmem>>, vector<32x128xf32>
    %cst_96 = arith.constant dense<0.000000e+00> : vector<20x128xf32>
    %348 = tpu.matmul %346, %347, %cst_96 {dimension_numbers = #tpu.dot_dimension_numbers<[1], [0], [0], [1], [0, 0, 1, 1], [], []>} : vector<20x32xf32>, vector<32x128xf32>, vector<20x128xf32> -> vector<20x128xf32>
    %c873 = arith.constant 873 : index
    %c0_97 = arith.constant 0 : index
    %349 = vector.load %arg2[%c873, %c0_97] : memref<912x128xf32, #tpu.memory_space<vmem>>, vector<1x128xf32>
    %350 = vector.broadcast %349 : vector<1x128xf32> to vector<20x128xf32>
    %351 = arith.addf %348, %350 : vector<20x128xf32>
    %352 = vector.extract_strided_slice %351 {offsets = [0, 0], sizes = [20, 32], strides = [1, 1]} : vector<20x128xf32> to vector<20x32xf32>
    %353 = arith.addf %208, %352 : vector<20x32xf32>
    %cst_98 = arith.constant dense<0.000000e+00> : vector<20xf32>
    %354 = vector.multi_reduction <add>, %353, %cst_98 [1] : vector<20x32xf32> to vector<20xf32>
    %355 = vector.shape_cast %354 : vector<20xf32> to vector<20x1xf32>
    %cst_99 = arith.constant 3.200000e+01 : f32
    %356 = vector.broadcast %cst_99 : f32 to vector<20x1xf32>
    %357 = arith.divf %355, %356 : vector<20x1xf32>
    %358 = vector.broadcast %357 : vector<20x1xf32> to vector<20x32xf32>
    %359 = arith.subf %353, %358 : vector<20x32xf32>
    %360 = arith.mulf %359, %359 : vector<20x32xf32>
    %cst_100 = arith.constant dense<0.000000e+00> : vector<20xf32>
    %361 = vector.multi_reduction <add>, %360, %cst_100 [1] : vector<20x32xf32> to vector<20xf32>
    %362 = vector.shape_cast %361 : vector<20xf32> to vector<20x1xf32>
    %cst_101 = arith.constant 3.200000e+01 : f32
    %363 = vector.broadcast %cst_101 : f32 to vector<20x1xf32>
    %364 = arith.divf %362, %363 : vector<20x1xf32>
    %365 = vector.broadcast %357 : vector<20x1xf32> to vector<20x32xf32>
    %366 = arith.subf %353, %365 : vector<20x32xf32>
    %cst_102 = arith.constant 9.99999974E-6 : f32
    %367 = vector.broadcast %cst_102 : f32 to vector<20x1xf32>
    %368 = arith.addf %364, %367 : vector<20x1xf32>
    %369 = math.rsqrt %368 : vector<20x1xf32>
    %370 = vector.broadcast %369 : vector<20x1xf32> to vector<20x32xf32>
    %371 = arith.mulf %366, %370 : vector<20x32xf32>
    %c876 = arith.constant 876 : index
    %c0_103 = arith.constant 0 : index
    %372 = vector.load %arg2[%c876, %c0_103] : memref<912x128xf32, #tpu.memory_space<vmem>>, vector<1x32xf32>
    %373 = vector.broadcast %372 : vector<1x32xf32> to vector<20x32xf32>
    %374 = arith.mulf %371, %373 : vector<20x32xf32>
    %c877 = arith.constant 877 : index
    %c0_104 = arith.constant 0 : index
    %375 = vector.load %arg2[%c877, %c0_104] : memref<912x128xf32, #tpu.memory_space<vmem>>, vector<1x32xf32>
    %376 = vector.broadcast %375 : vector<1x32xf32> to vector<20x32xf32>
    %377 = arith.addf %374, %376 : vector<20x32xf32>
    %c224 = arith.constant 224 : index
    %c0_105 = arith.constant 0 : index
    %378 = vector.load %arg2[%c224, %c0_105] : memref<912x128xf32, #tpu.memory_space<vmem>>, vector<32x128xf32>
    %cst_106 = arith.constant dense<0.000000e+00> : vector<20x128xf32>
    %379 = tpu.matmul %377, %378, %cst_106 {dimension_numbers = #tpu.dot_dimension_numbers<[1], [0], [0], [1], [0, 0, 1, 1], [], []>} : vector<20x32xf32>, vector<32x128xf32>, vector<20x128xf32> -> vector<20x128xf32>
    %c874 = arith.constant 874 : index
    %c0_107 = arith.constant 0 : index
    %380 = vector.load %arg2[%c874, %c0_107] : memref<912x128xf32, #tpu.memory_space<vmem>>, vector<1x128xf32>
    %381 = vector.broadcast %380 : vector<1x128xf32> to vector<20x128xf32>
    %382 = arith.addf %379, %381 : vector<20x128xf32>
    %383 = vector.extract_strided_slice %382 {offsets = [0, 0], sizes = [20, 64], strides = [1, 1]} : vector<20x128xf32> to vector<20x64xf32>
    %cst_108 = arith.constant 0.000000e+00 : f32
    %384 = vector.broadcast %cst_108 : f32 to vector<20x64xf32>
    %385 = arith.maximumf %383, %384 : vector<20x64xf32>
    %c256 = arith.constant 256 : index
    %c0_109 = arith.constant 0 : index
    %386 = vector.load %arg2[%c256, %c0_109] : memref<912x128xf32, #tpu.memory_space<vmem>>, vector<64x128xf32>
    %cst_110 = arith.constant dense<0.000000e+00> : vector<20x128xf32>
    %387 = tpu.matmul %385, %386, %cst_110 {dimension_numbers = #tpu.dot_dimension_numbers<[1], [0], [0], [1], [0, 0, 1, 1], [], []>} : vector<20x64xf32>, vector<64x128xf32>, vector<20x128xf32> -> vector<20x128xf32>
    %c875 = arith.constant 875 : index
    %c0_111 = arith.constant 0 : index
    %388 = vector.load %arg2[%c875, %c0_111] : memref<912x128xf32, #tpu.memory_space<vmem>>, vector<1x128xf32>
    %389 = vector.broadcast %388 : vector<1x128xf32> to vector<20x128xf32>
    %390 = arith.addf %387, %389 : vector<20x128xf32>
    %391 = vector.extract_strided_slice %390 {offsets = [0, 0], sizes = [20, 32], strides = [1, 1]} : vector<20x128xf32> to vector<20x32xf32>
    %392 = arith.addf %377, %391 : vector<20x32xf32>
    %cst_112 = arith.constant dense<0.000000e+00> : vector<20xf32>
    %393 = vector.multi_reduction <add>, %392, %cst_112 [1] : vector<20x32xf32> to vector<20xf32>
    %394 = vector.shape_cast %393 : vector<20xf32> to vector<20x1xf32>
    %cst_113 = arith.constant 3.200000e+01 : f32
    %395 = vector.broadcast %cst_113 : f32 to vector<20x1xf32>
    %396 = arith.divf %394, %395 : vector<20x1xf32>
    %397 = vector.broadcast %396 : vector<20x1xf32> to vector<20x32xf32>
    %398 = arith.subf %392, %397 : vector<20x32xf32>
    %399 = arith.mulf %398, %398 : vector<20x32xf32>
    %cst_114 = arith.constant dense<0.000000e+00> : vector<20xf32>
    %400 = vector.multi_reduction <add>, %399, %cst_114 [1] : vector<20x32xf32> to vector<20xf32>
    %401 = vector.shape_cast %400 : vector<20xf32> to vector<20x1xf32>
    %cst_115 = arith.constant 3.200000e+01 : f32
    %402 = vector.broadcast %cst_115 : f32 to vector<20x1xf32>
    %403 = arith.divf %401, %402 : vector<20x1xf32>
    %404 = vector.broadcast %396 : vector<20x1xf32> to vector<20x32xf32>
    %405 = arith.subf %392, %404 : vector<20x32xf32>
    %cst_116 = arith.constant 9.99999974E-6 : f32
    %406 = vector.broadcast %cst_116 : f32 to vector<20x1xf32>
    %407 = arith.addf %403, %406 : vector<20x1xf32>
    %408 = math.rsqrt %407 : vector<20x1xf32>
    %409 = vector.broadcast %408 : vector<20x1xf32> to vector<20x32xf32>
    %410 = arith.mulf %405, %409 : vector<20x32xf32>
    %c878 = arith.constant 878 : index
    %c0_117 = arith.constant 0 : index
    %411 = vector.load %arg2[%c878, %c0_117] : memref<912x128xf32, #tpu.memory_space<vmem>>, vector<1x32xf32>
    %412 = vector.broadcast %411 : vector<1x32xf32> to vector<20x32xf32>
    %413 = arith.mulf %410, %412 : vector<20x32xf32>
    %c879 = arith.constant 879 : index
    %c0_118 = arith.constant 0 : index
    %414 = vector.load %arg2[%c879, %c0_118] : memref<912x128xf32, #tpu.memory_space<vmem>>, vector<1x32xf32>
    %415 = vector.broadcast %414 : vector<1x32xf32> to vector<20x32xf32>
    %416 = arith.addf %413, %415 : vector<20x32xf32>
    %cst_119 = arith.constant dense<0.000000e+00> : vector<20xf32>
    %417 = vector.multi_reduction <add>, %416, %cst_119 [1] : vector<20x32xf32> to vector<20xf32>
    %418 = vector.shape_cast %417 : vector<20xf32> to vector<20x1xf32>
    %cst_120 = arith.constant 3.200000e+01 : f32
    %419 = vector.broadcast %cst_120 : f32 to vector<20x1xf32>
    %420 = arith.divf %418, %419 : vector<20x1xf32>
    %421 = vector.broadcast %420 : vector<20x1xf32> to vector<20x32xf32>
    %422 = arith.subf %416, %421 : vector<20x32xf32>
    %423 = arith.mulf %422, %422 : vector<20x32xf32>
    %cst_121 = arith.constant dense<0.000000e+00> : vector<20xf32>
    %424 = vector.multi_reduction <add>, %423, %cst_121 [1] : vector<20x32xf32> to vector<20xf32>
    %425 = vector.shape_cast %424 : vector<20xf32> to vector<20x1xf32>
    %cst_122 = arith.constant 3.200000e+01 : f32
    %426 = vector.broadcast %cst_122 : f32 to vector<20x1xf32>
    %427 = arith.divf %425, %426 : vector<20x1xf32>
    %428 = vector.broadcast %420 : vector<20x1xf32> to vector<20x32xf32>
    %429 = arith.subf %416, %428 : vector<20x32xf32>
    %cst_123 = arith.constant 9.99999974E-6 : f32
    %430 = vector.broadcast %cst_123 : f32 to vector<20x1xf32>
    %431 = arith.addf %427, %430 : vector<20x1xf32>
    %432 = math.rsqrt %431 : vector<20x1xf32>
    %433 = vector.broadcast %432 : vector<20x1xf32> to vector<20x32xf32>
    %434 = arith.mulf %429, %433 : vector<20x32xf32>
    %c906 = arith.constant 906 : index
    %c0_124 = arith.constant 0 : index
    %435 = vector.load %arg2[%c906, %c0_124] : memref<912x128xf32, #tpu.memory_space<vmem>>, vector<1x32xf32>
    %436 = vector.broadcast %435 : vector<1x32xf32> to vector<20x32xf32>
    %437 = arith.mulf %434, %436 : vector<20x32xf32>
    %c907 = arith.constant 907 : index
    %c0_125 = arith.constant 0 : index
    %438 = vector.load %arg2[%c907, %c0_125] : memref<912x128xf32, #tpu.memory_space<vmem>>, vector<1x32xf32>
    %439 = vector.broadcast %438 : vector<1x32xf32> to vector<20x32xf32>
    %440 = arith.addf %437, %439 : vector<20x32xf32>
    %c0_126 = arith.constant 0 : index
    %c0_127 = arith.constant 0 : index
    %441 = vector.load %arg1[%c0_126, %c0_127] : memref<16x32xf32, #tpu.memory_space<vmem>>, vector<16x32xf32>
    %c320 = arith.constant 320 : index
    %c0_128 = arith.constant 0 : index
    %442 = vector.load %arg2[%c320, %c0_128] : memref<912x128xf32, #tpu.memory_space<vmem>>, vector<32x128xf32>
    %cst_129 = arith.constant dense<0.000000e+00> : vector<16x128xf32>
    %443 = tpu.matmul %441, %442, %cst_129 {dimension_numbers = #tpu.dot_dimension_numbers<[1], [0], [0], [1], [0, 0, 1, 1], [], []>} : vector<16x32xf32>, vector<32x128xf32>, vector<16x128xf32> -> vector<16x128xf32>
    %c880 = arith.constant 880 : index
    %c0_130 = arith.constant 0 : index
    %444 = vector.load %arg2[%c880, %c0_130] : memref<912x128xf32, #tpu.memory_space<vmem>>, vector<1x128xf32>
    %445 = vector.broadcast %444 : vector<1x128xf32> to vector<16x128xf32>
    %446 = arith.addf %443, %445 : vector<16x128xf32>
    %447 = vector.extract_strided_slice %446 {offsets = [0, 0], sizes = [16, 96], strides = [1, 1]} : vector<16x128xf32> to vector<16x96xf32>
    %448 = vector.extract_strided_slice %447 {offsets = [0, 0], sizes = [16, 32], strides = [1, 1]} : vector<16x96xf32> to vector<16x32xf32>
    %449 = vector.extract_strided_slice %447 {offsets = [0, 32], sizes = [16, 32], strides = [1, 1]} : vector<16x96xf32> to vector<16x32xf32>
    %450 = vector.extract_strided_slice %447 {offsets = [0, 64], sizes = [16, 32], strides = [1, 1]} : vector<16x96xf32> to vector<16x32xf32>
    %451 = vector.extract_strided_slice %448 {offsets = [0, 0], sizes = [8, 32], strides = [1, 1]} : vector<16x32xf32> to vector<8x32xf32>
    %452 = vector.extract_strided_slice %449 {offsets = [0, 0], sizes = [8, 32], strides = [1, 1]} : vector<16x32xf32> to vector<8x32xf32>
    %453 = vector.extract_strided_slice %450 {offsets = [0, 0], sizes = [8, 32], strides = [1, 1]} : vector<16x32xf32> to vector<8x32xf32>
    %454 = vector.extract_strided_slice %451 {offsets = [0, 0], sizes = [8, 8], strides = [1, 1]} : vector<8x32xf32> to vector<8x8xf32>
    %455 = vector.extract_strided_slice %452 {offsets = [0, 0], sizes = [8, 8], strides = [1, 1]} : vector<8x32xf32> to vector<8x8xf32>
    %cst_131 = arith.constant dense<0.000000e+00> : vector<8x8xf32>
    %456 = tpu.matmul %454, %455, %cst_131 {dimension_numbers = #tpu.dot_dimension_numbers<[1], [1], [0], [0], [0, 0, 1, 0], [], []>} : vector<8x8xf32>, vector<8x8xf32>, vector<8x8xf32> -> vector<8x8xf32>
    %cst_132 = arith.constant dense<0xFF800000> : vector<8xf32>
    %457 = vector.multi_reduction <maximumf>, %456, %cst_132 [1] : vector<8x8xf32> to vector<8xf32>
    %458 = vector.shape_cast %457 : vector<8xf32> to vector<8x1xf32>
    %459 = vector.broadcast %458 : vector<8x1xf32> to vector<8x8xf32>
    %460 = arith.subf %456, %459 : vector<8x8xf32>
    %461 = math.exp %460 : vector<8x8xf32>
    %cst_133 = arith.constant dense<0.000000e+00> : vector<8xf32>
    %462 = vector.multi_reduction <add>, %461, %cst_133 [1] : vector<8x8xf32> to vector<8xf32>
    %463 = vector.shape_cast %462 : vector<8xf32> to vector<8x1xf32>
    %464 = tpu.reciprocal %463 {approx = true} : vector<8x1xf32> -> vector<8x1xf32>
    %465 = vector.broadcast %464 : vector<8x1xf32> to vector<8x8xf32>
    %466 = arith.mulf %461, %465 : vector<8x8xf32>
    %467 = vector.extract_strided_slice %453 {offsets = [0, 0], sizes = [8, 8], strides = [1, 1]} : vector<8x32xf32> to vector<8x8xf32>
    %cst_134 = arith.constant dense<0.000000e+00> : vector<8x8xf32>
    %468 = tpu.matmul %466, %467, %cst_134 {dimension_numbers = #tpu.dot_dimension_numbers<[1], [0], [0], [1], [0, 0, 1, 1], [], []>} : vector<8x8xf32>, vector<8x8xf32>, vector<8x8xf32> -> vector<8x8xf32>
    %469 = vector.extract_strided_slice %451 {offsets = [0, 8], sizes = [8, 8], strides = [1, 1]} : vector<8x32xf32> to vector<8x8xf32>
    %470 = vector.extract_strided_slice %452 {offsets = [0, 8], sizes = [8, 8], strides = [1, 1]} : vector<8x32xf32> to vector<8x8xf32>
    %cst_135 = arith.constant dense<0.000000e+00> : vector<8x8xf32>
    %471 = tpu.matmul %469, %470, %cst_135 {dimension_numbers = #tpu.dot_dimension_numbers<[1], [1], [0], [0], [0, 0, 1, 0], [], []>} : vector<8x8xf32>, vector<8x8xf32>, vector<8x8xf32> -> vector<8x8xf32>
    %cst_136 = arith.constant dense<0xFF800000> : vector<8xf32>
    %472 = vector.multi_reduction <maximumf>, %471, %cst_136 [1] : vector<8x8xf32> to vector<8xf32>
    %473 = vector.shape_cast %472 : vector<8xf32> to vector<8x1xf32>
    %474 = vector.broadcast %473 : vector<8x1xf32> to vector<8x8xf32>
    %475 = arith.subf %471, %474 : vector<8x8xf32>
    %476 = math.exp %475 : vector<8x8xf32>
    %cst_137 = arith.constant dense<0.000000e+00> : vector<8xf32>
    %477 = vector.multi_reduction <add>, %476, %cst_137 [1] : vector<8x8xf32> to vector<8xf32>
    %478 = vector.shape_cast %477 : vector<8xf32> to vector<8x1xf32>
    %479 = tpu.reciprocal %478 {approx = true} : vector<8x1xf32> -> vector<8x1xf32>
    %480 = vector.broadcast %479 : vector<8x1xf32> to vector<8x8xf32>
    %481 = arith.mulf %476, %480 : vector<8x8xf32>
    %482 = vector.extract_strided_slice %453 {offsets = [0, 8], sizes = [8, 8], strides = [1, 1]} : vector<8x32xf32> to vector<8x8xf32>
    %cst_138 = arith.constant dense<0.000000e+00> : vector<8x8xf32>
    %483 = tpu.matmul %481, %482, %cst_138 {dimension_numbers = #tpu.dot_dimension_numbers<[1], [0], [0], [1], [0, 0, 1, 1], [], []>} : vector<8x8xf32>, vector<8x8xf32>, vector<8x8xf32> -> vector<8x8xf32>
    %484 = vector.extract_strided_slice %451 {offsets = [0, 16], sizes = [8, 8], strides = [1, 1]} : vector<8x32xf32> to vector<8x8xf32>
    %485 = vector.extract_strided_slice %452 {offsets = [0, 16], sizes = [8, 8], strides = [1, 1]} : vector<8x32xf32> to vector<8x8xf32>
    %cst_139 = arith.constant dense<0.000000e+00> : vector<8x8xf32>
    %486 = tpu.matmul %484, %485, %cst_139 {dimension_numbers = #tpu.dot_dimension_numbers<[1], [1], [0], [0], [0, 0, 1, 0], [], []>} : vector<8x8xf32>, vector<8x8xf32>, vector<8x8xf32> -> vector<8x8xf32>
    %cst_140 = arith.constant dense<0xFF800000> : vector<8xf32>
    %487 = vector.multi_reduction <maximumf>, %486, %cst_140 [1] : vector<8x8xf32> to vector<8xf32>
    %488 = vector.shape_cast %487 : vector<8xf32> to vector<8x1xf32>
    %489 = vector.broadcast %488 : vector<8x1xf32> to vector<8x8xf32>
    %490 = arith.subf %486, %489 : vector<8x8xf32>
    %491 = math.exp %490 : vector<8x8xf32>
    %cst_141 = arith.constant dense<0.000000e+00> : vector<8xf32>
    %492 = vector.multi_reduction <add>, %491, %cst_141 [1] : vector<8x8xf32> to vector<8xf32>
    %493 = vector.shape_cast %492 : vector<8xf32> to vector<8x1xf32>
    %494 = tpu.reciprocal %493 {approx = true} : vector<8x1xf32> -> vector<8x1xf32>
    %495 = vector.broadcast %494 : vector<8x1xf32> to vector<8x8xf32>
    %496 = arith.mulf %491, %495 : vector<8x8xf32>
    %497 = vector.extract_strided_slice %453 {offsets = [0, 16], sizes = [8, 8], strides = [1, 1]} : vector<8x32xf32> to vector<8x8xf32>
    %cst_142 = arith.constant dense<0.000000e+00> : vector<8x8xf32>
    %498 = tpu.matmul %496, %497, %cst_142 {dimension_numbers = #tpu.dot_dimension_numbers<[1], [0], [0], [1], [0, 0, 1, 1], [], []>} : vector<8x8xf32>, vector<8x8xf32>, vector<8x8xf32> -> vector<8x8xf32>
    %499 = vector.extract_strided_slice %451 {offsets = [0, 24], sizes = [8, 8], strides = [1, 1]} : vector<8x32xf32> to vector<8x8xf32>
    %500 = vector.extract_strided_slice %452 {offsets = [0, 24], sizes = [8, 8], strides = [1, 1]} : vector<8x32xf32> to vector<8x8xf32>
    %cst_143 = arith.constant dense<0.000000e+00> : vector<8x8xf32>
    %501 = tpu.matmul %499, %500, %cst_143 {dimension_numbers = #tpu.dot_dimension_numbers<[1], [1], [0], [0], [0, 0, 1, 0], [], []>} : vector<8x8xf32>, vector<8x8xf32>, vector<8x8xf32> -> vector<8x8xf32>
    %cst_144 = arith.constant dense<0xFF800000> : vector<8xf32>
    %502 = vector.multi_reduction <maximumf>, %501, %cst_144 [1] : vector<8x8xf32> to vector<8xf32>
    %503 = vector.shape_cast %502 : vector<8xf32> to vector<8x1xf32>
    %504 = vector.broadcast %503 : vector<8x1xf32> to vector<8x8xf32>
    %505 = arith.subf %501, %504 : vector<8x8xf32>
    %506 = math.exp %505 : vector<8x8xf32>
    %cst_145 = arith.constant dense<0.000000e+00> : vector<8xf32>
    %507 = vector.multi_reduction <add>, %506, %cst_145 [1] : vector<8x8xf32> to vector<8xf32>
    %508 = vector.shape_cast %507 : vector<8xf32> to vector<8x1xf32>
    %509 = tpu.reciprocal %508 {approx = true} : vector<8x1xf32> -> vector<8x1xf32>
    %510 = vector.broadcast %509 : vector<8x1xf32> to vector<8x8xf32>
    %511 = arith.mulf %506, %510 : vector<8x8xf32>
    %512 = vector.extract_strided_slice %453 {offsets = [0, 24], sizes = [8, 8], strides = [1, 1]} : vector<8x32xf32> to vector<8x8xf32>
    %cst_146 = arith.constant dense<0.000000e+00> : vector<8x8xf32>
    %513 = tpu.matmul %511, %512, %cst_146 {dimension_numbers = #tpu.dot_dimension_numbers<[1], [0], [0], [1], [0, 0, 1, 1], [], []>} : vector<8x8xf32>, vector<8x8xf32>, vector<8x8xf32> -> vector<8x8xf32>
    %514 = tpu.concatenate %468, %483, %498, %513 in 1 : vector<8x8xf32>, vector<8x8xf32>, vector<8x8xf32>, vector<8x8xf32> -> vector<8x32xf32>
    %515 = vector.extract_strided_slice %448 {offsets = [8, 0], sizes = [8, 32], strides = [1, 1]} : vector<16x32xf32> to vector<8x32xf32>
    %516 = vector.extract_strided_slice %449 {offsets = [8, 0], sizes = [8, 32], strides = [1, 1]} : vector<16x32xf32> to vector<8x32xf32>
    %517 = vector.extract_strided_slice %450 {offsets = [8, 0], sizes = [8, 32], strides = [1, 1]} : vector<16x32xf32> to vector<8x32xf32>
    %518 = vector.extract_strided_slice %515 {offsets = [0, 0], sizes = [8, 8], strides = [1, 1]} : vector<8x32xf32> to vector<8x8xf32>
    %519 = vector.extract_strided_slice %516 {offsets = [0, 0], sizes = [8, 8], strides = [1, 1]} : vector<8x32xf32> to vector<8x8xf32>
    %cst_147 = arith.constant dense<0.000000e+00> : vector<8x8xf32>
    %520 = tpu.matmul %518, %519, %cst_147 {dimension_numbers = #tpu.dot_dimension_numbers<[1], [1], [0], [0], [0, 0, 1, 0], [], []>} : vector<8x8xf32>, vector<8x8xf32>, vector<8x8xf32> -> vector<8x8xf32>
    %cst_148 = arith.constant dense<0xFF800000> : vector<8xf32>
    %521 = vector.multi_reduction <maximumf>, %520, %cst_148 [1] : vector<8x8xf32> to vector<8xf32>
    %522 = vector.shape_cast %521 : vector<8xf32> to vector<8x1xf32>
    %523 = vector.broadcast %522 : vector<8x1xf32> to vector<8x8xf32>
    %524 = arith.subf %520, %523 : vector<8x8xf32>
    %525 = math.exp %524 : vector<8x8xf32>
    %cst_149 = arith.constant dense<0.000000e+00> : vector<8xf32>
    %526 = vector.multi_reduction <add>, %525, %cst_149 [1] : vector<8x8xf32> to vector<8xf32>
    %527 = vector.shape_cast %526 : vector<8xf32> to vector<8x1xf32>
    %528 = tpu.reciprocal %527 {approx = true} : vector<8x1xf32> -> vector<8x1xf32>
    %529 = vector.broadcast %528 : vector<8x1xf32> to vector<8x8xf32>
    %530 = arith.mulf %525, %529 : vector<8x8xf32>
    %531 = vector.extract_strided_slice %517 {offsets = [0, 0], sizes = [8, 8], strides = [1, 1]} : vector<8x32xf32> to vector<8x8xf32>
    %cst_150 = arith.constant dense<0.000000e+00> : vector<8x8xf32>
    %532 = tpu.matmul %530, %531, %cst_150 {dimension_numbers = #tpu.dot_dimension_numbers<[1], [0], [0], [1], [0, 0, 1, 1], [], []>} : vector<8x8xf32>, vector<8x8xf32>, vector<8x8xf32> -> vector<8x8xf32>
    %533 = vector.extract_strided_slice %515 {offsets = [0, 8], sizes = [8, 8], strides = [1, 1]} : vector<8x32xf32> to vector<8x8xf32>
    %534 = vector.extract_strided_slice %516 {offsets = [0, 8], sizes = [8, 8], strides = [1, 1]} : vector<8x32xf32> to vector<8x8xf32>
    %cst_151 = arith.constant dense<0.000000e+00> : vector<8x8xf32>
    %535 = tpu.matmul %533, %534, %cst_151 {dimension_numbers = #tpu.dot_dimension_numbers<[1], [1], [0], [0], [0, 0, 1, 0], [], []>} : vector<8x8xf32>, vector<8x8xf32>, vector<8x8xf32> -> vector<8x8xf32>
    %cst_152 = arith.constant dense<0xFF800000> : vector<8xf32>
    %536 = vector.multi_reduction <maximumf>, %535, %cst_152 [1] : vector<8x8xf32> to vector<8xf32>
    %537 = vector.shape_cast %536 : vector<8xf32> to vector<8x1xf32>
    %538 = vector.broadcast %537 : vector<8x1xf32> to vector<8x8xf32>
    %539 = arith.subf %535, %538 : vector<8x8xf32>
    %540 = math.exp %539 : vector<8x8xf32>
    %cst_153 = arith.constant dense<0.000000e+00> : vector<8xf32>
    %541 = vector.multi_reduction <add>, %540, %cst_153 [1] : vector<8x8xf32> to vector<8xf32>
    %542 = vector.shape_cast %541 : vector<8xf32> to vector<8x1xf32>
    %543 = tpu.reciprocal %542 {approx = true} : vector<8x1xf32> -> vector<8x1xf32>
    %544 = vector.broadcast %543 : vector<8x1xf32> to vector<8x8xf32>
    %545 = arith.mulf %540, %544 : vector<8x8xf32>
    %546 = vector.extract_strided_slice %517 {offsets = [0, 8], sizes = [8, 8], strides = [1, 1]} : vector<8x32xf32> to vector<8x8xf32>
    %cst_154 = arith.constant dense<0.000000e+00> : vector<8x8xf32>
    %547 = tpu.matmul %545, %546, %cst_154 {dimension_numbers = #tpu.dot_dimension_numbers<[1], [0], [0], [1], [0, 0, 1, 1], [], []>} : vector<8x8xf32>, vector<8x8xf32>, vector<8x8xf32> -> vector<8x8xf32>
    %548 = vector.extract_strided_slice %515 {offsets = [0, 16], sizes = [8, 8], strides = [1, 1]} : vector<8x32xf32> to vector<8x8xf32>
    %549 = vector.extract_strided_slice %516 {offsets = [0, 16], sizes = [8, 8], strides = [1, 1]} : vector<8x32xf32> to vector<8x8xf32>
    %cst_155 = arith.constant dense<0.000000e+00> : vector<8x8xf32>
    %550 = tpu.matmul %548, %549, %cst_155 {dimension_numbers = #tpu.dot_dimension_numbers<[1], [1], [0], [0], [0, 0, 1, 0], [], []>} : vector<8x8xf32>, vector<8x8xf32>, vector<8x8xf32> -> vector<8x8xf32>
    %cst_156 = arith.constant dense<0xFF800000> : vector<8xf32>
    %551 = vector.multi_reduction <maximumf>, %550, %cst_156 [1] : vector<8x8xf32> to vector<8xf32>
    %552 = vector.shape_cast %551 : vector<8xf32> to vector<8x1xf32>
    %553 = vector.broadcast %552 : vector<8x1xf32> to vector<8x8xf32>
    %554 = arith.subf %550, %553 : vector<8x8xf32>
    %555 = math.exp %554 : vector<8x8xf32>
    %cst_157 = arith.constant dense<0.000000e+00> : vector<8xf32>
    %556 = vector.multi_reduction <add>, %555, %cst_157 [1] : vector<8x8xf32> to vector<8xf32>
    %557 = vector.shape_cast %556 : vector<8xf32> to vector<8x1xf32>
    %558 = tpu.reciprocal %557 {approx = true} : vector<8x1xf32> -> vector<8x1xf32>
    %559 = vector.broadcast %558 : vector<8x1xf32> to vector<8x8xf32>
    %560 = arith.mulf %555, %559 : vector<8x8xf32>
    %561 = vector.extract_strided_slice %517 {offsets = [0, 16], sizes = [8, 8], strides = [1, 1]} : vector<8x32xf32> to vector<8x8xf32>
    %cst_158 = arith.constant dense<0.000000e+00> : vector<8x8xf32>
    %562 = tpu.matmul %560, %561, %cst_158 {dimension_numbers = #tpu.dot_dimension_numbers<[1], [0], [0], [1], [0, 0, 1, 1], [], []>} : vector<8x8xf32>, vector<8x8xf32>, vector<8x8xf32> -> vector<8x8xf32>
    %563 = vector.extract_strided_slice %515 {offsets = [0, 24], sizes = [8, 8], strides = [1, 1]} : vector<8x32xf32> to vector<8x8xf32>
    %564 = vector.extract_strided_slice %516 {offsets = [0, 24], sizes = [8, 8], strides = [1, 1]} : vector<8x32xf32> to vector<8x8xf32>
    %cst_159 = arith.constant dense<0.000000e+00> : vector<8x8xf32>
    %565 = tpu.matmul %563, %564, %cst_159 {dimension_numbers = #tpu.dot_dimension_numbers<[1], [1], [0], [0], [0, 0, 1, 0], [], []>} : vector<8x8xf32>, vector<8x8xf32>, vector<8x8xf32> -> vector<8x8xf32>
    %cst_160 = arith.constant dense<0xFF800000> : vector<8xf32>
    %566 = vector.multi_reduction <maximumf>, %565, %cst_160 [1] : vector<8x8xf32> to vector<8xf32>
    %567 = vector.shape_cast %566 : vector<8xf32> to vector<8x1xf32>
    %568 = vector.broadcast %567 : vector<8x1xf32> to vector<8x8xf32>
    %569 = arith.subf %565, %568 : vector<8x8xf32>
    %570 = math.exp %569 : vector<8x8xf32>
    %cst_161 = arith.constant dense<0.000000e+00> : vector<8xf32>
    %571 = vector.multi_reduction <add>, %570, %cst_161 [1] : vector<8x8xf32> to vector<8xf32>
    %572 = vector.shape_cast %571 : vector<8xf32> to vector<8x1xf32>
    %573 = tpu.reciprocal %572 {approx = true} : vector<8x1xf32> -> vector<8x1xf32>
    %574 = vector.broadcast %573 : vector<8x1xf32> to vector<8x8xf32>
    %575 = arith.mulf %570, %574 : vector<8x8xf32>
    %576 = vector.extract_strided_slice %517 {offsets = [0, 24], sizes = [8, 8], strides = [1, 1]} : vector<8x32xf32> to vector<8x8xf32>
    %cst_162 = arith.constant dense<0.000000e+00> : vector<8x8xf32>
    %577 = tpu.matmul %575, %576, %cst_162 {dimension_numbers = #tpu.dot_dimension_numbers<[1], [0], [0], [1], [0, 0, 1, 1], [], []>} : vector<8x8xf32>, vector<8x8xf32>, vector<8x8xf32> -> vector<8x8xf32>
    %578 = tpu.concatenate %532, %547, %562, %577 in 1 : vector<8x8xf32>, vector<8x8xf32>, vector<8x8xf32>, vector<8x8xf32> -> vector<8x32xf32>
    %579 = tpu.concatenate %514, %578 in 0 : vector<8x32xf32>, vector<8x32xf32> -> vector<16x32xf32>
    %c352 = arith.constant 352 : index
    %c0_163 = arith.constant 0 : index
    %580 = vector.load %arg2[%c352, %c0_163] : memref<912x128xf32, #tpu.memory_space<vmem>>, vector<32x128xf32>
    %cst_164 = arith.constant dense<0.000000e+00> : vector<16x128xf32>
    %581 = tpu.matmul %579, %580, %cst_164 {dimension_numbers = #tpu.dot_dimension_numbers<[1], [0], [0], [1], [0, 0, 1, 1], [], []>} : vector<16x32xf32>, vector<32x128xf32>, vector<16x128xf32> -> vector<16x128xf32>
    %c881 = arith.constant 881 : index
    %c0_165 = arith.constant 0 : index
    %582 = vector.load %arg2[%c881, %c0_165] : memref<912x128xf32, #tpu.memory_space<vmem>>, vector<1x128xf32>
    %583 = vector.broadcast %582 : vector<1x128xf32> to vector<16x128xf32>
    %584 = arith.addf %581, %583 : vector<16x128xf32>
    %585 = vector.extract_strided_slice %584 {offsets = [0, 0], sizes = [16, 32], strides = [1, 1]} : vector<16x128xf32> to vector<16x32xf32>
    %586 = arith.addf %441, %585 : vector<16x32xf32>
    %cst_166 = arith.constant dense<0.000000e+00> : vector<16xf32>
    %587 = vector.multi_reduction <add>, %586, %cst_166 [1] : vector<16x32xf32> to vector<16xf32>
    %588 = vector.shape_cast %587 : vector<16xf32> to vector<16x1xf32>
    %cst_167 = arith.constant 3.200000e+01 : f32
    %589 = vector.broadcast %cst_167 : f32 to vector<16x1xf32>
    %590 = arith.divf %588, %589 : vector<16x1xf32>
    %591 = vector.broadcast %590 : vector<16x1xf32> to vector<16x32xf32>
    %592 = arith.subf %586, %591 : vector<16x32xf32>
    %593 = arith.mulf %592, %592 : vector<16x32xf32>
    %cst_168 = arith.constant dense<0.000000e+00> : vector<16xf32>
    %594 = vector.multi_reduction <add>, %593, %cst_168 [1] : vector<16x32xf32> to vector<16xf32>
    %595 = vector.shape_cast %594 : vector<16xf32> to vector<16x1xf32>
    %cst_169 = arith.constant 3.200000e+01 : f32
    %596 = vector.broadcast %cst_169 : f32 to vector<16x1xf32>
    %597 = arith.divf %595, %596 : vector<16x1xf32>
    %598 = vector.broadcast %590 : vector<16x1xf32> to vector<16x32xf32>
    %599 = arith.subf %586, %598 : vector<16x32xf32>
    %cst_170 = arith.constant 9.99999974E-6 : f32
    %600 = vector.broadcast %cst_170 : f32 to vector<16x1xf32>
    %601 = arith.addf %597, %600 : vector<16x1xf32>
    %602 = math.rsqrt %601 : vector<16x1xf32>
    %603 = vector.broadcast %602 : vector<16x1xf32> to vector<16x32xf32>
    %604 = arith.mulf %599, %603 : vector<16x32xf32>
    %c887 = arith.constant 887 : index
    %c0_171 = arith.constant 0 : index
    %605 = vector.load %arg2[%c887, %c0_171] : memref<912x128xf32, #tpu.memory_space<vmem>>, vector<1x32xf32>
    %606 = vector.broadcast %605 : vector<1x32xf32> to vector<16x32xf32>
    %607 = arith.mulf %604, %606 : vector<16x32xf32>
    %c888 = arith.constant 888 : index
    %c0_172 = arith.constant 0 : index
    %608 = vector.load %arg2[%c888, %c0_172] : memref<912x128xf32, #tpu.memory_space<vmem>>, vector<1x32xf32>
    %609 = vector.broadcast %608 : vector<1x32xf32> to vector<16x32xf32>
    %610 = arith.addf %607, %609 : vector<16x32xf32>
    %c384 = arith.constant 384 : index
    %c0_173 = arith.constant 0 : index
    %611 = vector.load %arg2[%c384, %c0_173] : memref<912x128xf32, #tpu.memory_space<vmem>>, vector<32x128xf32>
    %cst_174 = arith.constant dense<0.000000e+00> : vector<16x128xf32>
    %612 = tpu.matmul %610, %611, %cst_174 {dimension_numbers = #tpu.dot_dimension_numbers<[1], [0], [0], [1], [0, 0, 1, 1], [], []>} : vector<16x32xf32>, vector<32x128xf32>, vector<16x128xf32> -> vector<16x128xf32>
    %c882 = arith.constant 882 : index
    %c0_175 = arith.constant 0 : index
    %613 = vector.load %arg2[%c882, %c0_175] : memref<912x128xf32, #tpu.memory_space<vmem>>, vector<1x128xf32>
    %614 = vector.broadcast %613 : vector<1x128xf32> to vector<16x128xf32>
    %615 = arith.addf %612, %614 : vector<16x128xf32>
    %616 = vector.extract_strided_slice %615 {offsets = [0, 0], sizes = [16, 32], strides = [1, 1]} : vector<16x128xf32> to vector<16x32xf32>
    %c416 = arith.constant 416 : index
    %c0_176 = arith.constant 0 : index
    %617 = vector.load %arg2[%c416, %c0_176] : memref<912x128xf32, #tpu.memory_space<vmem>>, vector<32x128xf32>
    %cst_177 = arith.constant dense<0.000000e+00> : vector<20x128xf32>
    %618 = tpu.matmul %440, %617, %cst_177 {dimension_numbers = #tpu.dot_dimension_numbers<[1], [0], [0], [1], [0, 0, 1, 1], [], []>} : vector<20x32xf32>, vector<32x128xf32>, vector<20x128xf32> -> vector<20x128xf32>
    %c883 = arith.constant 883 : index
    %c0_178 = arith.constant 0 : index
    %619 = vector.load %arg2[%c883, %c0_178] : memref<912x128xf32, #tpu.memory_space<vmem>>, vector<1x128xf32>
    %620 = vector.broadcast %619 : vector<1x128xf32> to vector<20x128xf32>
    %621 = arith.addf %618, %620 : vector<20x128xf32>
    %622 = vector.extract_strided_slice %621 {offsets = [0, 0], sizes = [20, 64], strides = [1, 1]} : vector<20x128xf32> to vector<20x64xf32>
    %623 = vector.extract_strided_slice %622 {offsets = [0, 0], sizes = [20, 32], strides = [1, 1]} : vector<20x64xf32> to vector<20x32xf32>
    %624 = vector.extract_strided_slice %622 {offsets = [0, 32], sizes = [20, 32], strides = [1, 1]} : vector<20x64xf32> to vector<20x32xf32>
    %625 = vector.extract_strided_slice %616 {offsets = [0, 0], sizes = [8, 32], strides = [1, 1]} : vector<16x32xf32> to vector<8x32xf32>
    %626 = vector.extract_strided_slice %623 {offsets = [0, 0], sizes = [10, 32], strides = [1, 1]} : vector<20x32xf32> to vector<10x32xf32>
    %627 = vector.extract_strided_slice %624 {offsets = [0, 0], sizes = [10, 32], strides = [1, 1]} : vector<20x32xf32> to vector<10x32xf32>
    %628 = vector.extract_strided_slice %625 {offsets = [0, 0], sizes = [8, 8], strides = [1, 1]} : vector<8x32xf32> to vector<8x8xf32>
    %629 = vector.extract_strided_slice %626 {offsets = [0, 0], sizes = [10, 8], strides = [1, 1]} : vector<10x32xf32> to vector<10x8xf32>
    %cst_179 = arith.constant dense<0.000000e+00> : vector<8x10xf32>
    %630 = tpu.matmul %628, %629, %cst_179 {dimension_numbers = #tpu.dot_dimension_numbers<[1], [1], [0], [0], [0, 0, 1, 0], [], []>} : vector<8x8xf32>, vector<10x8xf32>, vector<8x10xf32> -> vector<8x10xf32>
    %cst_180 = arith.constant dense<0xFF800000> : vector<8xf32>
    %631 = vector.multi_reduction <maximumf>, %630, %cst_180 [1] : vector<8x10xf32> to vector<8xf32>
    %632 = vector.shape_cast %631 : vector<8xf32> to vector<8x1xf32>
    %633 = vector.broadcast %632 : vector<8x1xf32> to vector<8x10xf32>
    %634 = arith.subf %630, %633 : vector<8x10xf32>
    %635 = math.exp %634 : vector<8x10xf32>
    %cst_181 = arith.constant dense<0.000000e+00> : vector<8xf32>
    %636 = vector.multi_reduction <add>, %635, %cst_181 [1] : vector<8x10xf32> to vector<8xf32>
    %637 = vector.shape_cast %636 : vector<8xf32> to vector<8x1xf32>
    %638 = tpu.reciprocal %637 {approx = true} : vector<8x1xf32> -> vector<8x1xf32>
    %639 = vector.broadcast %638 : vector<8x1xf32> to vector<8x10xf32>
    %640 = arith.mulf %635, %639 : vector<8x10xf32>
    %641 = vector.extract_strided_slice %627 {offsets = [0, 0], sizes = [10, 8], strides = [1, 1]} : vector<10x32xf32> to vector<10x8xf32>
    %cst_182 = arith.constant dense<0.000000e+00> : vector<8x8xf32>
    %642 = tpu.matmul %640, %641, %cst_182 {dimension_numbers = #tpu.dot_dimension_numbers<[1], [0], [0], [1], [0, 0, 1, 1], [], []>} : vector<8x10xf32>, vector<10x8xf32>, vector<8x8xf32> -> vector<8x8xf32>
    %643 = vector.extract_strided_slice %625 {offsets = [0, 8], sizes = [8, 8], strides = [1, 1]} : vector<8x32xf32> to vector<8x8xf32>
    %644 = vector.extract_strided_slice %626 {offsets = [0, 8], sizes = [10, 8], strides = [1, 1]} : vector<10x32xf32> to vector<10x8xf32>
    %cst_183 = arith.constant dense<0.000000e+00> : vector<8x10xf32>
    %645 = tpu.matmul %643, %644, %cst_183 {dimension_numbers = #tpu.dot_dimension_numbers<[1], [1], [0], [0], [0, 0, 1, 0], [], []>} : vector<8x8xf32>, vector<10x8xf32>, vector<8x10xf32> -> vector<8x10xf32>
    %cst_184 = arith.constant dense<0xFF800000> : vector<8xf32>
    %646 = vector.multi_reduction <maximumf>, %645, %cst_184 [1] : vector<8x10xf32> to vector<8xf32>
    %647 = vector.shape_cast %646 : vector<8xf32> to vector<8x1xf32>
    %648 = vector.broadcast %647 : vector<8x1xf32> to vector<8x10xf32>
    %649 = arith.subf %645, %648 : vector<8x10xf32>
    %650 = math.exp %649 : vector<8x10xf32>
    %cst_185 = arith.constant dense<0.000000e+00> : vector<8xf32>
    %651 = vector.multi_reduction <add>, %650, %cst_185 [1] : vector<8x10xf32> to vector<8xf32>
    %652 = vector.shape_cast %651 : vector<8xf32> to vector<8x1xf32>
    %653 = tpu.reciprocal %652 {approx = true} : vector<8x1xf32> -> vector<8x1xf32>
    %654 = vector.broadcast %653 : vector<8x1xf32> to vector<8x10xf32>
    %655 = arith.mulf %650, %654 : vector<8x10xf32>
    %656 = vector.extract_strided_slice %627 {offsets = [0, 8], sizes = [10, 8], strides = [1, 1]} : vector<10x32xf32> to vector<10x8xf32>
    %cst_186 = arith.constant dense<0.000000e+00> : vector<8x8xf32>
    %657 = tpu.matmul %655, %656, %cst_186 {dimension_numbers = #tpu.dot_dimension_numbers<[1], [0], [0], [1], [0, 0, 1, 1], [], []>} : vector<8x10xf32>, vector<10x8xf32>, vector<8x8xf32> -> vector<8x8xf32>
    %658 = vector.extract_strided_slice %625 {offsets = [0, 16], sizes = [8, 8], strides = [1, 1]} : vector<8x32xf32> to vector<8x8xf32>
    %659 = vector.extract_strided_slice %626 {offsets = [0, 16], sizes = [10, 8], strides = [1, 1]} : vector<10x32xf32> to vector<10x8xf32>
    %cst_187 = arith.constant dense<0.000000e+00> : vector<8x10xf32>
    %660 = tpu.matmul %658, %659, %cst_187 {dimension_numbers = #tpu.dot_dimension_numbers<[1], [1], [0], [0], [0, 0, 1, 0], [], []>} : vector<8x8xf32>, vector<10x8xf32>, vector<8x10xf32> -> vector<8x10xf32>
    %cst_188 = arith.constant dense<0xFF800000> : vector<8xf32>
    %661 = vector.multi_reduction <maximumf>, %660, %cst_188 [1] : vector<8x10xf32> to vector<8xf32>
    %662 = vector.shape_cast %661 : vector<8xf32> to vector<8x1xf32>
    %663 = vector.broadcast %662 : vector<8x1xf32> to vector<8x10xf32>
    %664 = arith.subf %660, %663 : vector<8x10xf32>
    %665 = math.exp %664 : vector<8x10xf32>
    %cst_189 = arith.constant dense<0.000000e+00> : vector<8xf32>
    %666 = vector.multi_reduction <add>, %665, %cst_189 [1] : vector<8x10xf32> to vector<8xf32>
    %667 = vector.shape_cast %666 : vector<8xf32> to vector<8x1xf32>
    %668 = tpu.reciprocal %667 {approx = true} : vector<8x1xf32> -> vector<8x1xf32>
    %669 = vector.broadcast %668 : vector<8x1xf32> to vector<8x10xf32>
    %670 = arith.mulf %665, %669 : vector<8x10xf32>
    %671 = vector.extract_strided_slice %627 {offsets = [0, 16], sizes = [10, 8], strides = [1, 1]} : vector<10x32xf32> to vector<10x8xf32>
    %cst_190 = arith.constant dense<0.000000e+00> : vector<8x8xf32>
    %672 = tpu.matmul %670, %671, %cst_190 {dimension_numbers = #tpu.dot_dimension_numbers<[1], [0], [0], [1], [0, 0, 1, 1], [], []>} : vector<8x10xf32>, vector<10x8xf32>, vector<8x8xf32> -> vector<8x8xf32>
    %673 = vector.extract_strided_slice %625 {offsets = [0, 24], sizes = [8, 8], strides = [1, 1]} : vector<8x32xf32> to vector<8x8xf32>
    %674 = vector.extract_strided_slice %626 {offsets = [0, 24], sizes = [10, 8], strides = [1, 1]} : vector<10x32xf32> to vector<10x8xf32>
    %cst_191 = arith.constant dense<0.000000e+00> : vector<8x10xf32>
    %675 = tpu.matmul %673, %674, %cst_191 {dimension_numbers = #tpu.dot_dimension_numbers<[1], [1], [0], [0], [0, 0, 1, 0], [], []>} : vector<8x8xf32>, vector<10x8xf32>, vector<8x10xf32> -> vector<8x10xf32>
    %cst_192 = arith.constant dense<0xFF800000> : vector<8xf32>
    %676 = vector.multi_reduction <maximumf>, %675, %cst_192 [1] : vector<8x10xf32> to vector<8xf32>
    %677 = vector.shape_cast %676 : vector<8xf32> to vector<8x1xf32>
    %678 = vector.broadcast %677 : vector<8x1xf32> to vector<8x10xf32>
    %679 = arith.subf %675, %678 : vector<8x10xf32>
    %680 = math.exp %679 : vector<8x10xf32>
    %cst_193 = arith.constant dense<0.000000e+00> : vector<8xf32>
    %681 = vector.multi_reduction <add>, %680, %cst_193 [1] : vector<8x10xf32> to vector<8xf32>
    %682 = vector.shape_cast %681 : vector<8xf32> to vector<8x1xf32>
    %683 = tpu.reciprocal %682 {approx = true} : vector<8x1xf32> -> vector<8x1xf32>
    %684 = vector.broadcast %683 : vector<8x1xf32> to vector<8x10xf32>
    %685 = arith.mulf %680, %684 : vector<8x10xf32>
    %686 = vector.extract_strided_slice %627 {offsets = [0, 24], sizes = [10, 8], strides = [1, 1]} : vector<10x32xf32> to vector<10x8xf32>
    %cst_194 = arith.constant dense<0.000000e+00> : vector<8x8xf32>
    %687 = tpu.matmul %685, %686, %cst_194 {dimension_numbers = #tpu.dot_dimension_numbers<[1], [0], [0], [1], [0, 0, 1, 1], [], []>} : vector<8x10xf32>, vector<10x8xf32>, vector<8x8xf32> -> vector<8x8xf32>
    %688 = tpu.concatenate %642, %657, %672, %687 in 1 : vector<8x8xf32>, vector<8x8xf32>, vector<8x8xf32>, vector<8x8xf32> -> vector<8x32xf32>
    %689 = vector.extract_strided_slice %616 {offsets = [8, 0], sizes = [8, 32], strides = [1, 1]} : vector<16x32xf32> to vector<8x32xf32>
    %690 = vector.extract_strided_slice %623 {offsets = [10, 0], sizes = [10, 32], strides = [1, 1]} : vector<20x32xf32> to vector<10x32xf32>
    %691 = vector.extract_strided_slice %624 {offsets = [10, 0], sizes = [10, 32], strides = [1, 1]} : vector<20x32xf32> to vector<10x32xf32>
    %692 = vector.extract_strided_slice %689 {offsets = [0, 0], sizes = [8, 8], strides = [1, 1]} : vector<8x32xf32> to vector<8x8xf32>
    %693 = vector.extract_strided_slice %690 {offsets = [0, 0], sizes = [10, 8], strides = [1, 1]} : vector<10x32xf32> to vector<10x8xf32>
    %cst_195 = arith.constant dense<0.000000e+00> : vector<8x10xf32>
    %694 = tpu.matmul %692, %693, %cst_195 {dimension_numbers = #tpu.dot_dimension_numbers<[1], [1], [0], [0], [0, 0, 1, 0], [], []>} : vector<8x8xf32>, vector<10x8xf32>, vector<8x10xf32> -> vector<8x10xf32>
    %cst_196 = arith.constant dense<0xFF800000> : vector<8xf32>
    %695 = vector.multi_reduction <maximumf>, %694, %cst_196 [1] : vector<8x10xf32> to vector<8xf32>
    %696 = vector.shape_cast %695 : vector<8xf32> to vector<8x1xf32>
    %697 = vector.broadcast %696 : vector<8x1xf32> to vector<8x10xf32>
    %698 = arith.subf %694, %697 : vector<8x10xf32>
    %699 = math.exp %698 : vector<8x10xf32>
    %cst_197 = arith.constant dense<0.000000e+00> : vector<8xf32>
    %700 = vector.multi_reduction <add>, %699, %cst_197 [1] : vector<8x10xf32> to vector<8xf32>
    %701 = vector.shape_cast %700 : vector<8xf32> to vector<8x1xf32>
    %702 = tpu.reciprocal %701 {approx = true} : vector<8x1xf32> -> vector<8x1xf32>
    %703 = vector.broadcast %702 : vector<8x1xf32> to vector<8x10xf32>
    %704 = arith.mulf %699, %703 : vector<8x10xf32>
    %705 = vector.extract_strided_slice %691 {offsets = [0, 0], sizes = [10, 8], strides = [1, 1]} : vector<10x32xf32> to vector<10x8xf32>
    %cst_198 = arith.constant dense<0.000000e+00> : vector<8x8xf32>
    %706 = tpu.matmul %704, %705, %cst_198 {dimension_numbers = #tpu.dot_dimension_numbers<[1], [0], [0], [1], [0, 0, 1, 1], [], []>} : vector<8x10xf32>, vector<10x8xf32>, vector<8x8xf32> -> vector<8x8xf32>
    %707 = vector.extract_strided_slice %689 {offsets = [0, 8], sizes = [8, 8], strides = [1, 1]} : vector<8x32xf32> to vector<8x8xf32>
    %708 = vector.extract_strided_slice %690 {offsets = [0, 8], sizes = [10, 8], strides = [1, 1]} : vector<10x32xf32> to vector<10x8xf32>
    %cst_199 = arith.constant dense<0.000000e+00> : vector<8x10xf32>
    %709 = tpu.matmul %707, %708, %cst_199 {dimension_numbers = #tpu.dot_dimension_numbers<[1], [1], [0], [0], [0, 0, 1, 0], [], []>} : vector<8x8xf32>, vector<10x8xf32>, vector<8x10xf32> -> vector<8x10xf32>
    %cst_200 = arith.constant dense<0xFF800000> : vector<8xf32>
    %710 = vector.multi_reduction <maximumf>, %709, %cst_200 [1] : vector<8x10xf32> to vector<8xf32>
    %711 = vector.shape_cast %710 : vector<8xf32> to vector<8x1xf32>
    %712 = vector.broadcast %711 : vector<8x1xf32> to vector<8x10xf32>
    %713 = arith.subf %709, %712 : vector<8x10xf32>
    %714 = math.exp %713 : vector<8x10xf32>
    %cst_201 = arith.constant dense<0.000000e+00> : vector<8xf32>
    %715 = vector.multi_reduction <add>, %714, %cst_201 [1] : vector<8x10xf32> to vector<8xf32>
    %716 = vector.shape_cast %715 : vector<8xf32> to vector<8x1xf32>
    %717 = tpu.reciprocal %716 {approx = true} : vector<8x1xf32> -> vector<8x1xf32>
    %718 = vector.broadcast %717 : vector<8x1xf32> to vector<8x10xf32>
    %719 = arith.mulf %714, %718 : vector<8x10xf32>
    %720 = vector.extract_strided_slice %691 {offsets = [0, 8], sizes = [10, 8], strides = [1, 1]} : vector<10x32xf32> to vector<10x8xf32>
    %cst_202 = arith.constant dense<0.000000e+00> : vector<8x8xf32>
    %721 = tpu.matmul %719, %720, %cst_202 {dimension_numbers = #tpu.dot_dimension_numbers<[1], [0], [0], [1], [0, 0, 1, 1], [], []>} : vector<8x10xf32>, vector<10x8xf32>, vector<8x8xf32> -> vector<8x8xf32>
    %722 = vector.extract_strided_slice %689 {offsets = [0, 16], sizes = [8, 8], strides = [1, 1]} : vector<8x32xf32> to vector<8x8xf32>
    %723 = vector.extract_strided_slice %690 {offsets = [0, 16], sizes = [10, 8], strides = [1, 1]} : vector<10x32xf32> to vector<10x8xf32>
    %cst_203 = arith.constant dense<0.000000e+00> : vector<8x10xf32>
    %724 = tpu.matmul %722, %723, %cst_203 {dimension_numbers = #tpu.dot_dimension_numbers<[1], [1], [0], [0], [0, 0, 1, 0], [], []>} : vector<8x8xf32>, vector<10x8xf32>, vector<8x10xf32> -> vector<8x10xf32>
    %cst_204 = arith.constant dense<0xFF800000> : vector<8xf32>
    %725 = vector.multi_reduction <maximumf>, %724, %cst_204 [1] : vector<8x10xf32> to vector<8xf32>
    %726 = vector.shape_cast %725 : vector<8xf32> to vector<8x1xf32>
    %727 = vector.broadcast %726 : vector<8x1xf32> to vector<8x10xf32>
    %728 = arith.subf %724, %727 : vector<8x10xf32>
    %729 = math.exp %728 : vector<8x10xf32>
    %cst_205 = arith.constant dense<0.000000e+00> : vector<8xf32>
    %730 = vector.multi_reduction <add>, %729, %cst_205 [1] : vector<8x10xf32> to vector<8xf32>
    %731 = vector.shape_cast %730 : vector<8xf32> to vector<8x1xf32>
    %732 = tpu.reciprocal %731 {approx = true} : vector<8x1xf32> -> vector<8x1xf32>
    %733 = vector.broadcast %732 : vector<8x1xf32> to vector<8x10xf32>
    %734 = arith.mulf %729, %733 : vector<8x10xf32>
    %735 = vector.extract_strided_slice %691 {offsets = [0, 16], sizes = [10, 8], strides = [1, 1]} : vector<10x32xf32> to vector<10x8xf32>
    %cst_206 = arith.constant dense<0.000000e+00> : vector<8x8xf32>
    %736 = tpu.matmul %734, %735, %cst_206 {dimension_numbers = #tpu.dot_dimension_numbers<[1], [0], [0], [1], [0, 0, 1, 1], [], []>} : vector<8x10xf32>, vector<10x8xf32>, vector<8x8xf32> -> vector<8x8xf32>
    %737 = vector.extract_strided_slice %689 {offsets = [0, 24], sizes = [8, 8], strides = [1, 1]} : vector<8x32xf32> to vector<8x8xf32>
    %738 = vector.extract_strided_slice %690 {offsets = [0, 24], sizes = [10, 8], strides = [1, 1]} : vector<10x32xf32> to vector<10x8xf32>
    %cst_207 = arith.constant dense<0.000000e+00> : vector<8x10xf32>
    %739 = tpu.matmul %737, %738, %cst_207 {dimension_numbers = #tpu.dot_dimension_numbers<[1], [1], [0], [0], [0, 0, 1, 0], [], []>} : vector<8x8xf32>, vector<10x8xf32>, vector<8x10xf32> -> vector<8x10xf32>
    %cst_208 = arith.constant dense<0xFF800000> : vector<8xf32>
    %740 = vector.multi_reduction <maximumf>, %739, %cst_208 [1] : vector<8x10xf32> to vector<8xf32>
    %741 = vector.shape_cast %740 : vector<8xf32> to vector<8x1xf32>
    %742 = vector.broadcast %741 : vector<8x1xf32> to vector<8x10xf32>
    %743 = arith.subf %739, %742 : vector<8x10xf32>
    %744 = math.exp %743 : vector<8x10xf32>
    %cst_209 = arith.constant dense<0.000000e+00> : vector<8xf32>
    %745 = vector.multi_reduction <add>, %744, %cst_209 [1] : vector<8x10xf32> to vector<8xf32>
    %746 = vector.shape_cast %745 : vector<8xf32> to vector<8x1xf32>
    %747 = tpu.reciprocal %746 {approx = true} : vector<8x1xf32> -> vector<8x1xf32>
    %748 = vector.broadcast %747 : vector<8x1xf32> to vector<8x10xf32>
    %749 = arith.mulf %744, %748 : vector<8x10xf32>
    %750 = vector.extract_strided_slice %691 {offsets = [0, 24], sizes = [10, 8], strides = [1, 1]} : vector<10x32xf32> to vector<10x8xf32>
    %cst_210 = arith.constant dense<0.000000e+00> : vector<8x8xf32>
    %751 = tpu.matmul %749, %750, %cst_210 {dimension_numbers = #tpu.dot_dimension_numbers<[1], [0], [0], [1], [0, 0, 1, 1], [], []>} : vector<8x10xf32>, vector<10x8xf32>, vector<8x8xf32> -> vector<8x8xf32>
    %752 = tpu.concatenate %706, %721, %736, %751 in 1 : vector<8x8xf32>, vector<8x8xf32>, vector<8x8xf32>, vector<8x8xf32> -> vector<8x32xf32>
    %753 = tpu.concatenate %688, %752 in 0 : vector<8x32xf32>, vector<8x32xf32> -> vector<16x32xf32>
    %c448 = arith.constant 448 : index
    %c0_211 = arith.constant 0 : index
    %754 = vector.load %arg2[%c448, %c0_211] : memref<912x128xf32, #tpu.memory_space<vmem>>, vector<32x128xf32>
    %cst_212 = arith.constant dense<0.000000e+00> : vector<16x128xf32>
    %755 = tpu.matmul %753, %754, %cst_212 {dimension_numbers = #tpu.dot_dimension_numbers<[1], [0], [0], [1], [0, 0, 1, 1], [], []>} : vector<16x32xf32>, vector<32x128xf32>, vector<16x128xf32> -> vector<16x128xf32>
    %c884 = arith.constant 884 : index
    %c0_213 = arith.constant 0 : index
    %756 = vector.load %arg2[%c884, %c0_213] : memref<912x128xf32, #tpu.memory_space<vmem>>, vector<1x128xf32>
    %757 = vector.broadcast %756 : vector<1x128xf32> to vector<16x128xf32>
    %758 = arith.addf %755, %757 : vector<16x128xf32>
    %759 = vector.extract_strided_slice %758 {offsets = [0, 0], sizes = [16, 32], strides = [1, 1]} : vector<16x128xf32> to vector<16x32xf32>
    %760 = arith.addf %610, %759 : vector<16x32xf32>
    %cst_214 = arith.constant dense<0.000000e+00> : vector<16xf32>
    %761 = vector.multi_reduction <add>, %760, %cst_214 [1] : vector<16x32xf32> to vector<16xf32>
    %762 = vector.shape_cast %761 : vector<16xf32> to vector<16x1xf32>
    %cst_215 = arith.constant 3.200000e+01 : f32
    %763 = vector.broadcast %cst_215 : f32 to vector<16x1xf32>
    %764 = arith.divf %762, %763 : vector<16x1xf32>
    %765 = vector.broadcast %764 : vector<16x1xf32> to vector<16x32xf32>
    %766 = arith.subf %760, %765 : vector<16x32xf32>
    %767 = arith.mulf %766, %766 : vector<16x32xf32>
    %cst_216 = arith.constant dense<0.000000e+00> : vector<16xf32>
    %768 = vector.multi_reduction <add>, %767, %cst_216 [1] : vector<16x32xf32> to vector<16xf32>
    %769 = vector.shape_cast %768 : vector<16xf32> to vector<16x1xf32>
    %cst_217 = arith.constant 3.200000e+01 : f32
    %770 = vector.broadcast %cst_217 : f32 to vector<16x1xf32>
    %771 = arith.divf %769, %770 : vector<16x1xf32>
    %772 = vector.broadcast %764 : vector<16x1xf32> to vector<16x32xf32>
    %773 = arith.subf %760, %772 : vector<16x32xf32>
    %cst_218 = arith.constant 9.99999974E-6 : f32
    %774 = vector.broadcast %cst_218 : f32 to vector<16x1xf32>
    %775 = arith.addf %771, %774 : vector<16x1xf32>
    %776 = math.rsqrt %775 : vector<16x1xf32>
    %777 = vector.broadcast %776 : vector<16x1xf32> to vector<16x32xf32>
    %778 = arith.mulf %773, %777 : vector<16x32xf32>
    %c889 = arith.constant 889 : index
    %c0_219 = arith.constant 0 : index
    %779 = vector.load %arg2[%c889, %c0_219] : memref<912x128xf32, #tpu.memory_space<vmem>>, vector<1x32xf32>
    %780 = vector.broadcast %779 : vector<1x32xf32> to vector<16x32xf32>
    %781 = arith.mulf %778, %780 : vector<16x32xf32>
    %c890 = arith.constant 890 : index
    %c0_220 = arith.constant 0 : index
    %782 = vector.load %arg2[%c890, %c0_220] : memref<912x128xf32, #tpu.memory_space<vmem>>, vector<1x32xf32>
    %783 = vector.broadcast %782 : vector<1x32xf32> to vector<16x32xf32>
    %784 = arith.addf %781, %783 : vector<16x32xf32>
    %c480 = arith.constant 480 : index
    %c0_221 = arith.constant 0 : index
    %785 = vector.load %arg2[%c480, %c0_221] : memref<912x128xf32, #tpu.memory_space<vmem>>, vector<32x128xf32>
    %cst_222 = arith.constant dense<0.000000e+00> : vector<16x128xf32>
    %786 = tpu.matmul %784, %785, %cst_222 {dimension_numbers = #tpu.dot_dimension_numbers<[1], [0], [0], [1], [0, 0, 1, 1], [], []>} : vector<16x32xf32>, vector<32x128xf32>, vector<16x128xf32> -> vector<16x128xf32>
    %c885 = arith.constant 885 : index
    %c0_223 = arith.constant 0 : index
    %787 = vector.load %arg2[%c885, %c0_223] : memref<912x128xf32, #tpu.memory_space<vmem>>, vector<1x128xf32>
    %788 = vector.broadcast %787 : vector<1x128xf32> to vector<16x128xf32>
    %789 = arith.addf %786, %788 : vector<16x128xf32>
    %790 = vector.extract_strided_slice %789 {offsets = [0, 0], sizes = [16, 64], strides = [1, 1]} : vector<16x128xf32> to vector<16x64xf32>
    %cst_224 = arith.constant 0.000000e+00 : f32
    %791 = vector.broadcast %cst_224 : f32 to vector<16x64xf32>
    %792 = arith.maximumf %790, %791 : vector<16x64xf32>
    %c512 = arith.constant 512 : index
    %c0_225 = arith.constant 0 : index
    %793 = vector.load %arg2[%c512, %c0_225] : memref<912x128xf32, #tpu.memory_space<vmem>>, vector<64x128xf32>
    %cst_226 = arith.constant dense<0.000000e+00> : vector<16x128xf32>
    %794 = tpu.matmul %792, %793, %cst_226 {dimension_numbers = #tpu.dot_dimension_numbers<[1], [0], [0], [1], [0, 0, 1, 1], [], []>} : vector<16x64xf32>, vector<64x128xf32>, vector<16x128xf32> -> vector<16x128xf32>
    %c886 = arith.constant 886 : index
    %c0_227 = arith.constant 0 : index
    %795 = vector.load %arg2[%c886, %c0_227] : memref<912x128xf32, #tpu.memory_space<vmem>>, vector<1x128xf32>
    %796 = vector.broadcast %795 : vector<1x128xf32> to vector<16x128xf32>
    %797 = arith.addf %794, %796 : vector<16x128xf32>
    %798 = vector.extract_strided_slice %797 {offsets = [0, 0], sizes = [16, 32], strides = [1, 1]} : vector<16x128xf32> to vector<16x32xf32>
    %799 = arith.addf %784, %798 : vector<16x32xf32>
    %cst_228 = arith.constant dense<0.000000e+00> : vector<16xf32>
    %800 = vector.multi_reduction <add>, %799, %cst_228 [1] : vector<16x32xf32> to vector<16xf32>
    %801 = vector.shape_cast %800 : vector<16xf32> to vector<16x1xf32>
    %cst_229 = arith.constant 3.200000e+01 : f32
    %802 = vector.broadcast %cst_229 : f32 to vector<16x1xf32>
    %803 = arith.divf %801, %802 : vector<16x1xf32>
    %804 = vector.broadcast %803 : vector<16x1xf32> to vector<16x32xf32>
    %805 = arith.subf %799, %804 : vector<16x32xf32>
    %806 = arith.mulf %805, %805 : vector<16x32xf32>
    %cst_230 = arith.constant dense<0.000000e+00> : vector<16xf32>
    %807 = vector.multi_reduction <add>, %806, %cst_230 [1] : vector<16x32xf32> to vector<16xf32>
    %808 = vector.shape_cast %807 : vector<16xf32> to vector<16x1xf32>
    %cst_231 = arith.constant 3.200000e+01 : f32
    %809 = vector.broadcast %cst_231 : f32 to vector<16x1xf32>
    %810 = arith.divf %808, %809 : vector<16x1xf32>
    %811 = vector.broadcast %803 : vector<16x1xf32> to vector<16x32xf32>
    %812 = arith.subf %799, %811 : vector<16x32xf32>
    %cst_232 = arith.constant 9.99999974E-6 : f32
    %813 = vector.broadcast %cst_232 : f32 to vector<16x1xf32>
    %814 = arith.addf %810, %813 : vector<16x1xf32>
    %815 = math.rsqrt %814 : vector<16x1xf32>
    %816 = vector.broadcast %815 : vector<16x1xf32> to vector<16x32xf32>
    %817 = arith.mulf %812, %816 : vector<16x32xf32>
    %c891 = arith.constant 891 : index
    %c0_233 = arith.constant 0 : index
    %818 = vector.load %arg2[%c891, %c0_233] : memref<912x128xf32, #tpu.memory_space<vmem>>, vector<1x32xf32>
    %819 = vector.broadcast %818 : vector<1x32xf32> to vector<16x32xf32>
    %820 = arith.mulf %817, %819 : vector<16x32xf32>
    %c892 = arith.constant 892 : index
    %c0_234 = arith.constant 0 : index
    %821 = vector.load %arg2[%c892, %c0_234] : memref<912x128xf32, #tpu.memory_space<vmem>>, vector<1x32xf32>
    %822 = vector.broadcast %821 : vector<1x32xf32> to vector<16x32xf32>
    %823 = arith.addf %820, %822 : vector<16x32xf32>
    %c576 = arith.constant 576 : index
    %c0_235 = arith.constant 0 : index
    %824 = vector.load %arg2[%c576, %c0_235] : memref<912x128xf32, #tpu.memory_space<vmem>>, vector<32x128xf32>
    %cst_236 = arith.constant dense<0.000000e+00> : vector<16x128xf32>
    %825 = tpu.matmul %823, %824, %cst_236 {dimension_numbers = #tpu.dot_dimension_numbers<[1], [0], [0], [1], [0, 0, 1, 1], [], []>} : vector<16x32xf32>, vector<32x128xf32>, vector<16x128xf32> -> vector<16x128xf32>
    %c893 = arith.constant 893 : index
    %c0_237 = arith.constant 0 : index
    %826 = vector.load %arg2[%c893, %c0_237] : memref<912x128xf32, #tpu.memory_space<vmem>>, vector<1x128xf32>
    %827 = vector.broadcast %826 : vector<1x128xf32> to vector<16x128xf32>
    %828 = arith.addf %825, %827 : vector<16x128xf32>
    %829 = vector.extract_strided_slice %828 {offsets = [0, 0], sizes = [16, 96], strides = [1, 1]} : vector<16x128xf32> to vector<16x96xf32>
    %830 = vector.extract_strided_slice %829 {offsets = [0, 0], sizes = [16, 32], strides = [1, 1]} : vector<16x96xf32> to vector<16x32xf32>
    %831 = vector.extract_strided_slice %829 {offsets = [0, 32], sizes = [16, 32], strides = [1, 1]} : vector<16x96xf32> to vector<16x32xf32>
    %832 = vector.extract_strided_slice %829 {offsets = [0, 64], sizes = [16, 32], strides = [1, 1]} : vector<16x96xf32> to vector<16x32xf32>
    %833 = vector.extract_strided_slice %830 {offsets = [0, 0], sizes = [8, 32], strides = [1, 1]} : vector<16x32xf32> to vector<8x32xf32>
    %834 = vector.extract_strided_slice %831 {offsets = [0, 0], sizes = [8, 32], strides = [1, 1]} : vector<16x32xf32> to vector<8x32xf32>
    %835 = vector.extract_strided_slice %832 {offsets = [0, 0], sizes = [8, 32], strides = [1, 1]} : vector<16x32xf32> to vector<8x32xf32>
    %836 = vector.extract_strided_slice %833 {offsets = [0, 0], sizes = [8, 8], strides = [1, 1]} : vector<8x32xf32> to vector<8x8xf32>
    %837 = vector.extract_strided_slice %834 {offsets = [0, 0], sizes = [8, 8], strides = [1, 1]} : vector<8x32xf32> to vector<8x8xf32>
    %cst_238 = arith.constant dense<0.000000e+00> : vector<8x8xf32>
    %838 = tpu.matmul %836, %837, %cst_238 {dimension_numbers = #tpu.dot_dimension_numbers<[1], [1], [0], [0], [0, 0, 1, 0], [], []>} : vector<8x8xf32>, vector<8x8xf32>, vector<8x8xf32> -> vector<8x8xf32>
    %cst_239 = arith.constant dense<0xFF800000> : vector<8xf32>
    %839 = vector.multi_reduction <maximumf>, %838, %cst_239 [1] : vector<8x8xf32> to vector<8xf32>
    %840 = vector.shape_cast %839 : vector<8xf32> to vector<8x1xf32>
    %841 = vector.broadcast %840 : vector<8x1xf32> to vector<8x8xf32>
    %842 = arith.subf %838, %841 : vector<8x8xf32>
    %843 = math.exp %842 : vector<8x8xf32>
    %cst_240 = arith.constant dense<0.000000e+00> : vector<8xf32>
    %844 = vector.multi_reduction <add>, %843, %cst_240 [1] : vector<8x8xf32> to vector<8xf32>
    %845 = vector.shape_cast %844 : vector<8xf32> to vector<8x1xf32>
    %846 = tpu.reciprocal %845 {approx = true} : vector<8x1xf32> -> vector<8x1xf32>
    %847 = vector.broadcast %846 : vector<8x1xf32> to vector<8x8xf32>
    %848 = arith.mulf %843, %847 : vector<8x8xf32>
    %849 = vector.extract_strided_slice %835 {offsets = [0, 0], sizes = [8, 8], strides = [1, 1]} : vector<8x32xf32> to vector<8x8xf32>
    %cst_241 = arith.constant dense<0.000000e+00> : vector<8x8xf32>
    %850 = tpu.matmul %848, %849, %cst_241 {dimension_numbers = #tpu.dot_dimension_numbers<[1], [0], [0], [1], [0, 0, 1, 1], [], []>} : vector<8x8xf32>, vector<8x8xf32>, vector<8x8xf32> -> vector<8x8xf32>
    %851 = vector.extract_strided_slice %833 {offsets = [0, 8], sizes = [8, 8], strides = [1, 1]} : vector<8x32xf32> to vector<8x8xf32>
    %852 = vector.extract_strided_slice %834 {offsets = [0, 8], sizes = [8, 8], strides = [1, 1]} : vector<8x32xf32> to vector<8x8xf32>
    %cst_242 = arith.constant dense<0.000000e+00> : vector<8x8xf32>
    %853 = tpu.matmul %851, %852, %cst_242 {dimension_numbers = #tpu.dot_dimension_numbers<[1], [1], [0], [0], [0, 0, 1, 0], [], []>} : vector<8x8xf32>, vector<8x8xf32>, vector<8x8xf32> -> vector<8x8xf32>
    %cst_243 = arith.constant dense<0xFF800000> : vector<8xf32>
    %854 = vector.multi_reduction <maximumf>, %853, %cst_243 [1] : vector<8x8xf32> to vector<8xf32>
    %855 = vector.shape_cast %854 : vector<8xf32> to vector<8x1xf32>
    %856 = vector.broadcast %855 : vector<8x1xf32> to vector<8x8xf32>
    %857 = arith.subf %853, %856 : vector<8x8xf32>
    %858 = math.exp %857 : vector<8x8xf32>
    %cst_244 = arith.constant dense<0.000000e+00> : vector<8xf32>
    %859 = vector.multi_reduction <add>, %858, %cst_244 [1] : vector<8x8xf32> to vector<8xf32>
    %860 = vector.shape_cast %859 : vector<8xf32> to vector<8x1xf32>
    %861 = tpu.reciprocal %860 {approx = true} : vector<8x1xf32> -> vector<8x1xf32>
    %862 = vector.broadcast %861 : vector<8x1xf32> to vector<8x8xf32>
    %863 = arith.mulf %858, %862 : vector<8x8xf32>
    %864 = vector.extract_strided_slice %835 {offsets = [0, 8], sizes = [8, 8], strides = [1, 1]} : vector<8x32xf32> to vector<8x8xf32>
    %cst_245 = arith.constant dense<0.000000e+00> : vector<8x8xf32>
    %865 = tpu.matmul %863, %864, %cst_245 {dimension_numbers = #tpu.dot_dimension_numbers<[1], [0], [0], [1], [0, 0, 1, 1], [], []>} : vector<8x8xf32>, vector<8x8xf32>, vector<8x8xf32> -> vector<8x8xf32>
    %866 = vector.extract_strided_slice %833 {offsets = [0, 16], sizes = [8, 8], strides = [1, 1]} : vector<8x32xf32> to vector<8x8xf32>
    %867 = vector.extract_strided_slice %834 {offsets = [0, 16], sizes = [8, 8], strides = [1, 1]} : vector<8x32xf32> to vector<8x8xf32>
    %cst_246 = arith.constant dense<0.000000e+00> : vector<8x8xf32>
    %868 = tpu.matmul %866, %867, %cst_246 {dimension_numbers = #tpu.dot_dimension_numbers<[1], [1], [0], [0], [0, 0, 1, 0], [], []>} : vector<8x8xf32>, vector<8x8xf32>, vector<8x8xf32> -> vector<8x8xf32>
    %cst_247 = arith.constant dense<0xFF800000> : vector<8xf32>
    %869 = vector.multi_reduction <maximumf>, %868, %cst_247 [1] : vector<8x8xf32> to vector<8xf32>
    %870 = vector.shape_cast %869 : vector<8xf32> to vector<8x1xf32>
    %871 = vector.broadcast %870 : vector<8x1xf32> to vector<8x8xf32>
    %872 = arith.subf %868, %871 : vector<8x8xf32>
    %873 = math.exp %872 : vector<8x8xf32>
    %cst_248 = arith.constant dense<0.000000e+00> : vector<8xf32>
    %874 = vector.multi_reduction <add>, %873, %cst_248 [1] : vector<8x8xf32> to vector<8xf32>
    %875 = vector.shape_cast %874 : vector<8xf32> to vector<8x1xf32>
    %876 = tpu.reciprocal %875 {approx = true} : vector<8x1xf32> -> vector<8x1xf32>
    %877 = vector.broadcast %876 : vector<8x1xf32> to vector<8x8xf32>
    %878 = arith.mulf %873, %877 : vector<8x8xf32>
    %879 = vector.extract_strided_slice %835 {offsets = [0, 16], sizes = [8, 8], strides = [1, 1]} : vector<8x32xf32> to vector<8x8xf32>
    %cst_249 = arith.constant dense<0.000000e+00> : vector<8x8xf32>
    %880 = tpu.matmul %878, %879, %cst_249 {dimension_numbers = #tpu.dot_dimension_numbers<[1], [0], [0], [1], [0, 0, 1, 1], [], []>} : vector<8x8xf32>, vector<8x8xf32>, vector<8x8xf32> -> vector<8x8xf32>
    %881 = vector.extract_strided_slice %833 {offsets = [0, 24], sizes = [8, 8], strides = [1, 1]} : vector<8x32xf32> to vector<8x8xf32>
    %882 = vector.extract_strided_slice %834 {offsets = [0, 24], sizes = [8, 8], strides = [1, 1]} : vector<8x32xf32> to vector<8x8xf32>
    %cst_250 = arith.constant dense<0.000000e+00> : vector<8x8xf32>
    %883 = tpu.matmul %881, %882, %cst_250 {dimension_numbers = #tpu.dot_dimension_numbers<[1], [1], [0], [0], [0, 0, 1, 0], [], []>} : vector<8x8xf32>, vector<8x8xf32>, vector<8x8xf32> -> vector<8x8xf32>
    %cst_251 = arith.constant dense<0xFF800000> : vector<8xf32>
    %884 = vector.multi_reduction <maximumf>, %883, %cst_251 [1] : vector<8x8xf32> to vector<8xf32>
    %885 = vector.shape_cast %884 : vector<8xf32> to vector<8x1xf32>
    %886 = vector.broadcast %885 : vector<8x1xf32> to vector<8x8xf32>
    %887 = arith.subf %883, %886 : vector<8x8xf32>
    %888 = math.exp %887 : vector<8x8xf32>
    %cst_252 = arith.constant dense<0.000000e+00> : vector<8xf32>
    %889 = vector.multi_reduction <add>, %888, %cst_252 [1] : vector<8x8xf32> to vector<8xf32>
    %890 = vector.shape_cast %889 : vector<8xf32> to vector<8x1xf32>
    %891 = tpu.reciprocal %890 {approx = true} : vector<8x1xf32> -> vector<8x1xf32>
    %892 = vector.broadcast %891 : vector<8x1xf32> to vector<8x8xf32>
    %893 = arith.mulf %888, %892 : vector<8x8xf32>
    %894 = vector.extract_strided_slice %835 {offsets = [0, 24], sizes = [8, 8], strides = [1, 1]} : vector<8x32xf32> to vector<8x8xf32>
    %cst_253 = arith.constant dense<0.000000e+00> : vector<8x8xf32>
    %895 = tpu.matmul %893, %894, %cst_253 {dimension_numbers = #tpu.dot_dimension_numbers<[1], [0], [0], [1], [0, 0, 1, 1], [], []>} : vector<8x8xf32>, vector<8x8xf32>, vector<8x8xf32> -> vector<8x8xf32>
    %896 = tpu.concatenate %850, %865, %880, %895 in 1 : vector<8x8xf32>, vector<8x8xf32>, vector<8x8xf32>, vector<8x8xf32> -> vector<8x32xf32>
    %897 = vector.extract_strided_slice %830 {offsets = [8, 0], sizes = [8, 32], strides = [1, 1]} : vector<16x32xf32> to vector<8x32xf32>
    %898 = vector.extract_strided_slice %831 {offsets = [8, 0], sizes = [8, 32], strides = [1, 1]} : vector<16x32xf32> to vector<8x32xf32>
    %899 = vector.extract_strided_slice %832 {offsets = [8, 0], sizes = [8, 32], strides = [1, 1]} : vector<16x32xf32> to vector<8x32xf32>
    %900 = vector.extract_strided_slice %897 {offsets = [0, 0], sizes = [8, 8], strides = [1, 1]} : vector<8x32xf32> to vector<8x8xf32>
    %901 = vector.extract_strided_slice %898 {offsets = [0, 0], sizes = [8, 8], strides = [1, 1]} : vector<8x32xf32> to vector<8x8xf32>
    %cst_254 = arith.constant dense<0.000000e+00> : vector<8x8xf32>
    %902 = tpu.matmul %900, %901, %cst_254 {dimension_numbers = #tpu.dot_dimension_numbers<[1], [1], [0], [0], [0, 0, 1, 0], [], []>} : vector<8x8xf32>, vector<8x8xf32>, vector<8x8xf32> -> vector<8x8xf32>
    %cst_255 = arith.constant dense<0xFF800000> : vector<8xf32>
    %903 = vector.multi_reduction <maximumf>, %902, %cst_255 [1] : vector<8x8xf32> to vector<8xf32>
    %904 = vector.shape_cast %903 : vector<8xf32> to vector<8x1xf32>
    %905 = vector.broadcast %904 : vector<8x1xf32> to vector<8x8xf32>
    %906 = arith.subf %902, %905 : vector<8x8xf32>
    %907 = math.exp %906 : vector<8x8xf32>
    %cst_256 = arith.constant dense<0.000000e+00> : vector<8xf32>
    %908 = vector.multi_reduction <add>, %907, %cst_256 [1] : vector<8x8xf32> to vector<8xf32>
    %909 = vector.shape_cast %908 : vector<8xf32> to vector<8x1xf32>
    %910 = tpu.reciprocal %909 {approx = true} : vector<8x1xf32> -> vector<8x1xf32>
    %911 = vector.broadcast %910 : vector<8x1xf32> to vector<8x8xf32>
    %912 = arith.mulf %907, %911 : vector<8x8xf32>
    %913 = vector.extract_strided_slice %899 {offsets = [0, 0], sizes = [8, 8], strides = [1, 1]} : vector<8x32xf32> to vector<8x8xf32>
    %cst_257 = arith.constant dense<0.000000e+00> : vector<8x8xf32>
    %914 = tpu.matmul %912, %913, %cst_257 {dimension_numbers = #tpu.dot_dimension_numbers<[1], [0], [0], [1], [0, 0, 1, 1], [], []>} : vector<8x8xf32>, vector<8x8xf32>, vector<8x8xf32> -> vector<8x8xf32>
    %915 = vector.extract_strided_slice %897 {offsets = [0, 8], sizes = [8, 8], strides = [1, 1]} : vector<8x32xf32> to vector<8x8xf32>
    %916 = vector.extract_strided_slice %898 {offsets = [0, 8], sizes = [8, 8], strides = [1, 1]} : vector<8x32xf32> to vector<8x8xf32>
    %cst_258 = arith.constant dense<0.000000e+00> : vector<8x8xf32>
    %917 = tpu.matmul %915, %916, %cst_258 {dimension_numbers = #tpu.dot_dimension_numbers<[1], [1], [0], [0], [0, 0, 1, 0], [], []>} : vector<8x8xf32>, vector<8x8xf32>, vector<8x8xf32> -> vector<8x8xf32>
    %cst_259 = arith.constant dense<0xFF800000> : vector<8xf32>
    %918 = vector.multi_reduction <maximumf>, %917, %cst_259 [1] : vector<8x8xf32> to vector<8xf32>
    %919 = vector.shape_cast %918 : vector<8xf32> to vector<8x1xf32>
    %920 = vector.broadcast %919 : vector<8x1xf32> to vector<8x8xf32>
    %921 = arith.subf %917, %920 : vector<8x8xf32>
    %922 = math.exp %921 : vector<8x8xf32>
    %cst_260 = arith.constant dense<0.000000e+00> : vector<8xf32>
    %923 = vector.multi_reduction <add>, %922, %cst_260 [1] : vector<8x8xf32> to vector<8xf32>
    %924 = vector.shape_cast %923 : vector<8xf32> to vector<8x1xf32>
    %925 = tpu.reciprocal %924 {approx = true} : vector<8x1xf32> -> vector<8x1xf32>
    %926 = vector.broadcast %925 : vector<8x1xf32> to vector<8x8xf32>
    %927 = arith.mulf %922, %926 : vector<8x8xf32>
    %928 = vector.extract_strided_slice %899 {offsets = [0, 8], sizes = [8, 8], strides = [1, 1]} : vector<8x32xf32> to vector<8x8xf32>
    %cst_261 = arith.constant dense<0.000000e+00> : vector<8x8xf32>
    %929 = tpu.matmul %927, %928, %cst_261 {dimension_numbers = #tpu.dot_dimension_numbers<[1], [0], [0], [1], [0, 0, 1, 1], [], []>} : vector<8x8xf32>, vector<8x8xf32>, vector<8x8xf32> -> vector<8x8xf32>
    %930 = vector.extract_strided_slice %897 {offsets = [0, 16], sizes = [8, 8], strides = [1, 1]} : vector<8x32xf32> to vector<8x8xf32>
    %931 = vector.extract_strided_slice %898 {offsets = [0, 16], sizes = [8, 8], strides = [1, 1]} : vector<8x32xf32> to vector<8x8xf32>
    %cst_262 = arith.constant dense<0.000000e+00> : vector<8x8xf32>
    %932 = tpu.matmul %930, %931, %cst_262 {dimension_numbers = #tpu.dot_dimension_numbers<[1], [1], [0], [0], [0, 0, 1, 0], [], []>} : vector<8x8xf32>, vector<8x8xf32>, vector<8x8xf32> -> vector<8x8xf32>
    %cst_263 = arith.constant dense<0xFF800000> : vector<8xf32>
    %933 = vector.multi_reduction <maximumf>, %932, %cst_263 [1] : vector<8x8xf32> to vector<8xf32>
    %934 = vector.shape_cast %933 : vector<8xf32> to vector<8x1xf32>
    %935 = vector.broadcast %934 : vector<8x1xf32> to vector<8x8xf32>
    %936 = arith.subf %932, %935 : vector<8x8xf32>
    %937 = math.exp %936 : vector<8x8xf32>
    %cst_264 = arith.constant dense<0.000000e+00> : vector<8xf32>
    %938 = vector.multi_reduction <add>, %937, %cst_264 [1] : vector<8x8xf32> to vector<8xf32>
    %939 = vector.shape_cast %938 : vector<8xf32> to vector<8x1xf32>
    %940 = tpu.reciprocal %939 {approx = true} : vector<8x1xf32> -> vector<8x1xf32>
    %941 = vector.broadcast %940 : vector<8x1xf32> to vector<8x8xf32>
    %942 = arith.mulf %937, %941 : vector<8x8xf32>
    %943 = vector.extract_strided_slice %899 {offsets = [0, 16], sizes = [8, 8], strides = [1, 1]} : vector<8x32xf32> to vector<8x8xf32>
    %cst_265 = arith.constant dense<0.000000e+00> : vector<8x8xf32>
    %944 = tpu.matmul %942, %943, %cst_265 {dimension_numbers = #tpu.dot_dimension_numbers<[1], [0], [0], [1], [0, 0, 1, 1], [], []>} : vector<8x8xf32>, vector<8x8xf32>, vector<8x8xf32> -> vector<8x8xf32>
    %945 = vector.extract_strided_slice %897 {offsets = [0, 24], sizes = [8, 8], strides = [1, 1]} : vector<8x32xf32> to vector<8x8xf32>
    %946 = vector.extract_strided_slice %898 {offsets = [0, 24], sizes = [8, 8], strides = [1, 1]} : vector<8x32xf32> to vector<8x8xf32>
    %cst_266 = arith.constant dense<0.000000e+00> : vector<8x8xf32>
    %947 = tpu.matmul %945, %946, %cst_266 {dimension_numbers = #tpu.dot_dimension_numbers<[1], [1], [0], [0], [0, 0, 1, 0], [], []>} : vector<8x8xf32>, vector<8x8xf32>, vector<8x8xf32> -> vector<8x8xf32>
    %cst_267 = arith.constant dense<0xFF800000> : vector<8xf32>
    %948 = vector.multi_reduction <maximumf>, %947, %cst_267 [1] : vector<8x8xf32> to vector<8xf32>
    %949 = vector.shape_cast %948 : vector<8xf32> to vector<8x1xf32>
    %950 = vector.broadcast %949 : vector<8x1xf32> to vector<8x8xf32>
    %951 = arith.subf %947, %950 : vector<8x8xf32>
    %952 = math.exp %951 : vector<8x8xf32>
    %cst_268 = arith.constant dense<0.000000e+00> : vector<8xf32>
    %953 = vector.multi_reduction <add>, %952, %cst_268 [1] : vector<8x8xf32> to vector<8xf32>
    %954 = vector.shape_cast %953 : vector<8xf32> to vector<8x1xf32>
    %955 = tpu.reciprocal %954 {approx = true} : vector<8x1xf32> -> vector<8x1xf32>
    %956 = vector.broadcast %955 : vector<8x1xf32> to vector<8x8xf32>
    %957 = arith.mulf %952, %956 : vector<8x8xf32>
    %958 = vector.extract_strided_slice %899 {offsets = [0, 24], sizes = [8, 8], strides = [1, 1]} : vector<8x32xf32> to vector<8x8xf32>
    %cst_269 = arith.constant dense<0.000000e+00> : vector<8x8xf32>
    %959 = tpu.matmul %957, %958, %cst_269 {dimension_numbers = #tpu.dot_dimension_numbers<[1], [0], [0], [1], [0, 0, 1, 1], [], []>} : vector<8x8xf32>, vector<8x8xf32>, vector<8x8xf32> -> vector<8x8xf32>
    %960 = tpu.concatenate %914, %929, %944, %959 in 1 : vector<8x8xf32>, vector<8x8xf32>, vector<8x8xf32>, vector<8x8xf32> -> vector<8x32xf32>
    %961 = tpu.concatenate %896, %960 in 0 : vector<8x32xf32>, vector<8x32xf32> -> vector<16x32xf32>
    %c608 = arith.constant 608 : index
    %c0_270 = arith.constant 0 : index
    %962 = vector.load %arg2[%c608, %c0_270] : memref<912x128xf32, #tpu.memory_space<vmem>>, vector<32x128xf32>
    %cst_271 = arith.constant dense<0.000000e+00> : vector<16x128xf32>
    %963 = tpu.matmul %961, %962, %cst_271 {dimension_numbers = #tpu.dot_dimension_numbers<[1], [0], [0], [1], [0, 0, 1, 1], [], []>} : vector<16x32xf32>, vector<32x128xf32>, vector<16x128xf32> -> vector<16x128xf32>
    %c894 = arith.constant 894 : index
    %c0_272 = arith.constant 0 : index
    %964 = vector.load %arg2[%c894, %c0_272] : memref<912x128xf32, #tpu.memory_space<vmem>>, vector<1x128xf32>
    %965 = vector.broadcast %964 : vector<1x128xf32> to vector<16x128xf32>
    %966 = arith.addf %963, %965 : vector<16x128xf32>
    %967 = vector.extract_strided_slice %966 {offsets = [0, 0], sizes = [16, 32], strides = [1, 1]} : vector<16x128xf32> to vector<16x32xf32>
    %968 = arith.addf %823, %967 : vector<16x32xf32>
    %cst_273 = arith.constant dense<0.000000e+00> : vector<16xf32>
    %969 = vector.multi_reduction <add>, %968, %cst_273 [1] : vector<16x32xf32> to vector<16xf32>
    %970 = vector.shape_cast %969 : vector<16xf32> to vector<16x1xf32>
    %cst_274 = arith.constant 3.200000e+01 : f32
    %971 = vector.broadcast %cst_274 : f32 to vector<16x1xf32>
    %972 = arith.divf %970, %971 : vector<16x1xf32>
    %973 = vector.broadcast %972 : vector<16x1xf32> to vector<16x32xf32>
    %974 = arith.subf %968, %973 : vector<16x32xf32>
    %975 = arith.mulf %974, %974 : vector<16x32xf32>
    %cst_275 = arith.constant dense<0.000000e+00> : vector<16xf32>
    %976 = vector.multi_reduction <add>, %975, %cst_275 [1] : vector<16x32xf32> to vector<16xf32>
    %977 = vector.shape_cast %976 : vector<16xf32> to vector<16x1xf32>
    %cst_276 = arith.constant 3.200000e+01 : f32
    %978 = vector.broadcast %cst_276 : f32 to vector<16x1xf32>
    %979 = arith.divf %977, %978 : vector<16x1xf32>
    %980 = vector.broadcast %972 : vector<16x1xf32> to vector<16x32xf32>
    %981 = arith.subf %968, %980 : vector<16x32xf32>
    %cst_277 = arith.constant 9.99999974E-6 : f32
    %982 = vector.broadcast %cst_277 : f32 to vector<16x1xf32>
    %983 = arith.addf %979, %982 : vector<16x1xf32>
    %984 = math.rsqrt %983 : vector<16x1xf32>
    %985 = vector.broadcast %984 : vector<16x1xf32> to vector<16x32xf32>
    %986 = arith.mulf %981, %985 : vector<16x32xf32>
    %c900 = arith.constant 900 : index
    %c0_278 = arith.constant 0 : index
    %987 = vector.load %arg2[%c900, %c0_278] : memref<912x128xf32, #tpu.memory_space<vmem>>, vector<1x32xf32>
    %988 = vector.broadcast %987 : vector<1x32xf32> to vector<16x32xf32>
    %989 = arith.mulf %986, %988 : vector<16x32xf32>
    %c901 = arith.constant 901 : index
    %c0_279 = arith.constant 0 : index
    %990 = vector.load %arg2[%c901, %c0_279] : memref<912x128xf32, #tpu.memory_space<vmem>>, vector<1x32xf32>
    %991 = vector.broadcast %990 : vector<1x32xf32> to vector<16x32xf32>
    %992 = arith.addf %989, %991 : vector<16x32xf32>
    %c640 = arith.constant 640 : index
    %c0_280 = arith.constant 0 : index
    %993 = vector.load %arg2[%c640, %c0_280] : memref<912x128xf32, #tpu.memory_space<vmem>>, vector<32x128xf32>
    %cst_281 = arith.constant dense<0.000000e+00> : vector<16x128xf32>
    %994 = tpu.matmul %992, %993, %cst_281 {dimension_numbers = #tpu.dot_dimension_numbers<[1], [0], [0], [1], [0, 0, 1, 1], [], []>} : vector<16x32xf32>, vector<32x128xf32>, vector<16x128xf32> -> vector<16x128xf32>
    %c895 = arith.constant 895 : index
    %c0_282 = arith.constant 0 : index
    %995 = vector.load %arg2[%c895, %c0_282] : memref<912x128xf32, #tpu.memory_space<vmem>>, vector<1x128xf32>
    %996 = vector.broadcast %995 : vector<1x128xf32> to vector<16x128xf32>
    %997 = arith.addf %994, %996 : vector<16x128xf32>
    %998 = vector.extract_strided_slice %997 {offsets = [0, 0], sizes = [16, 32], strides = [1, 1]} : vector<16x128xf32> to vector<16x32xf32>
    %c672 = arith.constant 672 : index
    %c0_283 = arith.constant 0 : index
    %999 = vector.load %arg2[%c672, %c0_283] : memref<912x128xf32, #tpu.memory_space<vmem>>, vector<32x128xf32>
    %cst_284 = arith.constant dense<0.000000e+00> : vector<20x128xf32>
    %1000 = tpu.matmul %440, %999, %cst_284 {dimension_numbers = #tpu.dot_dimension_numbers<[1], [0], [0], [1], [0, 0, 1, 1], [], []>} : vector<20x32xf32>, vector<32x128xf32>, vector<20x128xf32> -> vector<20x128xf32>
    %c896 = arith.constant 896 : index
    %c0_285 = arith.constant 0 : index
    %1001 = vector.load %arg2[%c896, %c0_285] : memref<912x128xf32, #tpu.memory_space<vmem>>, vector<1x128xf32>
    %1002 = vector.broadcast %1001 : vector<1x128xf32> to vector<20x128xf32>
    %1003 = arith.addf %1000, %1002 : vector<20x128xf32>
    %1004 = vector.extract_strided_slice %1003 {offsets = [0, 0], sizes = [20, 64], strides = [1, 1]} : vector<20x128xf32> to vector<20x64xf32>
    %1005 = vector.extract_strided_slice %1004 {offsets = [0, 0], sizes = [20, 32], strides = [1, 1]} : vector<20x64xf32> to vector<20x32xf32>
    %1006 = vector.extract_strided_slice %1004 {offsets = [0, 32], sizes = [20, 32], strides = [1, 1]} : vector<20x64xf32> to vector<20x32xf32>
    %1007 = vector.extract_strided_slice %998 {offsets = [0, 0], sizes = [8, 32], strides = [1, 1]} : vector<16x32xf32> to vector<8x32xf32>
    %1008 = vector.extract_strided_slice %1005 {offsets = [0, 0], sizes = [10, 32], strides = [1, 1]} : vector<20x32xf32> to vector<10x32xf32>
    %1009 = vector.extract_strided_slice %1006 {offsets = [0, 0], sizes = [10, 32], strides = [1, 1]} : vector<20x32xf32> to vector<10x32xf32>
    %1010 = vector.extract_strided_slice %1007 {offsets = [0, 0], sizes = [8, 8], strides = [1, 1]} : vector<8x32xf32> to vector<8x8xf32>
    %1011 = vector.extract_strided_slice %1008 {offsets = [0, 0], sizes = [10, 8], strides = [1, 1]} : vector<10x32xf32> to vector<10x8xf32>
    %cst_286 = arith.constant dense<0.000000e+00> : vector<8x10xf32>
    %1012 = tpu.matmul %1010, %1011, %cst_286 {dimension_numbers = #tpu.dot_dimension_numbers<[1], [1], [0], [0], [0, 0, 1, 0], [], []>} : vector<8x8xf32>, vector<10x8xf32>, vector<8x10xf32> -> vector<8x10xf32>
    %cst_287 = arith.constant dense<0xFF800000> : vector<8xf32>
    %1013 = vector.multi_reduction <maximumf>, %1012, %cst_287 [1] : vector<8x10xf32> to vector<8xf32>
    %1014 = vector.shape_cast %1013 : vector<8xf32> to vector<8x1xf32>
    %1015 = vector.broadcast %1014 : vector<8x1xf32> to vector<8x10xf32>
    %1016 = arith.subf %1012, %1015 : vector<8x10xf32>
    %1017 = math.exp %1016 : vector<8x10xf32>
    %cst_288 = arith.constant dense<0.000000e+00> : vector<8xf32>
    %1018 = vector.multi_reduction <add>, %1017, %cst_288 [1] : vector<8x10xf32> to vector<8xf32>
    %1019 = vector.shape_cast %1018 : vector<8xf32> to vector<8x1xf32>
    %1020 = tpu.reciprocal %1019 {approx = true} : vector<8x1xf32> -> vector<8x1xf32>
    %1021 = vector.broadcast %1020 : vector<8x1xf32> to vector<8x10xf32>
    %1022 = arith.mulf %1017, %1021 : vector<8x10xf32>
    %1023 = vector.extract_strided_slice %1009 {offsets = [0, 0], sizes = [10, 8], strides = [1, 1]} : vector<10x32xf32> to vector<10x8xf32>
    %cst_289 = arith.constant dense<0.000000e+00> : vector<8x8xf32>
    %1024 = tpu.matmul %1022, %1023, %cst_289 {dimension_numbers = #tpu.dot_dimension_numbers<[1], [0], [0], [1], [0, 0, 1, 1], [], []>} : vector<8x10xf32>, vector<10x8xf32>, vector<8x8xf32> -> vector<8x8xf32>
    %1025 = vector.extract_strided_slice %1007 {offsets = [0, 8], sizes = [8, 8], strides = [1, 1]} : vector<8x32xf32> to vector<8x8xf32>
    %1026 = vector.extract_strided_slice %1008 {offsets = [0, 8], sizes = [10, 8], strides = [1, 1]} : vector<10x32xf32> to vector<10x8xf32>
    %cst_290 = arith.constant dense<0.000000e+00> : vector<8x10xf32>
    %1027 = tpu.matmul %1025, %1026, %cst_290 {dimension_numbers = #tpu.dot_dimension_numbers<[1], [1], [0], [0], [0, 0, 1, 0], [], []>} : vector<8x8xf32>, vector<10x8xf32>, vector<8x10xf32> -> vector<8x10xf32>
    %cst_291 = arith.constant dense<0xFF800000> : vector<8xf32>
    %1028 = vector.multi_reduction <maximumf>, %1027, %cst_291 [1] : vector<8x10xf32> to vector<8xf32>
    %1029 = vector.shape_cast %1028 : vector<8xf32> to vector<8x1xf32>
    %1030 = vector.broadcast %1029 : vector<8x1xf32> to vector<8x10xf32>
    %1031 = arith.subf %1027, %1030 : vector<8x10xf32>
    %1032 = math.exp %1031 : vector<8x10xf32>
    %cst_292 = arith.constant dense<0.000000e+00> : vector<8xf32>
    %1033 = vector.multi_reduction <add>, %1032, %cst_292 [1] : vector<8x10xf32> to vector<8xf32>
    %1034 = vector.shape_cast %1033 : vector<8xf32> to vector<8x1xf32>
    %1035 = tpu.reciprocal %1034 {approx = true} : vector<8x1xf32> -> vector<8x1xf32>
    %1036 = vector.broadcast %1035 : vector<8x1xf32> to vector<8x10xf32>
    %1037 = arith.mulf %1032, %1036 : vector<8x10xf32>
    %1038 = vector.extract_strided_slice %1009 {offsets = [0, 8], sizes = [10, 8], strides = [1, 1]} : vector<10x32xf32> to vector<10x8xf32>
    %cst_293 = arith.constant dense<0.000000e+00> : vector<8x8xf32>
    %1039 = tpu.matmul %1037, %1038, %cst_293 {dimension_numbers = #tpu.dot_dimension_numbers<[1], [0], [0], [1], [0, 0, 1, 1], [], []>} : vector<8x10xf32>, vector<10x8xf32>, vector<8x8xf32> -> vector<8x8xf32>
    %1040 = vector.extract_strided_slice %1007 {offsets = [0, 16], sizes = [8, 8], strides = [1, 1]} : vector<8x32xf32> to vector<8x8xf32>
    %1041 = vector.extract_strided_slice %1008 {offsets = [0, 16], sizes = [10, 8], strides = [1, 1]} : vector<10x32xf32> to vector<10x8xf32>
    %cst_294 = arith.constant dense<0.000000e+00> : vector<8x10xf32>
    %1042 = tpu.matmul %1040, %1041, %cst_294 {dimension_numbers = #tpu.dot_dimension_numbers<[1], [1], [0], [0], [0, 0, 1, 0], [], []>} : vector<8x8xf32>, vector<10x8xf32>, vector<8x10xf32> -> vector<8x10xf32>
    %cst_295 = arith.constant dense<0xFF800000> : vector<8xf32>
    %1043 = vector.multi_reduction <maximumf>, %1042, %cst_295 [1] : vector<8x10xf32> to vector<8xf32>
    %1044 = vector.shape_cast %1043 : vector<8xf32> to vector<8x1xf32>
    %1045 = vector.broadcast %1044 : vector<8x1xf32> to vector<8x10xf32>
    %1046 = arith.subf %1042, %1045 : vector<8x10xf32>
    %1047 = math.exp %1046 : vector<8x10xf32>
    %cst_296 = arith.constant dense<0.000000e+00> : vector<8xf32>
    %1048 = vector.multi_reduction <add>, %1047, %cst_296 [1] : vector<8x10xf32> to vector<8xf32>
    %1049 = vector.shape_cast %1048 : vector<8xf32> to vector<8x1xf32>
    %1050 = tpu.reciprocal %1049 {approx = true} : vector<8x1xf32> -> vector<8x1xf32>
    %1051 = vector.broadcast %1050 : vector<8x1xf32> to vector<8x10xf32>
    %1052 = arith.mulf %1047, %1051 : vector<8x10xf32>
    %1053 = vector.extract_strided_slice %1009 {offsets = [0, 16], sizes = [10, 8], strides = [1, 1]} : vector<10x32xf32> to vector<10x8xf32>
    %cst_297 = arith.constant dense<0.000000e+00> : vector<8x8xf32>
    %1054 = tpu.matmul %1052, %1053, %cst_297 {dimension_numbers = #tpu.dot_dimension_numbers<[1], [0], [0], [1], [0, 0, 1, 1], [], []>} : vector<8x10xf32>, vector<10x8xf32>, vector<8x8xf32> -> vector<8x8xf32>
    %1055 = vector.extract_strided_slice %1007 {offsets = [0, 24], sizes = [8, 8], strides = [1, 1]} : vector<8x32xf32> to vector<8x8xf32>
    %1056 = vector.extract_strided_slice %1008 {offsets = [0, 24], sizes = [10, 8], strides = [1, 1]} : vector<10x32xf32> to vector<10x8xf32>
    %cst_298 = arith.constant dense<0.000000e+00> : vector<8x10xf32>
    %1057 = tpu.matmul %1055, %1056, %cst_298 {dimension_numbers = #tpu.dot_dimension_numbers<[1], [1], [0], [0], [0, 0, 1, 0], [], []>} : vector<8x8xf32>, vector<10x8xf32>, vector<8x10xf32> -> vector<8x10xf32>
    %cst_299 = arith.constant dense<0xFF800000> : vector<8xf32>
    %1058 = vector.multi_reduction <maximumf>, %1057, %cst_299 [1] : vector<8x10xf32> to vector<8xf32>
    %1059 = vector.shape_cast %1058 : vector<8xf32> to vector<8x1xf32>
    %1060 = vector.broadcast %1059 : vector<8x1xf32> to vector<8x10xf32>
    %1061 = arith.subf %1057, %1060 : vector<8x10xf32>
    %1062 = math.exp %1061 : vector<8x10xf32>
    %cst_300 = arith.constant dense<0.000000e+00> : vector<8xf32>
    %1063 = vector.multi_reduction <add>, %1062, %cst_300 [1] : vector<8x10xf32> to vector<8xf32>
    %1064 = vector.shape_cast %1063 : vector<8xf32> to vector<8x1xf32>
    %1065 = tpu.reciprocal %1064 {approx = true} : vector<8x1xf32> -> vector<8x1xf32>
    %1066 = vector.broadcast %1065 : vector<8x1xf32> to vector<8x10xf32>
    %1067 = arith.mulf %1062, %1066 : vector<8x10xf32>
    %1068 = vector.extract_strided_slice %1009 {offsets = [0, 24], sizes = [10, 8], strides = [1, 1]} : vector<10x32xf32> to vector<10x8xf32>
    %cst_301 = arith.constant dense<0.000000e+00> : vector<8x8xf32>
    %1069 = tpu.matmul %1067, %1068, %cst_301 {dimension_numbers = #tpu.dot_dimension_numbers<[1], [0], [0], [1], [0, 0, 1, 1], [], []>} : vector<8x10xf32>, vector<10x8xf32>, vector<8x8xf32> -> vector<8x8xf32>
    %1070 = tpu.concatenate %1024, %1039, %1054, %1069 in 1 : vector<8x8xf32>, vector<8x8xf32>, vector<8x8xf32>, vector<8x8xf32> -> vector<8x32xf32>
    %1071 = vector.extract_strided_slice %998 {offsets = [8, 0], sizes = [8, 32], strides = [1, 1]} : vector<16x32xf32> to vector<8x32xf32>
    %1072 = vector.extract_strided_slice %1005 {offsets = [10, 0], sizes = [10, 32], strides = [1, 1]} : vector<20x32xf32> to vector<10x32xf32>
    %1073 = vector.extract_strided_slice %1006 {offsets = [10, 0], sizes = [10, 32], strides = [1, 1]} : vector<20x32xf32> to vector<10x32xf32>
    %1074 = vector.extract_strided_slice %1071 {offsets = [0, 0], sizes = [8, 8], strides = [1, 1]} : vector<8x32xf32> to vector<8x8xf32>
    %1075 = vector.extract_strided_slice %1072 {offsets = [0, 0], sizes = [10, 8], strides = [1, 1]} : vector<10x32xf32> to vector<10x8xf32>
    %cst_302 = arith.constant dense<0.000000e+00> : vector<8x10xf32>
    %1076 = tpu.matmul %1074, %1075, %cst_302 {dimension_numbers = #tpu.dot_dimension_numbers<[1], [1], [0], [0], [0, 0, 1, 0], [], []>} : vector<8x8xf32>, vector<10x8xf32>, vector<8x10xf32> -> vector<8x10xf32>
    %cst_303 = arith.constant dense<0xFF800000> : vector<8xf32>
    %1077 = vector.multi_reduction <maximumf>, %1076, %cst_303 [1] : vector<8x10xf32> to vector<8xf32>
    %1078 = vector.shape_cast %1077 : vector<8xf32> to vector<8x1xf32>
    %1079 = vector.broadcast %1078 : vector<8x1xf32> to vector<8x10xf32>
    %1080 = arith.subf %1076, %1079 : vector<8x10xf32>
    %1081 = math.exp %1080 : vector<8x10xf32>
    %cst_304 = arith.constant dense<0.000000e+00> : vector<8xf32>
    %1082 = vector.multi_reduction <add>, %1081, %cst_304 [1] : vector<8x10xf32> to vector<8xf32>
    %1083 = vector.shape_cast %1082 : vector<8xf32> to vector<8x1xf32>
    %1084 = tpu.reciprocal %1083 {approx = true} : vector<8x1xf32> -> vector<8x1xf32>
    %1085 = vector.broadcast %1084 : vector<8x1xf32> to vector<8x10xf32>
    %1086 = arith.mulf %1081, %1085 : vector<8x10xf32>
    %1087 = vector.extract_strided_slice %1073 {offsets = [0, 0], sizes = [10, 8], strides = [1, 1]} : vector<10x32xf32> to vector<10x8xf32>
    %cst_305 = arith.constant dense<0.000000e+00> : vector<8x8xf32>
    %1088 = tpu.matmul %1086, %1087, %cst_305 {dimension_numbers = #tpu.dot_dimension_numbers<[1], [0], [0], [1], [0, 0, 1, 1], [], []>} : vector<8x10xf32>, vector<10x8xf32>, vector<8x8xf32> -> vector<8x8xf32>
    %1089 = vector.extract_strided_slice %1071 {offsets = [0, 8], sizes = [8, 8], strides = [1, 1]} : vector<8x32xf32> to vector<8x8xf32>
    %1090 = vector.extract_strided_slice %1072 {offsets = [0, 8], sizes = [10, 8], strides = [1, 1]} : vector<10x32xf32> to vector<10x8xf32>
    %cst_306 = arith.constant dense<0.000000e+00> : vector<8x10xf32>
    %1091 = tpu.matmul %1089, %1090, %cst_306 {dimension_numbers = #tpu.dot_dimension_numbers<[1], [1], [0], [0], [0, 0, 1, 0], [], []>} : vector<8x8xf32>, vector<10x8xf32>, vector<8x10xf32> -> vector<8x10xf32>
    %cst_307 = arith.constant dense<0xFF800000> : vector<8xf32>
    %1092 = vector.multi_reduction <maximumf>, %1091, %cst_307 [1] : vector<8x10xf32> to vector<8xf32>
    %1093 = vector.shape_cast %1092 : vector<8xf32> to vector<8x1xf32>
    %1094 = vector.broadcast %1093 : vector<8x1xf32> to vector<8x10xf32>
    %1095 = arith.subf %1091, %1094 : vector<8x10xf32>
    %1096 = math.exp %1095 : vector<8x10xf32>
    %cst_308 = arith.constant dense<0.000000e+00> : vector<8xf32>
    %1097 = vector.multi_reduction <add>, %1096, %cst_308 [1] : vector<8x10xf32> to vector<8xf32>
    %1098 = vector.shape_cast %1097 : vector<8xf32> to vector<8x1xf32>
    %1099 = tpu.reciprocal %1098 {approx = true} : vector<8x1xf32> -> vector<8x1xf32>
    %1100 = vector.broadcast %1099 : vector<8x1xf32> to vector<8x10xf32>
    %1101 = arith.mulf %1096, %1100 : vector<8x10xf32>
    %1102 = vector.extract_strided_slice %1073 {offsets = [0, 8], sizes = [10, 8], strides = [1, 1]} : vector<10x32xf32> to vector<10x8xf32>
    %cst_309 = arith.constant dense<0.000000e+00> : vector<8x8xf32>
    %1103 = tpu.matmul %1101, %1102, %cst_309 {dimension_numbers = #tpu.dot_dimension_numbers<[1], [0], [0], [1], [0, 0, 1, 1], [], []>} : vector<8x10xf32>, vector<10x8xf32>, vector<8x8xf32> -> vector<8x8xf32>
    %1104 = vector.extract_strided_slice %1071 {offsets = [0, 16], sizes = [8, 8], strides = [1, 1]} : vector<8x32xf32> to vector<8x8xf32>
    %1105 = vector.extract_strided_slice %1072 {offsets = [0, 16], sizes = [10, 8], strides = [1, 1]} : vector<10x32xf32> to vector<10x8xf32>
    %cst_310 = arith.constant dense<0.000000e+00> : vector<8x10xf32>
    %1106 = tpu.matmul %1104, %1105, %cst_310 {dimension_numbers = #tpu.dot_dimension_numbers<[1], [1], [0], [0], [0, 0, 1, 0], [], []>} : vector<8x8xf32>, vector<10x8xf32>, vector<8x10xf32> -> vector<8x10xf32>
    %cst_311 = arith.constant dense<0xFF800000> : vector<8xf32>
    %1107 = vector.multi_reduction <maximumf>, %1106, %cst_311 [1] : vector<8x10xf32> to vector<8xf32>
    %1108 = vector.shape_cast %1107 : vector<8xf32> to vector<8x1xf32>
    %1109 = vector.broadcast %1108 : vector<8x1xf32> to vector<8x10xf32>
    %1110 = arith.subf %1106, %1109 : vector<8x10xf32>
    %1111 = math.exp %1110 : vector<8x10xf32>
    %cst_312 = arith.constant dense<0.000000e+00> : vector<8xf32>
    %1112 = vector.multi_reduction <add>, %1111, %cst_312 [1] : vector<8x10xf32> to vector<8xf32>
    %1113 = vector.shape_cast %1112 : vector<8xf32> to vector<8x1xf32>
    %1114 = tpu.reciprocal %1113 {approx = true} : vector<8x1xf32> -> vector<8x1xf32>
    %1115 = vector.broadcast %1114 : vector<8x1xf32> to vector<8x10xf32>
    %1116 = arith.mulf %1111, %1115 : vector<8x10xf32>
    %1117 = vector.extract_strided_slice %1073 {offsets = [0, 16], sizes = [10, 8], strides = [1, 1]} : vector<10x32xf32> to vector<10x8xf32>
    %cst_313 = arith.constant dense<0.000000e+00> : vector<8x8xf32>
    %1118 = tpu.matmul %1116, %1117, %cst_313 {dimension_numbers = #tpu.dot_dimension_numbers<[1], [0], [0], [1], [0, 0, 1, 1], [], []>} : vector<8x10xf32>, vector<10x8xf32>, vector<8x8xf32> -> vector<8x8xf32>
    %1119 = vector.extract_strided_slice %1071 {offsets = [0, 24], sizes = [8, 8], strides = [1, 1]} : vector<8x32xf32> to vector<8x8xf32>
    %1120 = vector.extract_strided_slice %1072 {offsets = [0, 24], sizes = [10, 8], strides = [1, 1]} : vector<10x32xf32> to vector<10x8xf32>
    %cst_314 = arith.constant dense<0.000000e+00> : vector<8x10xf32>
    %1121 = tpu.matmul %1119, %1120, %cst_314 {dimension_numbers = #tpu.dot_dimension_numbers<[1], [1], [0], [0], [0, 0, 1, 0], [], []>} : vector<8x8xf32>, vector<10x8xf32>, vector<8x10xf32> -> vector<8x10xf32>
    %cst_315 = arith.constant dense<0xFF800000> : vector<8xf32>
    %1122 = vector.multi_reduction <maximumf>, %1121, %cst_315 [1] : vector<8x10xf32> to vector<8xf32>
    %1123 = vector.shape_cast %1122 : vector<8xf32> to vector<8x1xf32>
    %1124 = vector.broadcast %1123 : vector<8x1xf32> to vector<8x10xf32>
    %1125 = arith.subf %1121, %1124 : vector<8x10xf32>
    %1126 = math.exp %1125 : vector<8x10xf32>
    %cst_316 = arith.constant dense<0.000000e+00> : vector<8xf32>
    %1127 = vector.multi_reduction <add>, %1126, %cst_316 [1] : vector<8x10xf32> to vector<8xf32>
    %1128 = vector.shape_cast %1127 : vector<8xf32> to vector<8x1xf32>
    %1129 = tpu.reciprocal %1128 {approx = true} : vector<8x1xf32> -> vector<8x1xf32>
    %1130 = vector.broadcast %1129 : vector<8x1xf32> to vector<8x10xf32>
    %1131 = arith.mulf %1126, %1130 : vector<8x10xf32>
    %1132 = vector.extract_strided_slice %1073 {offsets = [0, 24], sizes = [10, 8], strides = [1, 1]} : vector<10x32xf32> to vector<10x8xf32>
    %cst_317 = arith.constant dense<0.000000e+00> : vector<8x8xf32>
    %1133 = tpu.matmul %1131, %1132, %cst_317 {dimension_numbers = #tpu.dot_dimension_numbers<[1], [0], [0], [1], [0, 0, 1, 1], [], []>} : vector<8x10xf32>, vector<10x8xf32>, vector<8x8xf32> -> vector<8x8xf32>
    %1134 = tpu.concatenate %1088, %1103, %1118, %1133 in 1 : vector<8x8xf32>, vector<8x8xf32>, vector<8x8xf32>, vector<8x8xf32> -> vector<8x32xf32>
    %1135 = tpu.concatenate %1070, %1134 in 0 : vector<8x32xf32>, vector<8x32xf32> -> vector<16x32xf32>
    %c704 = arith.constant 704 : index
    %c0_318 = arith.constant 0 : index
    %1136 = vector.load %arg2[%c704, %c0_318] : memref<912x128xf32, #tpu.memory_space<vmem>>, vector<32x128xf32>
    %cst_319 = arith.constant dense<0.000000e+00> : vector<16x128xf32>
    %1137 = tpu.matmul %1135, %1136, %cst_319 {dimension_numbers = #tpu.dot_dimension_numbers<[1], [0], [0], [1], [0, 0, 1, 1], [], []>} : vector<16x32xf32>, vector<32x128xf32>, vector<16x128xf32> -> vector<16x128xf32>
    %c897 = arith.constant 897 : index
    %c0_320 = arith.constant 0 : index
    %1138 = vector.load %arg2[%c897, %c0_320] : memref<912x128xf32, #tpu.memory_space<vmem>>, vector<1x128xf32>
    %1139 = vector.broadcast %1138 : vector<1x128xf32> to vector<16x128xf32>
    %1140 = arith.addf %1137, %1139 : vector<16x128xf32>
    %1141 = vector.extract_strided_slice %1140 {offsets = [0, 0], sizes = [16, 32], strides = [1, 1]} : vector<16x128xf32> to vector<16x32xf32>
    %1142 = arith.addf %992, %1141 : vector<16x32xf32>
    %cst_321 = arith.constant dense<0.000000e+00> : vector<16xf32>
    %1143 = vector.multi_reduction <add>, %1142, %cst_321 [1] : vector<16x32xf32> to vector<16xf32>
    %1144 = vector.shape_cast %1143 : vector<16xf32> to vector<16x1xf32>
    %cst_322 = arith.constant 3.200000e+01 : f32
    %1145 = vector.broadcast %cst_322 : f32 to vector<16x1xf32>
    %1146 = arith.divf %1144, %1145 : vector<16x1xf32>
    %1147 = vector.broadcast %1146 : vector<16x1xf32> to vector<16x32xf32>
    %1148 = arith.subf %1142, %1147 : vector<16x32xf32>
    %1149 = arith.mulf %1148, %1148 : vector<16x32xf32>
    %cst_323 = arith.constant dense<0.000000e+00> : vector<16xf32>
    %1150 = vector.multi_reduction <add>, %1149, %cst_323 [1] : vector<16x32xf32> to vector<16xf32>
    %1151 = vector.shape_cast %1150 : vector<16xf32> to vector<16x1xf32>
    %cst_324 = arith.constant 3.200000e+01 : f32
    %1152 = vector.broadcast %cst_324 : f32 to vector<16x1xf32>
    %1153 = arith.divf %1151, %1152 : vector<16x1xf32>
    %1154 = vector.broadcast %1146 : vector<16x1xf32> to vector<16x32xf32>
    %1155 = arith.subf %1142, %1154 : vector<16x32xf32>
    %cst_325 = arith.constant 9.99999974E-6 : f32
    %1156 = vector.broadcast %cst_325 : f32 to vector<16x1xf32>
    %1157 = arith.addf %1153, %1156 : vector<16x1xf32>
    %1158 = math.rsqrt %1157 : vector<16x1xf32>
    %1159 = vector.broadcast %1158 : vector<16x1xf32> to vector<16x32xf32>
    %1160 = arith.mulf %1155, %1159 : vector<16x32xf32>
    %c902 = arith.constant 902 : index
    %c0_326 = arith.constant 0 : index
    %1161 = vector.load %arg2[%c902, %c0_326] : memref<912x128xf32, #tpu.memory_space<vmem>>, vector<1x32xf32>
    %1162 = vector.broadcast %1161 : vector<1x32xf32> to vector<16x32xf32>
    %1163 = arith.mulf %1160, %1162 : vector<16x32xf32>
    %c903 = arith.constant 903 : index
    %c0_327 = arith.constant 0 : index
    %1164 = vector.load %arg2[%c903, %c0_327] : memref<912x128xf32, #tpu.memory_space<vmem>>, vector<1x32xf32>
    %1165 = vector.broadcast %1164 : vector<1x32xf32> to vector<16x32xf32>
    %1166 = arith.addf %1163, %1165 : vector<16x32xf32>
    %c736 = arith.constant 736 : index
    %c0_328 = arith.constant 0 : index
    %1167 = vector.load %arg2[%c736, %c0_328] : memref<912x128xf32, #tpu.memory_space<vmem>>, vector<32x128xf32>
    %cst_329 = arith.constant dense<0.000000e+00> : vector<16x128xf32>
    %1168 = tpu.matmul %1166, %1167, %cst_329 {dimension_numbers = #tpu.dot_dimension_numbers<[1], [0], [0], [1], [0, 0, 1, 1], [], []>} : vector<16x32xf32>, vector<32x128xf32>, vector<16x128xf32> -> vector<16x128xf32>
    %c898 = arith.constant 898 : index
    %c0_330 = arith.constant 0 : index
    %1169 = vector.load %arg2[%c898, %c0_330] : memref<912x128xf32, #tpu.memory_space<vmem>>, vector<1x128xf32>
    %1170 = vector.broadcast %1169 : vector<1x128xf32> to vector<16x128xf32>
    %1171 = arith.addf %1168, %1170 : vector<16x128xf32>
    %1172 = vector.extract_strided_slice %1171 {offsets = [0, 0], sizes = [16, 64], strides = [1, 1]} : vector<16x128xf32> to vector<16x64xf32>
    %cst_331 = arith.constant 0.000000e+00 : f32
    %1173 = vector.broadcast %cst_331 : f32 to vector<16x64xf32>
    %1174 = arith.maximumf %1172, %1173 : vector<16x64xf32>
    %c768 = arith.constant 768 : index
    %c0_332 = arith.constant 0 : index
    %1175 = vector.load %arg2[%c768, %c0_332] : memref<912x128xf32, #tpu.memory_space<vmem>>, vector<64x128xf32>
    %cst_333 = arith.constant dense<0.000000e+00> : vector<16x128xf32>
    %1176 = tpu.matmul %1174, %1175, %cst_333 {dimension_numbers = #tpu.dot_dimension_numbers<[1], [0], [0], [1], [0, 0, 1, 1], [], []>} : vector<16x64xf32>, vector<64x128xf32>, vector<16x128xf32> -> vector<16x128xf32>
    %c899 = arith.constant 899 : index
    %c0_334 = arith.constant 0 : index
    %1177 = vector.load %arg2[%c899, %c0_334] : memref<912x128xf32, #tpu.memory_space<vmem>>, vector<1x128xf32>
    %1178 = vector.broadcast %1177 : vector<1x128xf32> to vector<16x128xf32>
    %1179 = arith.addf %1176, %1178 : vector<16x128xf32>
    %1180 = vector.extract_strided_slice %1179 {offsets = [0, 0], sizes = [16, 32], strides = [1, 1]} : vector<16x128xf32> to vector<16x32xf32>
    %1181 = arith.addf %1166, %1180 : vector<16x32xf32>
    %cst_335 = arith.constant dense<0.000000e+00> : vector<16xf32>
    %1182 = vector.multi_reduction <add>, %1181, %cst_335 [1] : vector<16x32xf32> to vector<16xf32>
    %1183 = vector.shape_cast %1182 : vector<16xf32> to vector<16x1xf32>
    %cst_336 = arith.constant 3.200000e+01 : f32
    %1184 = vector.broadcast %cst_336 : f32 to vector<16x1xf32>
    %1185 = arith.divf %1183, %1184 : vector<16x1xf32>
    %1186 = vector.broadcast %1185 : vector<16x1xf32> to vector<16x32xf32>
    %1187 = arith.subf %1181, %1186 : vector<16x32xf32>
    %1188 = arith.mulf %1187, %1187 : vector<16x32xf32>
    %cst_337 = arith.constant dense<0.000000e+00> : vector<16xf32>
    %1189 = vector.multi_reduction <add>, %1188, %cst_337 [1] : vector<16x32xf32> to vector<16xf32>
    %1190 = vector.shape_cast %1189 : vector<16xf32> to vector<16x1xf32>
    %cst_338 = arith.constant 3.200000e+01 : f32
    %1191 = vector.broadcast %cst_338 : f32 to vector<16x1xf32>
    %1192 = arith.divf %1190, %1191 : vector<16x1xf32>
    %1193 = vector.broadcast %1185 : vector<16x1xf32> to vector<16x32xf32>
    %1194 = arith.subf %1181, %1193 : vector<16x32xf32>
    %cst_339 = arith.constant 9.99999974E-6 : f32
    %1195 = vector.broadcast %cst_339 : f32 to vector<16x1xf32>
    %1196 = arith.addf %1192, %1195 : vector<16x1xf32>
    %1197 = math.rsqrt %1196 : vector<16x1xf32>
    %1198 = vector.broadcast %1197 : vector<16x1xf32> to vector<16x32xf32>
    %1199 = arith.mulf %1194, %1198 : vector<16x32xf32>
    %c904 = arith.constant 904 : index
    %c0_340 = arith.constant 0 : index
    %1200 = vector.load %arg2[%c904, %c0_340] : memref<912x128xf32, #tpu.memory_space<vmem>>, vector<1x32xf32>
    %1201 = vector.broadcast %1200 : vector<1x32xf32> to vector<16x32xf32>
    %1202 = arith.mulf %1199, %1201 : vector<16x32xf32>
    %c905 = arith.constant 905 : index
    %c0_341 = arith.constant 0 : index
    %1203 = vector.load %arg2[%c905, %c0_341] : memref<912x128xf32, #tpu.memory_space<vmem>>, vector<1x32xf32>
    %1204 = vector.broadcast %1203 : vector<1x32xf32> to vector<16x32xf32>
    %1205 = arith.addf %1202, %1204 : vector<16x32xf32>
    %cst_342 = arith.constant dense<0.000000e+00> : vector<16xf32>
    %1206 = vector.multi_reduction <add>, %1205, %cst_342 [1] : vector<16x32xf32> to vector<16xf32>
    %1207 = vector.shape_cast %1206 : vector<16xf32> to vector<16x1xf32>
    %cst_343 = arith.constant 3.200000e+01 : f32
    %1208 = vector.broadcast %cst_343 : f32 to vector<16x1xf32>
    %1209 = arith.divf %1207, %1208 : vector<16x1xf32>
    %1210 = vector.broadcast %1209 : vector<16x1xf32> to vector<16x32xf32>
    %1211 = arith.subf %1205, %1210 : vector<16x32xf32>
    %1212 = arith.mulf %1211, %1211 : vector<16x32xf32>
    %cst_344 = arith.constant dense<0.000000e+00> : vector<16xf32>
    %1213 = vector.multi_reduction <add>, %1212, %cst_344 [1] : vector<16x32xf32> to vector<16xf32>
    %1214 = vector.shape_cast %1213 : vector<16xf32> to vector<16x1xf32>
    %cst_345 = arith.constant 3.200000e+01 : f32
    %1215 = vector.broadcast %cst_345 : f32 to vector<16x1xf32>
    %1216 = arith.divf %1214, %1215 : vector<16x1xf32>
    %1217 = vector.broadcast %1209 : vector<16x1xf32> to vector<16x32xf32>
    %1218 = arith.subf %1205, %1217 : vector<16x32xf32>
    %cst_346 = arith.constant 9.99999974E-6 : f32
    %1219 = vector.broadcast %cst_346 : f32 to vector<16x1xf32>
    %1220 = arith.addf %1216, %1219 : vector<16x1xf32>
    %1221 = math.rsqrt %1220 : vector<16x1xf32>
    %1222 = vector.broadcast %1221 : vector<16x1xf32> to vector<16x32xf32>
    %1223 = arith.mulf %1218, %1222 : vector<16x32xf32>
    %c908 = arith.constant 908 : index
    %c0_347 = arith.constant 0 : index
    %1224 = vector.load %arg2[%c908, %c0_347] : memref<912x128xf32, #tpu.memory_space<vmem>>, vector<1x32xf32>
    %1225 = vector.broadcast %1224 : vector<1x32xf32> to vector<16x32xf32>
    %1226 = arith.mulf %1223, %1225 : vector<16x32xf32>
    %c909 = arith.constant 909 : index
    %c0_348 = arith.constant 0 : index
    %1227 = vector.load %arg2[%c909, %c0_348] : memref<912x128xf32, #tpu.memory_space<vmem>>, vector<1x32xf32>
    %1228 = vector.broadcast %1227 : vector<1x32xf32> to vector<16x32xf32>
    %1229 = arith.addf %1226, %1228 : vector<16x32xf32>
    %c832 = arith.constant 832 : index
    %c0_349 = arith.constant 0 : index
    %1230 = vector.load %arg2[%c832, %c0_349] : memref<912x128xf32, #tpu.memory_space<vmem>>, vector<32x128xf32>
    %cst_350 = arith.constant dense<0.000000e+00> : vector<16x128xf32>
    %1231 = tpu.matmul %1229, %1230, %cst_350 {dimension_numbers = #tpu.dot_dimension_numbers<[1], [0], [0], [1], [0, 0, 1, 1], [], []>} : vector<16x32xf32>, vector<32x128xf32>, vector<16x128xf32> -> vector<16x128xf32>
    %c910 = arith.constant 910 : index
    %c0_351 = arith.constant 0 : index
    %1232 = vector.load %arg2[%c910, %c0_351] : memref<912x128xf32, #tpu.memory_space<vmem>>, vector<1x128xf32>
    %1233 = vector.broadcast %1232 : vector<1x128xf32> to vector<16x128xf32>
    %1234 = arith.addf %1231, %1233 : vector<16x128xf32>
    %c0_352 = arith.constant 0 : index
    %c0_353 = arith.constant 0 : index
    %1235 = vector.load %arg3[%c0_352, %c0_353] : memref<16x128xf32, #tpu.memory_space<vmem>>, vector<16x128xf32>
    tpu.vector_store %arg3[%c0_352, %c0_353], %1234 {strides = array<i32>} : memref<16x128xf32, #tpu.memory_space<vmem>>, vector<16x128xf32>,
    return
  }
}

</mosaic_0001>

<bundles_post_ra>
// kernel: time_series_transformer_forward.1
= control target key start
LH: loop header
LB: loop body
LE: loop exit
PB: predicated region body
PF: predicated region fallthrough
CT: control target
= control target key end

     0   :  { %8 = vsyncpa [#allocation3], 0  ;;  %s6419_s15 = smov [#allocation2]   ;;  %s6420_s17 = smov 128   ;;  %s8134_s0 = inlined_call_operand.vmem [shape: f32[20,32], index: 0, kind: input, shape index: {}]   ;;  %s8135_s1 = inlined_call_operand.vmem [shape: f32[16,32], index: 1, kind: input, shape index: {}]   ;;  %s8136_s2 = inlined_call_operand.hbm [shape: f32[912,128], index: 2, kind: input, shape index: {}]   ;;  %s8137_s3 = inlined_call_operand.vmem [shape: f32[16,128], index: 3, kind: output, shape index: {}]  }
   0x1   :  { %s17_s14 = sshll.u32 %s8136_s2, 4  ;;  %s19_s16 = sshll.u32 %s6419_s15, 4  ;;  %s18_s14 = int_to_ptr.hbm [resolvable:$true] %s17_s14  ;;  %s20_s16 = int_to_ptr.vmem [resolvable:$true] %s19_s16 }
   0x2   :  { %s6421_s18 = smov 8  }
   0x3   :  { %25 = dma.hbm_to_vmem [thread:$0]  %s18_s14, 14592, %s20_s16, [#allocation3], %s6420_s17, %s6420_s17, %s6421_s18  }
   0x4   :  { %6417 = dma.done.wait [#allocation3], 14592  }
   0x5   :  { %6418 = vsyncadd [#allocation3], 4294952704  ;;  %v36_v0 = vld [vmem:[#allocation2 + $0x18] sm:$0xff]  ;;  %v35_v1 = vld [vmem:[#allocation2 + $0x10] sm:$0xff]  ;;  %vm39_vm0 = vcmask 261120   ;;  %s6422_s24 = smov 120  }
   0x6   :  { %61 = vmatpush.msra.mxu0 %v36_v0  ;;  %v34_v2 = vld [vmem:[#allocation2 + $0x8] sm:$0xff]  ;;  %v33_v3 = vld [vmem:[#allocation2] sm:$0xff]  ;;  %v6474_v6 = vld [vmem:[%s8134_s0 + $0x10] sm:$0xf]  ;;  %s6423_s25 = smov 88   ;;  %s6424_s26 = smov 96  }
   0x7   :  { %v30_v4 = vld [vmem:[%s8134_s0] sm:$0xff]  ;;  %v6467_v5 = vld [vmem:[%s8134_s0 + $0x8] sm:$0xff]  ;;  %s6425_s27 = smov 80   ;;  %s6426_s28 = smov 104   ;;  %vm498_vm1 = vcmask 1045504   ;;  %vm81_vm2 = vcmask 64512  }
   0x8   :  { %62 = vmatpush.msra.mxu0 %v35_v1  ;;  %v6028_v7 = vld [vmem:[#allocation2 + $0x360] ss:$0 sm:$0xff]  ;;  %s6427_s29 = smov 112   ;;  %s6428_s30 = smov 72   ;;  %vm148_vm3 = vcmask 1041408   ;;  %vm113_vm4 = vcmask 80896  }
   0x9   :  { %s6429_s4 = smov 48   ;;  %s6430_s5 = smov 64   ;;  %vm117_vm5 = vcmask 74752   ;;  %vm491_vm6 = vcmask 130048   ;;  %vm494_vm7 = vcmask 195584   ;;  %vm972_vm8 = vcmask 257024  }
   0xa   :  { %63 = vmatpush.msra.mxu0 %v34_v2  ;;  %s6431_s6 = smov 40   ;;  %s6432_s7 = smov 56  }
   0xb   :  { %s6433_s8 = smov 16   ;;  %s6434_s9 = smov 24  }
   0xc   :  { %64 = vmatpush.msra.mxu0 %v33_v3 }
   0xd   :  { %5705 = vmatmul.msk.f32.vlgmr.msra.gmra.mxu0 %vm39_vm0, %v30_v4 }
  0x15   :  { %5706 = vmatmul.msk.f32.gmra.mxu0 %vm39_vm0, %v6467_v5 }
  0x1d   :  { %5707 = vmatmul.msk.f32.gmra.mxu0 %vm39_vm0, %v6474_v6 }
  0x8a   :  { %v66_v8 = vpop.f32.mrf.mxu0 }
  0x8b   :  { %v6478_v9 = vadd.f32 %v6028_v7, %v66_v8 }
  0x8d   :  { %174 = vrot.lane.b32.xlu2 %v6478_v9, %s6422_s24 }
  0x92   :  { %v69_v10 = vpop.f32.mrf.mxu0 }
  0x93   :  { %v6482_v11 = vadd.f32 %v6028_v7, %v69_v10 }
  0x95   :  { %180 = vrot.lane.b32.xlu1 %v6482_v11, %s6423_s25  ;;  %79 = vrot.lane.b32.xlu0 %v6482_v11, %s6424_s26  ;;  %v499_v15 = vrot.slane %v6482_v11, 2 }
  0x96   :  { %275 = vrot.lane.b32.xlu2 %v6478_v9, %s6425_s27 }
  0x9a   :  { %v72_v12 = vpop.f32.mrf.mxu0 }
  0x9b   :  { %v73_v13 = vadd.f32 %v6028_v7, %v72_v12 }
  0x9d   :  { %178 = vrot.lane.b32.xlu1 %v6478_v9, %s6423_s25  ;;  %77 = vrot.lane.b32.xlu0 %v6478_v9, %s6424_s26  ;;  %v6502_v14 = vrot.slane %v73_v13, 2 }
  0x9e   :  { %368 = vrot.lane.b32.xlu2 %v6478_v9, %s6426_s28 }
  0x9f   :  { %v6519_v16 = vsel %vm498_vm1, %v499_v15, %v6502_v14 }
  0xa5   :  { %271 = vrot.lane.b32.xlu1 %v6478_v9, %s6427_s29  ;;  %372 = vrot.lane.b32.xlu0 %v6478_v9, %s6428_s30 }
  0xa6   :  { %176 = vrot.lane.b32.xlu2 %v6482_v11, %s6422_s24 }
  0xad   :  { %374 = vrot.lane.b32.xlu1 %v6482_v11, %s6428_s30  ;;  %277 = vrot.lane.b32.xlu0 %v6482_v11, %s6425_s27 }
  0xae   :  { %504 = vrot.lane.b32.xlu2 %v6502_v14, %s6424_s26 }
  0xb5   :  { %370 = vrot.lane.b32.xlu1 %v6482_v11, %s6426_s28  ;;  %273 = vrot.lane.b32.xlu0 %v6482_v11, %s6427_s29 }
  0xb6   :  { %698 = vrot.lane.b32.xlu2 %v6502_v14, %s6425_s27 }
  0xbd   :  { %502 = vrot.lane.b32.xlu1 %v6519_v16, %s6424_s26  ;;  %601 = vrot.lane.b32.xlu0 %v6502_v14, %s6423_s25 }
  0xbe   :  { %599 = vrot.lane.b32.xlu2 %v6519_v16, %s6423_s25 }
  0xc5   :  { %597 = vrot.lane.b32.xlu1 %v6502_v14, %s6422_s24  ;;  %595 = vrot.lane.b32.xlu0 %v6519_v16, %s6422_s24 }
  0xc6   :  { %793 = vrot.lane.b32.xlu2 %v6519_v16, %s6428_s30 }
  0xcd   :  { %696 = vrot.lane.b32.xlu1 %v6519_v16, %s6425_s27  ;;  %795 = vrot.lane.b32.xlu0 %v6502_v14, %s6428_s30 }
  0xce   :  { %694 = vrot.lane.b32.xlu2 %v6502_v14, %s6427_s29 }
  0xd5   :  { %789 = vrot.lane.b32.xlu1 %v6519_v16, %s6426_s28  ;;  %692 = vrot.lane.b32.xlu0 %v6519_v16, %s6427_s29 }
  0xd6   :  { %334 = vrot.lane.b32.xlu2 %v6482_v11, %s6429_s4 }
  0xdd   :  { %139 = vrot.lane.b32.xlu1 %v6482_v11, %s6430_s5  ;;  %791 = vrot.lane.b32.xlu0 %v6502_v14, %s6426_s28 }
  0xde   :  { %431 = vrot.lane.b32.xlu2 %v6482_v11, %s6431_s6 }
  0xe5   :  { %332 = vrot.lane.b32.xlu1 %v6478_v9, %s6429_s4  ;;  %137 = vrot.lane.b32.xlu0 %v6478_v9, %s6430_s5 }
  0xe6   :  { %561 = vrot.lane.b32.xlu2 %v6502_v14, %s6430_s5 }
  0xe7   :  { %v175_v17 = vpop.permute.xlu2 %174 }
  0xed   :  { %237 = vrot.lane.b32.xlu0 %v6482_v11, %s6432_s7 }
  0xf0   :  { %v276_v18 = vpop.permute.xlu2 %275 }
  0xf5   :  { %235 = vrot.lane.b32.xlu0 %v6478_v9, %s6432_s7 }
  0xf8   :  { %v369_v19 = vpop.permute.xlu2 %368 }
  0xfd   :  { %429 = vrot.lane.b32.xlu0 %v6478_v9, %s6431_s6 }
 0x100   :  { %v177_v20 = vpop.permute.xlu2 %176 }
 0x105   :  { %658 = vrot.lane.b32.xlu0 %v6502_v14, %s6432_s7 }
 0x107   :  { %v181_v21 = vpop.permute.xlu1 %180  ;;  %v80_v22 = vpop.permute.xlu0 %79 }
 0x108   :  { %v505_v23 = vpop.permute.xlu2 %504  ;;  %5708 = vmatpush.xpose.msk.msra.mxu1 %vm81_vm2, %v80_v22  ;;  %5715 = vmatpush.xpose.msk.msra.mxu3 %vm81_vm2, %v181_v21 }
 0x10f   :  { %v179_v24 = vpop.permute.xlu1 %178  ;;  %v78_v25 = vpop.permute.xlu0 %77 }
 0x110   :  { %v699_v26 = vpop.permute.xlu2 %698  ;;  %5709 = vmatpush.xpose.msk.msra.mxu1 %vm81_vm2, %v78_v25  ;;  %5716 = vmatpush.xpose.msk.msra.mxu3 %vm81_vm2, %v179_v24 }
 0x113   :  { %5710 = vmatmul.msk.f32.vlgmr.msra.gmra.mxu1 %vm81_vm2, %v6478_v9  ;;  %5717 = vmatmul.msk.f32.vlgmr.msra.gmra.mxu3 %vm81_vm2, %v175_v17 }
 0x117   :  { %v272_v27 = vpop.permute.xlu1 %271  ;;  %v373_v28 = vpop.permute.xlu0 %372 }
 0x118   :  { %v600_v29 = vpop.permute.xlu2 %599 }
 0x11b   :  { %5711 = vmatmul.msk.f32.gmra.mxu1 %vm81_vm2, %v6482_v11  ;;  %5718 = vmatmul.msk.f32.gmra.mxu3 %vm81_vm2, %v177_v20 }
 0x11f   :  { %v375_v30 = vpop.permute.xlu1 %374  ;;  %v278_v31 = vpop.permute.xlu0 %277 }
 0x120   :  { %v794_v32 = vpop.permute.xlu2 %793  ;;  %5722 = vmatpush.xpose.msk.msrb.mxu1 %vm81_vm2, %v278_v31  ;;  %5729 = vmatpush.xpose.msk.msrb.mxu0 %vm81_vm2, %v375_v30 }
 0x124   :  { %5723 = vmatpush.xpose.msk.msrb.mxu1 %vm81_vm2, %v276_v18  ;;  %5730 = vmatpush.xpose.msk.msrb.mxu0 %vm81_vm2, %v373_v28 }
 0x127   :  { %v371_v33 = vpop.permute.xlu1 %370  ;;  %5724 = vmatmul.msk.f32.vlgmr.msrb.gmra.mxu1 %vm81_vm2, %v272_v27  ;;  %5731 = vmatmul.msk.f32.vlgmr.msrb.gmra.mxu0 %vm81_vm2, %v369_v19  ;;  %v274_v34 = vpop.permute.xlu0 %273 }
 0x128   :  { %5736 = vmatpush.xpose.msk.msra.mxu1 %vm81_vm2, %v505_v23  ;;  %v695_v35 = vpop.permute.xlu2 %694 }
 0x12f   :  { %v503_v36 = vpop.permute.xlu1 %502  ;;  %5725 = vmatmul.msk.f32.gmra.mxu1 %vm81_vm2, %v274_v34  ;;  %5732 = vmatmul.msk.f32.gmra.mxu0 %vm81_vm2, %v371_v33  ;;  %v602_v37 = vpop.permute.xlu0 %601 }
 0x130   :  { %v335_v38 = vpop.permute.xlu2 %334  ;;  %5737 = vmatpush.xpose.msk.msra.mxu1 %vm81_vm2, %v503_v36  ;;  %5743 = vmatpush.xpose.msk.msra.mxu0 %vm81_vm2, %v602_v37 }
 0x131   :  { %5726 = vmatpush.msk.msrb.mxu3 %vm148_vm3, %v335_v38 }
 0x134   :  { %5750 = vmatpush.xpose.msk.msrb.mxu1 %vm81_vm2, %v699_v26  ;;  %5744 = vmatpush.xpose.msk.msra.mxu0 %vm81_vm2, %v600_v29 }
 0x137   :  { %v598_v39 = vpop.permute.xlu1 %597  ;;  %5738 = vmatmul.msk.f32.vlgmr.msra.gmra.mxu1 %vm81_vm2, %v6519_v16  ;;  %v596_v40 = vpop.permute.xlu0 %595 }
 0x138   :  { %5745 = vmatmul.msk.f32.vlgmr.msra.gmra.mxu0 %vm81_vm2, %v596_v40  ;;  %v6600_v47 = vpop.permute.xlu2 %431 }
 0x13f   :  { %v697_v41 = vpop.permute.xlu1 %696  ;;  %5739 = vmatmul.msk.f32.gmra.mxu1 %vm81_vm2, %v6502_v14  ;;  %v796_v42 = vpop.permute.xlu0 %795 }
 0x140   :  { %5746 = vmatmul.msk.f32.gmra.mxu0 %vm81_vm2, %v598_v39  ;;  %5751 = vmatpush.xpose.msk.msrb.mxu1 %vm81_vm2, %v697_v41  ;;  %v562_v50 = vpop.permute.xlu2 %561 }
 0x141   :  { %5757 = vmatpush.xpose.msk.msrb.mxu0 %vm81_vm2, %v796_v42 }
 0x145   :  { %5758 = vmatpush.xpose.msk.msrb.mxu0 %vm81_vm2, %v794_v32 }
 0x147   :  { %v790_v43 = vpop.permute.xlu1 %789  ;;  %v693_v44 = vpop.permute.xlu0 %692 }
 0x148   :  { %5752 = vmatmul.msk.f32.vlgmr.msrb.gmra.mxu1 %vm81_vm2, %v693_v44  ;;  %5759 = vmatmul.msk.f32.vlgmr.msrb.gmra.mxu0 %vm81_vm2, %v790_v43 }
 0x14f   :  { %v140_v45 = vpop.permute.xlu1 %139  ;;  %v792_v46 = vpop.permute.xlu0 %791 }
 0x150   :  { %5712 = vmatpush.msk.msra.mxu2 %vm148_vm3, %v140_v45  ;;  %5753 = vmatmul.msk.f32.gmra.mxu1 %vm81_vm2, %v695_v35 }
 0x151   :  { %5760 = vmatmul.msk.f32.gmra.mxu0 %vm81_vm2, %v792_v46 }
 0x157   :  { %v333_v48 = vpop.permute.xlu1 %332  ;;  %v138_v49 = vpop.permute.xlu0 %137 }
 0x158   :  { %166 = vmatpush.msra.mxu2 %v138_v49  ;;  %360 = vmatpush.msrb.mxu3 %v333_v48 }
 0x15a   :  { %5740 = vmatpush.msk.msra.mxu3 %vm148_vm3, %v562_v50 }
 0x15f   :  { %v238_v51 = vpop.permute.xlu0 %237 }
 0x160   :  { %5719 = vmatpush.msk.msrb.mxu2 %vm148_vm3, %v238_v51 }
 0x167   :  { %v236_v52 = vpop.permute.xlu0 %235 }
 0x168   :  { %263 = vmatpush.msrb.mxu2 %v236_v52 }
 0x16f   :  { %v6659_v19 = vpop.permute.xlu0 %429 }
 0x177   :  { %v6667_v23 = vpop.permute.xlu0 %658 }
 0x190   :  { %v107_v53 = vpop.f32.mrf.mxu1 }
 0x191   :  { %v114_v54 = vsel %vm113_vm4, %v107_v53, -inf }
 0x192   :  { %115 = vmax.xlane.f32.xlu1 %v114_v54 }
 0x196   :  { %v207_v55 = vpop.f32.mrf.mxu3 }
 0x197   :  { %v213_v56 = vsel %vm113_vm4, %v207_v55, -inf }
 0x198   :  { %214 = vmax.xlane.f32.xlu0 %v213_v56  ;;  %v6613_v59 = vpop.f32.mrf.mxu1 }
 0x199   :  { %v118_v61 = vsel %vm117_vm5, %v6613_v59, -inf }
 0x19e   :  { %v6623_v0 = vpop.f32.mrf.mxu3 }
 0x19f   :  { %v216_v2 = vsel %vm117_vm5, %v6623_v0, -inf }
 0x1a4   :  { %v6609_v57 = vpop.f32.mrf.mxu0  ;;  %v6621_v63 = vpop.f32.mrf.mxu1 }
 0x1a5   :  { %v407_v58 = vsel %vm113_vm4, %v6609_v57, -inf  ;;  %v310_v3 = vsel %vm113_vm4, %v6621_v63, -inf }
 0x1a6   :  { %408 = vmax.xlane.f32.xlu2 %v407_v58 }
 0x1ac   :  { %v6615_v60 = vpop.f32.mrf.mxu0  ;;  %v6633_v7 = vpop.f32.mrf.mxu1 }
 0x1ad   :  { %v410_v62 = vsel %vm117_vm5, %v6615_v60, -inf  ;;  %v313_v8 = vsel %vm117_vm5, %v6633_v7, -inf }
 0x1ae   :  { %119 = vmax.xlane.f32.xlu2 %v118_v61  ;;  %411 = vmax.xlane.f32.xlu1 %v410_v62 }
 0x1b4   :  { %v6645_v11 = vpop.f32.mrf.mxu1 }
 0x1b5   :  { %v6625_v1 = vpop.f32.mrf.mxu0  ;;  %v537_v17 = vsel %vm113_vm4, %v6645_v11, -inf }
 0x1b6   :  { %217 = vmax.xlane.f32.xlu2 %v216_v2  ;;  %311 = vmax.xlane.f32.xlu1 %v310_v3  ;;  %v634_v4 = vsel %vm113_vm4, %v6625_v1, -inf }
 0x1b7   :  { %635 = vmax.xlane.f32.xlu0 %v634_v4 }
 0x1bc   :  { %v6649_v12 = vpop.f32.mrf.mxu1 }
 0x1bd   :  { %v6637_v9 = vpop.f32.mrf.mxu0  ;;  %v540_v27 = vsel %vm117_vm5, %v6649_v12, -inf }
 0x1be   :  { %v637_v10 = vsel %vm117_vm5, %v6637_v9, -inf }
 0x1bf   :  { %314 = vmax.xlane.f32.xlu0 %v313_v8 }
 0x1c5   :  { %v6651_v13 = vpop.f32.mrf.mxu1  ;;  %v6661_v20 = vpop.f32.mrf.mxu0 }
 0x1c6   :  { %v828_v21 = vsel %vm113_vm4, %v6661_v20, -inf  ;;  %v731_v32 = vsel %vm113_vm4, %v6651_v13, -inf }
 0x1c7   :  { %638 = vmax.xlane.f32.xlu0 %v637_v10 }
 0x1cd   :  { %v6653_v15 = vpop.f32.mrf.mxu1 }
 0x1ce   :  { %755 = vrot.lane.b32.xlu2 %v6502_v14, %s6429_s4  ;;  %v734_v18 = vsel %vm117_vm5, %v6653_v15, -inf  ;;  %v6665_v22 = vpop.f32.mrf.mxu0 }
 0x1cf   :  { %559 = vrot.lane.b32.xlu1 %v6519_v16, %s6430_s5  ;;  %v831_v24 = vsel %vm117_vm5, %v6665_v22, -inf }
 0x1db   :  { %656 = vrot.lane.b32.xlu0 %v6519_v16, %s6432_s7 }
 0x1f7   :  { %538 = vmax.xlane.f32.xlu2 %v537_v17 }
 0x1f9   :  { %735 = vmax.xlane.f32.xlu1 %v734_v18 }
 0x1ff   :  { %829 = vmax.xlane.f32.xlu2 %v828_v21 }
 0x205   :  { %v116_v25 = vpop.xlane.xlu1 %115  ;;  %832 = vmax.xlane.f32.xlu0 %v831_v24 }
 0x206   :  { %v121_v26 = vsub.f32 %v107_v53, %v116_v25 }
 0x207   :  { %541 = vmax.xlane.f32.xlu2 %v540_v27 }
 0x208   :  { %v123_v28 = vmul.f32 1.442695, %v121_v26 }
 0x20a   :  { %6075 = vpow2.f32 %v123_v28 }
 0x20b   :  { %v215_v29 = vpop.xlane.xlu0 %214 }
 0x20c   :  { %v219_v30 = vsub.f32 %v207_v55, %v215_v29 }
 0x20e   :  { %v221_v31 = vmul.f32 1.442695, %v219_v30 }
 0x20f   :  { %732 = vmax.xlane.f32.xlu2 %v731_v32 }
 0x210   :  { %v6675_v33 = vpop.eup %6075  ;;  %6077 = vpow2.f32 %v221_v31 }
 0x211   :  { %v127_v34 = vsel %vm113_vm4, %v6675_v33, 0.0 }
 0x212   :  { %128 = vadd.xlane.f32.xlu1 %v127_v34 }
 0x216   :  { %v6679_v35 = vpop.eup %6077 }
 0x217   :  { %v225_v37 = vsel %vm113_vm4, %v6679_v35, 0.0 }
 0x219   :  { %v409_v36 = vpop.xlane.xlu2 %408 }
 0x21a   :  { %v413_v38 = vsub.f32 %v6609_v57, %v409_v36  ;;  %226 = vadd.xlane.f32.xlu1 %v225_v37 }
 0x21c   :  { %v415_v39 = vmul.f32 1.442695, %v413_v38 }
 0x21e   :  { %6079 = vpow2.f32 %v415_v39 }
 0x221   :  { %v120_v40 = vpop.xlane.xlu2 %119  ;;  %v412_v41 = vpop.xlane.xlu1 %411 }
 0x222   :  { %v122_v42 = vsub.f32 %v6613_v59, %v120_v40  ;;  %v414_v45 = vsub.f32 %v6615_v60, %v412_v41 }
 0x224   :  { %v6685_v43 = vpop.eup %6079  ;;  %v125_v44 = vmul.f32 1.442695, %v122_v42  ;;  %v417_v48 = vmul.f32 1.442695, %v414_v45 }
 0x225   :  { %v419_v46 = vsel %vm113_vm4, %v6685_v43, 0.0 }
 0x226   :  { %6081 = vpow2.f32 %v125_v44  ;;  %420 = vadd.xlane.f32.xlu0 %v419_v46 }
 0x227   :  { %6083 = vpow2.f32 %v417_v48 }
 0x229   :  { %v218_v49 = vpop.xlane.xlu2 %217  ;;  %v312_v55 = vpop.xlane.xlu1 %311 }
 0x22a   :  { %v636_v50 = vpop.xlane.xlu0 %635  ;;  %v220_v52 = vsub.f32 %v6623_v0, %v218_v49  ;;  %v316_v59 = vsub.f32 %v6621_v63, %v312_v55 }
 0x22b   :  { %v640_v2 = vsub.f32 %v6625_v1, %v636_v50 }
 0x22c   :  { %v6690_v51 = vpop.eup %6081  ;;  %v223_v54 = vmul.f32 1.442695, %v220_v52  ;;  %v318_v62 = vmul.f32 1.442695, %v316_v59 }
 0x22d   :  { %v130_v53 = vsel %vm117_vm5, %v6690_v51, 0.0  ;;  %v6695_v56 = vpop.eup %6083 }
 0x22e   :  { %131 = vadd.xlane.f32.xlu2 %v130_v53  ;;  %6085 = vpow2.f32 %v223_v54  ;;  %v422_v61 = vsel %vm117_vm5, %v6695_v56, 0.0 }
 0x231   :  { %v6723_v28 = vpop.permute.xlu2 %755 }
 0x232   :  { %v315_v57 = vpop.xlane.xlu0 %314 }
 0x233   :  { %v317_v58 = vsub.f32 %v6633_v7, %v315_v57  ;;  %v642_v7 = vmul.f32 1.442695, %v640_v2 }
 0x234   :  { %v6701_v0 = vpop.eup %6085 }
 0x235   :  { %v320_v60 = vmul.f32 1.442695, %v317_v58  ;;  %v228_v4 = vsel %vm117_vm5, %v6701_v0, 0.0 }
 0x236   :  { %423 = vadd.xlane.f32.xlu2 %v422_v61 }
 0x237   :  { %6087 = vpow2.f32 %v320_v60 }
 0x238   :  { %6089 = vpow2.f32 %v318_v62 }
 0x239   :  { %6091 = vpow2.f32 %v642_v7 }
 0x23a   :  { %v639_v8 = vpop.xlane.xlu0 %638 }
 0x23b   :  { %v641_v18 = vsub.f32 %v6637_v9, %v639_v8 }
 0x23d   :  { %v6704_v3 = vpop.eup %6087  ;;  %v644_v21 = vmul.f32 1.442695, %v641_v18 }
 0x23e   :  { %229 = vadd.xlane.f32.xlu2 %v228_v4  ;;  %v325_v63 = vsel %vm117_vm5, %v6704_v3, 0.0  ;;  %v6710_v17 = vpop.eup %6089 }
 0x23f   :  { %326 = vadd.xlane.f32.xlu1 %v325_v63  ;;  %v322_v1 = vsel %vm113_vm4, %v6710_v17, 0.0  ;;  %v6715_v24 = vpop.eup %6091  ;;  %6093 = vpow2.f32 %v644_v21 }
 0x240   :  { %v646_v25 = vsel %vm113_vm4, %v6715_v24, 0.0 }
 0x241   :  { %v560_v10 = vpop.permute.xlu1 %559 }
 0x242   :  { %587 = vmatpush.msra.mxu3 %v560_v10 }
 0x245   :  { %v6719_v26 = vpop.eup %6093 }
 0x246   :  { %323 = vadd.xlane.f32.xlu2 %v322_v1  ;;  %v649_v27 = vsel %vm117_vm5, %v6719_v26, 0.0 }
 0x24e   :  { %647 = vadd.xlane.f32.xlu2 %v646_v25 }
 0x256   :  { %650 = vadd.xlane.f32.xlu2 %v649_v27 }
 0x26a   :  { %v539_v9 = vpop.xlane.xlu2 %538 }
 0x26b   :  { %v543_v29 = vsub.f32 %v6645_v11, %v539_v9 }
 0x26c   :  { %v736_v41 = vpop.xlane.xlu1 %735 }
 0x26d   :  { %v545_v30 = vmul.f32 1.442695, %v543_v29  ;;  %v738_v55 = vsub.f32 %v6653_v15, %v736_v41 }
 0x26f   :  { %6095 = vpow2.f32 %v545_v30  ;;  %v741_v60 = vmul.f32 1.442695, %v738_v55 }
 0x272   :  { %v830_v31 = vpop.xlane.xlu2 %829 }
 0x273   :  { %v834_v32 = vsub.f32 %v6661_v20, %v830_v31 }
 0x275   :  { %v6727_v34 = vpop.eup %6095  ;;  %v836_v36 = vmul.f32 1.442695, %v834_v32 }
 0x276   :  { %v549_v37 = vsel %vm113_vm4, %v6727_v34, 0.0 }
 0x277   :  { %6097 = vpow2.f32 %v836_v36  ;;  %550 = vadd.xlane.f32.xlu2 %v549_v37 }
 0x27a   :  { %v542_v38 = vpop.xlane.xlu2 %541 }
 0x27b   :  { %v544_v39 = vsub.f32 %v6649_v12, %v542_v38 }
 0x27d   :  { %v6732_v40 = vpop.eup %6097  ;;  %v547_v11 = vmul.f32 1.442695, %v544_v39 }
 0x27e   :  { %v840_v42 = vsel %vm113_vm4, %v6732_v40, 0.0 }
 0x27f   :  { %6099 = vpow2.f32 %v547_v11  ;;  %841 = vadd.xlane.f32.xlu0 %v840_v42 }
 0x282   :  { %v733_v20 = vpop.xlane.xlu2 %732 }
 0x283   :  { %v737_v44 = vsub.f32 %v6651_v13, %v733_v20  ;;  %v657_v13 = vpop.permute.xlu0 %656 }
 0x285   :  { %v6737_v45 = vpop.eup %6099  ;;  %v739_v46 = vmul.f32 1.442695, %v737_v44  ;;  %v129_v48 = vpop.xlane.xlu1 %128 }
 0x286   :  { %6101 = vrcp.f32 %v129_v48  ;;  %v552_v12 = vsel %vm117_vm5, %v6737_v45, 0.0 }
 0x287   :  { %6103 = vpow2.f32 %v739_v46  ;;  %553 = vadd.xlane.f32.xlu1 %v552_v12 }
 0x28b   :  { %v833_v58 = vpop.xlane.xlu0 %832 }
 0x28c   :  { %v6102_v49 = vpop.eup %6101 }
 0x28d   :  { %v6741_v50 = vpop.eup %6103  ;;  %v135_v52 = vmul.f32 %v6102_v49, %v6675_v33  ;;  %v227_v33 = vpop.xlane.xlu1 %226 }
 0x28e   :  { %v743_v53 = vsel %vm113_vm4, %v6741_v50, 0.0 }
 0x28f   :  { %5713 = vmatmul.msk.f32.vlgmr.msra.gmra.mxu2 %vm113_vm4, %v135_v52  ;;  %744 = vadd.xlane.f32.xlu1 %v743_v53 }
 0x290   :  { %5733 = vmatpush.msk.msra.mxu2 %vm148_vm3, %v6600_v47  ;;  %850 = vrot.lane.b32.xlu2 %v6519_v16, %s6431_s6 }
 0x292   :  { %457 = vmatpush.msra.mxu2 %v6659_v19  ;;  %v835_v19 = vsub.f32 %v6665_v22, %v833_v58 }
 0x293   :  { %753 = vrot.lane.b32.xlu0 %v6519_v16, %s6429_s4 }
 0x294   :  { %v838_v61 = vmul.f32 1.442695, %v835_v19  ;;  %v926_v19 = vld [vmem:[#allocation2 + $0x38] sm:$0xff] }
 0x295   :  { %949 = vmatpush.msra.mxu1 %v926_v19 }
 0x2a1   :  { %v132_v54 = vpop.xlane.xlu2 %131 }
 0x2a2   :  { %6105 = vrcp.f32 %v132_v54 }
 0x2a3   :  { %6107 = vrcp.f32 %v227_v33 }
 0x2a4   :  { %6109 = vpow2.f32 %v741_v60 }
 0x2a8   :  { %v6106_v57 = vpop.eup %6105  ;;  %852 = vrot.lane.b32.xlu1 %v6502_v14, %s6431_s6 }
 0x2a9   :  { %v424_v47 = vpop.xlane.xlu2 %423  ;;  %v136_v59 = vmul.f32 %v6106_v57, %v6690_v51  ;;  %v6108_v16 = vpop.eup %6107 }
 0x2aa   :  { %v233_v15 = vmul.f32 %v6108_v16, %v6679_v35  ;;  %v6764_v14 = vpop.eup %6109  ;;  %v421_v51 = vpop.xlane.xlu0 %420  ;;  %v925_v16 = vld [vmem:[#allocation2 + $0x30] sm:$0xff] }
 0x2ab   :  { %5714 = vmatmul.msk.f32.gmra.mxu2 %vm113_vm4, %v136_v59  ;;  %v746_v2 = vsel %vm117_vm5, %v6764_v14, 0.0  ;;  %950 = vmatpush.msra.mxu1 %v925_v16 }
 0x2b1   :  { %v230_v62 = vpop.xlane.xlu2 %229 }
 0x2b2   :  { %6111 = vrcp.f32 %v230_v62  ;;  %v327_v7 = vpop.xlane.xlu1 %326 }
 0x2b3   :  { %6113 = vpow2.f32 %v838_v61  ;;  %5720 = vmatmul.msk.f32.vlgmr.msrb.gmra.mxu2 %vm113_vm4, %v233_v15  ;;  %v924_v61 = vld [vmem:[#allocation2 + $0x28] sm:$0xff]  ;;  %v923_v15 = vld [vmem:[#allocation2 + $0x20] sm:$0xff] }
 0x2b4   :  { %5747 = vmatpush.msk.msrb.mxu2 %vm148_vm3, %v6667_v23  ;;  %6115 = vrcp.f32 %v421_v51  ;;  %951 = vmatpush.msra.mxu1 %v924_v61  ;;  %v1053_v61 = vld [vmem:[#allocation2 + $0x58] sm:$0xff] }
 0x2b6   :  { %684 = vmatpush.msrb.mxu2 %v657_v13  ;;  %952 = vmatpush.msra.mxu1 %v923_v15 }
 0x2b8   :  { %v6112_v22 = vpop.eup %6111 }
 0x2b9   :  { %v6768_v4 = vpop.eup %6113  ;;  %747 = vadd.xlane.f32.xlu2 %v746_v2  ;;  %v324_v35 = vpop.xlane.xlu2 %323  ;;  %v234_v63 = vmul.f32 %v6112_v22, %v6701_v0 }
 0x2ba   :  { %6117 = vrcp.f32 %v324_v35  ;;  %v843_v23 = vsel %vm117_vm5, %v6768_v4, 0.0  ;;  %v6116_v8 = vpop.eup %6115 }
 0x2bb   :  { %5721 = vmatmul.msk.f32.gmra.mxu2 %vm113_vm4, %v234_v63  ;;  %6119 = vrcp.f32 %v424_v47  ;;  %v427_v18 = vmul.f32 %v6116_v8, %v6685_v43 }
 0x2bc   :  { %6121 = vrcp.f32 %v327_v7 }
 0x2bd   :  { %844 = vadd.xlane.f32.xlu0 %v843_v23 }
 0x2c0   :  { %v6118_v10 = vpop.eup %6117 }
 0x2c1   :  { %v330_v1 = vmul.f32 %v6118_v10, %v6710_v17  ;;  %v648_v21 = vpop.xlane.xlu2 %647  ;;  %v6120_v0 = vpop.eup %6119 }
 0x2c2   :  { %v6122_v25 = vpop.eup %6121  ;;  %6123 = vrcp.f32 %v648_v21  ;;  %v428_v9 = vmul.f32 %v6120_v0, %v6695_v56 }
 0x2c3   :  { %5727 = vmatmul.msk.f32.vlgmr.msrb.gmra.mxu3 %vm113_vm4, %v330_v1  ;;  %5734 = vmatmul.msk.f32.vlgmr.msra.gmra.mxu2 %vm113_vm4, %v427_v18  ;;  %v331_v27 = vmul.f32 %v6122_v25, %v6704_v3 }
 0x2c4   :  { %5754 = vmatpush.msk.msrb.mxu3 %vm148_vm3, %v6723_v28 }
 0x2c8   :  { %v6124_v17 = vpop.eup %6123 }
 0x2c9   :  { %v651_v43 = vpop.xlane.xlu2 %650  ;;  %v654_v29 = vmul.f32 %v6124_v17, %v6715_v24 }
 0x2ca   :  { %6125 = vrcp.f32 %v651_v43 }
 0x2cb   :  { %5728 = vmatmul.msk.f32.gmra.mxu3 %vm113_vm4, %v331_v27  ;;  %5735 = vmatmul.msk.f32.gmra.mxu2 %vm113_vm4, %v428_v9 }
 0x2d0   :  { %v6126_v30 = vpop.eup %6125 }
 0x2d1   :  { %v655_v28 = vmul.f32 %v6126_v30, %v6719_v26 }
 0x2d3   :  { %5748 = vmatmul.msk.f32.vlgmr.msrb.gmra.mxu2 %vm113_vm4, %v654_v29 }
 0x2db   :  { %5749 = vmatmul.msk.f32.gmra.mxu2 %vm113_vm4, %v655_v28 }
 0x2ea   :  { %v551_v31 = vpop.xlane.xlu2 %550 }
 0x2eb   :  { %6127 = vrcp.f32 %v551_v31 }
 0x2f1   :  { %v6128_v3 = vpop.eup %6127 }
 0x2f2   :  { %v557_v56 = vmul.f32 %v6128_v3, %v6727_v34  ;;  %v842_v36 = vpop.xlane.xlu0 %841  ;;  %v851_v42 = vpop.permute.xlu2 %850 }
 0x2f4   :  { %5741 = vmatmul.msk.f32.vlgmr.msra.gmra.mxu3 %vm113_vm4, %v557_v56 }
 0x2fa   :  { %v554_v32 = vpop.xlane.xlu1 %553 }
 0x2fb   :  { %6129 = vrcp.f32 %v554_v32 }
 0x301   :  { %v6130_v37 = vpop.eup %6129 }
 0x302   :  { %v745_v38 = vpop.xlane.xlu1 %744  ;;  %v558_v24 = vmul.f32 %v6130_v37, %v6737_v45 }
 0x303   :  { %6131 = vrcp.f32 %v745_v38 }
 0x304   :  { %5742 = vmatmul.msk.f32.gmra.mxu3 %vm113_vm4, %v558_v24  ;;  %6133 = vrcp.f32 %v842_v36  ;;  %v6029_v24 = vld [vmem:[#allocation2 + $0x361] ss:$0 sm:$0xff] }
 0x305   :  { %v754_v26 = vpop.permute.xlu0 %753 }
 0x306   :  { %781 = vmatpush.msrb.mxu3 %v754_v26 }
 0x308   :  { %1077 = vmatpush.msra.mxu3 %v1053_v61 }
 0x309   :  { %v6132_v39 = vpop.eup %6131 }
 0x30a   :  { %v751_v41 = vmul.f32 %v6132_v39, %v6741_v50  ;;  %v6134_v34 = vpop.eup %6133 }
 0x30b   :  { %v848_v20 = vmul.f32 %v6134_v34, %v6732_v40 }
 0x30c   :  { %5755 = vmatmul.msk.f32.vlgmr.msrb.gmra.mxu3 %vm113_vm4, %v751_v41  ;;  %v6391_v41 = vld [vmem:[%s8134_s0] sm:$0xff] }
 0x312   :  { %v168_v44 = vpop.f32.mrf.mxu2 }
 0x31a   :  { %v853_v11 = vpop.permute.xlu1 %852 }
 0x31b   :  { %5761 = vmatpush.msk.msra.mxu2 %vm148_vm3, %v853_v11 }
 0x31d   :  { %878 = vmatpush.msra.mxu2 %v851_v42 }
 0x31e   :  { %5762 = vmatmul.msk.f32.vlgmr.msra.gmra.mxu2 %vm113_vm4, %v848_v20 }
 0x32c   :  { %v748_v45 = vpop.xlane.xlu2 %747 }
 0x32d   :  { %6135 = vrcp.f32 %v748_v45 }
 0x32e   :  { %v6797_v46 = vpop.f32.mrf.mxu2 }
 0x330   :  { %v845_v48 = vpop.xlane.xlu0 %844 }
 0x331   :  { %6137 = vrcp.f32 %v845_v48 }
 0x333   :  { %v6136_v12 = vpop.eup %6135 }
 0x334   :  { %v752_v49 = vmul.f32 %v6136_v12, %v6764_v14 }
 0x336   :  { %5756 = vmatmul.msk.f32.gmra.mxu3 %vm113_vm4, %v752_v49  ;;  %v265_v50 = vpop.f32.mrf.mxu2 }
 0x337   :  { %v6138_v52 = vpop.eup %6137  ;;  %467 = vrot.lane.b32.xlu1 %v265_v50, %s6421_s18 }
 0x338   :  { %v849_v40 = vmul.f32 %v6138_v52, %v6768_v4 }
 0x33a   :  { %5763 = vmatmul.msk.f32.gmra.mxu2 %vm113_vm4, %v849_v40 }
 0x33e   :  { %v268_v53 = vpop.f32.mrf.mxu2 }
 0x33f   :  { %469 = vrot.lane.b32.xlu2 %v268_v53, %s6421_s18 }
 0x346   :  { %v362_v13 = vpop.f32.mrf.mxu3  ;;  %v459_v54 = vpop.f32.mrf.mxu2 }
 0x347   :  { %475 = vrot.lane.b32.xlu1 %v362_v13, %s6433_s8 }
 0x34e   :  { %v462_v33 = vpop.f32.mrf.mxu2  ;;  %v365_v57 = vpop.f32.mrf.mxu3 }
 0x34f   :  { %483 = vrot.lane.b32.xlu1 %v459_v54, %s6434_s9 }
 0x356   :  { %v686_v55 = vpop.f32.mrf.mxu2 }
 0x357   :  { %888 = vrot.lane.b32.xlu1 %v686_v55, %s6421_s18 }
 0x35e   :  { %v689_v60 = vpop.f32.mrf.mxu2 }
 0x377   :  { %v589_v58 = vpop.f32.mrf.mxu3 }
 0x387   :  { %v592_v47 = vpop.f32.mrf.mxu3 }
 0x38f   :  { %v783_v59 = vpop.f32.mrf.mxu3 }
 0x390   :  { %896 = vrot.lane.b32.xlu1 %v783_v59, %s6433_s8 }
 0x398   :  { %477 = vrot.lane.b32.xlu1 %v365_v57, %s6433_s8 }
 0x399   :  { %v470_v18 = vpop.permute.xlu2 %469 }
 0x39a   :  { %v490_v27 = vsel %vm81_vm2, %v6797_v46, %v470_v18  ;;  %v6435_v46 = vmov 32.0  }
 0x39b   :  { %6139 = vrcp.f32 %v6435_v46 }
 0x3a0   :  { %485 = vrot.lane.b32.xlu1 %v462_v33, %s6434_s9 }
 0x3a1   :  { %v880_v62 = vpop.f32.mrf.mxu2  ;;  %v6140_v48 = vpop.eup %6139 }
 0x3a2   :  { %904 = vrot.lane.b32.xlu0 %v880_v62, %s6434_s9  ;;  %v977_v12 = vmul.f32 32.0, %v6140_v48  ;;  %vm981_vm9 = vweird.f32 %v6140_v48 }
 0x3a4   :  { %v978_v49 = vsub.f32 1.0, %v977_v12 }
 0x3a6   :  { %v979_v50 = vmul.f32 %v6140_v48, %v978_v49 }
 0x3a8   :  { %890 = vrot.lane.b32.xlu1 %v689_v60, %s6421_s18  ;;  %v980_v53 = vadd.f32 %v6140_v48, %v979_v50 }
 0x3a9   :  { %v468_v14 = vpop.permute.xlu1 %467 }
 0x3aa   :  { %v489_v4 = vsel %vm81_vm2, %v168_v44, %v468_v14  ;;  %v6841_v33 = vsel %vm981_vm9, %v6140_v48, %v980_v53  ;;  %v1052_v14 = vld [vmem:[#allocation2 + $0x50] sm:$0xff]  ;;  %v1097_v48 = vld [vmem:[#allocation2 + $0x78] sm:$0xff]  ;;  %v1095_v53 = vld [vmem:[#allocation2 + $0x68] sm:$0xff] }
 0x3ab   :  { %1078 = vmatpush.msra.mxu3 %v1052_v14 }
 0x3b9   :  { %v786_v51 = vpop.f32.mrf.mxu3  ;;  %v476_v22 = vpop.permute.xlu1 %475 }
 0x3ba   :  { %898 = vrot.lane.b32.xlu2 %v786_v51, %s6433_s8  ;;  %v492_v35 = vsel %vm491_vm6, %v489_v4, %v476_v22  ;;  %v1051_v51 = vld [vmem:[#allocation2 + $0x48] sm:$0xff] }
 0x3bb   :  { %1079 = vmatpush.msra.mxu3 %v1051_v51 }
 0x3bd   :  { %v883_v2 = vpop.f32.mrf.mxu2 }
 0x3be   :  { %906 = vrot.lane.b32.xlu0 %v883_v2, %s6434_s9  ;;  %v1050_v2 = vld [vmem:[#allocation2 + $0x40] sm:$0xff] }
 0x3bf   :  { %1080 = vmatpush.msra.mxu3 %v1050_v2 }
 0x3c1   :  { %v484_v63 = vpop.permute.xlu1 %483 }
 0x3c2   :  { %v495_v23 = vsel %vm494_vm7, %v492_v35, %v484_v63 }
 0x3c3   :  { %5764 = vmatmul.msk.f32.vlgmr.msra.gmra.mxu1 %vm39_vm0, %v495_v23 }
 0x3c9   :  { %v889_v7 = vpop.permute.xlu1 %888 }
 0x3ca   :  { %v910_v1 = vsel %vm81_vm2, %v589_v58, %v889_v7 }
 0x402   :  { %v897_v8 = vpop.permute.xlu1 %896 }
 0x403   :  { %v912_v21 = vsel %vm491_vm6, %v910_v1, %v897_v8 }
 0x40a   :  { %v478_v10 = vpop.permute.xlu1 %477 }
 0x40b   :  { %v493_v43 = vsel %vm491_vm6, %v490_v27, %v478_v10 }
 0x412   :  { %v486_v0 = vpop.permute.xlu1 %485 }
 0x413   :  { %v496_v29 = vsel %vm494_vm7, %v493_v43, %v486_v0  ;;  %v6031_v43 = vld [vmem:[#allocation2 + $0x365] ss:$0 sm:$0xff] }
 0x414   :  { %v905_v25 = vpop.permute.xlu0 %904  ;;  %v899_v3 = vpop.permute.xlu2 %898 }
 0x415   :  { %v914_v9 = vsel %vm494_vm7, %v912_v21, %v905_v25  ;;  %v6030_v25 = vld [vmem:[#allocation2 + $0x364] ss:$0 sm:$0xff] }
 0x416   :  { %v918_v17 = vrot.slane %v914_v9, 6 }
 0x418   :  { %v922_v30 = vsel %vm148_vm3, %v496_v29, %v918_v17 }
 0x419   :  { %5765 = vmatmul.msk.f32.gmra.mxu1 %vm39_vm0, %v922_v30 }
 0x41a   :  { %v891_v28 = vpop.permute.xlu1 %890 }
 0x41b   :  { %v911_v31 = vsel %vm81_vm2, %v592_v47, %v891_v28 }
 0x41c   :  { %v913_v56 = vsel %vm491_vm6, %v911_v31, %v899_v3 }
 0x430   :  { %v907_v32 = vpop.permute.xlu0 %906 }
 0x431   :  { %v915_v36 = vsel %vm494_vm7, %v913_v56, %v907_v32 }
 0x432   :  { %v919_v37 = vrot.slane %v915_v36, 6 }
 0x434   :  { %v920_v38 = vsel %vm148_vm3, %v918_v17, %v919_v37 }
 0x435   :  { %5766 = vmatmul.msk.f32.gmra.mxu1 %vm39_vm0, %v920_v38 }
 0x440   :  { %v954_v26 = vpop.f32.mrf.mxu1 }
 0x441   :  { %v955_v39 = vadd.f32 %v6029_v24, %v954_v26 }
 0x443   :  { %v963_v34 = vadd.f32 %v6391_v41, %v955_v39  ;;  %v1101_v41 = vld [vmem:[#allocation2 + $0x98] sm:$0xff] }
 0x444   :  { %1122 = vmatpush.msra.mxu0 %v1101_v41 }
 0x445   :  { %v966_v11 = vsel %vm39_vm0, %v963_v34, 0.0 }
 0x446   :  { %967 = vadd.xlane.f32.xlu1 %v966_v11 }
 0x496   :  { %v957_v42 = vpop.f32.mrf.mxu1 }
 0x497   :  { %v958_v20 = vadd.f32 %v6029_v24, %v957_v42  ;;  %v1099_v42 = vld [vmem:[#allocation2 + $0x88] sm:$0xff] }
 0x499   :  { %v964_v44 = vadd.f32 %v958_v20, %v6467_v5 }
 0x49b   :  { %v969_v45 = vsel %vm39_vm0, %v964_v44, 0.0 }
 0x49c   :  { %970 = vadd.xlane.f32.xlu2 %v969_v45  ;;  %v1098_v45 = vld [vmem:[#allocation2 + $0x80] sm:$0xff] }
 0x4b2   :  { %v960_v52 = vpop.f32.mrf.mxu1 }
 0x4b3   :  { %v961_v40 = vadd.f32 %v6029_v24, %v960_v52  ;;  %v1096_v52 = vld [vmem:[#allocation2 + $0x70] sm:$0xff] }
 0x4b5   :  { %v965_v13 = vadd.f32 %v961_v40, %v6474_v6 }
 0x4b7   :  { %v973_v54 = vsel %vm972_vm8, %v965_v13, 0.0 }
 0x4b8   :  { %974 = vadd.xlane.f32.xlu0 %v973_v54 }
 0x4b9   :  { %v968_v5 = vpop.xlane.xlu1 %967 }
 0x4ba   :  { %v983_v55 = vmul.f32 %v6841_v33, %v968_v5 }
 0x4bc   :  { %v986_v57 = vsub.f32 %v963_v34, %v983_v55  ;;  %v1100_v34 = vld [vmem:[#allocation2 + $0x90] sm:$0xff] }
 0x4bd   :  { %1123 = vmatpush.msra.mxu0 %v1100_v34 }
 0x4be   :  { %v989_v58 = vmul.f32 %v986_v57, %v986_v57 }
 0x4bf   :  { %1124 = vmatpush.msra.mxu0 %v1099_v42 }
 0x4c0   :  { %v992_v47 = vsel %vm39_vm0, %v989_v58, 0.0 }
 0x4c1   :  { %993 = vadd.xlane.f32.xlu2 %v992_v47  ;;  %1125 = vmatpush.msra.mxu0 %v1098_v45 }
 0x4c3   :  { %1126 = vmatpush.msra.mxu0 %v1097_v48 }
 0x4c5   :  { %1127 = vmatpush.msra.mxu0 %v1096_v52 }
 0x4c7   :  { %1128 = vmatpush.msra.mxu0 %v1095_v53 }
 0x50f   :  { %v971_v59 = vpop.xlane.xlu2 %970 }
 0x510   :  { %v984_v60 = vmul.f32 %v6841_v33, %v971_v59  ;;  %v6032_v59 = vld [vmem:[#allocation2 + $0x362] ss:$0 sm:$0xff] }
 0x512   :  { %v987_v19 = vsub.f32 %v964_v44, %v984_v60 }
 0x514   :  { %v990_v16 = vmul.f32 %v987_v19, %v987_v19 }
 0x516   :  { %v995_v6 = vsel %vm39_vm0, %v990_v16, 0.0 }
 0x517   :  { %996 = vadd.xlane.f32.xlu1 %v995_v6 }
 0x52b   :  { %v975_v62 = vpop.xlane.xlu0 %974 }
 0x52c   :  { %v985_v15 = vmul.f32 %v6841_v33, %v975_v62 }
 0x52e   :  { %v6848_v22 = vsub.f32 %v965_v13, %v985_v15  ;;  %v1094_v13 = vld [vmem:[#allocation2 + $0x60] sm:$0xff] }
 0x52f   :  { %1129 = vmatpush.msra.mxu0 %v1094_v13 }
 0x530   :  { %v991_v4 = vmul.f32 %v6848_v22, %v6848_v22 }
 0x532   :  { %v998_v35 = vsel %vm972_vm8, %v991_v4, 0.0 }
 0x533   :  { %999 = vadd.xlane.f32.xlu0 %v998_v35 }
 0x534   :  { %v994_v63 = vpop.xlane.xlu2 %993 }
 0x535   :  { %v1001_v23 = vmul.f32 %v994_v63, %v6841_v33 }
 0x537   :  { %v1004_v7 = vadd.f32 1e-05, %v1001_v23 }
 0x539   :  { %6141 = vrsqrt.f32 %v1004_v7  ;;  %vm1013_vm11 = vweird.f32 %v1004_v7 }
 0x53f   :  { %v6142_v8 = vpop.eup %6141 }
 0x540   :  { %v1008_v10 = vmul.f32 %v6142_v8, %v1004_v7  ;;  %vm1014_vm10 = vweird.f32 %v6142_v8 }
 0x541   :  { %vm1015_vm12 = vmor %vm1013_vm11, %vm1014_vm10 }
 0x542   :  { %v1009_v18 = vmul.f32 %v6142_v8, %v1008_v10 }
 0x544   :  { %v1010_v1 = vmul.f32 0.5, %v1009_v18 }
 0x546   :  { %v1011_v21 = vsub.f32 1.5, %v1010_v1 }
 0x548   :  { %v1012_v0 = vmul.f32 %v6142_v8, %v1011_v21 }
 0x54a   :  { %v1016_v27 = vsel %vm1015_vm12, %v6142_v8, %v1012_v0  ;;  %vm1104_vm12 = vcmask 523264  }
 0x54b   :  { %v1037_v9 = vmul.f32 %v1016_v27, %v986_v57 }
 0x54d   :  { %v1042_v17 = vmul.f32 %v6030_v25, %v1037_v9 }
 0x54f   :  { %v6854_v29 = vadd.f32 %v6031_v43, %v1042_v17 }
 0x551   :  { %5767 = vmatmul.msk.f32.vlgmr.msra.gmra.mxu3 %vm39_vm0, %v6854_v29 }
 0x58a   :  { %v997_v30 = vpop.xlane.xlu1 %996 }
 0x58b   :  { %v1002_v28 = vmul.f32 %v997_v30, %v6841_v33 }
 0x58d   :  { %v1005_v31 = vadd.f32 1e-05, %v1002_v28 }
 0x58f   :  { %6143 = vrsqrt.f32 %v1005_v31  ;;  %vm1023_vm14 = vweird.f32 %v1005_v31 }
 0x595   :  { %v6144_v3 = vpop.eup %6143 }
 0x596   :  { %v1018_v56 = vmul.f32 %v6144_v3, %v1005_v31  ;;  %vm1024_vm13 = vweird.f32 %v6144_v3 }
 0x597   :  { %vm1025_vm15 = vmor %vm1023_vm14, %vm1024_vm13 }
 0x598   :  { %v1019_v32 = vmul.f32 %v6144_v3, %v1018_v56  ;;  %v1222_v56 = vld [vmem:[#allocation2 + $0xb8] sm:$0xff] }
 0x599   :  { %1246 = vmatpush.msrb.mxu2 %v1222_v56 }
 0x59a   :  { %v1020_v36 = vmul.f32 0.5, %v1019_v32 }
 0x59c   :  { %v1021_v37 = vsub.f32 1.5, %v1020_v36 }
 0x59e   :  { %v1022_v38 = vmul.f32 %v6144_v3, %v1021_v37  ;;  %v1221_v37 = vld [vmem:[#allocation2 + $0xb0] sm:$0xff] }
 0x59f   :  { %1247 = vmatpush.msrb.mxu2 %v1221_v37 }
 0x5a0   :  { %v1026_v24 = vsel %vm1025_vm15, %v6144_v3, %v1022_v38  ;;  %v1220_v38 = vld [vmem:[#allocation2 + $0xa8] sm:$0xff] }
 0x5a1   :  { %v1038_v26 = vmul.f32 %v1026_v24, %v987_v19  ;;  %1248 = vmatpush.msrb.mxu2 %v1220_v38 }
 0x5a3   :  { %v1043_v39 = vmul.f32 %v6030_v25, %v1038_v26  ;;  %v1219_v26 = vld [vmem:[#allocation2 + $0xa0] sm:$0xff] }
 0x5a4   :  { %1249 = vmatpush.msrb.mxu2 %v1219_v26 }
 0x5a5   :  { %v1048_v11 = vadd.f32 %v6031_v43, %v1043_v39 }
 0x5a6   :  { %v1000_v20 = vpop.xlane.xlu0 %999 }
 0x5a7   :  { %v1003_v44 = vmul.f32 %v1000_v20, %v6841_v33  ;;  %5768 = vmatmul.msk.f32.gmra.mxu3 %vm39_vm0, %v1048_v11 }
 0x5a9   :  { %v1006_v46 = vadd.f32 1e-05, %v1003_v44 }
 0x5ab   :  { %6145 = vrsqrt.f32 %v1006_v46  ;;  %vm1033_vm10 = vweird.f32 %v1006_v46 }
 0x5b1   :  { %v6146_v12 = vpop.eup %6145 }
 0x5b2   :  { %v1028_v49 = vmul.f32 %v6146_v12, %v1006_v46  ;;  %vm1034_vm9 = vweird.f32 %v6146_v12 }
 0x5b3   :  { %vm1035_vm11 = vmor %vm1033_vm10, %vm1034_vm9 }
 0x5b4   :  { %v1029_v50 = vmul.f32 %v6146_v12, %v1028_v49  ;;  %v6034_v49 = vld [vmem:[#allocation2 + $0x366] ss:$0 sm:$0xff] }
 0x5b6   :  { %v1030_v40 = vmul.f32 0.5, %v1029_v50 }
 0x5b8   :  { %v1031_v54 = vsub.f32 1.5, %v1030_v40  ;;  %v6035_v40 = vld [vmem:[#allocation2 + $0x367] ss:$0 sm:$0xff] }
 0x5ba   :  { %v1032_v5 = vmul.f32 %v6146_v12, %v1031_v54 }
 0x5bc   :  { %v1036_v55 = vsel %vm1035_vm11, %v6146_v12, %v1032_v5 }
 0x5bd   :  { %v1039_v57 = vmul.f32 %v1036_v55, %v6848_v22  ;;  %v6033_v22 = vld [vmem:[#allocation2 + $0x363] ss:$0 sm:$0xff] }
 0x5bf   :  { %v1044_v58 = vmul.f32 %v6030_v25, %v1039_v57 }
 0x5c1   :  { %v1049_v47 = vadd.f32 %v6031_v43, %v1044_v58 }
 0x5c3   :  { %5769 = vmatmul.msk.f32.gmra.mxu3 %vm39_vm0, %v1049_v47 }
 0x5d4   :  { %v1082_v60 = vpop.f32.mrf.mxu3 }
 0x5d5   :  { %v1083_v19 = vadd.f32 %v6032_v59, %v1082_v60 }
 0x5d7   :  { %v1091_v16 = vmax.f32 %v1083_v19, 0.0 }
 0x5d9   :  { %5770 = vmatmul.msk.f32.vlgmr.msra.gmra.mxu0 %vm1104_vm12, %v1091_v16 }
 0x62a   :  { %v1085_v6 = vpop.f32.mrf.mxu3 }
 0x62b   :  { %v1086_v61 = vadd.f32 %v6032_v59, %v1085_v6 }
 0x62d   :  { %v1092_v62 = vmax.f32 %v1086_v61, 0.0 }
 0x62f   :  { %5771 = vmatmul.msk.f32.gmra.mxu0 %vm1104_vm12, %v1092_v62 }
 0x646   :  { %v1088_v15 = vpop.f32.mrf.mxu3 }
 0x647   :  { %v1089_v14 = vadd.f32 %v6032_v59, %v1088_v15 }
 0x649   :  { %v1093_v51 = vmax.f32 %v1089_v14, 0.0 }
 0x64b   :  { %5772 = vmatmul.msk.f32.gmra.mxu0 %vm1104_vm12, %v1093_v51 }
 0x656   :  { %v1131_v2 = vpop.f32.mrf.mxu0 }
 0x657   :  { %v1132_v4 = vadd.f32 %v6033_v22, %v1131_v2 }
 0x659   :  { %v1140_v35 = vadd.f32 %v1132_v4, %v6854_v29 }
 0x65b   :  { %v1143_v63 = vsel %vm39_vm0, %v1140_v35, 0.0 }
 0x65c   :  { %1144 = vadd.xlane.f32.xlu2 %v1143_v63 }
 0x6ac   :  { %v1134_v23 = vpop.f32.mrf.mxu0 }
 0x6ad   :  { %v1135_v7 = vadd.f32 %v6033_v22, %v1134_v23 }
 0x6af   :  { %v1141_v8 = vadd.f32 %v1135_v7, %v1048_v11 }
 0x6b1   :  { %v1146_v10 = vsel %vm39_vm0, %v1141_v8, 0.0 }
 0x6b2   :  { %1147 = vadd.xlane.f32.xlu1 %v1146_v10 }
 0x6c8   :  { %v1137_v18 = vpop.f32.mrf.mxu0 }
 0x6c9   :  { %v1138_v1 = vadd.f32 %v6033_v22, %v1137_v18 }
 0x6cb   :  { %v1142_v21 = vadd.f32 %v1138_v1, %v1049_v47  ;;  %v6036_v1 = vld [vmem:[#allocation2 + $0x368] ss:$0 sm:$0xff] }
 0x6cd   :  { %v1149_v0 = vsel %vm972_vm8, %v1142_v21, 0.0 }
 0x6ce   :  { %1150 = vadd.xlane.f32.xlu0 %v1149_v0 }
 0x6cf   :  { %v1145_v25 = vpop.xlane.xlu2 %1144 }
 0x6d0   :  { %v1152_v27 = vmul.f32 %v1145_v25, %v6841_v33 }
 0x6d2   :  { %v1155_v9 = vsub.f32 %v1140_v35, %v1152_v27 }
 0x6d4   :  { %v1158_v43 = vmul.f32 %v1155_v9, %v1155_v9 }
 0x6d6   :  { %v1161_v17 = vsel %vm39_vm0, %v1158_v43, 0.0 }
 0x6d7   :  { %1162 = vadd.xlane.f32.xlu2 %v1161_v17 }
 0x725   :  { %v1148_v29 = vpop.xlane.xlu1 %1147 }
 0x726   :  { %v1153_v30 = vmul.f32 %v1148_v29, %v6841_v33 }
 0x728   :  { %v1156_v28 = vsub.f32 %v1141_v8, %v1153_v30 }
 0x72a   :  { %v1159_v31 = vmul.f32 %v1156_v28, %v1156_v28 }
 0x72c   :  { %v1164_v3 = vsel %vm39_vm0, %v1159_v31, 0.0 }
 0x72d   :  { %1165 = vadd.xlane.f32.xlu1 %v1164_v3 }
 0x741   :  { %v1151_v32 = vpop.xlane.xlu0 %1150 }
 0x742   :  { %v1154_v36 = vmul.f32 %v1151_v32, %v6841_v33 }
 0x744   :  { %v1157_v24 = vsub.f32 %v1142_v21, %v1154_v36 }
 0x746   :  { %v1160_v39 = vmul.f32 %v1157_v24, %v1157_v24 }
 0x748   :  { %v1167_v41 = vsel %vm972_vm8, %v1160_v39, 0.0 }
 0x749   :  { %1168 = vadd.xlane.f32.xlu0 %v1167_v41 }
 0x74a   :  { %v1163_v34 = vpop.xlane.xlu2 %1162 }
 0x74b   :  { %v1170_v11 = vmul.f32 %v1163_v34, %v6841_v33 }
 0x74d   :  { %v1173_v42 = vadd.f32 1e-05, %v1170_v11 }
 0x74f   :  { %6147 = vrsqrt.f32 %v1173_v42  ;;  %vm1182_vm14 = vweird.f32 %v1173_v42 }
 0x755   :  { %v6148_v20 = vpop.eup %6147 }
 0x756   :  { %v1177_v44 = vmul.f32 %v6148_v20, %v1173_v42  ;;  %vm1183_vm13 = vweird.f32 %v6148_v20 }
 0x757   :  { %vm1184_vm15 = vmor %vm1182_vm14, %vm1183_vm13 }
 0x758   :  { %v1178_v45 = vmul.f32 %v6148_v20, %v1177_v44 }
 0x75a   :  { %v1179_v46 = vmul.f32 0.5, %v1178_v45 }
 0x75c   :  { %v1180_v48 = vsub.f32 1.5, %v1179_v46 }
 0x75e   :  { %v1181_v12 = vmul.f32 %v6148_v20, %v1180_v48 }
 0x760   :  { %v1185_v50 = vsel %vm1184_vm15, %v6148_v20, %v1181_v12 }
 0x761   :  { %v1206_v52 = vmul.f32 %v1185_v50, %v1155_v9 }
 0x763   :  { %v1211_v53 = vmul.f32 %v6034_v49, %v1206_v52 }
 0x765   :  { %v6877_v13 = vadd.f32 %v6035_v40, %v1211_v53 }
 0x767   :  { %5773 = vmatmul.msk.f32.vlgmr.msrb.gmra.mxu2 %vm39_vm0, %v6877_v13 }
 0x7a0   :  { %v1166_v54 = vpop.xlane.xlu1 %1165 }
 0x7a1   :  { %v1171_v5 = vmul.f32 %v1166_v54, %v6841_v33 }
 0x7a3   :  { %v1174_v55 = vadd.f32 1e-05, %v1171_v5 }
 0x7a5   :  { %6149 = vrsqrt.f32 %v1174_v55  ;;  %vm1192_vm10 = vweird.f32 %v1174_v55 }
 0x7ab   :  { %v6150_v57 = vpop.eup %6149 }
 0x7ac   :  { %v1187_v58 = vmul.f32 %v6150_v57, %v1174_v55  ;;  %vm1193_vm9 = vweird.f32 %v6150_v57 }
 0x7ad   :  { %vm1194_vm11 = vmor %vm1192_vm10, %vm1193_vm9 }
 0x7ae   :  { %v1188_v47 = vmul.f32 %v6150_v57, %v1187_v58 }
 0x7b0   :  { %v1189_v59 = vmul.f32 0.5, %v1188_v47 }
 0x7b2   :  { %v1190_v60 = vsub.f32 1.5, %v1189_v59 }
 0x7b4   :  { %v1191_v19 = vmul.f32 %v6150_v57, %v1190_v60 }
 0x7b6   :  { %v1195_v16 = vsel %vm1194_vm11, %v6150_v57, %v1191_v19 }
 0x7b7   :  { %v1207_v6 = vmul.f32 %v1195_v16, %v1156_v28 }
 0x7b9   :  { %v1212_v61 = vmul.f32 %v6034_v49, %v1207_v6 }
 0x7bb   :  { %v6882_v62 = vadd.f32 %v6035_v40, %v1212_v61 }
 0x7bc   :  { %v1169_v15 = vpop.xlane.xlu0 %1168 }
 0x7bd   :  { %v1172_v14 = vmul.f32 %v1169_v15, %v6841_v33  ;;  %5774 = vmatmul.msk.f32.gmra.mxu2 %vm39_vm0, %v6882_v62 }
 0x7bf   :  { %v1175_v51 = vadd.f32 1e-05, %v1172_v14 }
 0x7c1   :  { %6151 = vrsqrt.f32 %v1175_v51  ;;  %vm1202_vm14 = vweird.f32 %v1175_v51 }
 0x7c7   :  { %v6152_v22 = vpop.eup %6151 }
 0x7c8   :  { %v1197_v2 = vmul.f32 %v6152_v22, %v1175_v51  ;;  %vm1203_vm13 = vweird.f32 %v6152_v22 }
 0x7c9   :  { %vm1204_vm15 = vmor %vm1202_vm14, %vm1203_vm13 }
 0x7ca   :  { %v1198_v4 = vmul.f32 %v6152_v22, %v1197_v2 }
 0x7cc   :  { %v1199_v35 = vmul.f32 0.5, %v1198_v4 }
 0x7ce   :  { %v1200_v63 = vsub.f32 1.5, %v1199_v35 }
 0x7d0   :  { %v1201_v23 = vmul.f32 %v6152_v22, %v1200_v63 }
 0x7d2   :  { %v1205_v7 = vsel %vm1204_vm15, %v6152_v22, %v1201_v23 }
 0x7d3   :  { %v1208_v8 = vmul.f32 %v1205_v7, %v1157_v24 }
 0x7d5   :  { %v1213_v10 = vmul.f32 %v6034_v49, %v1208_v8 }
 0x7d7   :  { %v6887_v18 = vadd.f32 %v6035_v40, %v1213_v10 }
 0x7d9   :  { %5775 = vmatmul.msk.f32.gmra.mxu2 %vm39_vm0, %v6887_v18 }
 0x7ea   :  { %v1251_v21 = vpop.f32.mrf.mxu2 }
 0x7eb   :  { %v1252_v0 = vadd.f32 %v6036_v1, %v1251_v21 }
 0x7ed   :  { %1355 = vrot.lane.b32.xlu2 %v1252_v0, %s6422_s24  ;;  %1262 = vrot.lane.b32.xlu0 %v1252_v0, %s6424_s26 }
 0x7f5   :  { %1359 = vrot.lane.b32.xlu0 %v1252_v0, %s6423_s25 }
 0x7fd   :  { %1553 = vrot.lane.b32.xlu0 %v1252_v0, %s6428_s30 }
 0x840   :  { %v1254_v25 = vpop.f32.mrf.mxu2 }
 0x841   :  { %v1255_v27 = vadd.f32 %v6036_v1, %v1254_v25 }
 0x843   :  { %1361 = vrot.lane.b32.xlu1 %v1255_v27, %s6423_s25  ;;  %1264 = vrot.lane.b32.xlu2 %v1255_v27, %s6424_s26  ;;  %v1677_v29 = vrot.slane %v1255_v27, 2 }
 0x844   :  { %1458 = vrot.lane.b32.xlu0 %v1255_v27, %s6425_s27 }
 0x847   :  { %v1356_v28 = vpop.permute.xlu2 %1355 }
 0x84b   :  { %1456 = vrot.lane.b32.xlu1 %v1252_v0, %s6425_s27  ;;  %1452 = vrot.lane.b32.xlu2 %v1252_v0, %s6427_s29 }
 0x84c   :  { %1454 = vrot.lane.b32.xlu0 %v1255_v27, %s6427_s29 }
 0x853   :  { %1357 = vrot.lane.b32.xlu1 %v1255_v27, %s6422_s24  ;;  %1555 = vrot.lane.b32.xlu2 %v1255_v27, %s6428_s30 }
 0x85b   :  { %1549 = vrot.lane.b32.xlu1 %v1252_v0, %s6426_s28  ;;  %1551 = vrot.lane.b32.xlu2 %v1255_v27, %s6426_s28 }
 0x85c   :  { %v1257_v9 = vpop.f32.mrf.mxu2 }
 0x85d   :  { %v1258_v43 = vadd.f32 %v6036_v1, %v1257_v9 }
 0x85f   :  { %v6905_v17 = vrot.slane %v1258_v43, 2  ;;  %v1263_v3 = vpop.permute.xlu0 %1262 }
 0x861   :  { %1779 = vrot.lane.b32.xlu0 %v6905_v17, %s6423_s25  ;;  %v6911_v30 = vsel %vm498_vm1, %v1677_v29, %v6905_v17 }
 0x862   :  { %v6023_v31 = vpack.i.bf16 %v6911_v30, %v1252_v0 }
 0x863   :  { %1682 = vrot.lane.b32.xlu1 %v6905_v17, %s6424_s26  ;;  %1680 = vrot.lane.b32.xlu2 %v6911_v30, %s6424_s26 }
 0x867   :  { %v1360_v32 = vpop.permute.xlu0 %1359 }
 0x869   :  { %1973 = vrot.lane.b32.xlu0 %v6905_v17, %s6428_s30 }
 0x86b   :  { %1777 = vrot.lane.b32.xlu1 %v6911_v30, %s6423_s25  ;;  %1775 = vrot.lane.b32.xlu2 %v6905_v17, %s6422_s24 }
 0x86f   :  { %v1554_v38 = vpop.permute.xlu0 %1553 }
 0x871   :  { %1773 = vrot.lane.b32.xlu0 %v6911_v30, %s6422_s24 }
 0x873   :  { %1876 = vrot.lane.b32.xlu1 %v6905_v17, %s6425_s27  ;;  %1874 = vrot.lane.b32.xlu2 %v6911_v30, %s6425_s27 }
 0x879   :  { %1870 = vrot.lane.b32.xlu0 %v6911_v30, %s6427_s29 }
 0x87b   :  { %1971 = vrot.lane.b32.xlu1 %v6911_v30, %s6428_s30  ;;  %1967 = vrot.lane.b32.xlu2 %v6911_v30, %s6426_s28 }
 0x881   :  { %1969 = vrot.lane.b32.xlu0 %v6905_v17, %s6426_s28 }
 0x883   :  { %1872 = vrot.lane.b32.xlu1 %v6905_v17, %s6427_s29  ;;  %1321 = vrot.lane.b32.xlu2 %v1255_v27, %s6430_s5 }
 0x889   :  { %1418 = vrot.lane.b32.xlu0 %v1255_v27, %s6432_s7 }
 0x88b   :  { %1612 = vrot.lane.b32.xlu1 %v1255_v27, %s6431_s6  ;;  %1515 = vrot.lane.b32.xlu2 %v1255_v27, %s6429_s4 }
 0x891   :  { %1513 = vrot.lane.b32.xlu0 %v1252_v0, %s6429_s4 }
 0x893   :  { %1610 = vrot.lane.b32.xlu1 %v1252_v0, %s6431_s6  ;;  %1739 = vrot.lane.b32.xlu2 %v6905_v17, %s6430_s5 }
 0x899   :  { %6024 = vrot.lane.b32.xlu0 %v6023_v31, %s6432_s7 }
 0x89b   :  { %6019 = vrot.lane.b32.xlu1 %v6023_v31, %s6430_s5 }
 0x89d   :  { %v1265_v56 = vpop.permute.xlu2 %1264 }
 0x89e   :  { %5776 = vmatpush.xpose.msk.msrb.mxu1 %vm81_vm2, %v1265_v56 }
 0x8a2   :  { %5777 = vmatpush.xpose.msk.msrb.mxu1 %vm81_vm2, %v1263_v3 }
 0x8a5   :  { %v1453_v36 = vpop.permute.xlu2 %1452  ;;  %5778 = vmatmul.msk.f32.vlgmr.msrb.gmra.mxu1 %vm81_vm2, %v1252_v0 }
 0x8ad   :  { %v1556_v37 = vpop.permute.xlu2 %1555  ;;  %5779 = vmatmul.msk.f32.gmra.mxu1 %vm81_vm2, %v1255_v27 }
 0x8b5   :  { %v1362_v24 = vpop.permute.xlu1 %1361  ;;  %v1552_v26 = vpop.permute.xlu2 %1551 }
 0x8b6   :  { %v1459_v39 = vpop.permute.xlu0 %1458  ;;  %5783 = vmatpush.xpose.msk.msrb.mxu0 %vm81_vm2, %v1362_v24 }
 0x8b7   :  { %5790 = vmatpush.xpose.msk.msra.mxu1 %vm81_vm2, %v1459_v39 }
 0x8ba   :  { %5784 = vmatpush.xpose.msk.msrb.mxu0 %vm81_vm2, %v1360_v32 }
 0x8bd   :  { %v1457_v41 = vpop.permute.xlu1 %1456  ;;  %v1681_v34 = vpop.permute.xlu2 %1680  ;;  %5785 = vmatmul.msk.f32.vlgmr.msrb.gmra.mxu0 %vm81_vm2, %v1356_v28 }
 0x8be   :  { %5797 = vmatpush.xpose.msk.msra.mxu0 %vm81_vm2, %v1556_v37  ;;  %5791 = vmatpush.xpose.msk.msra.mxu1 %vm81_vm2, %v1457_v41  ;;  %v1455_v20 = vpop.permute.xlu0 %1454 }
 0x8c1   :  { %5792 = vmatmul.msk.f32.vlgmr.msra.gmra.mxu1 %vm81_vm2, %v1453_v36 }
 0x8c2   :  { %5798 = vmatpush.xpose.msk.msra.mxu0 %vm81_vm2, %v1554_v38 }
 0x8c5   :  { %v1358_v11 = vpop.permute.xlu1 %1357  ;;  %v1776_v42 = vpop.permute.xlu2 %1775 }
 0x8c6   :  { %5786 = vmatmul.msk.f32.gmra.mxu0 %vm81_vm2, %v1358_v11 }
 0x8c9   :  { %5793 = vmatmul.msk.f32.gmra.mxu1 %vm81_vm2, %v1455_v20 }
 0x8cd   :  { %v1550_v44 = vpop.permute.xlu1 %1549  ;;  %v1875_v45 = vpop.permute.xlu2 %1874 }
 0x8ce   :  { %5799 = vmatmul.msk.f32.vlgmr.msra.gmra.mxu0 %vm81_vm2, %v1550_v44 }
 0x8d3   :  { %v1780_v46 = vpop.permute.xlu0 %1779 }
 0x8d4   :  { %5811 = vmatpush.xpose.msk.msrb.mxu0 %vm81_vm2, %v1780_v46 }
 0x8d5   :  { %v1683_v48 = vpop.permute.xlu1 %1682  ;;  %v1968_v12 = vpop.permute.xlu2 %1967 }
 0x8d6   :  { %5800 = vmatmul.msk.f32.gmra.mxu0 %vm81_vm2, %v1552_v26  ;;  %5804 = vmatpush.xpose.msk.msrb.mxu1 %vm81_vm2, %v1683_v48 }
 0x8da   :  { %5805 = vmatpush.xpose.msk.msrb.mxu1 %vm81_vm2, %v1681_v34 }
 0x8db   :  { %v1974_v49 = vpop.permute.xlu0 %1973 }
 0x8dd   :  { %v1778_v50 = vpop.permute.xlu1 %1777  ;;  %v1322_v52 = vpop.permute.xlu2 %1321  ;;  %5806 = vmatmul.msk.f32.vlgmr.msrb.gmra.mxu1 %vm81_vm2, %v6911_v30 }
 0x8de   :  { %5780 = vmatpush.msk.msrb.mxu3 %vm148_vm3, %v1322_v52  ;;  %5812 = vmatpush.xpose.msk.msrb.mxu0 %vm81_vm2, %v1778_v50 }
 0x8e2   :  { %5825 = vmatpush.xpose.msk.msra.mxu0 %vm81_vm2, %v1974_v49 }
 0x8e3   :  { %v1774_v40 = vpop.permute.xlu0 %1773 }
 0x8e4   :  { %5813 = vmatmul.msk.f32.vlgmr.msrb.gmra.mxu0 %vm81_vm2, %v1774_v40 }
 0x8e5   :  { %v1877_v53 = vpop.permute.xlu1 %1876  ;;  %5807 = vmatmul.msk.f32.gmra.mxu1 %vm81_vm2, %v6905_v17  ;;  %v1516_v15 = vpop.permute.xlu2 %1515 }
 0x8e6   :  { %5818 = vmatpush.xpose.msk.msra.mxu1 %vm81_vm2, %v1877_v53 }
 0x8ea   :  { %5819 = vmatpush.xpose.msk.msra.mxu1 %vm81_vm2, %v1875_v45 }
 0x8eb   :  { %v1871_v54 = vpop.permute.xlu0 %1870 }
 0x8ec   :  { %5814 = vmatmul.msk.f32.gmra.mxu0 %vm81_vm2, %v1776_v42 }
 0x8ed   :  { %v1972_v5 = vpop.permute.xlu1 %1971  ;;  %5820 = vmatmul.msk.f32.vlgmr.msra.gmra.mxu1 %vm81_vm2, %v1871_v54  ;;  %v7049_v11 = vpop.permute.xlu2 %1739 }
 0x8ee   :  { %5826 = vmatpush.xpose.msk.msra.mxu0 %vm81_vm2, %v1972_v5 }
 0x8f3   :  { %v1970_v55 = vpop.permute.xlu0 %1969 }
 0x8f4   :  { %5827 = vmatmul.msk.f32.vlgmr.msra.gmra.mxu0 %vm81_vm2, %v1968_v12 }
 0x8f5   :  { %v1873_v57 = vpop.permute.xlu1 %1872 }
 0x8f6   :  { %5821 = vmatmul.msk.f32.gmra.mxu1 %vm81_vm2, %v1873_v57 }
 0x8fb   :  { %v1419_v58 = vpop.permute.xlu0 %1418 }
 0x8fc   :  { %5787 = vmatpush.msk.msra.mxu2 %vm148_vm3, %v1419_v58  ;;  %5828 = vmatmul.msk.f32.gmra.mxu0 %vm81_vm2, %v1970_v55 }
 0x8fd   :  { %v1613_v47 = vpop.permute.xlu1 %1612 }
 0x903   :  { %v1514_v59 = vpop.permute.xlu0 %1513 }
 0x905   :  { %v1611_v60 = vpop.permute.xlu1 %1610 }
 0x90b   :  { %v6986_v19 = vpop.permute.xlu0 %6024 }
 0x90c   :  { %v6026_v16 = vunpack.i.l.bf16 %v6986_v19 }
 0x90d   :  { %v6989_v6 = vpop.permute.xlu1 %6019 }
 0x90e   :  { %v6021_v61 = vunpack.i.l.bf16 %v6989_v6  ;;  %1444 = vmatpush.msra.mxu2 %v6026_v16 }
 0x910   :  { %5801 = vmatpush.msk.msrb.mxu2 %vm148_vm3, %v1613_v47  ;;  %1347 = vmatpush.msrb.mxu3 %v6021_v61 }
 0x912   :  { %5794 = vmatpush.msk.msra.mxu3 %vm148_vm3, %v1516_v15  ;;  %1638 = vmatpush.msrb.mxu2 %v1611_v60 }
 0x914   :  { %1541 = vmatpush.msra.mxu3 %v1514_v59 }
 0x922   :  { %v1291_v14 = vpop.f32.mrf.mxu1 }
 0x923   :  { %v1297_v51 = vsel %vm113_vm4, %v1291_v14, -inf }
 0x924   :  { %1298 = vmax.xlane.f32.xlu2 %v1297_v51 }
 0x92a   :  { %v1294_v22 = vpop.f32.mrf.mxu1 }
 0x92b   :  { %v1300_v2 = vsel %vm117_vm5, %v1294_v22, -inf }
 0x92c   :  { %1301 = vmax.xlane.f32.xlu0 %v1300_v2 }
 0x93a   :  { %v1388_v4 = vpop.f32.mrf.mxu0 }
 0x93b   :  { %v1394_v35 = vsel %vm113_vm4, %v1388_v4, -inf }
 0x93c   :  { %1395 = vmax.xlane.f32.xlu1 %v1394_v35 }
 0x93e   :  { %v6997_v63 = vpop.f32.mrf.mxu1 }
 0x93f   :  { %v1491_v7 = vsel %vm113_vm4, %v6997_v63, -inf }
 0x943   :  { %v6999_v23 = vpop.f32.mrf.mxu0 }
 0x944   :  { %1492 = vmax.xlane.f32.xlu1 %v1491_v7  ;;  %v1397_v8 = vsel %vm117_vm5, %v6999_v23, -inf }
 0x945   :  { %1398 = vmax.xlane.f32.xlu2 %v1397_v8 }
 0x946   :  { %v7005_v10 = vpop.f32.mrf.mxu1 }
 0x947   :  { %v1494_v0 = vsel %vm117_vm5, %v7005_v10, -inf }
 0x94b   :  { %v7007_v1 = vpop.f32.mrf.mxu0 }
 0x94c   :  { %v1588_v21 = vsel %vm113_vm4, %v7007_v1, -inf }
 0x94d   :  { %1589 = vmax.xlane.f32.xlu0 %v1588_v21  ;;  %1495 = vmax.xlane.f32.xlu2 %v1494_v0 }
 0x953   :  { %v7013_v25 = vpop.f32.mrf.mxu0 }
 0x954   :  { %v1591_v27 = vsel %vm117_vm5, %v7013_v25, -inf }
 0x955   :  { %1592 = vmax.xlane.f32.xlu1 %v1591_v27 }
 0x95a   :  { %v7017_v9 = vpop.f32.mrf.mxu1 }
 0x95b   :  { %v1715_v43 = vsel %vm113_vm4, %v7017_v9, -inf }
 0x95c   :  { %1716 = vmax.xlane.f32.xlu0 %v1715_v43 }
 0x961   :  { %v7021_v29 = vpop.f32.mrf.mxu0 }
 0x962   :  { %v7023_v28 = vpop.f32.mrf.mxu1  ;;  %v1812_v31 = vsel %vm113_vm4, %v7021_v29, -inf }
 0x963   :  { %1813 = vmax.xlane.f32.xlu2 %v1812_v31  ;;  %v1718_v3 = vsel %vm117_vm5, %v7023_v28, -inf }
 0x964   :  { %1719 = vmax.xlane.f32.xlu1 %v1718_v3 }
 0x969   :  { %v7029_v56 = vpop.f32.mrf.mxu0 }
 0x96a   :  { %v7031_v32 = vpop.f32.mrf.mxu1  ;;  %v1815_v36 = vsel %vm117_vm5, %v7029_v56, -inf }
 0x96b   :  { %1816 = vmax.xlane.f32.xlu0 %v1815_v36  ;;  %v1909_v37 = vsel %vm113_vm4, %v7031_v32, -inf }
 0x96c   :  { %1910 = vmax.xlane.f32.xlu2 %v1909_v37 }
 0x971   :  { %v7037_v38 = vpop.f32.mrf.mxu0 }
 0x972   :  { %v2006_v24 = vsel %vm113_vm4, %v7037_v38, -inf }
 0x973   :  { %2007 = vmax.xlane.f32.xlu1 %v2006_v24  ;;  %v7041_v26 = vpop.f32.mrf.mxu1 }
 0x974   :  { %v1912_v41 = vsel %vm117_vm5, %v7041_v26, -inf }
 0x979   :  { %v7043_v39 = vpop.f32.mrf.mxu0 }
 0x97a   :  { %v2009_v34 = vsel %vm117_vm5, %v7043_v39, -inf }
 0x97b   :  { %1913 = vmax.xlane.f32.xlu1 %v1912_v41  ;;  %2010 = vmax.xlane.f32.xlu0 %v2009_v34 }
 0x997   :  { %v1299_v42 = vpop.xlane.xlu2 %1298 }
 0x998   :  { %v1303_v20 = vsub.f32 %v1291_v14, %v1299_v42 }
 0x99a   :  { %v1305_v44 = vmul.f32 1.442695, %v1303_v20 }
 0x99c   :  { %6153 = vpow2.f32 %v1305_v44 }
 0x99f   :  { %v1302_v45 = vpop.xlane.xlu0 %1301 }
 0x9a0   :  { %v1304_v46 = vsub.f32 %v1294_v22, %v1302_v45 }
 0x9a2   :  { %v7051_v48 = vpop.eup %6153  ;;  %v1307_v12 = vmul.f32 1.442695, %v1304_v46 }
 0x9a3   :  { %v1309_v49 = vsel %vm113_vm4, %v7051_v48, 0.0 }
 0x9a4   :  { %6155 = vpow2.f32 %v1307_v12  ;;  %1310 = vadd.xlane.f32.xlu0 %v1309_v49 }
 0x9aa   :  { %v7055_v50 = vpop.eup %6155 }
 0x9ab   :  { %v1312_v52 = vsel %vm117_vm5, %v7055_v50, 0.0 }
 0x9ac   :  { %1313 = vadd.xlane.f32.xlu1 %v1312_v52 }
 0x9af   :  { %v1396_v40 = vpop.xlane.xlu1 %1395 }
 0x9b0   :  { %v1400_v53 = vsub.f32 %v1388_v4, %v1396_v40 }
 0x9b2   :  { %v1402_v54 = vmul.f32 1.442695, %v1400_v53 }
 0x9b4   :  { %6157 = vpow2.f32 %v1402_v54 }
 0x9b7   :  { %v1493_v5 = vpop.xlane.xlu1 %1492 }
 0x9b8   :  { %v1497_v55 = vsub.f32 %v6997_v63, %v1493_v5  ;;  %v1399_v57 = vpop.xlane.xlu2 %1398 }
 0x9b9   :  { %v1401_v58 = vsub.f32 %v6999_v23, %v1399_v57 }
 0x9ba   :  { %v7061_v47 = vpop.eup %6157  ;;  %v1499_v59 = vmul.f32 1.442695, %v1497_v55 }
 0x9bb   :  { %v1404_v60 = vmul.f32 1.442695, %v1401_v58  ;;  %v1406_v16 = vsel %vm113_vm4, %v7061_v47, 0.0 }
 0x9bc   :  { %6159 = vpow2.f32 %v1499_v59  ;;  %1407 = vadd.xlane.f32.xlu2 %v1406_v16 }
 0x9bd   :  { %6161 = vpow2.f32 %v1404_v60 }
 0x9c0   :  { %v1496_v61 = vpop.xlane.xlu2 %1495  ;;  %v1590_v15 = vpop.xlane.xlu0 %1589 }
 0x9c1   :  { %v1498_v14 = vsub.f32 %v7005_v10, %v1496_v61  ;;  %v1594_v51 = vsub.f32 %v7007_v1, %v1590_v15 }
 0x9c2   :  { %v7067_v22 = vpop.eup %6159 }
 0x9c3   :  { %v7069_v2 = vpop.eup %6161  ;;  %v1501_v4 = vmul.f32 1.442695, %v1498_v14  ;;  %v1596_v35 = vmul.f32 1.442695, %v1594_v51  ;;  %v1503_v63 = vsel %vm113_vm4, %v7067_v22, 0.0 }
 0x9c4   :  { %1504 = vadd.xlane.f32.xlu0 %v1503_v63  ;;  %v1409_v23 = vsel %vm117_vm5, %v7069_v2, 0.0 }
 0x9c5   :  { %6163 = vpow2.f32 %v1501_v4  ;;  %1410 = vadd.xlane.f32.xlu2 %v1409_v23  ;;  %v6022_v4 = vunpack.i.h.bf16 %v6989_v6 }
 0x9c6   :  { %6165 = vpow2.f32 %v1596_v35 }
 0x9c8   :  { %v1593_v7 = vpop.xlane.xlu1 %1592 }
 0x9c9   :  { %v1595_v8 = vsub.f32 %v7013_v25, %v1593_v7 }
 0x9cb   :  { %v7076_v10 = vpop.eup %6163  ;;  %v1598_v1 = vmul.f32 1.442695, %v1595_v8 }
 0x9cc   :  { %v7078_v21 = vpop.eup %6165  ;;  %v1506_v0 = vsel %vm117_vm5, %v7076_v10, 0.0 }
 0x9cd   :  { %6167 = vpow2.f32 %v1598_v1  ;;  %1507 = vadd.xlane.f32.xlu0 %v1506_v0  ;;  %v1600_v27 = vsel %vm113_vm4, %v7078_v21, 0.0 }
 0x9ce   :  { %1601 = vadd.xlane.f32.xlu1 %v1600_v27 }
 0x9cf   :  { %v1717_v43 = vpop.xlane.xlu0 %1716 }
 0x9d0   :  { %v1721_v31 = vsub.f32 %v7017_v9, %v1717_v43 }
 0x9d2   :  { %v1723_v3 = vmul.f32 1.442695, %v1721_v31 }
 0x9d3   :  { %v7085_v36 = vpop.eup %6167 }
 0x9d4   :  { %6169 = vpow2.f32 %v1723_v3  ;;  %v1603_v25 = vsel %vm117_vm5, %v7085_v36, 0.0 }
 0x9d5   :  { %1604 = vadd.xlane.f32.xlu2 %v1603_v25 }
 0x9d6   :  { %v1814_v37 = vpop.xlane.xlu2 %1813 }
 0x9d7   :  { %v1818_v24 = vsub.f32 %v7021_v29, %v1814_v37 }
 0x9d9   :  { %v1820_v41 = vmul.f32 1.442695, %v1818_v24 }
 0x9da   :  { %v7090_v34 = vpop.eup %6169 }
 0x9db   :  { %6171 = vpow2.f32 %v1820_v41  ;;  %v1727_v42 = vsel %vm113_vm4, %v7090_v34, 0.0 }
 0x9dc   :  { %1728 = vadd.xlane.f32.xlu0 %v1727_v42 }
 0x9de   :  { %v1817_v9 = vpop.xlane.xlu0 %1816 }
 0x9df   :  { %v1819_v20 = vsub.f32 %v7029_v56, %v1817_v9  ;;  %v1720_v56 = vpop.xlane.xlu1 %1719  ;;  %v1911_v53 = vpop.xlane.xlu2 %1910 }
 0x9e0   :  { %v1722_v52 = vsub.f32 %v7023_v28, %v1720_v56  ;;  %v1915_v54 = vsub.f32 %v7031_v32, %v1911_v53 }
 0x9e1   :  { %v7095_v44 = vpop.eup %6171  ;;  %v1822_v45 = vmul.f32 1.442695, %v1819_v20 }
 0x9e2   :  { %v1824_v46 = vsel %vm113_vm4, %v7095_v44, 0.0  ;;  %v1725_v40 = vmul.f32 1.442695, %v1722_v52  ;;  %v1917_v57 = vmul.f32 1.442695, %v1915_v54  ;;  %v6027_v52 = vunpack.i.h.bf16 %v6986_v19 }
 0x9e3   :  { %6173 = vpow2.f32 %v1822_v45  ;;  %1825 = vadd.xlane.f32.xlu1 %v1824_v46 }
 0x9e4   :  { %6175 = vpow2.f32 %v1725_v40 }
 0x9e5   :  { %6177 = vpow2.f32 %v1917_v57 }
 0x9e7   :  { %v2008_v49 = vpop.xlane.xlu1 %2007 }
 0x9e8   :  { %v2012_v60 = vsub.f32 %v7037_v38, %v2008_v49 }
 0x9e9   :  { %v7099_v29 = vpop.eup %6173 }
 0x9ea   :  { %v1827_v12 = vsel %vm117_vm5, %v7099_v29, 0.0  ;;  %v7116_v59 = vpop.eup %6175  ;;  %v2014_v32 = vmul.f32 1.442695, %v2012_v60 }
 0x9eb   :  { %1828 = vadd.xlane.f32.xlu2 %v1827_v12  ;;  %v7121_v61 = vpop.eup %6177 }
 0x9ec   :  { %v1921_v38 = vsel %vm113_vm4, %v7121_v61, 0.0 }
 0x9ee   :  { %v7113_v5 = vpop.xlane.xlu0 %2010 }
 0x9ef   :  { %v1914_v55 = vpop.xlane.xlu1 %1913  ;;  %v2013_v20 = vsub.f32 %v7043_v39, %v7113_v5 }
 0x9f0   :  { %1933 = vrot.lane.b32.xlu0 %v6905_v17, %s6429_s4  ;;  %v1916_v58 = vsub.f32 %v7041_v26, %v1914_v55 }
 0x9f2   :  { %v1919_v16 = vmul.f32 1.442695, %v1916_v58 }
 0x9fc   :  { %1836 = vrot.lane.b32.xlu1 %v6905_v17, %s6432_s7 }
 0xa03   :  { %1931 = vrot.lane.b32.xlu2 %v6911_v30, %s6429_s4 }
 0xa0b   :  { %2028 = vrot.lane.b32.xlu2 %v6911_v30, %s6431_s6  ;;  %v1730_v30 = vsel %vm117_vm5, %v7116_v59, 0.0 }
 0xa17   :  { %v1311_v28 = vpop.xlane.xlu0 %1310 }
 0xa18   :  { %6179 = vrcp.f32 %v1311_v28 }
 0xa19   :  { %6181 = vpow2.f32 %v1919_v16 }
 0xa1a   :  { %1731 = vadd.xlane.f32.xlu0 %v1730_v30  ;;  %6183 = vpow2.f32 %v2014_v32 }
 0xa1e   :  { %v6180_v15 = vpop.eup %6179 }
 0xa1f   :  { %v1317_v26 = vmul.f32 %v6180_v15, %v7051_v48  ;;  %v1314_v14 = vpop.xlane.xlu1 %1313  ;;  %v7127_v51 = vpop.eup %6181 }
 0xa20   :  { %6185 = vrcp.f32 %v1314_v14  ;;  %v7132_v35 = vpop.eup %6183  ;;  %v1924_v48 = vsel %vm117_vm5, %v7127_v51, 0.0 }
 0xa21   :  { %5781 = vmatmul.msk.f32.vlgmr.msrb.gmra.mxu3 %vm113_vm4, %v1317_v26  ;;  %v2018_v7 = vsel %vm113_vm4, %v7132_v35, 0.0 }
 0xa22   :  { %5808 = vmatpush.msk.msrb.mxu3 %vm148_vm3, %v7049_v11  ;;  %1922 = vadd.xlane.f32.xlu0 %v1921_v38 }
 0xa24   :  { %1765 = vmatpush.msrb.mxu3 %v6022_v4  ;;  %v2469_v4 = vld [vmem:[#allocation2 + $0x158] sm:$0xff] }
 0xa26   :  { %v6186_v63 = vpop.eup %6185  ;;  %1925 = vadd.xlane.f32.xlu1 %v1924_v48  ;;  %v2468_v48 = vld [vmem:[#allocation2 + $0x150] sm:$0xff] }
 0xa27   :  { %v1318_v23 = vmul.f32 %v6186_v63, %v7055_v50  ;;  %v2467_v63 = vld [vmem:[#allocation2 + $0x148] sm:$0xff] }
 0xa29   :  { %5782 = vmatmul.msk.f32.gmra.mxu3 %vm113_vm4, %v1318_v23 }
 0xa2a   :  { %2019 = vadd.xlane.f32.xlu0 %v2018_v7 }
 0xa2f   :  { %v1408_v6 = vpop.xlane.xlu2 %1407 }
 0xa30   :  { %6187 = vrcp.f32 %v1408_v6 }
 0xa36   :  { %v6188_v11 = vpop.eup %6187 }
 0xa37   :  { %v1414_v8 = vmul.f32 %v6188_v11, %v7061_v47  ;;  %v1505_v1 = vpop.xlane.xlu0 %1504 }
 0xa38   :  { %6189 = vrcp.f32 %v1505_v1  ;;  %v1411_v0 = vpop.xlane.xlu2 %1410 }
 0xa39   :  { %6191 = vrcp.f32 %v1411_v0  ;;  %5788 = vmatmul.msk.f32.vlgmr.msra.gmra.mxu2 %vm113_vm4, %v1414_v8  ;;  %v7191_v0 = vld [vmem:[%s8135_s1] sm:$0xff] }
 0xa3e   :  { %v6190_v27 = vpop.eup %6189  ;;  %2030 = vrot.lane.b32.xlu0 %v6905_v17, %s6431_s6 }
 0xa3f   :  { %v6192_v50 = vpop.eup %6191  ;;  %v1511_v43 = vmul.f32 %v6190_v27, %v7067_v22 }
 0xa40   :  { %v1508_v31 = vpop.xlane.xlu0 %1507  ;;  %v1415_v3 = vmul.f32 %v6192_v50, %v7069_v2 }
 0xa41   :  { %v1602_v25 = vpop.xlane.xlu1 %1601  ;;  %6193 = vrcp.f32 %v1508_v31  ;;  %5795 = vmatmul.msk.f32.vlgmr.msra.gmra.mxu3 %vm113_vm4, %v1511_v43  ;;  %v2104_v43 = vld [vmem:[#allocation2 + $0xd8] sm:$0xff]  ;;  %v2103_v31 = vld [vmem:[#allocation2 + $0xd0] sm:$0xff] }
 0xa42   :  { %6195 = vrcp.f32 %v1602_v25  ;;  %5789 = vmatmul.msk.f32.gmra.mxu2 %vm113_vm4, %v1415_v3  ;;  %2127 = vmatpush.msrb.mxu1 %v2104_v43  ;;  %v2102_v3 = vld [vmem:[#allocation2 + $0xc8] sm:$0xff]  ;;  %v2101_v25 = vld [vmem:[#allocation2 + $0xc0] sm:$0xff] }
 0xa44   :  { %2128 = vmatpush.msrb.mxu1 %v2103_v31 }
 0xa46   :  { %2129 = vmatpush.msrb.mxu1 %v2102_v3 }
 0xa47   :  { %v6194_v47 = vpop.eup %6193 }
 0xa48   :  { %v6196_v37 = vpop.eup %6195  ;;  %v1605_v24 = vpop.xlane.xlu2 %1604  ;;  %v1512_v41 = vmul.f32 %v6194_v47, %v7076_v10  ;;  %2130 = vmatpush.msrb.mxu1 %v2101_v25 }
 0xa49   :  { %v1608_v17 = vmul.f32 %v6196_v37, %v7078_v21  ;;  %6197 = vrcp.f32 %v1605_v24  ;;  %v2016_v21 = vmul.f32 1.442695, %v2013_v20 }
 0xa4a   :  { %5796 = vmatmul.msk.f32.gmra.mxu3 %vm113_vm4, %v1512_v41 }
 0xa4b   :  { %5802 = vmatmul.msk.f32.vlgmr.msrb.gmra.mxu2 %vm113_vm4, %v1608_v17 }
 0xa4f   :  { %v6198_v22 = vpop.eup %6197  ;;  %v1729_v2 = vpop.xlane.xlu0 %1728 }
 0xa50   :  { %6199 = vrcp.f32 %v1729_v2  ;;  %v1609_v42 = vmul.f32 %v6198_v22, %v7085_v36 }
 0xa51   :  { %6201 = vpow2.f32 %v2016_v21 }
 0xa53   :  { %5803 = vmatmul.msk.f32.gmra.mxu2 %vm113_vm4, %v1609_v42 }
 0xa56   :  { %v6200_v9 = vpop.eup %6199  ;;  %v1826_v56 = vpop.xlane.xlu1 %1825 }
 0xa57   :  { %v1735_v10 = vmul.f32 %v6200_v9, %v7090_v34  ;;  %v7159_v12 = vpop.eup %6201  ;;  %6203 = vrcp.f32 %v1826_v56 }
 0xa58   :  { %v2021_v49 = vsel %vm117_vm5, %v7159_v12, 0.0 }
 0xa59   :  { %5809 = vmatmul.msk.f32.vlgmr.msrb.gmra.mxu3 %vm113_vm4, %v1735_v10 }
 0xa5d   :  { %v6204_v39 = vpop.eup %6203 }
 0xa5e   :  { %v1829_v45 = vpop.xlane.xlu2 %1828  ;;  %v1832_v40 = vmul.f32 %v6204_v39, %v7095_v44 }
 0xa5f   :  { %6205 = vrcp.f32 %v1829_v45  ;;  %v7205_v45 = vld [vmem:[#allocation2 + $0x370] ss:$0 sm:$0xff] }
 0xa62   :  { %v1934_v46 = vpop.permute.xlu0 %1933 }
 0xa63   :  { %5822 = vmatpush.msk.msra.mxu3 %vm148_vm3, %v1934_v46 }
 0xa65   :  { %v6206_v53 = vpop.eup %6205 }
 0xa66   :  { %v1932_v36 = vpop.permute.xlu2 %1931  ;;  %v1833_v54 = vmul.f32 %v6206_v53, %v7099_v29 }
 0xa67   :  { %1959 = vmatpush.msra.mxu3 %v1932_v36 }
 0xa68   :  { %2022 = vadd.xlane.f32.xlu0 %v2021_v49 }
 0xa6e   :  { %v1837_v34 = vpop.permute.xlu1 %1836 }
 0xa6f   :  { %5815 = vmatpush.msk.msra.mxu2 %vm148_vm3, %v1837_v34 }
 0xa71   :  { %1862 = vmatpush.msra.mxu2 %v6027_v52 }
 0xa72   :  { %5816 = vmatmul.msk.f32.vlgmr.msra.gmra.mxu2 %vm113_vm4, %v1832_v40 }
 0xa7a   :  { %5817 = vmatmul.msk.f32.gmra.mxu2 %vm113_vm4, %v1833_v54 }
 0xa8d   :  { %v1732_v5 = vpop.xlane.xlu0 %1731 }
 0xa8e   :  { %6207 = vrcp.f32 %v1732_v5 }
 0xa94   :  { %v6208_v55 = vpop.eup %6207 }
 0xa95   :  { %v1923_v57 = vpop.xlane.xlu0 %1922  ;;  %v1736_v58 = vmul.f32 %v6208_v55, %v7116_v59  ;;  %v2029_v59 = vpop.permute.xlu2 %2028 }
 0xa96   :  { %6209 = vrcp.f32 %v1923_v57 }
 0xa97   :  { %5810 = vmatmul.msk.f32.gmra.mxu3 %vm113_vm4, %v1736_v58 }
 0xa99   :  { %v1926_v19 = vpop.xlane.xlu1 %1925 }
 0xa9a   :  { %6211 = vrcp.f32 %v1926_v19 }
 0xa9c   :  { %v6210_v60 = vpop.eup %6209 }
 0xa9d   :  { %v1929_v44 = vmul.f32 %v6210_v60, %v7121_v61  ;;  %v2020_v16 = vpop.xlane.xlu0 %2019  ;;  %v6038_v60 = vld [vmem:[#allocation2 + $0x369] ss:$0 sm:$0xff] }
 0xa9e   :  { %6213 = vrcp.f32 %v2020_v16 }
 0xa9f   :  { %5823 = vmatmul.msk.f32.vlgmr.msra.gmra.mxu3 %vm113_vm4, %v1929_v44 }
 0xaa0   :  { %v6212_v28 = vpop.eup %6211 }
 0xaa1   :  { %v1930_v29 = vmul.f32 %v6212_v28, %v7127_v51 }
 0xaa4   :  { %v6214_v30 = vpop.eup %6213  ;;  %v1349_v26 = vpop.f32.mrf.mxu3 }
 0xaa5   :  { %v2026_v15 = vmul.f32 %v6214_v30, %v7132_v35  ;;  %v2466_v35 = vld [vmem:[#allocation2 + $0x140] sm:$0xff] }
 0xaa7   :  { %5824 = vmatmul.msk.f32.gmra.mxu3 %vm113_vm4, %v1930_v29 }
 0xaac   :  { %v7178_v61 = vpop.f32.mrf.mxu3 }
 0xab0   :  { %v2031_v32 = vpop.permute.xlu0 %2030 }
 0xab1   :  { %5829 = vmatpush.msk.msrb.mxu2 %vm148_vm3, %v2031_v32 }
 0xab3   :  { %2056 = vmatpush.msrb.mxu2 %v2029_v59 }
 0xab4   :  { %5830 = vmatmul.msk.f32.vlgmr.msrb.gmra.mxu2 %vm113_vm4, %v2026_v15 }
 0xab5   :  { %2490 = vmatpush.msra.mxu2 %v2469_v4 }
 0xab7   :  { %2491 = vmatpush.msra.mxu2 %v2468_v48 }
 0xab9   :  { %2492 = vmatpush.msra.mxu2 %v2467_v63 }
 0xabb   :  { %2493 = vmatpush.msra.mxu2 %v2466_v35 }
 0xabc   :  { %v1446_v14 = vpop.f32.mrf.mxu2 }
 0xabd   :  { %1648 = vrot.lane.b32.xlu1 %v1446_v14, %s6421_s18 }
 0xac4   :  { %v1543_v38 = vpop.f32.mrf.mxu3 }
 0xac5   :  { %1656 = vrot.lane.b32.xlu2 %v1543_v38, %s6433_s8  ;;  %v1449_v51 = vpop.f32.mrf.mxu2 }
 0xac6   :  { %1650 = vrot.lane.b32.xlu1 %v1449_v51, %s6421_s18 }
 0xacd   :  { %v1546_v23 = vpop.f32.mrf.mxu3 }
 0xace   :  { %v1640_v7 = vpop.f32.mrf.mxu2  ;;  %1658 = vrot.lane.b32.xlu1 %v1546_v23, %s6433_s8  ;;  %v2465_v23 = vld [vmem:[%s8135_s1 + $0x8] sm:$0xff] }
 0xacf   :  { %1664 = vrot.lane.b32.xlu2 %v1640_v7, %s6434_s9 }
 0xad6   :  { %v1643_v6 = vpop.f32.mrf.mxu2 }
 0xad7   :  { %1666 = vrot.lane.b32.xlu2 %v1643_v6, %s6434_s9 }
 0xadb   :  { %v2023_v11 = vpop.xlane.xlu0 %2022 }
 0xadc   :  { %6215 = vrcp.f32 %v2023_v11  ;;  %v1767_v47 = vpop.f32.mrf.mxu3 }
 0xae2   :  { %v6216_v8 = vpop.eup %6215 }
 0xae3   :  { %v2027_v1 = vmul.f32 %v6216_v8, %v7159_v12 }
 0xae5   :  { %5831 = vmatmul.msk.f32.gmra.mxu2 %vm113_vm4, %v2027_v1 }
 0xaed   :  { %5841 = vmatmul.msk.f32.vlgmr.msra.gmra.mxu2 %vm39_vm0, %v7191_v0 }
 0xaf5   :  { %v1864_v27 = vpop.f32.mrf.mxu2  ;;  %5842 = vmatmul.msk.f32.gmra.mxu2 %vm39_vm0, %v2465_v23 }
 0xaf6   :  { %2066 = vrot.lane.b32.xlu0 %v1864_v27, %s6421_s18 }
 0xafd   :  { %v1867_v50 = vpop.f32.mrf.mxu2 }
 0xafe   :  { %2068 = vrot.lane.b32.xlu1 %v1867_v50, %s6421_s18 }
 0xb1a   :  { %v1770_v37 = vpop.f32.mrf.mxu3 }
 0xb1f   :  { %v1657_v41 = vpop.permute.xlu2 %1656 }
 0xb22   :  { %v1961_v24 = vpop.f32.mrf.mxu3 }
 0xb23   :  { %2074 = vrot.lane.b32.xlu2 %v1961_v24, %s6433_s8 }
 0xb29   :  { %v1665_v42 = vpop.permute.xlu2 %1664 }
 0xb2a   :  { %v1964_v17 = vpop.f32.mrf.mxu3 }
 0xb2b   :  { %2076 = vrot.lane.b32.xlu0 %v1964_v17, %s6433_s8 }
 0xb2f   :  { %v1649_v22 = vpop.permute.xlu1 %1648 }
 0xb30   :  { %v1670_v2 = vsel %vm81_vm2, %v1349_v26, %v1649_v22 }
 0xb31   :  { %v1672_v9 = vsel %vm491_vm6, %v1670_v2, %v1657_v41  ;;  %v1667_v56 = vpop.permute.xlu2 %1666 }
 0xb32   :  { %v1674_v20 = vsel %vm494_vm7, %v1672_v9, %v1665_v42  ;;  %v2223_v9 = vld [vmem:[#allocation2 + $0xf8] sm:$0xff] }
 0xb33   :  { %5832 = vmatmul.msk.f32.vlgmr.msrb.gmra.mxu1 %vm39_vm0, %v1674_v20  ;;  %2247 = vmatpush.msrb.mxu3 %v2223_v9 }
 0xb37   :  { %v2058_v10 = vpop.f32.mrf.mxu2 }
 0xb38   :  { %2082 = vrot.lane.b32.xlu2 %v2058_v10, %s6434_s9  ;;  %v1651_v36 = vpop.permute.xlu1 %1650  ;;  %v2221_v10 = vld [vmem:[#allocation2 + $0xe8] sm:$0xff] }
 0xb39   :  { %v1671_v52 = vsel %vm81_vm2, %v7178_v61, %v1651_v36 }
 0xb40   :  { %v1659_v34 = vpop.permute.xlu1 %1658 }
 0xb41   :  { %v1673_v53 = vsel %vm491_vm6, %v1671_v52, %v1659_v34 }
 0xb42   :  { %v1675_v58 = vsel %vm494_vm7, %v1673_v53, %v1667_v56 }
 0xb68   :  { %v2061_v21 = vpop.f32.mrf.mxu2  ;;  %v2067_v39 = vpop.permute.xlu0 %2066 }
 0xb69   :  { %2084 = vrot.lane.b32.xlu2 %v2061_v21, %s6434_s9  ;;  %v2088_v40 = vsel %vm81_vm2, %v1767_v47, %v2067_v39 }
 0xb70   :  { %v2495_v46 = vpop.f32.mrf.mxu2  ;;  %v2069_v30 = vpop.permute.xlu1 %2068 }
 0xb71   :  { %v7208_v12 = vadd.f32 %v7205_v45, %v2495_v46  ;;  %v2089_v59 = vsel %vm81_vm2, %v1770_v37, %v2069_v30  ;;  %v2220_v46 = vld [vmem:[#allocation2 + $0xe0] sm:$0xff] }
 0xb73   :  { %2502 = vrot.lane.b32.xlu1 %v7208_v12, %s6424_s26  ;;  %2567 = vrot.lane.b32.xlu0 %v7208_v12, %s6423_s25 }
 0xb7b   :  { %2565 = vrot.lane.b32.xlu1 %v7208_v12, %s6422_s24  ;;  %2632 = vrot.lane.b32.xlu0 %v7208_v12, %s6425_s27 }
 0xb7d   :  { %v2075_v49 = vpop.permute.xlu2 %2074 }
 0xb7e   :  { %v2090_v54 = vsel %vm491_vm6, %v2088_v40, %v2075_v49 }
 0xb83   :  { %2697 = vrot.lane.b32.xlu1 %v7208_v12, %s6428_s30 }
 0xb8b   :  { %2630 = vrot.lane.b32.xlu1 %v7208_v12, %s6427_s29 }
 0xb92   :  { %v2083_v5 = vpop.permute.xlu2 %2082 }
 0xb93   :  { %v2092_v55 = vsel %vm494_vm7, %v2090_v54, %v2083_v5  ;;  %2695 = vrot.lane.b32.xlu1 %v7208_v12, %s6426_s28 }
 0xb94   :  { %v2096_v57 = vrot.slane %v2092_v55, 6  ;;  %v7268_v55 = vld [vmem:[#allocation2 + $0x36c] ss:$0 sm:$0xff] }
 0xb96   :  { %v2100_v19 = vsel %vm148_vm3, %v1675_v58, %v2096_v57 }
 0xb97   :  { %5833 = vmatmul.msk.f32.gmra.mxu1 %vm39_vm0, %v2100_v19  ;;  %v7270_v19 = vld [vmem:[#allocation2 + $0x36d] ss:$0 sm:$0xff] }
 0xb9d   :  { %v2077_v32 = vpop.permute.xlu0 %2076 }
 0xb9e   :  { %v2091_v15 = vsel %vm491_vm6, %v2089_v59, %v2077_v32 }
 0xbb0   :  { %v2132_v44 = vpop.f32.mrf.mxu1 }
 0xbb1   :  { %v2133_v28 = vadd.f32 %v6038_v60, %v2132_v44  ;;  %v7273_v44 = vpop.f32.mrf.mxu2 }
 0xbb3   :  { %v2141_v29 = vadd.f32 %v2133_v28, %v6877_v13 }
 0xbb5   :  { %v2144_v16 = vsel %vm39_vm0, %v2141_v29, 0.0 }
 0xbb6   :  { %2145 = vadd.xlane.f32.xlu2 %v2144_v16 }
 0xbc3   :  { %v2085_v26 = vpop.permute.xlu2 %2084 }
 0xbc4   :  { %v2093_v61 = vsel %vm494_vm7, %v2091_v15, %v2085_v26 }
 0xbc5   :  { %v2097_v14 = vrot.slane %v2093_v61, 6 }
 0xbc7   :  { %v2098_v38 = vsel %vm148_vm3, %v2096_v57, %v2097_v14 }
 0xbc8   :  { %5834 = vmatmul.msk.f32.gmra.mxu1 %vm39_vm0, %v2098_v38 }
 0xbe5   :  { %v2503_v51 = vpop.permute.xlu1 %2502  ;;  %v2568_v4 = vpop.permute.xlu0 %2567 }
 0xbe6   :  { %5843 = vmatpush.xpose.msk.msra.mxu1 %vm81_vm2, %v2503_v51  ;;  %5846 = vmatpush.xpose.msk.msrb.mxu2 %vm81_vm2, %v2568_v4 }
 0xbe9   :  { %5844 = vmatmul.msk.f32.vlgmr.msra.gmra.mxu1 %vm81_vm2, %v7208_v12 }
 0xbed   :  { %v2566_v13 = vpop.permute.xlu1 %2565  ;;  %v2633_v63 = vpop.permute.xlu0 %2632 }
 0xbee   :  { %5849 = vmatpush.xpose.msk.msrb.mxu1 %vm81_vm2, %v2633_v63  ;;  %5847 = vmatmul.msk.f32.vlgmr.msrb.gmra.mxu2 %vm81_vm2, %v2566_v13 }
 0xbf5   :  { %v2698_v48 = vpop.permute.xlu1 %2697 }
 0xbf6   :  { %5852 = vmatpush.xpose.msk.msra.mxu2 %vm81_vm2, %v2698_v48 }
 0xbfd   :  { %v2631_v35 = vpop.permute.xlu1 %2630 }
 0xbfe   :  { %5850 = vmatmul.msk.f32.vlgmr.msrb.gmra.mxu1 %vm81_vm2, %v2631_v35 }
 0xc05   :  { %v2696_v11 = vpop.permute.xlu1 %2695 }
 0xc06   :  { %5853 = vmatmul.msk.f32.vlgmr.msra.gmra.mxu2 %vm81_vm2, %v2696_v11 }
 0xc14   :  { %v2135_v7 = vpop.f32.mrf.mxu1 }
 0xc15   :  { %v2136_v6 = vadd.f32 %v6038_v60, %v2135_v7 }
 0xc17   :  { %v2142_v8 = vadd.f32 %v2136_v6, %v6882_v62 }
 0xc19   :  { %v2147_v1 = vsel %vm39_vm0, %v2142_v8, 0.0 }
 0xc1a   :  { %2148 = vadd.xlane.f32.xlu0 %v2147_v1 }
 0xc29   :  { %v2146_v27 = vpop.xlane.xlu2 %2145 }
 0xc2a   :  { %v2153_v50 = vmul.f32 %v2146_v27, %v6841_v33  ;;  %v2271_v27 = vld [vmem:[#allocation2 + $0x138] sm:$0xff] }
 0xc2b   :  { %2291 = vmatpush.msrb.mxu0 %v2271_v27 }
 0xc2c   :  { %v2156_v43 = vsub.f32 %v2141_v29, %v2153_v50 }
 0xc2e   :  { %v2159_v31 = vmul.f32 %v2156_v43, %v2156_v43 }
 0xc30   :  { %v2162_v3 = vsel %vm39_vm0, %v2159_v31, 0.0 }
 0xc31   :  { %2163 = vadd.xlane.f32.xlu2 %v2162_v3 }
 0xc45   :  { %v2138_v25 = vpop.f32.mrf.mxu1 }
 0xc46   :  { %v2139_v47 = vadd.f32 %v6038_v60, %v2138_v25  ;;  %v2270_v25 = vld [vmem:[#allocation2 + $0x130] sm:$0xff] }
 0xc47   :  { %2292 = vmatpush.msrb.mxu0 %v2270_v25 }
 0xc48   :  { %v2143_v37 = vadd.f32 %v2139_v47, %v6887_v18  ;;  %v2222_v18 = vld [vmem:[#allocation2 + $0xf0] sm:$0xff] }
 0xc49   :  { %2248 = vmatpush.msrb.mxu3 %v2222_v18  ;;  %v2264_v18 = vld [vmem:[#allocation2 + $0x100] sm:$0xff] }
 0xc4a   :  { %v2150_v24 = vsel %vm972_vm8, %v2143_v37, 0.0 }
 0xc4b   :  { %2151 = vadd.xlane.f32.xlu1 %v2150_v24  ;;  %2249 = vmatpush.msrb.mxu3 %v2221_v10 }
 0xc4d   :  { %2250 = vmatpush.msrb.mxu3 %v2220_v46  ;;  %v7319_v46 = vadd.f32 %v7205_v45, %v7273_v44 }
 0xc66   :  { %v2525_v42 = vpop.f32.mrf.mxu1 }
 0xc67   :  { %v2528_v20 = vsel %vm81_vm2, %v2525_v42, -inf }
 0xc71   :  { %v7286_v15 = vpop.f32.mrf.mxu2 }
 0xc72   :  { %v2593_v26 = vsel %vm81_vm2, %v7286_v15, -inf }
 0xc7b   :  { %v2655_v21 = vpop.f32.mrf.mxu1 }
 0xc7c   :  { %v2658_v56 = vsel %vm81_vm2, %v2655_v21, -inf }
 0xc89   :  { %v7290_v61 = vpop.f32.mrf.mxu2 }
 0xc8a   :  { %v2723_v14 = vsel %vm81_vm2, %v7290_v61, -inf }
 0xc8d   :  { %v2149_v62 = vpop.xlane.xlu0 %2148 }
 0xc8e   :  { %v2154_v41 = vmul.f32 %v2149_v62, %v6841_v33  ;;  %v2268_v62 = vld [vmem:[#allocation2 + $0x120] sm:$0xff] }
 0xc90   :  { %v7260_v17 = vsub.f32 %v2142_v8, %v2154_v41 }
 0xc92   :  { %v2160_v22 = vmul.f32 %v7260_v17, %v7260_v17 }
 0xc94   :  { %v2165_v2 = vsel %vm39_vm0, %v2160_v22, 0.0  ;;  %v2267_v22 = vld [vmem:[#allocation2 + $0x118] sm:$0xff] }
 0xc95   :  { %2166 = vadd.xlane.f32.xlu2 %v2165_v2 }
 0xc9d   :  { %2529 = vmax.xlane.f32.xlu2 %v2528_v20  ;;  %v2266_v20 = vld [vmem:[#allocation2 + $0x110] sm:$0xff] }
 0xca4   :  { %v2164_v36 = vpop.xlane.xlu2 %2163 }
 0xca5   :  { %v2171_v49 = vmul.f32 %v2164_v36, %v6841_v33  ;;  %2659 = vmax.xlane.f32.xlu2 %v2658_v56 }
 0xca7   :  { %v2174_v39 = vadd.f32 1e-05, %v2171_v49  ;;  %v7325_v49 = vld [vmem:[#allocation2 + $0x36a] ss:$0 sm:$0xff] }
 0xca9   :  { %6217 = vrsqrt.f32 %v2174_v39  ;;  %vm2183_vm9 = vweird.f32 %v2174_v39 }
 0xcaf   :  { %v6218_v34 = vpop.eup %6217 }
 0xcb0   :  { %v2178_v52 = vmul.f32 %v6218_v34, %v2174_v39  ;;  %vm2184_vm5 = vweird.f32 %v6218_v34 }
 0xcb1   :  { %vm2185_vm10 = vmor %vm2183_vm9, %vm2184_vm5 }
 0xcb2   :  { %v2179_v40 = vmul.f32 %v6218_v34, %v2178_v52 }
 0xcb4   :  { %v2180_v53 = vmul.f32 0.5, %v2179_v40 }
 0xcb6   :  { %v2181_v54 = vsub.f32 1.5, %v2180_v53 }
 0xcb8   :  { %v2182_v5 = vmul.f32 %v6218_v34, %v2181_v54 }
 0xcba   :  { %v2186_v57 = vsel %vm2185_vm10, %v6218_v34, %v2182_v5 }
 0xcbb   :  { %v2207_v58 = vmul.f32 %v2186_v57, %v2156_v43 }
 0xcbd   :  { %v2212_v60 = vmul.f32 %v7268_v55, %v2207_v58 }
 0xcbe   :  { %v2152_v28 = vpop.xlane.xlu1 %2151 }
 0xcbf   :  { %v2155_v29 = vmul.f32 %v2152_v28, %v6841_v33  ;;  %v7277_v16 = vadd.f32 %v7270_v19, %v2212_v60 }
 0xcc1   :  { %v7279_v30 = vsub.f32 %v2143_v37, %v2155_v29  ;;  %5835 = vmatmul.msk.f32.vlgmr.msrb.gmra.mxu3 %vm39_vm0, %v7277_v16  ;;  %v2269_v37 = vld [vmem:[#allocation2 + $0x128] sm:$0xff] }
 0xcc2   :  { %2293 = vmatpush.msrb.mxu0 %v2269_v37 }
 0xcc3   :  { %v2161_v32 = vmul.f32 %v7279_v30, %v7279_v30 }
 0xcc4   :  { %2294 = vmatpush.msrb.mxu0 %v2268_v62 }
 0xcc5   :  { %v2168_v59 = vsel %vm972_vm8, %v2161_v32, 0.0 }
 0xcc6   :  { %2169 = vadd.xlane.f32.xlu0 %v2168_v59  ;;  %2295 = vmatpush.msrb.mxu0 %v2267_v22 }
 0xcc8   :  { %2296 = vmatpush.msrb.mxu0 %v2266_v20 }
 0xcce   :  { %2594 = vmax.xlane.f32.xlu0 %v2593_v26 }
 0xcd6   :  { %2724 = vmax.xlane.f32.xlu0 %v2723_v14 }
 0xcea   :  { %2604 = vrot.lane.b32.xlu0 %v7208_v12, %s6432_s7 }
 0xd08   :  { %v2167_v38 = vpop.xlane.xlu2 %2166 }
 0xd09   :  { %v2172_v51 = vmul.f32 %v2167_v38, %v6841_v33 }
 0xd0b   :  { %v2175_v13 = vadd.f32 1e-05, %v2172_v51 }
 0xd0d   :  { %6219 = vrsqrt.f32 %v2175_v13  ;;  %vm2193_vm13 = vweird.f32 %v2175_v13 }
 0xd10   :  { %v2530_v4 = vpop.xlane.xlu2 %2529 }
 0xd11   :  { %v2531_v48 = vsub.f32 %v2525_v42, %v2530_v4 }
 0xd13   :  { %v6220_v63 = vpop.eup %6219  ;;  %v2532_v35 = vmul.f32 1.442695, %v2531_v48 }
 0xd14   :  { %v2188_v23 = vmul.f32 %v6220_v63, %v2175_v13  ;;  %vm2194_vm11 = vweird.f32 %v6220_v63 }
 0xd15   :  { %6221 = vpow2.f32 %v2532_v35  ;;  %vm2195_vm14 = vmor %vm2193_vm13, %vm2194_vm11 }
 0xd16   :  { %v2189_v7 = vmul.f32 %v6220_v63, %v2188_v23 }
 0xd18   :  { %v2190_v6 = vmul.f32 0.5, %v2189_v7  ;;  %v2660_v11 = vpop.xlane.xlu2 %2659 }
 0xd19   :  { %v2661_v8 = vsub.f32 %v2655_v21, %v2660_v11 }
 0xd1a   :  { %v2191_v1 = vsub.f32 1.5, %v2190_v6 }
 0xd1b   :  { %v7297_v50 = vpop.eup %6221  ;;  %v2662_v43 = vmul.f32 1.442695, %v2661_v8 }
 0xd1c   :  { %v2192_v31 = vmul.f32 %v6220_v63, %v2191_v1  ;;  %v2534_v3 = vsel %vm81_vm2, %v7297_v50, 0.0 }
 0xd1d   :  { %6223 = vpow2.f32 %v2662_v43  ;;  %2535 = vadd.xlane.f32.xlu2 %v2534_v3 }
 0xd1e   :  { %v2196_v47 = vsel %vm2195_vm14, %v6220_v63, %v2192_v31 }
 0xd1f   :  { %v2208_v24 = vmul.f32 %v2196_v47, %v7260_v17  ;;  %v2265_v17 = vld [vmem:[#allocation2 + $0x108] sm:$0xff] }
 0xd20   :  { %2297 = vmatpush.msrb.mxu0 %v2265_v17 }
 0xd21   :  { %v2213_v41 = vmul.f32 %v7268_v55, %v2208_v24 }
 0xd22   :  { %2298 = vmatpush.msrb.mxu0 %v2264_v18 }
 0xd23   :  { %v7303_v2 = vpop.eup %6223  ;;  %v7306_v42 = vadd.f32 %v7270_v19, %v2213_v41 }
 0xd24   :  { %v2664_v9 = vsel %vm81_vm2, %v7303_v2, 0.0 }
 0xd25   :  { %5836 = vmatmul.msk.f32.gmra.mxu3 %vm39_vm0, %v7306_v42  ;;  %2665 = vadd.xlane.f32.xlu0 %v2664_v9 }
 0xd35   :  { %2539 = vrot.lane.b32.xlu2 %v7208_v12, %s6430_s5 }
 0xd39   :  { %2734 = vrot.lane.b32.xlu0 %v7208_v12, %s6431_s6  ;;  %v2170_v10 = vpop.xlane.xlu0 %2169 }
 0xd3a   :  { %v2173_v21 = vmul.f32 %v2170_v10, %v6841_v33 }
 0xd3c   :  { %v2176_v56 = vadd.f32 1e-05, %v2173_v21 }
 0xd3d   :  { %2776 = vrot.lane.b32.xlu2 %v7319_v46, %s6424_s26 }
 0xd3e   :  { %6225 = vrsqrt.f32 %v2176_v56  ;;  %vm2203_vm5 = vweird.f32 %v2176_v56 }
 0xd41   :  { %2841 = vrot.lane.b32.xlu0 %v7319_v46, %s6423_s25  ;;  %v2595_v36 = vpop.xlane.xlu0 %2594 }
 0xd42   :  { %v2596_v39 = vsub.f32 %v7286_v15, %v2595_v36 }
 0xd44   :  { %v6226_v34 = vpop.eup %6225  ;;  %v2597_v52 = vmul.f32 1.442695, %v2596_v39  ;;  %v2252_v40 = vpop.f32.mrf.mxu3 }
 0xd45   :  { %v2198_v53 = vmul.f32 %v6226_v34, %v2176_v56  ;;  %v2253_v45 = vadd.f32 %v7325_v49, %v2252_v40  ;;  %2839 = vrot.lane.b32.xlu2 %v7319_v46, %s6422_s24  ;;  %vm2204_vm15 = vweird.f32 %v6226_v34 }
 0xd46   :  { %6227 = vpow2.f32 %v2597_v52  ;;  %vm2205_vm9 = vmor %vm2203_vm5, %vm2204_vm15 }
 0xd47   :  { %v2199_v54 = vmul.f32 %v6226_v34, %v2198_v53  ;;  %v2261_v5 = vmax.f32 %v2253_v45, 0.0 }
 0xd49   :  { %v2200_v57 = vmul.f32 0.5, %v2199_v54  ;;  %5838 = vmatmul.msk.f32.vlgmr.msrb.gmra.mxu0 %vm1104_vm12, %v2261_v5  ;;  %2971 = vrot.lane.b32.xlu0 %v7319_v46, %s6428_s30  ;;  %v2725_v58 = vpop.xlane.xlu0 %2724 }
 0xd4a   :  { %v2726_v60 = vsub.f32 %v7290_v61, %v2725_v58 }
 0xd4b   :  { %v2201_v44 = vsub.f32 1.5, %v2200_v57 }
 0xd4c   :  { %v6228_v28 = vpop.eup %6227  ;;  %v2727_v29 = vmul.f32 1.442695, %v2726_v60  ;;  %v3052_v60 = vld [vmem:[#allocation2 + $0x178] sm:$0xff] }
 0xd4d   :  { %v2202_v32 = vmul.f32 %v6226_v34, %v2201_v44  ;;  %2904 = vrot.lane.b32.xlu2 %v7319_v46, %s6427_s29  ;;  %v2599_v59 = vsel %vm81_vm2, %v6228_v28, 0.0  ;;  %v3051_v44 = vld [vmem:[#allocation2 + $0x170] sm:$0xff] }
 0xd4e   :  { %6229 = vpow2.f32 %v2727_v29  ;;  %2600 = vadd.xlane.f32.xlu1 %v2599_v59 }
 0xd4f   :  { %v2206_v15 = vsel %vm2205_vm9, %v6226_v34, %v2202_v32 }
 0xd50   :  { %v2209_v26 = vmul.f32 %v2206_v15, %v7279_v30 }
 0xd52   :  { %v2214_v14 = vmul.f32 %v7268_v55, %v2209_v26 }
 0xd54   :  { %v6230_v61 = vpop.eup %6229  ;;  %v7341_v38 = vadd.f32 %v7270_v19, %v2214_v14 }
 0xd55   :  { %v2729_v51 = vsel %vm81_vm2, %v6230_v61, 0.0 }
 0xd56   :  { %5837 = vmatmul.msk.f32.gmra.mxu3 %vm39_vm0, %v7341_v38  ;;  %2730 = vadd.xlane.f32.xlu1 %v2729_v51 }
 0xd5c   :  { %v2605_v13 = vpop.permute.xlu0 %2604 }
 0xd5d   :  { %2625 = vmatpush.msra.mxu0 %v2605_v13 }
 0xd6f   :  { %2669 = vrot.lane.b32.xlu1 %v7208_v12, %s6429_s4 }
 0xd77   :  { %2906 = vrot.lane.b32.xlu1 %v7319_v46, %s6425_s27 }
 0xd7f   :  { %2969 = vrot.lane.b32.xlu1 %v7319_v46, %s6426_s28 }
 0xd90   :  { %v2536_v55 = vpop.xlane.xlu2 %2535 }
 0xd91   :  { %6231 = vrcp.f32 %v2536_v55 }
 0xd97   :  { %v6232_v19 = vpop.eup %6231 }
 0xd98   :  { %v2538_v30 = vmul.f32 %v6232_v19, %v7297_v50  ;;  %v2540_v4 = vpop.permute.xlu2 %2539  ;;  %v2666_v63 = vpop.xlane.xlu0 %2665 }
 0xd99   :  { %2560 = vmatpush.msra.mxu3 %v2540_v4  ;;  %6233 = vrcp.f32 %v2666_v63 }
 0xd9a   :  { %5845 = vmatmul.msk.f32.vlgmr.msra.gmra.mxu3 %vm81_vm2, %v2538_v30 }
 0xd9f   :  { %v6234_v3 = vpop.eup %6233 }
 0xda0   :  { %v2777_v48 = vpop.permute.xlu2 %2776  ;;  %v2668_v47 = vmul.f32 %v6234_v3, %v7303_v2 }
 0xda1   :  { %5855 = vmatpush.xpose.msk.msra.mxu1 %vm81_vm2, %v2777_v48 }
 0xda4   :  { %5856 = vmatmul.msk.f32.vlgmr.msra.gmra.mxu1 %vm81_vm2, %v7319_v46 }
 0xda8   :  { %v2255_v12 = vpop.f32.mrf.mxu3  ;;  %v2840_v11 = vpop.permute.xlu2 %2839 }
 0xda9   :  { %v2256_v35 = vadd.f32 %v7325_v49, %v2255_v12 }
 0xdab   :  { %v2262_v23 = vmax.f32 %v2256_v35, 0.0  ;;  %v2735_v7 = vpop.permute.xlu0 %2734 }
 0xdac   :  { %2755 = vmatpush.msrb.mxu0 %v2735_v7 }
 0xdad   :  { %5839 = vmatmul.msk.f32.gmra.mxu0 %vm1104_vm12, %v2262_v23 }
 0xdb0   :  { %v2905_v22 = vpop.permute.xlu2 %2904 }
 0xdb3   :  { %v2842_v6 = vpop.permute.xlu0 %2841 }
 0xdb4   :  { %5858 = vmatpush.xpose.msk.msrb.mxu2 %vm81_vm2, %v2842_v6 }
 0xdb7   :  { %5859 = vmatmul.msk.f32.vlgmr.msrb.gmra.mxu2 %vm81_vm2, %v2840_v11 }
 0xdbb   :  { %v2972_v8 = vpop.permute.xlu0 %2971 }
 0xdbc   :  { %5864 = vmatpush.xpose.msk.msra.mxu2 %vm81_vm2, %v2972_v8 }
 0xdc1   :  { %v2601_v1 = vpop.xlane.xlu1 %2600 }
 0xdc2   :  { %6235 = vrcp.f32 %v2601_v1 }
 0xdc6   :  { %v2300_v2 = vpop.f32.mrf.mxu0 }
 0xdc8   :  { %v6236_v25 = vpop.eup %6235 }
 0xdc9   :  { %v2731_v27 = vpop.xlane.xlu1 %2730  ;;  %v2603_v24 = vmul.f32 %v6236_v25, %v6228_v28 }
 0xdca   :  { %6237 = vrcp.f32 %v2731_v27 }
 0xdd0   :  { %v6238_v62 = vpop.eup %6237 }
 0xdd1   :  { %v2733_v9 = vmul.f32 %v6238_v62, %v6230_v61 }
 0xdd9   :  { %v2258_v50 = vpop.f32.mrf.mxu3 }
 0xdda   :  { %v2259_v43 = vadd.f32 %v7325_v49, %v2258_v50  ;;  %v7376_v49 = vld [vmem:[#allocation2 + $0x36b] ss:$0 sm:$0xff] }
 0xddb   :  { %v2301_v39 = vadd.f32 %v7376_v49, %v2300_v2 }
 0xddc   :  { %v2263_v31 = vmax.f32 %v2259_v43, 0.0 }
 0xddd   :  { %v2309_v52 = vadd.f32 %v2301_v39, %v7277_v16  ;;  %v3050_v16 = vld [vmem:[#allocation2 + $0x168] sm:$0xff] }
 0xdde   :  { %5840 = vmatmul.msk.f32.gmra.mxu0 %vm1104_vm12, %v2263_v31 }
 0xddf   :  { %v2312_v53 = vsel %vm39_vm0, %v2309_v52, 0.0 }
 0xde1   :  { %v2670_v37 = vpop.permute.xlu1 %2669 }
 0xde2   :  { %2690 = vmatpush.msrb.mxu3 %v2670_v37 }
 0xde3   :  { %5851 = vmatmul.msk.f32.vlgmr.msrb.gmra.mxu3 %vm81_vm2, %v2668_v47 }
 0xde6   :  { %5848 = vmatmul.msk.f32.vlgmr.msra.gmra.mxu0 %vm81_vm2, %v2603_v24 }
 0xde9   :  { %v2907_v41 = vpop.permute.xlu1 %2906 }
 0xdea   :  { %5861 = vmatpush.xpose.msk.msrb.mxu1 %vm81_vm2, %v2907_v41 }
 0xded   :  { %5862 = vmatmul.msk.f32.vlgmr.msrb.gmra.mxu1 %vm81_vm2, %v2905_v22 }
 0xdee   :  { %5854 = vmatmul.msk.f32.vlgmr.msrb.gmra.mxu0 %vm81_vm2, %v2733_v9  ;;  %3073 = vmatpush.msra.mxu1 %v3052_v60  ;;  %v7418_v60 = vld [vmem:[#allocation2 + $0x36e] ss:$0 sm:$0xff] }
 0xdf0   :  { %3074 = vmatpush.msra.mxu1 %v3051_v44 }
 0xdf1   :  { %v2970_v20 = vpop.permute.xlu1 %2969 }
 0xdf2   :  { %5865 = vmatmul.msk.f32.vlgmr.msra.gmra.mxu2 %vm81_vm2, %v2970_v20  ;;  %3075 = vmatpush.msra.mxu1 %v3050_v16 }
 0xe1d   :  { %v2562_v10 = vpop.f32.mrf.mxu3 }
 0xe21   :  { %v2799_v54 = vpop.f32.mrf.mxu1 }
 0xe22   :  { %v2802_v5 = vsel %vm81_vm2, %v2799_v54, -inf }
 0xe2a   :  { %v2303_v17 = vpop.f32.mrf.mxu0 }
 0xe2b   :  { %v2304_v34 = vadd.f32 %v7376_v49, %v2303_v17 }
 0xe2d   :  { %v2310_v40 = vadd.f32 %v2304_v34, %v7306_v42  ;;  %v3049_v42 = vld [vmem:[#allocation2 + $0x160] sm:$0xff] }
 0xe2e   :  { %3076 = vmatpush.msra.mxu1 %v3049_v42 }
 0xe2f   :  { %v2315_v45 = vsel %vm39_vm0, %v2310_v40, 0.0 }
 0xe3a   :  { %v2864_v35 = vpop.f32.mrf.mxu2 }
 0xe3b   :  { %v2867_v7 = vsel %vm81_vm2, %v2864_v35, -inf }
 0xe5b   :  { %v7371_v18 = vpop.f32.mrf.mxu0 }
 0xe63   :  { %v2627_v21 = vpop.f32.mrf.mxu0 }
 0xe64   :  { %2761 = vrot.lane.b32.xlu0 %v2627_v21, %s6421_s18 }
 0xe66   :  { %v2692_v56 = vpop.f32.mrf.mxu3 }
 0xe67   :  { %2765 = vrot.lane.b32.xlu2 %v2692_v56, %s6433_s8 }
 0xe6a   :  { %v2929_v57 = vpop.f32.mrf.mxu1 }
 0xe6b   :  { %v2757_v36 = vpop.f32.mrf.mxu0  ;;  %v2932_v58 = vsel %vm81_vm2, %v2929_v57, -inf }
 0xe6c   :  { %2769 = vrot.lane.b32.xlu1 %v2757_v36, %s6434_s9 }
 0xe75   :  { %v2994_v8 = vpop.f32.mrf.mxu2 }
 0xe76   :  { %v2997_v27 = vsel %vm81_vm2, %v2994_v8, -inf }
 0xe8e   :  { %2313 = vadd.xlane.f32.xlu0 %v2312_v53 }
 0xe90   :  { %2316 = vadd.xlane.f32.xlu2 %v2315_v45 }
 0xe96   :  { %2803 = vmax.xlane.f32.xlu0 %v2802_v5 }
 0xe9e   :  { %2933 = vmax.xlane.f32.xlu0 %v2932_v58 }
 0xec1   :  { %v2766_v32 = vpop.permute.xlu2 %2765 }
 0xed6   :  { %v2762_v28 = vpop.permute.xlu0 %2761 }
 0xed7   :  { %v2772_v29 = vsel %vm81_vm2, %v2562_v10, %v2762_v28 }
 0xed8   :  { %v2773_v15 = vsel %vm491_vm6, %v2772_v29, %v2766_v32  ;;  %v7424_v32 = vld [vmem:[#allocation2 + $0x36f] ss:$0 sm:$0xff] }
 0xede   :  { %v2770_v59 = vpop.permute.xlu1 %2769 }
 0xedf   :  { %v2774_v26 = vsel %vm494_vm7, %v2773_v15, %v2770_v59 }
 0xee0   :  { %5867 = vmatmul.msk.f32.vlgmr.msra.gmra.mxu1 %vm39_vm0, %v2774_v26 }
 0xf01   :  { %v2314_v14 = vpop.xlane.xlu0 %2313 }
 0xf02   :  { %v2321_v61 = vmul.f32 %v2314_v14, %v6841_v33 }
 0xf03   :  { %v2317_v51 = vpop.xlane.xlu2 %2316 }
 0xf04   :  { %v7391_v13 = vsub.f32 %v2309_v52, %v2321_v61  ;;  %v2322_v55 = vmul.f32 %v2317_v51, %v6841_v33  ;;  %v7414_v52 = vld [vmem:[#allocation2 + $0x371] ss:$0 sm:$0xff] }
 0xf06   :  { %v7394_v19 = vsub.f32 %v2310_v40, %v2322_v55  ;;  %v2327_v30 = vmul.f32 %v7391_v13, %v7391_v13 }
 0xf08   :  { %v2330_v4 = vsel %vm39_vm0, %v2327_v30, 0.0  ;;  %v2328_v48 = vmul.f32 %v7394_v19, %v7394_v19 }
 0xf09   :  { %2331 = vadd.xlane.f32.xlu1 %v2330_v4  ;;  %v2804_v12 = vpop.xlane.xlu0 %2803 }
 0xf0a   :  { %v2333_v63 = vsel %vm39_vm0, %v2328_v48, 0.0  ;;  %v2805_v23 = vsub.f32 %v2799_v54, %v2804_v12 }
 0xf0b   :  { %2334 = vadd.xlane.f32.xlu2 %v2333_v63 }
 0xf0c   :  { %v2806_v6 = vmul.f32 1.442695, %v2805_v23 }
 0xf0e   :  { %6239 = vpow2.f32 %v2806_v6 }
 0xf11   :  { %v2934_v11 = vpop.xlane.xlu0 %2933 }
 0xf12   :  { %v2935_v1 = vsub.f32 %v2929_v57, %v2934_v11 }
 0xf13   :  { %2868 = vmax.xlane.f32.xlu2 %v2867_v7 }
 0xf14   :  { %v2936_v50 = vmul.f32 1.442695, %v2935_v1  ;;  %v7404_v43 = vpop.eup %6239 }
 0xf15   :  { %v2808_v31 = vsel %vm81_vm2, %v7404_v43, 0.0 }
 0xf16   :  { %6241 = vpow2.f32 %v2936_v50 }
 0xf1b   :  { %2998 = vmax.xlane.f32.xlu2 %v2997_v27 }
 0xf1c   :  { %v7408_v3 = vpop.eup %6241 }
 0xf1d   :  { %v2938_v25 = vsel %vm81_vm2, %v7408_v3, 0.0 }
 0xf23   :  { %2809 = vadd.xlane.f32.xlu2 %v2808_v31 }
 0xf2b   :  { %2939 = vadd.xlane.f32.xlu2 %v2938_v25 }
 0xf5d   :  { %v3078_v54 = vpop.f32.mrf.mxu1 }
 0xf5e   :  { %v3079_v44 = vadd.f32 %v7414_v52, %v3078_v54 }
 0xf60   :  { %v3084_v26 = vadd.f32 %v3079_v44, %v7191_v0 }
 0xf62   :  { %v3086_v55 = vsel %vm39_vm0, %v3084_v26, 0.0 }
 0xf7c   :  { %v2332_v47 = vpop.xlane.xlu1 %2331 }
 0xf7d   :  { %v2339_v37 = vmul.f32 %v2332_v47, %v6841_v33 }
 0xf7e   :  { %v2335_v24 = vpop.xlane.xlu2 %2334 }
 0xf7f   :  { %v2342_v62 = vadd.f32 1e-05, %v2339_v37  ;;  %v2340_v41 = vmul.f32 %v2335_v24, %v6841_v33 }
 0xf81   :  { %6243 = vrsqrt.f32 %v2342_v62  ;;  %v2343_v22 = vadd.f32 1e-05, %v2340_v41  ;;  %vm2351_vm11 = vweird.f32 %v2342_v62 }
 0xf83   :  { %6245 = vrsqrt.f32 %v2343_v22  ;;  %vm2361_vm15 = vweird.f32 %v2343_v22 }
 0xf86   :  { %v2869_v9 = vpop.xlane.xlu2 %2868 }
 0xf87   :  { %v6244_v20 = vpop.eup %6243  ;;  %v2870_v2 = vsub.f32 %v2864_v35, %v2869_v9 }
 0xf88   :  { %v2346_v17 = vmul.f32 %v6244_v20, %v2342_v62  ;;  %vm2352_vm10 = vweird.f32 %v6244_v20 }
 0xf89   :  { %v6246_v10 = vpop.eup %6245  ;;  %v2871_v21 = vmul.f32 1.442695, %v2870_v2  ;;  %vm2353_vm13 = vmor %vm2351_vm11, %vm2352_vm10 }
 0xf8a   :  { %v2347_v56 = vmul.f32 %v6244_v20, %v2346_v17  ;;  %v2356_v36 = vmul.f32 %v6246_v10, %v2343_v22  ;;  %vm2362_vm14 = vweird.f32 %v6246_v10  ;;  %v3176_v17 = vld [vmem:[#allocation2 + $0x1b8] sm:$0xff] }
 0xf8b   :  { %6247 = vpow2.f32 %v2871_v21  ;;  %vm2363_vm5 = vmor %vm2361_vm15, %vm2362_vm14  ;;  %3200 = vmatpush.msrb.mxu2 %v3176_v17  ;;  %v3174_v21 = vld [vmem:[#allocation2 + $0x1a8] sm:$0xff] }
 0xf8c   :  { %v2348_v39 = vmul.f32 0.5, %v2347_v56  ;;  %v2357_v34 = vmul.f32 %v6246_v10, %v2356_v36  ;;  %v3173_v56 = vld [vmem:[#allocation2 + $0x1a0] sm:$0xff] }
 0xf8e   :  { %v2349_v40 = vsub.f32 1.5, %v2348_v39  ;;  %v2358_v53 = vmul.f32 0.5, %v2357_v34  ;;  %v2999_v45 = vpop.xlane.xlu2 %2998 }
 0xf8f   :  { %v3000_v57 = vsub.f32 %v2994_v8, %v2999_v45 }
 0xf90   :  { %v2350_v5 = vmul.f32 %v6244_v20, %v2349_v40  ;;  %v2359_v16 = vsub.f32 1.5, %v2358_v53 }
 0xf91   :  { %v7416_v58 = vpop.eup %6247  ;;  %v3001_v59 = vmul.f32 1.442695, %v3000_v57  ;;  %v3141_v57 = vld [vmem:[#allocation2 + $0x198] sm:$0xff] }
 0xf92   :  { %v2873_v42 = vsel %vm81_vm2, %v7416_v58, 0.0  ;;  %v2354_v28 = vsel %vm2353_vm13, %v6244_v20, %v2350_v5  ;;  %v2360_v14 = vmul.f32 %v6246_v10, %v2359_v16  ;;  %v3140_v16 = vld [vmem:[#allocation2 + $0x190] sm:$0xff] }
 0xf93   :  { %2874 = vadd.xlane.f32.xlu0 %v2873_v42  ;;  %v2375_v29 = vmul.f32 %v2354_v28, %v7391_v13  ;;  %6249 = vpow2.f32 %v3001_v59  ;;  %v3139_v59 = vld [vmem:[#allocation2 + $0x188] sm:$0xff] }
 0xf94   :  { %v2364_v13 = vsel %vm2363_vm5, %v6246_v10, %v2360_v14  ;;  %v3175_v10 = vld [vmem:[#allocation2 + $0x1b0] sm:$0xff]  ;;  %v3138_v14 = vld [vmem:[#allocation2 + $0x180] sm:$0xff] }
 0xf95   :  { %v2380_v15 = vmul.f32 %v7418_v60, %v2375_v29  ;;  %v2376_v30 = vmul.f32 %v2364_v13, %v7394_v19  ;;  %3201 = vmatpush.msrb.mxu2 %v3175_v10 }
 0xf96   :  { %v2810_v31 = vpop.xlane.xlu2 %2809 }
 0xf97   :  { %v2385_v61 = vadd.f32 %v7424_v32, %v2380_v15  ;;  %v2381_v48 = vmul.f32 %v7418_v60, %v2376_v30  ;;  %6251 = vrcp.f32 %v2810_v31  ;;  %3202 = vmatpush.msrb.mxu2 %v3174_v21 }
 0xf99   :  { %v2388_v51 = vsel %vm39_vm0, %v2385_v61, 0.0  ;;  %v7432_v4 = vpop.eup %6249  ;;  %v2386_v63 = vadd.f32 %v7424_v32, %v2381_v48  ;;  %3203 = vmatpush.msrb.mxu2 %v3173_v56 }
 0xf9a   :  { %2389 = vadd.xlane.f32.xlu1 %v2388_v51  ;;  %v3003_v0 = vsel %vm81_vm2, %v7432_v4, 0.0 }
 0xf9b   :  { %3087 = vadd.xlane.f32.xlu0 %v3086_v55  ;;  %v2391_v12 = vsel %vm39_vm0, %v2386_v63, 0.0 }
 0xf9d   :  { %v6252_v24 = vpop.eup %6251 }
 0xf9e   :  { %v2812_v22 = vmul.f32 %v6252_v24, %v7404_v43  ;;  %v2940_v43 = vpop.xlane.xlu2 %2939 }
 0xf9f   :  { %6253 = vrcp.f32 %v2940_v43 }
 0xfa2   :  { %3004 = vadd.xlane.f32.xlu1 %v3003_v0 }
 0xfaa   :  { %2392 = vadd.xlane.f32.xlu1 %v2391_v12 }
 0xfaf   :  { %2813 = vrot.lane.b32.xlu0 %v7319_v46, %s6430_s5 }
 0xfb7   :  { %3008 = vrot.lane.b32.xlu0 %v7319_v46, %s6431_s6 }
0x1006   :  { %v7443_v19 = vpop.xlane.xlu0 %2874 }
0x100d   :  { %v2390_v35 = vpop.xlane.xlu1 %2389 }
0x100e   :  { %v2397_v23 = vmul.f32 %v2390_v35, %v6841_v33  ;;  %v3088_v7 = vpop.xlane.xlu0 %3087 }
0x100f   :  { %v3092_v6 = vmul.f32 %v3088_v7, %v6841_v33  ;;  %v7480_v7 = vld [vmem:[#allocation2 + $0x38b] ss:$0 sm:$0xff] }
0x1010   :  { %v7447_v11 = vsub.f32 %v2385_v61, %v2397_v23  ;;  %v7478_v23 = vld [vmem:[#allocation2 + $0x377] ss:$0 sm:$0xff] }
0x1011   :  { %v7449_v8 = vsub.f32 %v3084_v26, %v3092_v6 }
0x1012   :  { %v2403_v1 = vmul.f32 %v7447_v11, %v7447_v11 }
0x1013   :  { %v3096_v27 = vmul.f32 %v7449_v8, %v7449_v8 }
0x1014   :  { %v2406_v50 = vsel %vm39_vm0, %v2403_v1, 0.0 }
0x1015   :  { %2407 = vadd.xlane.f32.xlu1 %v2406_v50  ;;  %v7456_v25 = vpop.xlane.xlu1 %3004  ;;  %v3098_v47 = vsel %vm39_vm0, %v3096_v27, 0.0  ;;  %v7483_v27 = vld [vmem:[#allocation2 + $0x378] ss:$0 sm:$0xff] }
0x1016   :  { %3099 = vadd.xlane.f32.xlu2 %v3098_v47 }
0x101d   :  { %v2393_v37 = vpop.xlane.xlu1 %2392 }
0x101e   :  { %v2398_v62 = vmul.f32 %v2393_v37, %v6841_v33 }
0x1020   :  { %v7460_v41 = vsub.f32 %v2386_v63, %v2398_v62  ;;  %v7476_v63 = vld [vmem:[#allocation2 + $0x38a] ss:$0 sm:$0xff] }
0x1021   :  { %v2814_v9 = vpop.permute.xlu0 %2813 }
0x1022   :  { %2834 = vmatpush.msra.mxu3 %v2814_v9  ;;  %v2404_v20 = vmul.f32 %v7460_v41, %v7460_v41 }
0x1023   :  { %5857 = vmatmul.msk.f32.vlgmr.msra.gmra.mxu3 %vm81_vm2, %v2812_v22 }
0x1024   :  { %v2409_v2 = vsel %vm39_vm0, %v2404_v20, 0.0 }
0x1025   :  { %2410 = vadd.xlane.f32.xlu1 %v2409_v2 }
0x102e   :  { %2943 = vrot.lane.b32.xlu2 %v7319_v46, %s6429_s4 }
0x103e   :  { %2878 = vrot.lane.b32.xlu1 %v7319_v46, %s6432_s7  ;;  %v6254_v46 = vpop.eup %6253 }
0x103f   :  { %v2942_v54 = vmul.f32 %v6254_v46, %v7408_v3 }
0x1088   :  { %v2408_v36 = vpop.xlane.xlu1 %2407 }
0x1089   :  { %v2415_v39 = vmul.f32 %v2408_v36, %v6841_v33  ;;  %v3100_v34 = vpop.xlane.xlu2 %3099  ;;  %v3009_v36 = vpop.permute.xlu0 %3008 }
0x108a   :  { %v3104_v40 = vmul.f32 %v3100_v34, %v6841_v33 }
0x108b   :  { %v2418_v53 = vadd.f32 1e-05, %v2415_v39 }
0x108c   :  { %v3106_v45 = vadd.f32 1e-05, %v3104_v40 }
0x108d   :  { %6255 = vrsqrt.f32 %v2418_v53  ;;  %vm2427_vm11 = vweird.f32 %v2418_v53 }
0x108e   :  { %6257 = vrsqrt.f32 %v3106_v45  ;;  %vm3114_vm14 = vweird.f32 %v3106_v45 }
0x1091   :  { %v2944_v5 = vpop.permute.xlu2 %2943 }
0x1092   :  { %2964 = vmatpush.msrb.mxu3 %v2944_v5 }
0x1093   :  { %v6256_v44 = vpop.eup %6255  ;;  %5863 = vmatmul.msk.f32.vlgmr.msrb.gmra.mxu3 %vm81_vm2, %v2942_v54 }
0x1094   :  { %v6258_v42 = vpop.eup %6257  ;;  %v2422_v28 = vmul.f32 %v6256_v44, %v2418_v53  ;;  %3162 = vmatpush.msra.mxu3 %v3141_v57  ;;  %vm2428_vm9 = vweird.f32 %v6256_v44  ;;  %v7512_v53 = vld [vmem:[#allocation2 + $0x373] ss:$0 sm:$0xff] }
0x1095   :  { %v3109_v29 = vmul.f32 %v6258_v42, %v3106_v45  ;;  %vm3115_vm10 = vweird.f32 %v6258_v42  ;;  %vm2429_vm13 = vmor %vm2427_vm11, %vm2428_vm9 }
0x1096   :  { %v2423_v15 = vmul.f32 %v6256_v44, %v2422_v28  ;;  %3163 = vmatpush.msra.mxu3 %v3140_v16  ;;  %vm3116_vm15 = vmor %vm3114_vm14, %vm3115_vm10 }
0x1097   :  { %v3110_v26 = vmul.f32 %v6258_v42, %v3109_v29 }
0x1098   :  { %v2424_v61 = vmul.f32 0.5, %v2423_v15  ;;  %v2411_v51 = vpop.xlane.xlu1 %2410  ;;  %3164 = vmatpush.msra.mxu3 %v3139_v59 }
0x1099   :  { %v3111_v3 = vmul.f32 0.5, %v3110_v26  ;;  %v2416_v55 = vmul.f32 %v2411_v51, %v6841_v33 }
0x109a   :  { %v2425_v13 = vsub.f32 1.5, %v2424_v61  ;;  %3165 = vmatpush.msra.mxu3 %v3138_v14 }
0x109b   :  { %v3112_v30 = vsub.f32 1.5, %v3111_v3  ;;  %v2419_v0 = vadd.f32 1e-05, %v2416_v55 }
0x109c   :  { %v2426_v48 = vmul.f32 %v6256_v44, %v2425_v13 }
0x109d   :  { %v3113_v12 = vmul.f32 %v6258_v42, %v3112_v30  ;;  %6259 = vrsqrt.f32 %v2419_v0  ;;  %vm2437_vm9 = vweird.f32 %v2419_v0  ;;  %v6392_v30 = vld [vmem:[%s8135_s1 + $0x8] sm:$0xff] }
0x109e   :  { %v2430_v35 = vsel %vm2429_vm13, %v6256_v44, %v2426_v48  ;;  %6261 = vrcp.f32 %v7443_v19 }
0x109f   :  { %v2451_v6 = vmul.f32 %v2430_v35, %v7447_v11  ;;  %v3117_v1 = vsel %vm3116_vm15, %v6258_v42, %v3113_v12  ;;  %6263 = vrcp.f32 %v7456_v25 }
0x10a0   :  { %v3128_v50 = vmul.f32 %v3117_v1, %v7449_v8 }
0x10a1   :  { %v2456_v31 = vmul.f32 %v7476_v63, %v2451_v6 }
0x10a2   :  { %v3132_v47 = vmul.f32 %v7478_v23, %v3128_v50 }
0x10a3   :  { %v6260_v37 = vpop.eup %6259  ;;  %v7489_v24 = vadd.f32 %v7480_v7, %v2456_v31 }
0x10a4   :  { %v7492_v62 = vadd.f32 %v7483_v27, %v3132_v47  ;;  %v2432_v22 = vmul.f32 %v6260_v37, %v2419_v0  ;;  %vm2438_vm5 = vweird.f32 %v6260_v37  ;;  %v6262_v2 = vpop.eup %6261 }
0x10a5   :  { %5871 = vmatmul.msk.f32.vlgmr.msrb.gmra.mxu2 %vm39_vm0, %v7489_v24  ;;  %vm2439_vm10 = vmor %vm2437_vm9, %vm2438_vm5  ;;  %v2877_v43 = vmul.f32 %v6262_v2, %v7416_v58  ;;  %v6264_v39 = vpop.eup %6263 }
0x10a6   :  { %v2433_v11 = vmul.f32 %v6260_v37, %v2432_v22  ;;  %5869 = vmatmul.msk.f32.vlgmr.msra.gmra.mxu3 %vm39_vm0, %v7492_v62  ;;  %v3007_v25 = vmul.f32 %v6264_v39, %v7432_v4  ;;  %v2836_v58 = vpop.f32.mrf.mxu3  ;;  %v7519_v4 = vld [vmem:[#allocation2 + $0x372] ss:$0 sm:$0xff] }
0x10a8   :  { %v2434_v8 = vmul.f32 0.5, %v2433_v11 }
0x10aa   :  { %v2435_v9 = vsub.f32 1.5, %v2434_v8 }
0x10ac   :  { %v2436_v20 = vmul.f32 %v6260_v37, %v2435_v9 }
0x10ae   :  { %v2440_v17 = vsel %vm2439_vm10, %v6260_v37, %v2436_v20 }
0x10af   :  { %v2452_v10 = vmul.f32 %v2440_v17, %v7460_v41 }
0x10b0   :  { %v2879_v21 = vpop.permute.xlu1 %2878 }
0x10b1   :  { %2899 = vmatpush.msra.mxu0 %v2879_v21  ;;  %v2457_v56 = vmul.f32 %v7476_v63, %v2452_v10  ;;  %v2307_v21 = vadd.f32 %v7376_v49, %v7371_v18 }
0x10b2   :  { %5860 = vmatmul.msk.f32.vlgmr.msra.gmra.mxu0 %vm81_vm2, %v2877_v43 }
0x10b3   :  { %3029 = vmatpush.msrb.mxu0 %v3009_v36  ;;  %v7505_v19 = vadd.f32 %v7480_v7, %v2457_v56  ;;  %v2311_v56 = vadd.f32 %v2307_v21, %v7341_v38 }
0x10b5   :  { %5872 = vmatmul.msk.f32.gmra.mxu2 %vm39_vm0, %v7505_v19  ;;  %v2318_v36 = vsel %vm972_vm8, %v2311_v56, 0.0 }
0x10ba   :  { %5866 = vmatmul.msk.f32.vlgmr.msrb.gmra.mxu0 %vm81_vm2, %v3007_v25 }
0x1116   :  { %v2966_v40 = vpop.f32.mrf.mxu3 }
0x1128   :  { %v3205_v34 = vpop.f32.mrf.mxu2 }
0x1129   :  { %v3167_v5 = vpop.f32.mrf.mxu3  ;;  %v7526_v57 = vadd.f32 %v7512_v53, %v3205_v34 }
0x112a   :  { %v3168_v44 = vadd.f32 %v7519_v4, %v3167_v5 }
0x112f   :  { %v2901_v41 = vpop.f32.mrf.mxu0 }
0x1130   :  { %3035 = vrot.lane.b32.xlu0 %v2901_v41, %s6421_s18 }
0x1137   :  { %v3031_v45 = vpop.f32.mrf.mxu0 }
0x1138   :  { %v3208_v46 = vpop.f32.mrf.mxu2  ;;  %3039 = vrot.lane.b32.xlu0 %v2966_v40, %s6433_s8  ;;  %3043 = vrot.lane.b32.xlu1 %v3031_v45, %s6434_s9 }
0x1139   :  { %v7517_v54 = vadd.f32 %v7512_v53, %v3208_v46 }
0x113b   :  { %3288 = vrot.lane.b32.xlu2 %v7517_v54, %s6422_s24  ;;  %5874 = vmatpush.xpose.msk.msra.mxu0 %vm81_vm2, %v7517_v54 }
0x113f   :  { %5875 = vmatpush.xpose.msk.msra.mxu0 %vm81_vm2, %v7526_v57 }
0x1140   :  { %3286 = vrot.lane.b32.xlu0 %v7526_v57, %s6422_s24  ;;  %3284 = vrot.lane.b32.xlu1 %v3168_v44, %s6422_s24 }
0x1142   :  { %5876 = vmatmul.msk.f32.vlgmr.msra.gmra.mxu0 %vm81_vm2, %v3168_v44 }
0x1195   :  { %v3289_v16 = vpop.permute.xlu2 %3288 }
0x1196   :  { %5879 = vmatpush.xpose.msk.msrb.mxu1 %vm81_vm2, %v3289_v16 }
0x11a2   :  { %v3036_v42 = vpop.permute.xlu0 %3035 }
0x11a3   :  { %v3046_v28 = vsel %vm81_vm2, %v2836_v58, %v3036_v42 }
0x11aa   :  { %v3044_v29 = vpop.permute.xlu1 %3043  ;;  %v3040_v59 = vpop.permute.xlu0 %3039 }
0x11ab   :  { %v3047_v15 = vsel %vm491_vm6, %v3046_v28, %v3040_v59 }
0x11ac   :  { %v3048_v26 = vsel %vm494_vm7, %v3047_v15, %v3044_v29 }
0x11ad   :  { %5868 = vmatmul.msk.f32.gmra.mxu1 %vm39_vm0, %v3048_v26 }
0x11b2   :  { %v3287_v14 = vpop.permute.xlu0 %3286  ;;  %v3285_v61 = vpop.permute.xlu1 %3284 }
0x11b3   :  { %5880 = vmatpush.xpose.msk.msrb.mxu1 %vm81_vm2, %v3287_v14 }
0x11b6   :  { %5881 = vmatmul.msk.f32.vlgmr.msrb.gmra.mxu1 %vm81_vm2, %v3285_v61 }
0x11bf   :  { %v3240_v51 = vpop.f32.mrf.mxu0 }
0x11c0   :  { %v3243_v3 = vsel %vm113_vm4, %v3240_v51, -inf }
0x11c1   :  { %3244 = vmax.xlane.f32.xlu1 %v3243_v3 }
0x11da   :  { %3329 = vrot.lane.b32.xlu1 %v7517_v54, %s6423_s25 }
0x11e2   :  { %3432 = vrot.lane.b32.xlu1 %v7526_v57, %s6426_s28 }
0x11ea   :  { %3430 = vrot.lane.b32.xlu1 %v3168_v44, %s6426_s28 }
0x11f2   :  { %3359 = vrot.lane.b32.xlu1 %v7526_v57, %s6427_s29 }
0x122a   :  { %v3081_v55 = vpop.f32.mrf.mxu1 }
0x122b   :  { %v3082_v13 = vadd.f32 %v7414_v52, %v3081_v55 }
0x122d   :  { %v3085_v0 = vadd.f32 %v6392_v30, %v3082_v13 }
0x122f   :  { %v3089_v48 = vsel %vm39_vm0, %v3085_v0, 0.0 }
0x1230   :  { %3090 = vadd.xlane.f32.xlu2 %v3089_v48 }
0x1233   :  { %v3313_v12 = vpop.f32.mrf.mxu1 }
0x1234   :  { %v3316_v35 = vsel %vm113_vm4, %v3313_v12, -inf  ;;  %v3245_v6 = vpop.xlane.xlu1 %3244 }
0x1235   :  { %3317 = vmax.xlane.f32.xlu0 %v3316_v35  ;;  %v3246_v52 = vsub.f32 %v3240_v51, %v3245_v6 }
0x1237   :  { %v3247_v50 = vmul.f32 1.442695, %v3246_v52 }
0x1239   :  { %6265 = vpow2.f32 %v3247_v50 }
0x123f   :  { %v6266_v31 = vpop.eup %6265 }
0x1240   :  { %v3249_v47 = vsel %vm113_vm4, %v6266_v31, 0.0 }
0x1249   :  { %3434 = vrot.lane.b32.xlu0 %v7517_v54, %s6426_s28 }
0x124c   :  { %v3330_v1 = vpop.permute.xlu1 %3329 }
0x124d   :  { %5882 = vmatpush.msk.msrb.mxu3 %vm148_vm3, %v3330_v1 }
0x1254   :  { %v3433_v5 = vpop.permute.xlu1 %3432 }
0x125c   :  { %v3431_v59 = vpop.permute.xlu1 %3430 }
0x1264   :  { %v3360_v13 = vpop.permute.xlu1 %3359 }
0x1273   :  { %3250 = vadd.xlane.f32.xlu0 %v3249_v47 }
0x12a3   :  { %v3091_v37 = vpop.xlane.xlu2 %3090 }
0x12a4   :  { %v3093_v22 = vmul.f32 %v3091_v37, %v6841_v33 }
0x12a6   :  { %v3095_v11 = vsub.f32 %v3085_v0, %v3093_v22 }
0x12a8   :  { %v3318_v8 = vpop.xlane.xlu0 %3317  ;;  %v3097_v9 = vmul.f32 %v3095_v11, %v3095_v11 }
0x12a9   :  { %v3319_v20 = vsub.f32 %v3313_v12, %v3318_v8 }
0x12aa   :  { %v3101_v2 = vsel %vm39_vm0, %v3097_v9, 0.0 }
0x12ab   :  { %v3320_v17 = vmul.f32 1.442695, %v3319_v20  ;;  %3102 = vadd.xlane.f32.xlu2 %v3101_v2 }
0x12ad   :  { %6267 = vpow2.f32 %v3320_v17 }
0x12b3   :  { %v6268_v10 = vpop.eup %6267 }
0x12b4   :  { %v3322_v43 = vsel %vm113_vm4, %v6268_v10, 0.0 }
0x12b5   :  { %3323 = vadd.xlane.f32.xlu0 %v3322_v43 }
0x12bb   :  { %v3435_v41 = vpop.permute.xlu0 %3434 }
0x12c3   :  { %3327 = vrot.lane.b32.xlu2 %v7526_v57, %s6423_s25 }
0x12c9   :  { %3361 = vrot.lane.b32.xlu0 %v7517_v54, %s6427_s29 }
0x12cb   :  { %3256 = vrot.lane.b32.xlu2 %v7517_v54, %s6424_s26 }
0x12d3   :  { %3254 = vrot.lane.b32.xlu2 %v7526_v57, %s6424_s26 }
0x12db   :  { %3357 = vrot.lane.b32.xlu2 %v3168_v44, %s6427_s29 }
0x12e6   :  { %v3251_v45 = vpop.xlane.xlu0 %3250 }
0x12f3   :  { %2319 = vadd.xlane.f32.xlu0 %v2318_v36 }
0x131e   :  { %v3103_v39 = vpop.xlane.xlu2 %3102 }
0x131f   :  { %v3105_v25 = vmul.f32 %v3103_v39, %v6841_v33 }
0x1321   :  { %v3107_v58 = vadd.f32 1e-05, %v3105_v25 }
0x1323   :  { %6269 = vrsqrt.f32 %v3107_v58  ;;  %vm3124_vm13 = vweird.f32 %v3107_v58 }
0x1324   :  { %6271 = vrcp.f32 %v3251_v45 }
0x1326   :  { %v3328_v34 = vpop.permute.xlu2 %3327 }
0x1327   :  { %3352 = vmatpush.msrb.mxu3 %v3328_v34 }
0x1328   :  { %v3324_v28 = vpop.xlane.xlu0 %3323 }
0x1329   :  { %5889 = vmatpush.xpose.msk.msra.mxu3 %vm81_vm2, %v3435_v41  ;;  %v6270_v40 = vpop.eup %6269  ;;  %6273 = vrcp.f32 %v3324_v28 }
0x132a   :  { %v3119_v46 = vmul.f32 %v6270_v40, %v3107_v58  ;;  %vm3125_vm11 = vweird.f32 %v6270_v40  ;;  %v6272_v42 = vpop.eup %6271 }
0x132b   :  { %vm3126_vm14 = vmor %vm3124_vm13, %vm3125_vm11  ;;  %v3253_v26 = vmul.f32 %v6272_v42, %v6266_v31 }
0x132c   :  { %v3120_v18 = vmul.f32 %v6270_v40, %v3119_v46 }
0x132d   :  { %5890 = vmatpush.xpose.msk.msra.mxu3 %vm81_vm2, %v3433_v5 }
0x132e   :  { %v3121_v38 = vmul.f32 0.5, %v3120_v18  ;;  %v3257_v49 = vpop.permute.xlu2 %3256 }
0x132f   :  { %5877 = vmatpush.msk.msrb.mxu0 %vm148_vm3, %v3257_v49  ;;  %v6274_v55 = vpop.eup %6273 }
0x1330   :  { %v3122_v44 = vsub.f32 1.5, %v3121_v38  ;;  %v3326_v30 = vmul.f32 %v6274_v55, %v6268_v10 }
0x1332   :  { %v3123_v16 = vmul.f32 %v6270_v40, %v3122_v44 }
0x1334   :  { %v3127_v29 = vsel %vm3126_vm14, %v6270_v40, %v3123_v16 }
0x1335   :  { %v3129_v15 = vmul.f32 %v3127_v29, %v3095_v11 }
0x1336   :  { %v3255_v14 = vpop.permute.xlu2 %3254 }
0x1337   :  { %3279 = vmatpush.msrb.mxu0 %v3255_v14  ;;  %v3133_v61 = vmul.f32 %v7478_v23, %v3129_v15 }
0x1338   :  { %5878 = vmatmul.msk.f32.vlgmr.msrb.gmra.mxu0 %vm113_vm4, %v3253_v26 }
0x1339   :  { %v7583_v51 = vadd.f32 %v7483_v27, %v3133_v61 }
0x133b   :  { %5870 = vmatmul.msk.f32.gmra.mxu3 %vm39_vm0, %v7583_v51  ;;  %v3362_v3 = vpop.permute.xlu0 %3361 }
0x133c   :  { %5884 = vmatpush.xpose.msk.msra.mxu0 %vm81_vm2, %v3362_v3 }
0x133e   :  { %v3358_v0 = vpop.permute.xlu2 %3357 }
0x1340   :  { %5885 = vmatpush.xpose.msk.msra.mxu0 %vm81_vm2, %v3360_v13 }
0x1343   :  { %5883 = vmatmul.msk.f32.vlgmr.msrb.gmra.mxu3 %vm113_vm4, %v3326_v30  ;;  %5886 = vmatmul.msk.f32.vlgmr.msra.gmra.mxu0 %vm81_vm2, %v3358_v0 }
0x134b   :  { %5891 = vmatmul.msk.f32.vlgmr.msra.gmra.mxu3 %vm81_vm2, %v3431_v59 }
0x1366   :  { %v2320_v23 = vpop.xlane.xlu0 %2319 }
0x1367   :  { %v2323_v27 = vmul.f32 %v2320_v23, %v6841_v33 }
0x1369   :  { %v2326_v48 = vsub.f32 %v2311_v56, %v2323_v27 }
0x136b   :  { %v2329_v12 = vmul.f32 %v2326_v48, %v2326_v48 }
0x136d   :  { %v2336_v35 = vsel %vm972_vm8, %v2329_v12, 0.0 }
0x136e   :  { %2337 = vadd.xlane.f32.xlu1 %v2336_v35 }
0x13b5   :  { %v7601_v21 = vpop.f32.mrf.mxu0 }
0x13be   :  { %v3170_v6 = vpop.f32.mrf.mxu3 }
0x13c0   :  { %v3386_v39 = vpop.f32.mrf.mxu0 }
0x13c1   :  { %v3389_v25 = vsel %vm113_vm4, %v3386_v39, -inf }
0x13c6   :  { %v7594_v1 = vpop.f32.mrf.mxu3 }
0x13ce   :  { %v3459_v52 = vpop.f32.mrf.mxu3 }
0x13cf   :  { %v3462_v50 = vsel %vm113_vm4, %v3459_v52, -inf }
0x13d0   :  { %3463 = vmax.xlane.f32.xlu0 %v3462_v50 }
0x13e1   :  { %v2338_v31 = vpop.xlane.xlu1 %2337 }
0x13e2   :  { %v2341_v47 = vmul.f32 %v2338_v31, %v6841_v33 }
0x13e4   :  { %v2344_v37 = vadd.f32 1e-05, %v2341_v47  ;;  %3473 = vrot.lane.b32.xlu0 %v7526_v57, %s6428_s30 }
0x13e6   :  { %6275 = vrsqrt.f32 %v2344_v37  ;;  %vm2371_vm5 = vweird.f32 %v2344_v37 }
0x13ec   :  { %v6276_v22 = vpop.eup %6275 }
0x13ed   :  { %v2366_v11 = vmul.f32 %v6276_v22, %v2344_v37  ;;  %vm2372_vm15 = vweird.f32 %v6276_v22 }
0x13ee   :  { %vm2373_vm9 = vmor %vm2371_vm5, %vm2372_vm15 }
0x13ef   :  { %v2367_v8 = vmul.f32 %v6276_v22, %v2366_v11 }
0x13f1   :  { %v2368_v9 = vmul.f32 0.5, %v2367_v8  ;;  %v3519_v8 = vrot.slane %v7517_v54, 2 }
0x13f3   :  { %v2369_v20 = vsub.f32 1.5, %v2368_v9 }
0x13f5   :  { %v2370_v2 = vmul.f32 %v6276_v22, %v2369_v20 }
0x13f7   :  { %v2374_v17 = vsel %vm2373_vm9, %v6276_v22, %v2370_v2 }
0x13f8   :  { %v2377_v10 = vmul.f32 %v2374_v17, %v2326_v48 }
0x13fa   :  { %v2382_v43 = vmul.f32 %v7418_v60, %v2377_v10 }
0x13fc   :  { %v2387_v56 = vadd.f32 %v7424_v32, %v2382_v43 }
0x13fe   :  { %v2394_v36 = vsel %vm972_vm8, %v2387_v56, 0.0 }
0x13ff   :  { %2395 = vadd.xlane.f32.xlu2 %v2394_v36 }
0x1407   :  { %3390 = vmax.xlane.f32.xlu2 %v3389_v25  ;;  %v3826_v25 = vld [vmem:[#allocation2 + $0x1d0] sm:$0xff] }
0x1443   :  { %v3464_v58 = vpop.xlane.xlu0 %3463 }
0x1444   :  { %v3465_v41 = vsub.f32 %v3459_v52, %v3464_v58 }
0x1446   :  { %v3466_v34 = vmul.f32 1.442695, %v3465_v41  ;;  %v3825_v41 = vld [vmem:[#allocation2 + $0x1c8] sm:$0xff] }
0x1448   :  { %6277 = vpow2.f32 %v3466_v34  ;;  %v3824_v34 = vld [vmem:[#allocation2 + $0x1c0] sm:$0xff] }
0x144e   :  { %v6278_v40 = vpop.eup %6277 }
0x144f   :  { %v3468_v45 = vsel %vm113_vm4, %v6278_v40, 0.0 }
0x1450   :  { %3469 = vadd.xlane.f32.xlu0 %v3468_v45 }
0x1456   :  { %v3474_v15 = vpop.permute.xlu0 %3473 }
0x1464   :  { %3400 = vrot.lane.b32.xlu0 %v7526_v57, %s6425_s27  ;;  %v3171_v57 = vadd.f32 %v7519_v4, %v3170_v6 }
0x1472   :  { %v2396_v60 = vpop.xlane.xlu2 %2395 }
0x1473   :  { %v2399_v32 = vmul.f32 %v2396_v60, %v6841_v33 }
0x1475   :  { %v2402_v46 = vsub.f32 %v2387_v56, %v2399_v32 }
0x1477   :  { %v2405_v5 = vmul.f32 %v2402_v46, %v2402_v46 }
0x1479   :  { %v2412_v18 = vsel %vm972_vm8, %v2405_v5, 0.0 }
0x147a   :  { %2413 = vadd.xlane.f32.xlu1 %v2412_v18  ;;  %v3391_v38 = vpop.xlane.xlu2 %3390 }
0x147b   :  { %v3392_v49 = vsub.f32 %v3386_v39, %v3391_v38 }
0x147d   :  { %v3393_v44 = vmul.f32 1.442695, %v3392_v49 }
0x147f   :  { %6279 = vpow2.f32 %v3393_v44 }
0x1485   :  { %v6280_v16 = vpop.eup %6279 }
0x1486   :  { %v3395_v42 = vsel %vm113_vm4, %v6280_v16, 0.0 }
0x1487   :  { %3396 = vadd.xlane.f32.xlu2 %v3395_v42 }
0x1493   :  { %3475 = vrot.lane.b32.xlu1 %v7517_v54, %s6428_s30 }
0x149f   :  { %3402 = vrot.lane.b32.xlu2 %v7517_v54, %s6425_s27 }
0x14a7   :  { %3590 = vrot.lane.b32.xlu2 %v3171_v57, %s6422_s24 }
0x14c3   :  { %v3470_v55 = vpop.xlane.xlu0 %3469 }
0x14d6   :  { %v3401_v48 = vpop.permute.xlu0 %3400 }
0x14ed   :  { %v2414_v28 = vpop.xlane.xlu1 %2413 }
0x14ee   :  { %v2417_v29 = vmul.f32 %v2414_v28, %v6841_v33 }
0x14f0   :  { %v2420_v59 = vadd.f32 1e-05, %v2417_v29  ;;  %v7678_v29 = vld [vmem:[#allocation2 + $0x374] ss:$0 sm:$0xff] }
0x14f2   :  { %6281 = vrsqrt.f32 %v2420_v59  ;;  %vm2447_vm10 = vweird.f32 %v2420_v59 }
0x14f8   :  { %v6282_v26 = vpop.eup %6281 }
0x14f9   :  { %v2442_v14 = vmul.f32 %v6282_v26, %v2420_v59  ;;  %vm2448_vm8 = vweird.f32 %v6282_v26 }
0x14fa   :  { %v3397_v61 = vpop.xlane.xlu2 %3396  ;;  %vm2449_vm11 = vmor %vm2447_vm10, %vm2448_vm8 }
0x14fb   :  { %v2443_v3 = vmul.f32 %v6282_v26, %v2442_v14  ;;  %6283 = vrcp.f32 %v3397_v61 }
0x14fc   :  { %6285 = vrcp.f32 %v3470_v55 }
0x14fd   :  { %v2444_v13 = vmul.f32 0.5, %v2443_v3 }
0x14ff   :  { %v2445_v30 = vsub.f32 1.5, %v2444_v13 }
0x1501   :  { %v6284_v0 = vpop.eup %6283  ;;  %v2446_v23 = vmul.f32 %v6282_v26, %v2445_v30 }
0x1502   :  { %v3403_v4 = vpop.permute.xlu2 %3402  ;;  %v3399_v35 = vmul.f32 %v6284_v0, %v6280_v16  ;;  %v6286_v31 = vpop.eup %6285 }
0x1503   :  { %v2450_v27 = vsel %vm2449_vm11, %v6282_v26, %v2446_v23  ;;  %5887 = vmatpush.msk.msra.mxu1 %vm148_vm3, %v3403_v4  ;;  %v3472_v47 = vmul.f32 %v6286_v31, %v6278_v40 }
0x1504   :  { %v2453_v12 = vmul.f32 %v2450_v27, %v2402_v46 }
0x1505   :  { %v3476_v6 = vpop.permute.xlu1 %3475  ;;  %3425 = vmatpush.msra.mxu1 %v3401_v48 }
0x1506   :  { %5888 = vmatmul.msk.f32.vlgmr.msra.gmra.mxu1 %vm113_vm4, %v3399_v35  ;;  %5892 = vmatpush.msk.msra.mxu2 %vm148_vm3, %v3476_v6  ;;  %v2458_v52 = vmul.f32 %v7476_v63, %v2453_v12 }
0x1508   :  { %3498 = vmatpush.msra.mxu2 %v3474_v15  ;;  %v7624_v50 = vadd.f32 %v7480_v7, %v2458_v52 }
0x150a   :  { %5873 = vmatmul.msk.f32.gmra.mxu2 %vm39_vm0, %v7624_v50  ;;  %v3591_v54 = vpop.permute.xlu2 %3590 }
0x1512   :  { %5893 = vmatmul.msk.f32.vlgmr.msra.gmra.mxu2 %vm113_vm4, %v3472_v47 }
0x158d   :  { %v3211_v37 = vpop.f32.mrf.mxu2 }
0x158e   :  { %v3212_v22 = vadd.f32 %v7512_v53, %v3211_v37  ;;  %v3427_v53 = vpop.f32.mrf.mxu1 }
0x1590   :  { %v7630_v11 = vrot.slane %v3212_v22, 2 }
0x1592   :  { %3594 = vrot.lane.b32.xlu1 %v7630_v11, %s6422_s24  ;;  %5894 = vmatpush.xpose.msk.msrb.mxu0 %vm81_vm2, %v7630_v11  ;;  %v7639_v63 = vsel %vm498_vm1, %v3519_v8, %v7630_v11 }
0x1593   :  { %3738 = vrot.lane.b32.xlu2 %v7639_v63, %s6426_s28  ;;  %3592 = vrot.lane.b32.xlu0 %v7639_v63, %s6422_s24 }
0x1595   :  { %v3500_v7 = vpop.f32.mrf.mxu2 }
0x1596   :  { %5895 = vmatpush.xpose.msk.msrb.mxu0 %vm81_vm2, %v7639_v63 }
0x1599   :  { %5896 = vmatmul.msk.f32.vlgmr.msrb.gmra.mxu0 %vm81_vm2, %v3171_v57 }
0x159a   :  { %3740 = vrot.lane.b32.xlu1 %v7630_v11, %s6426_s28 }
0x159b   :  { %3663 = vrot.lane.b32.xlu2 %v3171_v57, %s6427_s29  ;;  %3667 = vrot.lane.b32.xlu0 %v7630_v11, %s6427_s29 }
0x15a2   :  { %3665 = vrot.lane.b32.xlu1 %v7639_v63, %s6427_s29 }
0x15a3   :  { %3736 = vrot.lane.b32.xlu0 %v3171_v57, %s6426_s28  ;;  %3512 = vrot.lane.b32.xlu2 %v3500_v7, %s6434_s9 }
0x15aa   :  { %3504 = vrot.lane.b32.xlu1 %v7594_v1, %s6421_s18  ;;  %v3827_v1 = vld [vmem:[#allocation2 + $0x1d8] sm:$0xff] }
0x15ab   :  { %3508 = vrot.lane.b32.xlu0 %v3427_v53, %s6433_s8 }
0x15ed   :  { %v3739_v2 = vpop.permute.xlu2 %3738 }
0x15f5   :  { %v3664_v43 = vpop.permute.xlu2 %3663 }
0x15fd   :  { %v3513_v32 = vpop.permute.xlu2 %3512 }
0x1604   :  { %v3595_v9 = vpop.permute.xlu1 %3594 }
0x1605   :  { %5899 = vmatpush.xpose.msk.msrb.mxu3 %vm81_vm2, %v3595_v9  ;;  %v3593_v20 = vpop.permute.xlu0 %3592 }
0x1609   :  { %5900 = vmatpush.xpose.msk.msrb.mxu3 %vm81_vm2, %v3593_v20 }
0x160c   :  { %v3741_v17 = vpop.permute.xlu1 %3740  ;;  %5901 = vmatmul.msk.f32.vlgmr.msrb.gmra.mxu3 %vm81_vm2, %v3591_v54 }
0x160d   :  { %5909 = vmatpush.xpose.msk.msra.mxu3 %vm81_vm2, %v3741_v17  ;;  %v3668_v10 = vpop.permute.xlu0 %3667 }
0x160e   :  { %5904 = vmatpush.xpose.msk.msra.mxu0 %vm81_vm2, %v3668_v10 }
0x1611   :  { %5910 = vmatpush.xpose.msk.msra.mxu3 %vm81_vm2, %v3739_v2 }
0x1614   :  { %v3666_v56 = vpop.permute.xlu1 %3665 }
0x1615   :  { %5905 = vmatpush.xpose.msk.msra.mxu0 %vm81_vm2, %v3666_v56  ;;  %v3737_v36 = vpop.permute.xlu0 %3736 }
0x1616   :  { %v3546_v39 = vpop.f32.mrf.mxu0  ;;  %5911 = vmatmul.msk.f32.vlgmr.msra.gmra.mxu3 %vm81_vm2, %v3737_v36 }
0x1617   :  { %v3549_v58 = vsel %vm113_vm4, %v3546_v39, -inf }
0x1618   :  { %3550 = vmax.xlane.f32.xlu0 %v3549_v58  ;;  %5906 = vmatmul.msk.f32.vlgmr.msra.gmra.mxu0 %vm81_vm2, %v3664_v43 }
0x1619   :  { %3848 = vmatpush.msrb.mxu0 %v3827_v1 }
0x161b   :  { %3849 = vmatpush.msrb.mxu0 %v3826_v25 }
0x161c   :  { %v3505_v40 = vpop.permute.xlu1 %3504 }
0x161d   :  { %3850 = vmatpush.msrb.mxu0 %v3825_v41  ;;  %v3515_v45 = vsel %vm81_vm2, %v7601_v21, %v3505_v40  ;;  %v3509_v60 = vpop.permute.xlu0 %3508 }
0x161e   :  { %v3516_v46 = vsel %vm491_vm6, %v3515_v45, %v3509_v60 }
0x161f   :  { %3851 = vmatpush.msrb.mxu0 %v3824_v34  ;;  %v3517_v5 = vsel %vm494_vm7, %v3516_v46, %v3513_v32 }
0x1620   :  { %5914 = vmatmul.msk.f32.vlgmr.msrb.gmra.mxu0 %vm39_vm0, %v3517_v5 }
0x168b   :  { %v3551_v18 = vpop.xlane.xlu0 %3550 }
0x168c   :  { %v3552_v38 = vsub.f32 %v3546_v39, %v3551_v18  ;;  %v3916_v18 = vld [vmem:[#allocation2 + $0x1f8] sm:$0xff] }
0x168e   :  { %v3553_v16 = vmul.f32 1.442695, %v3552_v38  ;;  %v3915_v38 = vld [vmem:[#allocation2 + $0x1f0] sm:$0xff] }
0x168f   :  { %v3619_v49 = vpop.f32.mrf.mxu3 }
0x1690   :  { %v3622_v44 = vsel %vm113_vm4, %v3619_v49, -inf  ;;  %6287 = vpow2.f32 %v3553_v16  ;;  %v3914_v16 = vld [vmem:[#allocation2 + $0x1e8] sm:$0xff] }
0x1691   :  { %3623 = vmax.xlane.f32.xlu1 %v3622_v44 }
0x1695   :  { %v3692_v42 = vpop.f32.mrf.mxu0 }
0x1696   :  { %v3695_v21 = vsel %vm113_vm4, %v3692_v42, -inf  ;;  %v6288_v59 = vpop.eup %6287 }
0x1697   :  { %v3555_v61 = vsel %vm113_vm4, %v6288_v59, 0.0 }
0x1699   :  { %3696 = vmax.xlane.f32.xlu1 %v3695_v21  ;;  %v3765_v57 = vpop.f32.mrf.mxu3  ;;  %v3913_v21 = vld [vmem:[#allocation2 + $0x1e0] sm:$0xff] }
0x169a   :  { %v3768_v28 = vsel %vm113_vm4, %v3765_v57, -inf }
0x169b   :  { %3769 = vmax.xlane.f32.xlu2 %v3768_v28 }
0x169d   :  { %v3853_v15 = vpop.f32.mrf.mxu0 }
0x169e   :  { %v3854_v26 = vadd.f32 %v7678_v29, %v3853_v15  ;;  %v7714_v15 = vld [vmem:[#allocation2 + $0x379] ss:$0 sm:$0xff] }
0x16a0   :  { %v3859_v14 = vadd.f32 %v3854_v26, %v7492_v62 }
0x16a1   :  { %3556 = vadd.xlane.f32.xlu1 %v3555_v61 }
0x16a2   :  { %v3861_v3 = vsel %vm39_vm0, %v3859_v14, 0.0 }
0x16a3   :  { %3862 = vadd.xlane.f32.xlu0 %v3861_v3 }
0x16b7   :  { %3635 = vrot.lane.b32.xlu0 %v7630_v11, %s6423_s25 }
0x16ba   :  { %3633 = vrot.lane.b32.xlu1 %v7639_v63, %s6423_s25 }
0x16c2   :  { %3560 = vrot.lane.b32.xlu1 %v7639_v63, %s6424_s26 }
0x16ca   :  { %3781 = vrot.lane.b32.xlu1 %v7630_v11, %s6428_s30 }
0x16d2   :  { %3708 = vrot.lane.b32.xlu1 %v7630_v11, %s6425_s27 }
0x1704   :  { %v3624_v62 = vpop.xlane.xlu1 %3623 }
0x1705   :  { %v3625_v55 = vsub.f32 %v3619_v49, %v3624_v62 }
0x1707   :  { %v3626_v13 = vmul.f32 1.442695, %v3625_v55 }
0x1709   :  { %6289 = vpow2.f32 %v3626_v13 }
0x170c   :  { %v3697_v30 = vpop.xlane.xlu1 %3696 }
0x170d   :  { %v3698_v0 = vsub.f32 %v3692_v42, %v3697_v30  ;;  %v3957_v30 = vld [vmem:[#allocation2 + $0x238] sm:$0xff] }
0x170e   :  { %v3770_v23 = vpop.xlane.xlu2 %3769  ;;  %3974 = vmatpush.msrb.mxu3 %v3957_v30 }
0x170f   :  { %v6290_v4 = vpop.eup %6289  ;;  %v3699_v27 = vmul.f32 1.442695, %v3698_v0  ;;  %v3771_v48 = vsub.f32 %v3765_v57, %v3770_v23  ;;  %v3956_v0 = vld [vmem:[#allocation2 + $0x230] sm:$0xff]  ;;  %v3955_v23 = vld [vmem:[#allocation2 + $0x228] sm:$0xff] }
0x1710   :  { %v3628_v12 = vsel %vm113_vm4, %v6290_v4, 0.0  ;;  %3975 = vmatpush.msrb.mxu3 %v3956_v0 }
0x1711   :  { %6291 = vpow2.f32 %v3699_v27  ;;  %v3772_v35 = vmul.f32 1.442695, %v3771_v48  ;;  %3629 = vadd.xlane.f32.xlu2 %v3628_v12  ;;  %v3953_v27 = vld [vmem:[#allocation2 + $0x218] sm:$0xff]  ;;  %v3952_v48 = vld [vmem:[#allocation2 + $0x210] sm:$0xff]  ;;  %v3951_v12 = vld [vmem:[#allocation2 + $0x208] sm:$0xff] }
0x1712   :  { %3976 = vmatpush.msrb.mxu3 %v3955_v23 }
0x1713   :  { %6293 = vpow2.f32 %v3772_v35  ;;  %v3950_v35 = vld [vmem:[#allocation2 + $0x200] sm:$0xff] }
0x1714   :  { %v3557_v22 = vpop.xlane.xlu1 %3556 }
0x1716   :  { %v3863_v37 = vpop.xlane.xlu0 %3862 }
0x1717   :  { %v6292_v6 = vpop.eup %6291  ;;  %v3867_v9 = vmul.f32 %v3863_v37, %v6841_v33 }
0x1718   :  { %v3701_v52 = vsel %vm113_vm4, %v6292_v6, 0.0 }
0x1719   :  { %v6294_v31 = vpop.eup %6293  ;;  %3702 = vadd.xlane.f32.xlu0 %v3701_v52  ;;  %v3869_v20 = vsub.f32 %v3859_v14, %v3867_v9  ;;  %v7716_v14 = vld [vmem:[#allocation2 + $0x37a] ss:$0 sm:$0xff] }
0x171a   :  { %v3774_v47 = vsel %vm113_vm4, %v6294_v31, 0.0 }
0x171b   :  { %3775 = vadd.xlane.f32.xlu2 %v3774_v47  ;;  %v3871_v2 = vmul.f32 %v3869_v20, %v3869_v20 }
0x171d   :  { %v3873_v17 = vsel %vm39_vm0, %v3871_v2, 0.0  ;;  %v7732_v2 = vld [vmem:[#allocation2 + $0x376] ss:$0 sm:$0xff] }
0x1729   :  { %v3636_v8 = vpop.permute.xlu0 %3635 }
0x172a   :  { %5902 = vmatpush.msk.msrb.mxu2 %vm148_vm3, %v3636_v8 }
0x172c   :  { %v3634_v7 = vpop.permute.xlu1 %3633 }
0x172d   :  { %3658 = vmatpush.msrb.mxu2 %v3634_v7 }
0x1733   :  { %3562 = vrot.lane.b32.xlu2 %v7630_v11, %s6424_s26 }
0x1734   :  { %v3561_v53 = vpop.permute.xlu1 %3560 }
0x173b   :  { %3779 = vrot.lane.b32.xlu2 %v7639_v63, %s6428_s30 }
0x173c   :  { %v3782_v54 = vpop.permute.xlu1 %3781 }
0x173d   :  { %5912 = vmatpush.msk.msra.mxu2 %vm148_vm3, %v3782_v54 }
0x1744   :  { %v3709_v25 = vpop.permute.xlu1 %3708 }
0x1764   :  { %3874 = vadd.xlane.f32.xlu2 %v3873_v17 }
0x177c   :  { %3706 = vrot.lane.b32.xlu2 %v7639_v63, %s6425_s27 }
0x1784   :  { %v3630_v10 = vpop.xlane.xlu2 %3629 }
0x1785   :  { %6295 = vrcp.f32 %v3630_v10 }
0x1786   :  { %6297 = vrcp.f32 %v3557_v22 }
0x178b   :  { %v6296_v11 = vpop.eup %6295 }
0x178c   :  { %v3632_v1 = vmul.f32 %v6296_v11, %v6290_v4  ;;  %v6298_v56 = vpop.eup %6297  ;;  %v3703_v34 = vpop.xlane.xlu0 %3702  ;;  %v3954_v4 = vld [vmem:[#allocation2 + $0x220] sm:$0xff] }
0x178d   :  { %v3559_v39 = vmul.f32 %v6298_v56, %v6288_v59  ;;  %3977 = vmatpush.msrb.mxu3 %v3954_v4 }
0x178e   :  { %v3776_v43 = vpop.xlane.xlu2 %3775  ;;  %5903 = vmatmul.msk.f32.vlgmr.msrb.gmra.mxu2 %vm113_vm4, %v3632_v1 }
0x178f   :  { %6299 = vrcp.f32 %v3776_v43  ;;  %3978 = vmatpush.msrb.mxu3 %v3953_v27 }
0x1790   :  { %6301 = vrcp.f32 %v3703_v34 }
0x1791   :  { %3979 = vmatpush.msrb.mxu3 %v3952_v48 }
0x1793   :  { %3980 = vmatpush.msrb.mxu3 %v3951_v12 }
0x1795   :  { %v6300_v58 = vpop.eup %6299  ;;  %3981 = vmatpush.msrb.mxu3 %v3950_v35 }
0x1796   :  { %v3563_v36 = vpop.permute.xlu2 %3562  ;;  %v3778_v63 = vmul.f32 %v6300_v58, %v6294_v31  ;;  %v6302_v32 = vpop.eup %6301  ;;  %v7724_v31 = vld [vmem:[#allocation2 + $0x375] ss:$0 sm:$0xff] }
0x1797   :  { %5897 = vmatpush.msk.msrb.mxu1 %vm148_vm3, %v3563_v36  ;;  %v3705_v46 = vmul.f32 %v6302_v32, %v6292_v6 }
0x1799   :  { %3585 = vmatpush.msrb.mxu1 %v3561_v53 }
0x179a   :  { %5898 = vmatmul.msk.f32.vlgmr.msrb.gmra.mxu1 %vm113_vm4, %v3559_v39 }
0x179b   :  { %5907 = vmatpush.msk.msra.mxu1 %vm148_vm3, %v3709_v25 }
0x179e   :  { %v3780_v41 = vpop.permute.xlu2 %3779 }
0x179f   :  { %3804 = vmatpush.msra.mxu2 %v3780_v41 }
0x17a0   :  { %5913 = vmatmul.msk.f32.vlgmr.msra.gmra.mxu2 %vm113_vm4, %v3778_v63 }
0x17d7   :  { %v3875_v40 = vpop.xlane.xlu2 %3874 }
0x17d8   :  { %v3879_v45 = vmul.f32 %v3875_v40, %v6841_v33 }
0x17da   :  { %v3881_v60 = vadd.f32 1e-05, %v3879_v45 }
0x17dc   :  { %6303 = vrsqrt.f32 %v3881_v60  ;;  %vm3889_vm14 = vweird.f32 %v3881_v60 }
0x17df   :  { %v3707_v5 = vpop.permute.xlu2 %3706 }
0x17e0   :  { %3731 = vmatpush.msra.mxu1 %v3707_v5  ;;  %v4044_v5 = vld [vmem:[#allocation2 + $0x248] sm:$0xff] }
0x17e1   :  { %5908 = vmatmul.msk.f32.vlgmr.msra.gmra.mxu1 %vm113_vm4, %v3705_v46  ;;  %v4045_v46 = vld [vmem:[#allocation2 + $0x250] sm:$0xff] }
0x17e2   :  { %v6304_v49 = vpop.eup %6303  ;;  %3937 = vmatpush.msrb.mxu1 %v3916_v18  ;;  %v4043_v18 = vld [vmem:[#allocation2 + $0x240] sm:$0xff] }
0x17e3   :  { %v3884_v44 = vmul.f32 %v6304_v49, %v3881_v60  ;;  %vm3890_vm13 = vweird.f32 %v6304_v49 }
0x17e4   :  { %3938 = vmatpush.msrb.mxu1 %v3915_v38  ;;  %vm3891_vm15 = vmor %vm3889_vm14, %vm3890_vm13 }
0x17e5   :  { %v3885_v42 = vmul.f32 %v6304_v49, %v3884_v44 }
0x17e6   :  { %3939 = vmatpush.msrb.mxu1 %v3914_v16 }
0x17e7   :  { %v3886_v57 = vmul.f32 0.5, %v3885_v42 }
0x17e8   :  { %3940 = vmatpush.msrb.mxu1 %v3913_v21 }
0x17e9   :  { %v3887_v28 = vsub.f32 1.5, %v3886_v57 }
0x17eb   :  { %v3888_v59 = vmul.f32 %v6304_v49, %v3887_v28 }
0x17ed   :  { %v3892_v26 = vsel %vm3891_vm15, %v6304_v49, %v3888_v59 }
0x17ee   :  { %v3903_v61 = vmul.f32 %v3892_v26, %v3869_v20  ;;  %v7744_v26 = vld [vmem:[#allocation2 + $0x37b] ss:$0 sm:$0xff] }
0x17f0   :  { %v3907_v3 = vmul.f32 %v7714_v15, %v3903_v61 }
0x17f2   :  { %v3911_v62 = vadd.f32 %v7716_v14, %v3907_v3  ;;  %v7746_v3 = vld [vmem:[#allocation2 + $0x37c] ss:$0 sm:$0xff] }
0x17f4   :  { %5916 = vmatmul.msk.f32.vlgmr.msrb.gmra.mxu1 %vm39_vm0, %v3911_v62 }
0x1811   :  { %v3660_v55 = vpop.f32.mrf.mxu2 }
0x1812   :  { %3810 = vrot.lane.b32.xlu1 %v3660_v55, %s6421_s18 }
0x1817   :  { %v3587_v6 = vpop.f32.mrf.mxu1 }
0x1823   :  { %v3806_v13 = vpop.f32.mrf.mxu2 }
0x1824   :  { %3818 = vrot.lane.b32.xlu1 %v3806_v13, %s6434_s9 }
0x185e   :  { %v3733_v52 = vpop.f32.mrf.mxu1 }
0x185f   :  { %3814 = vrot.lane.b32.xlu2 %v3733_v52, %s6433_s8 }
0x1871   :  { %v3942_v47 = vpop.f32.mrf.mxu1 }
0x1872   :  { %v3943_v37 = vadd.f32 %v7724_v31, %v3942_v47 }
0x1874   :  { %v3948_v22 = vmax.f32 %v3943_v37, 0.0 }
0x1876   :  { %5918 = vmatmul.msk.f32.vlgmr.msrb.gmra.mxu3 %vm1104_vm12, %v3948_v22 }
0x1884   :  { %v3811_v8 = vpop.permute.xlu1 %3810 }
0x1885   :  { %v3821_v7 = vsel %vm81_vm2, %v3587_v6, %v3811_v8  ;;  %v7758_v8 = vld [vmem:[#allocation2 + $0x37d] ss:$0 sm:$0xff] }
0x1896   :  { %v3819_v54 = vpop.permute.xlu1 %3818 }
0x18b9   :  { %v3815_v53 = vpop.permute.xlu2 %3814 }
0x18ba   :  { %v3822_v9 = vsel %vm491_vm6, %v3821_v7, %v3815_v53 }
0x18bb   :  { %v3823_v20 = vsel %vm494_vm7, %v3822_v9, %v3819_v54 }
0x18bc   :  { %5915 = vmatmul.msk.f32.gmra.mxu0 %vm39_vm0, %v3823_v20 }
0x18f9   :  { %v3983_v17 = vpop.f32.mrf.mxu3 }
0x18fa   :  { %v3984_v10 = vadd.f32 %v7732_v2, %v3983_v17 }
0x18fc   :  { %v3989_v11 = vadd.f32 %v3984_v10, %v3911_v62 }
0x18fe   :  { %v3991_v1 = vsel %vm39_vm0, %v3989_v11, 0.0 }
0x18ff   :  { %3992 = vadd.xlane.f32.xlu0 %v3991_v1 }
0x1939   :  { %v3856_v43 = vpop.f32.mrf.mxu0 }
0x193a   :  { %v3857_v56 = vadd.f32 %v7678_v29, %v3856_v43 }
0x193c   :  { %v3860_v36 = vadd.f32 %v3857_v56, %v7583_v51  ;;  %v4046_v51 = vld [vmem:[#allocation2 + $0x258] sm:$0xff] }
0x193d   :  { %4067 = vmatpush.msrb.mxu2 %v4046_v51 }
0x193e   :  { %v3864_v39 = vsel %vm39_vm0, %v3860_v36, 0.0 }
0x193f   :  { %3865 = vadd.xlane.f32.xlu2 %v3864_v39  ;;  %4068 = vmatpush.msrb.mxu2 %v4045_v46 }
0x1941   :  { %4069 = vmatpush.msrb.mxu2 %v4044_v5 }
0x1943   :  { %4070 = vmatpush.msrb.mxu2 %v4043_v18 }
0x1972   :  { %v3993_v25 = vpop.xlane.xlu0 %3992 }
0x1973   :  { %v3997_v58 = vmul.f32 %v3993_v25, %v6841_v33 }
0x1975   :  { %v3999_v63 = vsub.f32 %v3989_v11, %v3997_v58 }
0x1977   :  { %v4001_v41 = vmul.f32 %v3999_v63, %v3999_v63 }
0x1979   :  { %v4003_v34 = vsel %vm39_vm0, %v4001_v41, 0.0 }
0x197a   :  { %4004 = vadd.xlane.f32.xlu1 %v4003_v34 }
0x19b2   :  { %v3866_v40 = vpop.xlane.xlu2 %3865 }
0x19b3   :  { %v3868_v45 = vmul.f32 %v3866_v40, %v6841_v33 }
0x19b5   :  { %v3870_v60 = vsub.f32 %v3860_v36, %v3868_v45 }
0x19b7   :  { %v3872_v32 = vmul.f32 %v3870_v60, %v3870_v60 }
0x19b9   :  { %v3876_v29 = vsel %vm39_vm0, %v3872_v32, 0.0 }
0x19ba   :  { %3877 = vadd.xlane.f32.xlu0 %v3876_v29 }
0x19ed   :  { %v4005_v38 = vpop.xlane.xlu1 %4004 }
0x19ee   :  { %v4009_v49 = vmul.f32 %v4005_v38, %v6841_v33 }
0x19f0   :  { %v4011_v44 = vadd.f32 1e-05, %v4009_v49 }
0x19f2   :  { %6305 = vrsqrt.f32 %v4011_v44  ;;  %vm4019_vm9 = vweird.f32 %v4011_v44 }
0x19f8   :  { %v6306_v16 = vpop.eup %6305 }
0x19f9   :  { %v4014_v42 = vmul.f32 %v6306_v16, %v4011_v44  ;;  %vm4020_vm5 = vweird.f32 %v6306_v16 }
0x19fa   :  { %vm4021_vm8 = vmor %vm4019_vm9, %vm4020_vm5 }
0x19fb   :  { %v4015_v21 = vmul.f32 %v6306_v16, %v4014_v42 }
0x19fd   :  { %v4016_v57 = vmul.f32 0.5, %v4015_v21 }
0x19ff   :  { %v4017_v28 = vsub.f32 1.5, %v4016_v57 }
0x1a01   :  { %v4018_v59 = vmul.f32 %v6306_v16, %v4017_v28 }
0x1a03   :  { %v4022_v61 = vsel %vm4021_vm8, %v6306_v16, %v4018_v59 }
0x1a04   :  { %v4033_v62 = vmul.f32 %v4022_v61, %v3999_v63 }
0x1a06   :  { %v4037_v55 = vmul.f32 %v7744_v26, %v4033_v62 }
0x1a08   :  { %v7750_v13 = vadd.f32 %v7746_v3, %v4037_v55 }
0x1a0a   :  { %5920 = vmatmul.msk.f32.vlgmr.msrb.gmra.mxu2 %vm39_vm0, %v7750_v13 }
0x1a2d   :  { %v3878_v30 = vpop.xlane.xlu0 %3877 }
0x1a2e   :  { %v3880_v0 = vmul.f32 %v3878_v30, %v6841_v33 }
0x1a30   :  { %v3882_v23 = vadd.f32 1e-05, %v3880_v0 }
0x1a32   :  { %6307 = vrsqrt.f32 %v3882_v23  ;;  %vm3899_vm11 = vweird.f32 %v3882_v23 }
0x1a38   :  { %v6308_v4 = vpop.eup %6307 }
0x1a39   :  { %v3894_v27 = vmul.f32 %v6308_v4, %v3882_v23  ;;  %vm3900_vm10 = vweird.f32 %v6308_v4 }
0x1a3a   :  { %vm3901_vm13 = vmor %vm3899_vm11, %vm3900_vm10 }
0x1a3b   :  { %v3895_v48 = vmul.f32 %v6308_v4, %v3894_v27 }
0x1a3d   :  { %v3896_v12 = vmul.f32 0.5, %v3895_v48 }
0x1a3f   :  { %v3897_v35 = vsub.f32 1.5, %v3896_v12 }
0x1a41   :  { %v3898_v6 = vmul.f32 %v6308_v4, %v3897_v35 }
0x1a43   :  { %v3902_v52 = vsel %vm3901_vm13, %v6308_v4, %v3898_v6 }
0x1a44   :  { %v3904_v47 = vmul.f32 %v3902_v52, %v3870_v60 }
0x1a46   :  { %v3908_v37 = vmul.f32 %v7714_v15, %v3904_v47 }
0x1a48   :  { %v3912_v22 = vadd.f32 %v7716_v14, %v3908_v37 }
0x1a4a   :  { %5917 = vmatmul.msk.f32.gmra.mxu1 %vm39_vm0, %v3912_v22 }
0x1a8d   :  { %v4072_v7 = vpop.f32.mrf.mxu2 }
0x1a8e   :  { %v7761_v53 = vadd.f32 %v7758_v8, %v4072_v7 }
0x1a90   :  { %4116 = vrot.lane.b32.xlu2 %v7761_v53, %s6430_s5  ;;  %4079 = vrot.lane.b32.xlu0 %v7761_v53, %s6424_s26 }
0x1ac7   :  { %v3945_v54 = vpop.f32.mrf.mxu1 }
0x1ac8   :  { %v3946_v9 = vadd.f32 %v7724_v31, %v3945_v54 }
0x1aca   :  { %v3949_v15 = vmax.f32 %v3946_v9, 0.0 }
0x1acc   :  { %5919 = vmatmul.msk.f32.gmra.mxu3 %vm1104_vm12, %v3949_v15 }
0x1aea   :  { %v4117_v14 = vpop.permute.xlu2 %4116 }
0x1aeb   :  { %4137 = vmatpush.msra.mxu1 %v4117_v14 }
0x1b02   :  { %v4080_v20 = vpop.permute.xlu0 %4079 }
0x1b03   :  { %5922 = vmatpush.xpose.msk.msra.mxu0 %vm81_vm2, %v4080_v20 }
0x1b06   :  { %5923 = vmatmul.msk.f32.vlgmr.msra.gmra.mxu0 %vm81_vm2, %v7761_v53 }
0x1b4f   :  { %v3986_v17 = vpop.f32.mrf.mxu3 }
0x1b50   :  { %v3987_v10 = vadd.f32 %v7732_v2, %v3986_v17 }
0x1b52   :  { %v3990_v11 = vadd.f32 %v3987_v10, %v3912_v22 }
0x1b54   :  { %v3994_v1 = vsel %vm39_vm0, %v3990_v11, 0.0 }
0x1b55   :  { %3995 = vadd.xlane.f32.xlu0 %v3994_v1 }
0x1b69   :  { %4142 = vrot.lane.b32.xlu0 %v7761_v53, %s6422_s24 }
0x1b71   :  { %4246 = vrot.lane.b32.xlu0 %v7761_v53, %s6429_s4 }
0x1b79   :  { %4311 = vrot.lane.b32.xlu0 %v7761_v53, %s6431_s6 }
0x1b83   :  { %v4102_v31 = vpop.f32.mrf.mxu0 }
0x1b84   :  { %v4105_v43 = vsel %vm81_vm2, %v4102_v31, -inf }
0x1b85   :  { %4106 = vmax.xlane.f32.xlu2 %v4105_v43 }
0x1b9d   :  { %4274 = vrot.lane.b32.xlu2 %v7761_v53, %s6428_s30 }
0x1bc8   :  { %v3996_v2 = vpop.xlane.xlu0 %3995 }
0x1bc9   :  { %v3998_v56 = vmul.f32 %v3996_v2, %v6841_v33 }
0x1bcb   :  { %v4000_v36 = vsub.f32 %v3990_v11, %v3998_v56 }
0x1bcd   :  { %v4002_v39 = vmul.f32 %v4000_v36, %v4000_v36 }
0x1bcf   :  { %v4006_v25 = vsel %vm39_vm0, %v4002_v39, 0.0 }
0x1bd0   :  { %4007 = vadd.xlane.f32.xlu1 %v4006_v25 }
0x1bdb   :  { %v4143_v58 = vpop.permute.xlu0 %4142 }
0x1be3   :  { %v4247_v63 = vpop.permute.xlu0 %4246 }
0x1be4   :  { %4267 = vmatpush.msra.mxu3 %v4247_v63 }
0x1be9   :  { %4144 = vrot.lane.b32.xlu1 %v7761_v53, %s6423_s25 }
0x1bf1   :  { %4209 = vrot.lane.b32.xlu1 %v7761_v53, %s6425_s27 }
0x1bf8   :  { %v4107_v41 = vpop.xlane.xlu2 %4106 }
0x1bf9   :  { %v4108_v34 = vsub.f32 %v4102_v31, %v4107_v41  ;;  %4207 = vrot.lane.b32.xlu1 %v7761_v53, %s6427_s29  ;;  %v4753_v41 = vld [vmem:[#allocation2 + $0x2b8] sm:$0xff] }
0x1bfb   :  { %v4109_v40 = vmul.f32 1.442695, %v4108_v34 }
0x1bfd   :  { %6309 = vpow2.f32 %v4109_v40 }
0x1c00   :  { %v4275_v57 = vpop.permute.xlu2 %4274 }
0x1c03   :  { %v6310_v45 = vpop.eup %6309 }
0x1c04   :  { %v4111_v60 = vsel %vm81_vm2, %v6310_v45, 0.0 }
0x1c05   :  { %4112 = vadd.xlane.f32.xlu2 %v4111_v60  ;;  %v4751_v60 = vld [vmem:[#allocation2 + $0x2a8] sm:$0xff] }
0x1c1d   :  { %4272 = vrot.lane.b32.xlu2 %v7761_v53, %s6426_s28 }
0x1c43   :  { %v4008_v32 = vpop.xlane.xlu1 %4007 }
0x1c44   :  { %v4010_v29 = vmul.f32 %v4008_v32, %v6841_v33 }
0x1c46   :  { %v4012_v51 = vadd.f32 1e-05, %v4010_v29  ;;  %v4750_v29 = vld [vmem:[#allocation2 + $0x2a0] sm:$0xff] }
0x1c48   :  { %6311 = vrsqrt.f32 %v4012_v51  ;;  %vm4029_vm15 = vweird.f32 %v4012_v51 }
0x1c4e   :  { %v6312_v46 = vpop.eup %6311 }
0x1c4f   :  { %v4024_v5 = vmul.f32 %v6312_v46, %v4012_v51  ;;  %vm4030_vm14 = vweird.f32 %v6312_v46 }
0x1c50   :  { %vm4031_vm5 = vmor %vm4029_vm15, %vm4030_vm14 }
0x1c51   :  { %v4025_v18 = vmul.f32 %v6312_v46, %v4024_v5 }
0x1c53   :  { %v4026_v38 = vmul.f32 0.5, %v4025_v18 }
0x1c55   :  { %v4027_v49 = vsub.f32 1.5, %v4026_v38 }
0x1c57   :  { %v4028_v44 = vmul.f32 %v6312_v46, %v4027_v49 }
0x1c59   :  { %v4032_v16 = vsel %vm4031_vm5, %v6312_v46, %v4028_v44 }
0x1c5a   :  { %v4034_v42 = vmul.f32 %v4032_v16, %v4000_v36 }
0x1c5b   :  { %v4145_v21 = vpop.permute.xlu1 %4144 }
0x1c5c   :  { %5925 = vmatpush.xpose.msk.msra.mxu2 %vm81_vm2, %v4145_v21  ;;  %v4038_v28 = vmul.f32 %v7744_v26, %v4034_v42 }
0x1c5e   :  { %v7799_v59 = vadd.f32 %v7746_v3, %v4038_v28 }
0x1c60   :  { %5931 = vmatpush.xpose.msk.msrb.mxu2 %vm81_vm2, %v4275_v57 }
0x1c61   :  { %5921 = vmatmul.msk.f32.gmra.mxu2 %vm39_vm0, %v7799_v59 }
0x1c63   :  { %v4210_v61 = vpop.permute.xlu1 %4209 }
0x1c64   :  { %5928 = vmatpush.xpose.msk.msrb.mxu1 %vm81_vm2, %v4210_v61 }
0x1c69   :  { %5926 = vmatmul.msk.f32.vlgmr.msra.gmra.mxu2 %vm81_vm2, %v4143_v58 }
0x1c6b   :  { %v4208_v26 = vpop.permute.xlu1 %4207 }
0x1c78   :  { %v4113_v62 = vpop.xlane.xlu2 %4112 }
0x1c79   :  { %6313 = vrcp.f32 %v4113_v62 }
0x1c7f   :  { %v6314_v55 = vpop.eup %6313 }
0x1c80   :  { %v4115_v30 = vmul.f32 %v6314_v55, %v6310_v45  ;;  %v4273_v0 = vpop.permute.xlu2 %4272  ;;  %v4752_v45 = vld [vmem:[#allocation2 + $0x2b0] sm:$0xff] }
0x1c81   :  { %5932 = vmatmul.msk.f32.vlgmr.msrb.gmra.mxu2 %vm81_vm2, %v4273_v0 }
0x1c82   :  { %5924 = vmatmul.msk.f32.vlgmr.msra.gmra.mxu1 %vm81_vm2, %v4115_v30 }
0x1c8a   :  { %5929 = vmatmul.msk.f32.vlgmr.msrb.gmra.mxu1 %vm81_vm2, %v4208_v26 }
0x1ce4   :  { %v4075_v3 = vpop.f32.mrf.mxu2 }
0x1ce5   :  { %v7816_v52 = vadd.f32 %v7758_v8, %v4075_v3 }
0x1cec   :  { %v4167_v23 = vpop.f32.mrf.mxu2 }
0x1ced   :  { %v4170_v4 = vsel %vm81_vm2, %v4167_v23, -inf }
0x1cee   :  { %4171 = vmax.xlane.f32.xlu1 %v4170_v4  ;;  %v4628_v4 = vld [vmem:[#allocation2 + $0x270] sm:$0xff] }
0x1cff   :  { %v7809_v27 = vpop.f32.mrf.mxu1 }
0x1d04   :  { %v4297_v48 = vpop.f32.mrf.mxu2 }
0x1d05   :  { %v4300_v12 = vsel %vm81_vm2, %v4297_v48, -inf }
0x1d06   :  { %4301 = vmax.xlane.f32.xlu2 %v4300_v12  ;;  %v4626_v12 = vld [vmem:[#allocation2 + $0x260] sm:$0xff] }
0x1d07   :  { %4181 = vrot.lane.b32.xlu1 %v7761_v53, %s6432_s7  ;;  %v4232_v35 = vpop.f32.mrf.mxu1  ;;  %v4312_v53 = vpop.permute.xlu0 %4311 }
0x1d08   :  { %v4235_v6 = vsel %vm81_vm2, %v4232_v35, -inf }
0x1d09   :  { %4236 = vmax.xlane.f32.xlu0 %v4235_v6 }
0x1d0f   :  { %4418 = vrot.lane.b32.xlu1 %v7816_v52, %s6423_s25 }
0x1d1d   :  { %4483 = vrot.lane.b32.xlu0 %v7816_v52, %s6425_s27 }
0x1d1e   :  { %4353 = vrot.lane.b32.xlu2 %v7816_v52, %s6424_s26 }
0x1d26   :  { %4416 = vrot.lane.b32.xlu2 %v7816_v52, %s6422_s24 }
0x1d61   :  { %v4172_v47 = vpop.xlane.xlu1 %4171 }
0x1d62   :  { %v4173_v37 = vsub.f32 %v4167_v23, %v4172_v47  ;;  %v4629_v23 = vld [vmem:[#allocation2 + $0x278] sm:$0xff] }
0x1d64   :  { %v4174_v22 = vmul.f32 1.442695, %v4173_v37 }
0x1d66   :  { %6315 = vpow2.f32 %v4174_v22 }
0x1d6c   :  { %v6316_v7 = vpop.eup %6315 }
0x1d6d   :  { %v4176_v8 = vsel %vm81_vm2, %v6316_v7, 0.0 }
0x1d6e   :  { %4177 = vadd.xlane.f32.xlu1 %v4176_v8 }
0x1d79   :  { %v4182_v54 = vpop.permute.xlu1 %4181  ;;  %v4302_v9 = vpop.xlane.xlu2 %4301 }
0x1d7a   :  { %4202 = vmatpush.msrb.mxu0 %v4182_v54  ;;  %v4303_v15 = vsub.f32 %v4297_v48, %v4302_v9  ;;  %v4627_v48 = vld [vmem:[#allocation2 + $0x268] sm:$0xff] }
0x1d7c   :  { %4332 = vmatpush.msra.mxu0 %v4312_v53  ;;  %v4304_v14 = vmul.f32 1.442695, %v4303_v15  ;;  %v4237_v20 = vpop.xlane.xlu0 %4236 }
0x1d7d   :  { %v4238_v17 = vsub.f32 %v4232_v35, %v4237_v20 }
0x1d7e   :  { %6317 = vpow2.f32 %v4304_v14 }
0x1d7f   :  { %v4239_v10 = vmul.f32 1.442695, %v4238_v17 }
0x1d81   :  { %v4419_v11 = vpop.permute.xlu1 %4418  ;;  %6319 = vpow2.f32 %v4239_v10  ;;  %v4354_v1 = vpop.permute.xlu2 %4353 }
0x1d82   :  { %5937 = vmatpush.xpose.msk.msra.mxu2 %vm81_vm2, %v4419_v11  ;;  %5934 = vmatpush.xpose.msk.msra.mxu1 %vm81_vm2, %v4354_v1 }
0x1d84   :  { %v6318_v31 = vpop.eup %6317 }
0x1d85   :  { %5935 = vmatmul.msk.f32.vlgmr.msra.gmra.mxu1 %vm81_vm2, %v7816_v52  ;;  %v4306_v43 = vsel %vm81_vm2, %v6318_v31, 0.0 }
0x1d86   :  { %4307 = vadd.xlane.f32.xlu2 %v4306_v43 }
0x1d87   :  { %4548 = vrot.lane.b32.xlu1 %v7816_v52, %s6428_s30  ;;  %v6320_v2 = vpop.eup %6319 }
0x1d88   :  { %v4241_v56 = vsel %vm81_vm2, %v6320_v2, 0.0 }
0x1d89   :  { %v4417_v36 = vpop.permute.xlu2 %4416  ;;  %4242 = vadd.xlane.f32.xlu0 %v4241_v56  ;;  %v7880_v56 = vld [vmem:[#allocation2 + $0x37e] ss:$0 sm:$0xff] }
0x1d8a   :  { %5938 = vmatmul.msk.f32.vlgmr.msra.gmra.mxu2 %vm81_vm2, %v4417_v36 }
0x1d8f   :  { %v4484_v39 = vpop.permute.xlu0 %4483 }
0x1d90   :  { %5940 = vmatpush.xpose.msk.msrb.mxu1 %vm81_vm2, %v4484_v39 }
0x1d94   :  { %4650 = vmatpush.msra.mxu1 %v4629_v23  ;;  %v4716_v23 = vld [vmem:[#allocation2 + $0x288] sm:$0xff] }
0x1d96   :  { %4651 = vmatpush.msra.mxu1 %v4628_v4  ;;  %v4715_v4 = vld [vmem:[#allocation2 + $0x280] sm:$0xff] }
0x1d98   :  { %4652 = vmatpush.msra.mxu1 %v4627_v48 }
0x1d9a   :  { %4653 = vmatpush.msra.mxu1 %v4626_v12 }
0x1d9d   :  { %4546 = vrot.lane.b32.xlu0 %v7816_v52, %s6426_s28 }
0x1d9e   :  { %4481 = vrot.lane.b32.xlu2 %v7816_v52, %s6427_s29 }
0x1de1   :  { %v4178_v25 = vpop.xlane.xlu1 %4177 }
0x1de2   :  { %6321 = vrcp.f32 %v4178_v25 }
0x1de8   :  { %v6322_v58 = vpop.eup %6321 }
0x1de9   :  { %v4180_v63 = vmul.f32 %v6322_v58, %v6316_v7 }
0x1deb   :  { %5927 = vmatmul.msk.f32.vlgmr.msrb.gmra.mxu0 %vm81_vm2, %v4180_v63 }
0x1df9   :  { %v4549_v34 = vpop.permute.xlu1 %4548  ;;  %v4308_v40 = vpop.xlane.xlu2 %4307 }
0x1dfa   :  { %5943 = vmatpush.xpose.msk.msrb.mxu2 %vm81_vm2, %v4549_v34  ;;  %6323 = vrcp.f32 %v4308_v40 }
0x1dfc   :  { %v4243_v32 = vpop.xlane.xlu0 %4242 }
0x1dfd   :  { %6325 = vrcp.f32 %v4243_v32 }
0x1dfe   :  { %4768 = vmatpush.msra.mxu2 %v4753_v41  ;;  %v7885_v41 = vld [vmem:[#allocation2 + $0x380] ss:$0 sm:$0xff] }
0x1e00   :  { %4769 = vmatpush.msra.mxu2 %v4752_v45  ;;  %v6324_v51 = vpop.eup %6323 }
0x1e01   :  { %v4310_v46 = vmul.f32 %v6324_v51, %v6318_v31  ;;  %v4482_v5 = vpop.permute.xlu2 %4481 }
0x1e02   :  { %4770 = vmatpush.msra.mxu2 %v4751_v60  ;;  %5941 = vmatmul.msk.f32.vlgmr.msrb.gmra.mxu1 %vm81_vm2, %v4482_v5  ;;  %v4376_v28 = vpop.f32.mrf.mxu1 }
0x1e03   :  { %v6326_v18 = vpop.eup %6325  ;;  %5933 = vmatmul.msk.f32.vlgmr.msra.gmra.mxu0 %vm81_vm2, %v4310_v46  ;;  %v4379_v61 = vsel %vm81_vm2, %v4376_v28, -inf }
0x1e04   :  { %4771 = vmatpush.msra.mxu2 %v4750_v29  ;;  %v4245_v38 = vmul.f32 %v6326_v18, %v6320_v2 }
0x1e06   :  { %5930 = vmatmul.msk.f32.vlgmr.msra.gmra.mxu3 %vm81_vm2, %v4245_v38 }
0x1e0d   :  { %v4441_v49 = vpop.f32.mrf.mxu2 }
0x1e0e   :  { %v4444_v44 = vsel %vm81_vm2, %v4441_v49, -inf }
0x1e0f   :  { %4445 = vmax.xlane.f32.xlu2 %v4444_v44  ;;  %v4547_v16 = vpop.permute.xlu0 %4546 }
0x1e10   :  { %5944 = vmatmul.msk.f32.vlgmr.msrb.gmra.mxu2 %vm81_vm2, %v4547_v16 }
0x1e18   :  { %5950 = vmatmul.msk.f32.vlgmr.msra.gmra.mxu2 %vm39_vm0, %v7489_v24 }
0x1e20   :  { %5951 = vmatmul.msk.f32.gmra.mxu2 %vm39_vm0, %v7505_v19 }
0x1e28   :  { %5952 = vmatmul.msk.f32.gmra.mxu2 %vm39_vm0, %v7624_v50 }
0x1e68   :  { %v4204_v42 = vpop.f32.mrf.mxu0 }
0x1e69   :  { %4338 = vrot.lane.b32.xlu1 %v4204_v42, %s6421_s18 }
0x1e7f   :  { %v4506_v19 = vpop.f32.mrf.mxu1 }
0x1e80   :  { %v4334_v21 = vpop.f32.mrf.mxu0  ;;  %v4509_v50 = vsel %vm81_vm2, %v4506_v19, -inf }
0x1e81   :  { %4346 = vrot.lane.b32.xlu0 %v4334_v21, %s6434_s9 }
0x1e82   :  { %v4446_v24 = vpop.xlane.xlu2 %4445 }
0x1e83   :  { %v4447_v62 = vsub.f32 %v4441_v49, %v4446_v24 }
0x1e85   :  { %v4448_v55 = vmul.f32 1.442695, %v4447_v62 }
0x1e87   :  { %6327 = vpow2.f32 %v4448_v55 }
0x1e89   :  { %v4269_v57 = vpop.f32.mrf.mxu3 }
0x1e8a   :  { %4342 = vrot.lane.b32.xlu2 %v4269_v57, %s6433_s8 }
0x1e8d   :  { %v7859_v30 = vpop.eup %6327 }
0x1e8e   :  { %v4450_v26 = vsel %vm81_vm2, %v7859_v30, 0.0 }
0x1e93   :  { %4380 = vmax.xlane.f32.xlu1 %v4379_v61  ;;  %v4571_v0 = vpop.f32.mrf.mxu2 }
0x1e94   :  { %v4574_v3 = vsel %vm81_vm2, %v4571_v0, -inf }
0x1e9b   :  { %v4773_v63 = vpop.f32.mrf.mxu2 }
0x1e9c   :  { %v7888_v34 = vadd.f32 %v7885_v41, %v4773_v63 }
0x1ea3   :  { %v4776_v40 = vpop.f32.mrf.mxu2 }
0x1ea4   :  { %v7893_v45 = vadd.f32 %v7885_v41, %v4776_v40 }
0x1eab   :  { %4510 = vmax.xlane.f32.xlu0 %v4509_v50 }
0x1eb3   :  { %4451 = vadd.xlane.f32.xlu0 %v4450_v26  ;;  %4575 = vmax.xlane.f32.xlu2 %v4574_v3  ;;  %v4718_v26 = vld [vmem:[#allocation2 + $0x298] sm:$0xff]  ;;  %v4717_v3 = vld [vmem:[#allocation2 + $0x290] sm:$0xff] }
0x1edb   :  { %v4339_v35 = vpop.permute.xlu1 %4338 }
0x1edc   :  { %v4349_v47 = vsel %vm81_vm2, %v7809_v27, %v4339_v35 }
0x1ee4   :  { %v4343_v6 = vpop.permute.xlu2 %4342 }
0x1ee5   :  { %v4350_v37 = vsel %vm491_vm6, %v4349_v47, %v4343_v6 }
0x1ef3   :  { %v4347_v22 = vpop.permute.xlu0 %4346 }
0x1ef4   :  { %v4351_v7 = vsel %vm494_vm7, %v4350_v37, %v4347_v22 }
0x1ef5   :  { %5946 = vmatmul.msk.f32.vlgmr.msra.gmra.mxu1 %vm39_vm0, %v4351_v7 }
0x1f06   :  { %v4381_v8 = vpop.xlane.xlu1 %4380 }
0x1f07   :  { %v4382_v53 = vsub.f32 %v4376_v28, %v4381_v8 }
0x1f09   :  { %v4383_v54 = vmul.f32 1.442695, %v4382_v53  ;;  %v7916_v53 = vld [vmem:[#allocation2 + $0x384] ss:$0 sm:$0xff] }
0x1f0b   :  { %6329 = vpow2.f32 %v4383_v54 }
0x1f11   :  { %v6330_v9 = vpop.eup %6329 }
0x1f12   :  { %v4385_v15 = vsel %vm81_vm2, %v6330_v9, 0.0 }
0x1f13   :  { %4386 = vadd.xlane.f32.xlu1 %v4385_v15 }
0x1f1e   :  { %v4511_v14 = vpop.xlane.xlu0 %4510 }
0x1f1f   :  { %v4512_v20 = vsub.f32 %v4506_v19, %v4511_v14 }
0x1f21   :  { %v4513_v17 = vmul.f32 1.442695, %v4512_v20 }
0x1f23   :  { %6331 = vpow2.f32 %v4513_v17 }
0x1f26   :  { %v4576_v27 = vpop.xlane.xlu2 %4575  ;;  %v4452_v60 = vpop.xlane.xlu0 %4451 }
0x1f27   :  { %v4577_v10 = vsub.f32 %v4571_v0, %v4576_v27 }
0x1f29   :  { %v6332_v11 = vpop.eup %6331  ;;  %v4578_v1 = vmul.f32 1.442695, %v4577_v10 }
0x1f2a   :  { %v4515_v31 = vsel %vm81_vm2, %v6332_v11, 0.0 }
0x1f2b   :  { %6333 = vpow2.f32 %v4578_v1  ;;  %4516 = vadd.xlane.f32.xlu2 %v4515_v31 }
0x1f2c   :  { %4390 = vrot.lane.b32.xlu1 %v7816_v52, %s6430_s5 }
0x1f31   :  { %v6334_v43 = vpop.eup %6333 }
0x1f32   :  { %v4580_v2 = vsel %vm81_vm2, %v6334_v43, 0.0 }
0x1f33   :  { %4581 = vadd.xlane.f32.xlu0 %v4580_v2 }
0x1f34   :  { %4585 = vrot.lane.b32.xlu1 %v7816_v52, %s6431_s6 }
0x1f43   :  { %4455 = vrot.lane.b32.xlu2 %v7816_v52, %s6432_s7 }
0x1f47   :  { %4520 = vrot.lane.b32.xlu0 %v7816_v52, %s6429_s4 }
0x1f72   :  { %v4655_v36 = vpop.f32.mrf.mxu1 }
0x1f73   :  { %v4656_v39 = vadd.f32 %v7880_v56, %v4655_v36  ;;  %v7932_v36 = vld [vmem:[#allocation2 + $0x37f] ss:$0 sm:$0xff] }
0x1f75   :  { %v4661_v25 = vadd.f32 %v4656_v39, %v7750_v13 }
0x1f77   :  { %v4663_v58 = vsel %vm39_vm0, %v4661_v25, 0.0 }
0x1f78   :  { %4664 = vadd.xlane.f32.xlu2 %v4663_v58 }
0x1f86   :  { %v4387_v52 = vpop.xlane.xlu1 %4386 }
0x1f87   :  { %6335 = vrcp.f32 %v4387_v52 }
0x1f88   :  { %6337 = vrcp.f32 %v4452_v60 }
0x1f8d   :  { %v6336_v13 = vpop.eup %6335 }
0x1f8e   :  { %v4389_v32 = vmul.f32 %v6336_v13, %v6330_v9  ;;  %v6338_v46 = vpop.eup %6337  ;;  %v7918_v9 = vld [vmem:[#allocation2 + $0x385] ss:$0 sm:$0xff] }
0x1f8f   :  { %v4454_v5 = vmul.f32 %v6338_v46, %v7859_v30 }
0x1f90   :  { %4854 = vrot.lane.b32.xlu2 %v7888_v34, %s6422_s24 }
0x1f98   :  { %5002 = vrot.lane.b32.xlu2 %v7893_v45, %s6426_s28 }
0x1f9e   :  { %v4391_v29 = vpop.permute.xlu1 %4390  ;;  %v4517_v51 = vpop.xlane.xlu2 %4516 }
0x1f9f   :  { %4411 = vmatpush.msrb.mxu3 %v4391_v29 }
0x1fa0   :  { %5936 = vmatmul.msk.f32.vlgmr.msrb.gmra.mxu3 %vm81_vm2, %v4389_v32  ;;  %4929 = vrot.lane.b32.xlu2 %v7893_v45, %s6427_s29 }
0x1fa6   :  { %v4456_v18 = vpop.permute.xlu2 %4455  ;;  %v4582_v38 = vpop.xlane.xlu0 %4581 }
0x1fa7   :  { %6339 = vrcp.f32 %v4582_v38  ;;  %4476 = vmatpush.msrb.mxu0 %v4456_v18  ;;  %v4586_v49 = vpop.permute.xlu1 %4585  ;;  %v4779_v18 = vpop.f32.mrf.mxu2 }
0x1fa8   :  { %5939 = vmatmul.msk.f32.vlgmr.msrb.gmra.mxu0 %vm81_vm2, %v4454_v5  ;;  %6341 = vrcp.f32 %v4517_v51  ;;  %v4780_v38 = vadd.f32 %v7885_v41, %v4779_v18 }
0x1fa9   :  { %4606 = vmatpush.msra.mxu0 %v4586_v49 }
0x1faa   :  { %v7963_v49 = vrot.slane %v4780_v38, 2 }
0x1fab   :  { %5953 = vmatpush.xpose.msk.msrb.mxu0 %vm81_vm2, %v7893_v45 }
0x1fad   :  { %v6340_v44 = vpop.eup %6339 }
0x1fae   :  { %v4584_v16 = vmul.f32 %v6340_v44, %v6334_v43  ;;  %v6342_v42 = vpop.eup %6341  ;;  %v5087_v44 = vrot.slane %v7893_v45, 2 }
0x1faf   :  { %5954 = vmatpush.xpose.msk.msrb.mxu0 %vm81_vm2, %v7888_v34  ;;  %v4519_v21 = vmul.f32 %v6342_v42, %v6332_v11 }
0x1fb0   :  { %5945 = vmatmul.msk.f32.vlgmr.msra.gmra.mxu0 %vm81_vm2, %v4584_v16  ;;  %v7970_v16 = vsel %vm498_vm1, %v5087_v44, %v7963_v49 }
0x1fb9   :  { %v4521_v57 = vpop.permute.xlu0 %4520 }
0x1fba   :  { %4541 = vmatpush.msra.mxu3 %v4521_v57 }
0x1fbb   :  { %5942 = vmatmul.msk.f32.vlgmr.msra.gmra.mxu3 %vm81_vm2, %v4519_v21 }
0x1fbc   :  { %4739 = vmatpush.msrb.mxu3 %v4718_v26 }
0x1fbe   :  { %4740 = vmatpush.msrb.mxu3 %v4717_v3 }
0x1fc0   :  { %4741 = vmatpush.msrb.mxu3 %v4716_v23 }
0x1fc2   :  { %4742 = vmatpush.msrb.mxu3 %v4715_v4 }
0x1feb   :  { %v4665_v28 = vpop.xlane.xlu2 %4664 }
0x1fec   :  { %v4669_v61 = vmul.f32 %v4665_v28, %v6841_v33 }
0x1fee   :  { %v4671_v24 = vsub.f32 %v4661_v25, %v4669_v61 }
0x1ff0   :  { %v4673_v62 = vmul.f32 %v4671_v24, %v4671_v24 }
0x1ff2   :  { %v4675_v55 = vsel %vm39_vm0, %v4673_v62, 0.0 }
0x1ff3   :  { %4676 = vadd.xlane.f32.xlu0 %v4675_v55  ;;  %v4855_v2 = vpop.permute.xlu2 %4854 }
0x2023   :  { %v4413_v50 = vpop.f32.mrf.mxu3 }
0x2025   :  { %v4478_v19 = vpop.f32.mrf.mxu0 }
0x2026   :  { %4612 = vrot.lane.b32.xlu1 %v4478_v19, %s6421_s18 }
0x202d   :  { %v4608_v0 = vpop.f32.mrf.mxu0 }
0x203e   :  { %v4543_v30 = vpop.f32.mrf.mxu3 }
0x203f   :  { %4616 = vrot.lane.b32.xlu1 %v4543_v30, %s6433_s8 }
0x2047   :  { %4620 = vrot.lane.b32.xlu1 %v4608_v0, %s6434_s9 }
0x204f   :  { %4856 = vrot.lane.b32.xlu1 %v7893_v45, %s6422_s24 }
0x2066   :  { %v4677_v48 = vpop.xlane.xlu0 %4676 }
0x2067   :  { %v4681_v12 = vmul.f32 %v4677_v48, %v6841_v33 }
0x2069   :  { %v4683_v35 = vadd.f32 1e-05, %v4681_v12 }
0x206b   :  { %6343 = vrsqrt.f32 %v4683_v35  ;;  %vm4691_vm8 = vweird.f32 %v4683_v35 }
0x2071   :  { %v6344_v6 = vpop.eup %6343 }
0x2072   :  { %v4686_v47 = vmul.f32 %v6344_v6, %v4683_v35  ;;  %vm4692_vm9 = vweird.f32 %v6344_v6 }
0x2073   :  { %vm4693_vm10 = vmor %vm4691_vm8, %vm4692_vm9 }
0x2074   :  { %v4687_v37 = vmul.f32 %v6344_v6, %v4686_v47 }
0x2076   :  { %v4688_v22 = vmul.f32 0.5, %v4687_v37 }
0x2078   :  { %v4689_v7 = vsub.f32 1.5, %v4688_v22 }
0x207a   :  { %v4690_v8 = vmul.f32 %v6344_v6, %v4689_v7 }
0x207c   :  { %v4694_v54 = vsel %vm4693_vm10, %v6344_v6, %v4690_v8 }
0x207d   :  { %v4705_v15 = vmul.f32 %v4694_v54, %v4671_v24 }
0x207f   :  { %v4709_v14 = vmul.f32 %v7916_v53, %v4705_v15 }
0x2081   :  { %v7922_v20 = vadd.f32 %v7918_v9, %v4709_v14 }
0x2083   :  { %5948 = vmatmul.msk.f32.vlgmr.msrb.gmra.mxu3 %vm39_vm0, %v7922_v20 }
0x2098   :  { %v4613_v17 = vpop.permute.xlu1 %4612 }
0x2099   :  { %v4623_v10 = vsel %vm81_vm2, %v4413_v50, %v4613_v17  ;;  %v5003_v50 = vpop.permute.xlu2 %5002 }
0x20a1   :  { %v4930_v12 = vpop.permute.xlu2 %4929 }
0x20b1   :  { %v4617_v27 = vpop.permute.xlu1 %4616 }
0x20b2   :  { %v4624_v11 = vsel %vm491_vm6, %v4623_v10, %v4617_v27 }
0x20b9   :  { %v4621_v1 = vpop.permute.xlu1 %4620 }
0x20ba   :  { %v4625_v31 = vsel %vm494_vm7, %v4624_v11, %v4621_v1 }
0x20bb   :  { %5947 = vmatmul.msk.f32.gmra.mxu1 %vm39_vm0, %v4625_v31 }
0x20c1   :  { %v4857_v43 = vpop.permute.xlu1 %4856 }
0x20c2   :  { %5958 = vmatpush.xpose.msk.msrb.mxu1 %vm81_vm2, %v4857_v43 }
0x20c6   :  { %5959 = vmatpush.xpose.msk.msrb.mxu1 %vm81_vm2, %v4855_v2 }
0x2106   :  { %v4744_v39 = vpop.f32.mrf.mxu3 }
0x2107   :  { %v4745_v25 = vadd.f32 %v7932_v36, %v4744_v39 }
0x2109   :  { %4852 = vrot.lane.b32.xlu0 %v4745_v25, %s6422_s24  ;;  %5955 = vmatmul.msk.f32.vlgmr.msrb.gmra.mxu0 %vm81_vm2, %v4745_v25 }
0x2138   :  { %v4658_v58 = vpop.f32.mrf.mxu1 }
0x2139   :  { %v4659_v63 = vadd.f32 %v7880_v56, %v4658_v58 }
0x213b   :  { %v4662_v52 = vadd.f32 %v4659_v63, %v7799_v59 }
0x213d   :  { %v4666_v40 = vsel %vm39_vm0, %v4662_v52, 0.0 }
0x213e   :  { %4667 = vadd.xlane.f32.xlu1 %v4666_v40 }
0x2157   :  { %4897 = vrot.lane.b32.xlu1 %v7893_v45, %s6423_s25 }
0x215f   :  { %5000 = vrot.lane.b32.xlu1 %v7888_v34, %s6426_s28 }
0x2167   :  { %4822 = vrot.lane.b32.xlu1 %v7888_v34, %s6424_s26 }
0x216f   :  { %4927 = vrot.lane.b32.xlu1 %v7888_v34, %s6427_s29 }
0x2177   :  { %4998 = vrot.lane.b32.xlu1 %v4745_v25, %s6426_s28 }
0x217b   :  { %v4853_v56 = vpop.permute.xlu0 %4852 }
0x217c   :  { %5960 = vmatmul.msk.f32.vlgmr.msrb.gmra.mxu1 %vm81_vm2, %v4853_v56 }
0x2186   :  { %v7950_v59 = vpop.f32.mrf.mxu0 }
0x2187   :  { %v4811_v13 = vsel %vm113_vm4, %v7950_v59, -inf }
0x21a1   :  { %4812 = vmax.xlane.f32.xlu1 %v4811_v13 }
0x21b1   :  { %v4668_v60 = vpop.xlane.xlu1 %4667 }
0x21b2   :  { %v4670_v32 = vmul.f32 %v4668_v60, %v6841_v33 }
0x21b4   :  { %v4672_v29 = vsub.f32 %v4662_v52, %v4670_v32 }
0x21b6   :  { %v4674_v51 = vmul.f32 %v4672_v29, %v4672_v29 }
0x21b8   :  { %v4678_v46 = vsel %vm39_vm0, %v4674_v51, 0.0 }
0x21b9   :  { %4679 = vadd.xlane.f32.xlu0 %v4678_v46 }
0x21ba   :  { %4925 = vrot.lane.b32.xlu1 %v4745_v25, %s6427_s29 }
0x21c9   :  { %v4898_v5 = vpop.permute.xlu1 %4897 }
0x21ca   :  { %5961 = vmatpush.msk.msra.mxu3 %vm148_vm3, %v4898_v5 }
0x21cd   :  { %4895 = vrot.lane.b32.xlu0 %v7888_v34, %s6423_s25 }
0x21d1   :  { %v5001_v61 = vpop.permute.xlu1 %5000 }
0x21d5   :  { %4824 = vrot.lane.b32.xlu0 %v7893_v45, %s6424_s26 }
0x21d9   :  { %v4823_v3 = vpop.permute.xlu1 %4822 }
0x21dd   :  { %5162 = vrot.lane.b32.xlu0 %v7963_v49, %s6422_s24 }
0x21e1   :  { %v4928_v35 = vpop.permute.xlu1 %4927 }
0x21e5   :  { %5160 = vrot.lane.b32.xlu0 %v7970_v16, %s6422_s24 }
0x21e9   :  { %v4999_v7 = vpop.permute.xlu1 %4998 }
0x21ed   :  { %5308 = vrot.lane.b32.xlu0 %v7963_v49, %s6426_s28 }
0x21f9   :  { %v4881_v37 = vpop.f32.mrf.mxu1 }
0x21fa   :  { %v4884_v22 = vsel %vm113_vm4, %v4881_v37, -inf }
0x2214   :  { %v4813_v8 = vpop.xlane.xlu1 %4812 }
0x2215   :  { %v4814_v54 = vsub.f32 %v7950_v59, %v4813_v8 }
0x222c   :  { %v4680_v42 = vpop.xlane.xlu0 %4679  ;;  %v4926_v13 = vpop.permute.xlu1 %4925 }
0x222d   :  { %v4682_v41 = vmul.f32 %v4680_v42, %v6841_v33 }
0x222f   :  { %v4684_v21 = vadd.f32 1e-05, %v4682_v41 }
0x2231   :  { %6345 = vrsqrt.f32 %v4684_v21  ;;  %vm4701_vm1 = vweird.f32 %v4684_v21 }
0x2237   :  { %v6346_v57 = vpop.eup %6345 }
0x2238   :  { %v4696_v28 = vmul.f32 %v6346_v57, %v4684_v21  ;;  %vm4702_vm11 = vweird.f32 %v6346_v57 }
0x2239   :  { %vm4703_vm13 = vmor %vm4701_vm1, %vm4702_vm11 }
0x223a   :  { %v4697_v24 = vmul.f32 %v6346_v57, %v4696_v28 }
0x223c   :  { %v4698_v62 = vmul.f32 0.5, %v4697_v24 }
0x223e   :  { %v4699_v55 = vsub.f32 1.5, %v4698_v62 }
0x223f   :  { %v4896_v19 = vpop.permute.xlu0 %4895 }
0x2240   :  { %v4700_v30 = vmul.f32 %v6346_v57, %v4699_v55  ;;  %4920 = vmatpush.msra.mxu3 %v4896_v19 }
0x2242   :  { %5968 = vmatpush.xpose.msk.msrb.mxu3 %vm81_vm2, %v5003_v50  ;;  %v4704_v0 = vsel %vm4703_vm13, %v6346_v57, %v4700_v30 }
0x2243   :  { %v4706_v26 = vmul.f32 %v4704_v0, %v4672_v29 }
0x2245   :  { %v4710_v23 = vmul.f32 %v7916_v53, %v4706_v26 }
0x2246   :  { %5969 = vmatpush.xpose.msk.msrb.mxu3 %vm81_vm2, %v5001_v61 }
0x2247   :  { %v4825_v4 = vpop.permute.xlu0 %4824  ;;  %v7981_v48 = vadd.f32 %v7918_v9, %v4710_v23  ;;  %v4815_v9 = vmul.f32 1.442695, %v4814_v54 }
0x2248   :  { %5956 = vmatpush.msk.msra.mxu0 %vm148_vm3, %v4825_v4 }
0x2249   :  { %5949 = vmatmul.msk.f32.gmra.mxu3 %vm39_vm0, %v7981_v48  ;;  %6347 = vpow2.f32 %v4815_v9 }
0x224a   :  { %4847 = vmatpush.msra.mxu0 %v4823_v3 }
0x224c   :  { %5963 = vmatpush.xpose.msk.msrb.mxu0 %vm81_vm2, %v4930_v12 }
0x224f   :  { %v5163_v53 = vpop.permute.xlu0 %5162  ;;  %v6348_v14 = vpop.eup %6347 }
0x2250   :  { %5964 = vmatpush.xpose.msk.msrb.mxu0 %vm81_vm2, %v4928_v35  ;;  %v4817_v17 = vsel %vm113_vm4, %v6348_v14, 0.0 }
0x2257   :  { %v5161_v15 = vpop.permute.xlu0 %5160 }
0x225f   :  { %v5309_v27 = vpop.permute.xlu0 %5308 }
0x22cc   :  { %v4747_v6 = vpop.f32.mrf.mxu3 }
0x22cd   :  { %v4748_v47 = vadd.f32 %v7932_v36, %v4747_v6 }
0x22cf   :  { %5304 = vrot.lane.b32.xlu0 %v4748_v47, %s6426_s28  ;;  %5158 = vrot.lane.b32.xlu2 %v4748_v47, %s6422_s24 }
0x22d7   :  { %5231 = vrot.lane.b32.xlu0 %v4748_v47, %s6427_s29 }
0x22df   :  { %5043 = vrot.lane.b32.xlu0 %v7893_v45, %s6428_s30 }
0x22f8   :  { %4885 = vmax.xlane.f32.xlu2 %v4884_v22 }
0x2310   :  { %5306 = vrot.lane.b32.xlu2 %v7970_v16, %s6426_s28 }
0x2329   :  { %v5159_v31 = vpop.permute.xlu2 %5158 }
0x2339   :  { %4818 = vadd.xlane.f32.xlu2 %v4817_v17 }
0x2341   :  { %v5305_v10 = vpop.permute.xlu0 %5304 }
0x2349   :  { %v5232_v11 = vpop.permute.xlu0 %5231 }
0x2351   :  { %v5044_v1 = vpop.permute.xlu0 %5043  ;;  %5233 = vrot.lane.b32.xlu2 %v7970_v16, %s6427_s29 }
0x2352   :  { %5971 = vmatpush.msk.msrb.mxu2 %vm148_vm3, %v5044_v1 }
0x2359   :  { %5041 = vrot.lane.b32.xlu2 %v7888_v34, %s6428_s30 }
0x236b   :  { %v4886_v43 = vpop.xlane.xlu2 %4885 }
0x236c   :  { %v4887_v2 = vsub.f32 %v4881_v37, %v4886_v43 }
0x236e   :  { %v4888_v36 = vmul.f32 1.442695, %v4887_v2 }
0x2370   :  { %6349 = vpow2.f32 %v4888_v36 }
0x2373   :  { %v5307_v58 = vpop.permute.xlu2 %5306 }
0x2376   :  { %v6350_v39 = vpop.eup %6349 }
0x2377   :  { %v4890_v25 = vsel %vm113_vm4, %v6350_v39, 0.0 }
0x2378   :  { %4891 = vadd.xlane.f32.xlu1 %v4890_v25 }
0x2391   :  { %5235 = vrot.lane.b32.xlu1 %v7963_v49, %s6427_s29 }
0x2399   :  { %4970 = vrot.lane.b32.xlu1 %v7893_v45, %s6425_s27 }
0x23ac   :  { %v4819_v63 = vpop.xlane.xlu2 %4818 }
0x23ad   :  { %6351 = vrcp.f32 %v4819_v63 }
0x23b3   :  { %v6352_v52 = vpop.eup %6351 }
0x23b4   :  { %v4821_v40 = vmul.f32 %v6352_v52, %v6348_v14  ;;  %v5234_v56 = vpop.permute.xlu2 %5233 }
0x23b6   :  { %5957 = vmatmul.msk.f32.vlgmr.msra.gmra.mxu0 %vm113_vm4, %v4821_v40 }
0x23b7   :  { %5973 = vmatpush.xpose.msk.msra.mxu0 %vm81_vm2, %v7963_v49 }
0x23bb   :  { %5974 = vmatpush.xpose.msk.msra.mxu0 %vm81_vm2, %v7970_v16 }
0x23bc   :  { %v5042_v59 = vpop.permute.xlu2 %5041 }
0x23bd   :  { %5066 = vmatpush.msrb.mxu2 %v5042_v59 }
0x23be   :  { %5965 = vmatmul.msk.f32.vlgmr.msrb.gmra.mxu0 %vm81_vm2, %v4926_v13 }
0x23c6   :  { %5975 = vmatmul.msk.f32.vlgmr.msra.gmra.mxu0 %vm81_vm2, %v4748_v47 }
0x23eb   :  { %v4892_v45 = vpop.xlane.xlu1 %4891 }
0x23ec   :  { %6353 = vrcp.f32 %v4892_v45 }
0x23f2   :  { %v6354_v60 = vpop.eup %6353 }
0x23f3   :  { %v4894_v32 = vmul.f32 %v6354_v60, %v6350_v39 }
0x23f5   :  { %5962 = vmatmul.msk.f32.vlgmr.msra.gmra.mxu3 %vm113_vm4, %v4894_v32 }
0x23f6   :  { %5978 = vmatpush.xpose.msk.msra.mxu3 %vm81_vm2, %v5163_v53 }
0x23fa   :  { %5979 = vmatpush.xpose.msk.msra.mxu3 %vm81_vm2, %v5161_v15 }
0x23fd   :  { %5970 = vmatmul.msk.f32.vlgmr.msrb.gmra.mxu3 %vm81_vm2, %v4999_v7 }
0x23fe   :  { %5988 = vmatpush.xpose.msk.msrb.mxu3 %vm81_vm2, %v5309_v27 }
0x2402   :  { %5989 = vmatpush.xpose.msk.msrb.mxu3 %vm81_vm2, %v5307_v58 }
0x2403   :  { %v5236_v29 = vpop.permute.xlu1 %5235 }
0x2404   :  { %5983 = vmatpush.xpose.msk.msrb.mxu0 %vm81_vm2, %v5236_v29 }
0x2405   :  { %5980 = vmatmul.msk.f32.vlgmr.msra.gmra.mxu3 %vm81_vm2, %v5159_v31 }
0x2408   :  { %5984 = vmatpush.xpose.msk.msrb.mxu0 %vm81_vm2, %v5234_v56 }
0x240b   :  { %5985 = vmatmul.msk.f32.vlgmr.msrb.gmra.mxu0 %vm81_vm2, %v5232_v11  ;;  %v4971_v51 = vpop.permute.xlu1 %4970 }
0x240c   :  { %5966 = vmatpush.msk.msra.mxu1 %vm148_vm3, %v4971_v51 }
0x240d   :  { %5990 = vmatmul.msk.f32.vlgmr.msrb.gmra.mxu3 %vm81_vm2, %v5305_v10 }
0x2433   :  { %v8028_v46 = vpop.f32.mrf.mxu0 }
0x243b   :  { %v4954_v5 = vpop.f32.mrf.mxu0 }
0x243c   :  { %v4957_v18 = vsel %vm113_vm4, %v4954_v5, -inf }
0x243d   :  { %4958 = vmax.xlane.f32.xlu2 %v4957_v18 }
0x2443   :  { %v5114_v38 = vpop.f32.mrf.mxu0 }
0x2444   :  { %v5117_v44 = vsel %vm113_vm4, %v5114_v38, -inf }
0x2445   :  { %5118 = vmax.xlane.f32.xlu1 %v5117_v44 }
0x2478   :  { %v8032_v42 = vpop.f32.mrf.mxu3 }
0x2480   :  { %v5027_v41 = vpop.f32.mrf.mxu3 }
0x2481   :  { %v5030_v21 = vsel %vm113_vm4, %v5027_v41, -inf }
0x2482   :  { %5031 = vmax.xlane.f32.xlu1 %v5030_v21 }
0x2488   :  { %v8035_v57 = vpop.f32.mrf.mxu0  ;;  %v5187_v61 = vpop.f32.mrf.mxu3 }
0x2489   :  { %v5263_v28 = vsel %vm113_vm4, %v8035_v57, -inf  ;;  %v5190_v24 = vsel %vm113_vm4, %v5187_v61, -inf }
0x248a   :  { %5264 = vmax.xlane.f32.xlu0 %v5263_v28 }
0x2490   :  { %v5333_v23 = vpop.f32.mrf.mxu3 }
0x2491   :  { %v5336_v12 = vsel %vm113_vm4, %v5333_v23, -inf }
0x2492   :  { %5191 = vmax.xlane.f32.xlu0 %v5190_v24 }
0x249b   :  { %5203 = vrot.lane.b32.xlu1 %v7963_v49, %s6423_s25 }
0x24a3   :  { %5201 = vrot.lane.b32.xlu1 %v7970_v16, %s6423_s25 }
0x24b0   :  { %v4959_v62 = vpop.xlane.xlu2 %4958 }
0x24b1   :  { %v4960_v55 = vsub.f32 %v4954_v5, %v4959_v62 }
0x24b3   :  { %v4961_v19 = vmul.f32 1.442695, %v4960_v55 }
0x24b5   :  { %6355 = vpow2.f32 %v4961_v19 }
0x24b8   :  { %v5119_v50 = vpop.xlane.xlu1 %5118 }
0x24b9   :  { %v5120_v30 = vsub.f32 %v5114_v38, %v5119_v50 }
0x24bb   :  { %v6356_v0 = vpop.eup %6355  ;;  %v5121_v26 = vmul.f32 1.442695, %v5120_v30  ;;  %v5395_v30 = vld [vmem:[#allocation2 + $0x2d8] sm:$0xff] }
0x24bc   :  { %v4963_v3 = vsel %vm113_vm4, %v6356_v0, 0.0  ;;  %5416 = vmatpush.msra.mxu0 %v5395_v30 }
0x24bd   :  { %6357 = vpow2.f32 %v5121_v26  ;;  %4964 = vadd.xlane.f32.xlu2 %v4963_v3  ;;  %v5393_v3 = vld [vmem:[#allocation2 + $0x2c8] sm:$0xff] }
0x24c3   :  { %v8045_v4 = vpop.eup %6357 }
0x24c4   :  { %v5123_v35 = vsel %vm113_vm4, %v8045_v4, 0.0 }
0x24c5   :  { %5337 = vmax.xlane.f32.xlu2 %v5336_v12  ;;  %5124 = vadd.xlane.f32.xlu0 %v5123_v35 }
0x24d9   :  { %5128 = vrot.lane.b32.xlu0 %v7970_v16, %s6424_s26 }
0x24dd   :  { %4968 = vrot.lane.b32.xlu2 %v7888_v34, %s6425_s27 }
0x24e1   :  { %5347 = vrot.lane.b32.xlu0 %v7970_v16, %s6428_s30 }
0x24e9   :  { %5276 = vrot.lane.b32.xlu0 %v7963_v49, %s6425_s27 }
0x24f1   :  { %5274 = vrot.lane.b32.xlu0 %v7970_v16, %s6425_s27 }
0x24f5   :  { %v5032_v6 = vpop.xlane.xlu1 %5031 }
0x24f6   :  { %v5033_v47 = vsub.f32 %v5027_v41, %v5032_v6 }
0x24f8   :  { %v5034_v37 = vmul.f32 1.442695, %v5033_v47 }
0x24fa   :  { %6359 = vpow2.f32 %v5034_v37 }
0x24fd   :  { %v5265_v22 = vpop.xlane.xlu0 %5264 }
0x24fe   :  { %v5266_v36 = vsub.f32 %v8035_v57, %v5265_v22 }
0x2500   :  { %v6360_v7 = vpop.eup %6359  ;;  %v5267_v25 = vmul.f32 1.442695, %v5266_v36 }
0x2501   :  { %v5036_v8 = vsel %vm113_vm4, %v6360_v7, 0.0 }
0x2502   :  { %5037 = vadd.xlane.f32.xlu1 %v5036_v8 }
0x2505   :  { %v5192_v53 = vpop.xlane.xlu0 %5191 }
0x2506   :  { %v5193_v34 = vsub.f32 %v5187_v61, %v5192_v53 }
0x2508   :  { %v5194_v54 = vmul.f32 1.442695, %v5193_v34 }
0x250a   :  { %6361 = vpow2.f32 %v5194_v54 }
0x250d   :  { %v5204_v9 = vpop.permute.xlu1 %5203 }
0x250e   :  { %5981 = vmatpush.msk.msra.mxu2 %vm148_vm3, %v5204_v9  ;;  %v6065_v9 = vld [vmem:[#allocation2 + $0x381] ss:$0 sm:$0xff] }
0x2510   :  { %v6362_v15 = vpop.eup %6361 }
0x2511   :  { %v5196_v14 = vsel %vm113_vm4, %v6362_v15, 0.0 }
0x2512   :  { %5197 = vadd.xlane.f32.xlu1 %v5196_v14 }
0x2515   :  { %v5202_v16 = vpop.permute.xlu1 %5201 }
0x2516   :  { %5226 = vmatpush.msra.mxu2 %v5202_v16 }
0x252b   :  { %5130 = vrot.lane.b32.xlu1 %v7963_v49, %s6424_s26 }
0x2530   :  { %v4965_v17 = vpop.xlane.xlu2 %4964 }
0x2531   :  { %6363 = vrcp.f32 %v4965_v17 }
0x2537   :  { %v6364_v1 = vpop.eup %6363 }
0x2538   :  { %v5338_v27 = vpop.xlane.xlu2 %5337  ;;  %v4967_v31 = vmul.f32 %v6364_v1, %v6356_v0  ;;  %v5125_v56 = vpop.xlane.xlu0 %5124  ;;  %v5394_v0 = vld [vmem:[#allocation2 + $0x2d0] sm:$0xff] }
0x2539   :  { %v5339_v10 = vsub.f32 %v5333_v23, %v5338_v27  ;;  %5417 = vmatpush.msra.mxu0 %v5394_v0  ;;  %v5392_v23 = vld [vmem:[#allocation2 + $0x2c0] sm:$0xff] }
0x253b   :  { %v5340_v11 = vmul.f32 1.442695, %v5339_v10  ;;  %5418 = vmatpush.msra.mxu0 %v5393_v3 }
0x253d   :  { %6365 = vpow2.f32 %v5340_v11  ;;  %5419 = vmatpush.msra.mxu0 %v5392_v23 }
0x253e   :  { %6367 = vpow2.f32 %v5267_v25 }
0x2540   :  { %v4969_v43 = vpop.permute.xlu2 %4968 }
0x2541   :  { %4993 = vmatpush.msra.mxu1 %v4969_v43 }
0x2542   :  { %5967 = vmatmul.msk.f32.vlgmr.msra.gmra.mxu1 %vm113_vm4, %v4967_v31 }
0x2543   :  { %v6366_v2 = vpop.eup %6365 }
0x2544   :  { %v5342_v39 = vsel %vm113_vm4, %v6366_v2, 0.0  ;;  %v6368_v58 = vpop.eup %6367 }
0x2545   :  { %5343 = vadd.xlane.f32.xlu2 %v5342_v39  ;;  %v5269_v63 = vsel %vm113_vm4, %v6368_v58, 0.0 }
0x254b   :  { %v5129_v13 = vpop.permute.xlu0 %5128 }
0x2553   :  { %v5348_v29 = vpop.permute.xlu0 %5347 }
0x2555   :  { %5270 = vadd.xlane.f32.xlu1 %v5269_v63 }
0x255d   :  { %5349 = vrot.lane.b32.xlu2 %v7963_v49, %s6428_s30  ;;  %v5277_v49 = vpop.permute.xlu0 %5276 }
0x2565   :  { %v5275_v38 = vpop.permute.xlu0 %5274 }
0x256e   :  { %5072 = vrot.lane.b32.xlu1 %v8032_v42, %s6421_s18 }
0x2575   :  { %v5038_v52 = vpop.xlane.xlu1 %5037 }
0x2576   :  { %6369 = vrcp.f32 %v5038_v52  ;;  %v5483_v52 = vld [vmem:[#allocation2 + $0x2f0] sm:$0xff] }
0x257c   :  { %v6370_v40 = vpop.eup %6369 }
0x257d   :  { %v5040_v59 = vmul.f32 %v6370_v40, %v6360_v7  ;;  %v5482_v40 = vld [vmem:[#allocation2 + $0x2e8] sm:$0xff] }
0x257f   :  { %5972 = vmatmul.msk.f32.vlgmr.msrb.gmra.mxu2 %vm113_vm4, %v5040_v59 }
0x2585   :  { %v5198_v45 = vpop.xlane.xlu1 %5197 }
0x2586   :  { %6371 = vrcp.f32 %v5198_v45 }
0x2587   :  { %6373 = vrcp.f32 %v5125_v56  ;;  %v5481_v56 = vld [vmem:[#allocation2 + $0x2e0] sm:$0xff] }
0x258c   :  { %v6372_v60 = vpop.eup %6371 }
0x258d   :  { %v5200_v32 = vmul.f32 %v6372_v60, %v6362_v15  ;;  %v6374_v51 = vpop.eup %6373 }
0x258e   :  { %v5127_v18 = vmul.f32 %v6374_v51, %v8045_v4 }
0x258f   :  { %5982 = vmatmul.msk.f32.vlgmr.msra.gmra.mxu2 %vm113_vm4, %v5200_v32 }
0x259d   :  { %v5131_v5 = vpop.permute.xlu1 %5130 }
0x259e   :  { %5976 = vmatpush.msk.msrb.mxu1 %vm148_vm3, %v5131_v5 }
0x25a0   :  { %5153 = vmatpush.msrb.mxu1 %v5129_v13 }
0x25a1   :  { %5977 = vmatmul.msk.f32.vlgmr.msrb.gmra.mxu1 %vm113_vm4, %v5127_v18  ;;  %v6066_v18 = vld [vmem:[#allocation2 + $0x386] ss:$0 sm:$0xff] }
0x25a2   :  { %5986 = vmatpush.msk.msra.mxu1 %vm148_vm3, %v5277_v49 }
0x25a4   :  { %5299 = vmatpush.msra.mxu1 %v5275_v38 }
0x25b8   :  { %v5344_v44 = vpop.xlane.xlu2 %5343 }
0x25b9   :  { %6375 = vrcp.f32 %v5344_v44  ;;  %v6067_v44 = vld [vmem:[#allocation2 + $0x387] ss:$0 sm:$0xff] }
0x25bf   :  { %v6376_v42 = vpop.eup %6375  ;;  %v4995_v41 = vpop.f32.mrf.mxu1 }
0x25c0   :  { %v5350_v21 = vpop.permute.xlu2 %5349  ;;  %5076 = vrot.lane.b32.xlu2 %v4995_v41, %s6433_s8  ;;  %v5346_v57 = vmul.f32 %v6376_v42, %v6366_v2 }
0x25c1   :  { %5991 = vmatpush.msk.msrb.mxu2 %vm148_vm3, %v5350_v21 }
0x25c3   :  { %5372 = vmatpush.msrb.mxu2 %v5348_v29 }
0x25c4   :  { %5992 = vmatmul.msk.f32.vlgmr.msrb.gmra.mxu2 %vm113_vm4, %v5346_v57  ;;  %v5525_v57 = vld [vmem:[#allocation2 + $0x338] sm:$0xff] }
0x25c5   :  { %5542 = vmatpush.msra.mxu3 %v5525_v57 }
0x25c8   :  { %v5271_v28 = vpop.xlane.xlu1 %5270 }
0x25c9   :  { %6377 = vrcp.f32 %v5271_v28  ;;  %v5524_v28 = vld [vmem:[#allocation2 + $0x330] sm:$0xff] }
0x25ca   :  { %5543 = vmatpush.msra.mxu3 %v5524_v28 }
0x25cf   :  { %v6378_v61 = vpop.eup %6377 }
0x25d0   :  { %v5273_v24 = vmul.f32 %v6378_v61, %v6368_v58  ;;  %v5523_v61 = vld [vmem:[#allocation2 + $0x328] sm:$0xff] }
0x25d1   :  { %5544 = vmatpush.msra.mxu3 %v5523_v61 }
0x25d2   :  { %5987 = vmatmul.msk.f32.vlgmr.msra.gmra.mxu1 %vm113_vm4, %v5273_v24 }
0x25e0   :  { %v5073_v4 = vpop.permute.xlu1 %5072 }
0x25e1   :  { %v5083_v35 = vsel %vm81_vm2, %v8028_v46, %v5073_v4 }
0x2602   :  { %v5068_v62 = vpop.f32.mrf.mxu2 }
0x2603   :  { %5080 = vrot.lane.b32.xlu0 %v5068_v62, %s6434_s9 }
0x2612   :  { %v5228_v55 = vpop.f32.mrf.mxu2 }
0x2613   :  { %5378 = vrot.lane.b32.xlu2 %v5228_v55, %s6421_s18  ;;  %v5522_v55 = vld [vmem:[#allocation2 + $0x320] sm:$0xff] }
0x2614   :  { %5545 = vmatpush.msra.mxu3 %v5522_v55 }
0x261a   :  { %v5077_v12 = vpop.permute.xlu2 %5076 }
0x261b   :  { %v5084_v6 = vsel %vm491_vm6, %v5083_v35, %v5077_v12 }
0x261e   :  { %v5155_v19 = vpop.f32.mrf.mxu1 }
0x2647   :  { %v5374_v50 = vpop.f32.mrf.mxu2 }
0x2648   :  { %5386 = vrot.lane.b32.xlu2 %v5374_v50, %s6434_s9  ;;  %v5521_v50 = vld [vmem:[#allocation2 + $0x318] sm:$0xff] }
0x2649   :  { %5546 = vmatpush.msra.mxu3 %v5521_v50 }
0x264f   :  { %v5301_v26 = vpop.f32.mrf.mxu1 }
0x2650   :  { %5382 = vrot.lane.b32.xlu0 %v5301_v26, %s6433_s8 }
0x266d   :  { %v5379_v22 = vpop.permute.xlu2 %5378 }
0x266e   :  { %v5389_v7 = vsel %vm81_vm2, %v5155_v19, %v5379_v22  ;;  %v5519_v22 = vld [vmem:[#allocation2 + $0x308] sm:$0xff] }
0x2675   :  { %v5081_v47 = vpop.permute.xlu0 %5080 }
0x2676   :  { %v5085_v37 = vsel %vm494_vm7, %v5084_v6, %v5081_v47 }
0x2677   :  { %5993 = vmatmul.msk.f32.vlgmr.msra.gmra.mxu0 %vm39_vm0, %v5085_v37  ;;  %v5520_v37 = vld [vmem:[#allocation2 + $0x310] sm:$0xff] }
0x2678   :  { %5547 = vmatpush.msra.mxu3 %v5520_v37 }
0x267a   :  { %5548 = vmatpush.msra.mxu3 %v5519_v22 }
0x26a2   :  { %v5387_v53 = vpop.permute.xlu2 %5386 }
0x26c2   :  { %v5383_v8 = vpop.permute.xlu0 %5382 }
0x26c3   :  { %v5390_v34 = vsel %vm491_vm6, %v5389_v7, %v5383_v8  ;;  %v5518_v7 = vld [vmem:[#allocation2 + $0x300] sm:$0xff] }
0x26c4   :  { %v5391_v54 = vsel %vm494_vm7, %v5390_v34, %v5387_v53  ;;  %5549 = vmatpush.msra.mxu3 %v5518_v7  ;;  %v6068_v8 = vld [vmem:[#allocation2 + $0x382] ss:$0 sm:$0xff] }
0x26c5   :  { %5994 = vmatmul.msk.f32.gmra.mxu0 %vm39_vm0, %v5391_v54 }
0x26f4   :  { %v5421_v46 = vpop.f32.mrf.mxu0 }
0x26f5   :  { %v5422_v15 = vadd.f32 %v6065_v9, %v5421_v46 }
0x26f7   :  { %v5427_v14 = vadd.f32 %v5422_v15, %v7922_v20 }
0x26f9   :  { %v5429_v16 = vsel %vm39_vm0, %v5427_v14, 0.0 }
0x26fa   :  { %5430 = vadd.xlane.f32.xlu0 %v5429_v16 }
0x2742   :  { %v5424_v17 = vpop.f32.mrf.mxu0 }
0x2743   :  { %v5425_v27 = vadd.f32 %v6065_v9, %v5424_v17 }
0x2745   :  { %v5428_v10 = vadd.f32 %v5425_v27, %v7981_v48  ;;  %v5484_v48 = vld [vmem:[#allocation2 + $0x2f8] sm:$0xff] }
0x2746   :  { %5505 = vmatpush.msrb.mxu1 %v5484_v48 }
0x2747   :  { %v5432_v11 = vsel %vm39_vm0, %v5428_v10, 0.0 }
0x2748   :  { %5433 = vadd.xlane.f32.xlu1 %v5432_v11  ;;  %5506 = vmatpush.msrb.mxu1 %v5483_v52 }
0x274a   :  { %5507 = vmatpush.msrb.mxu1 %v5482_v40 }
0x274c   :  { %5508 = vmatpush.msrb.mxu1 %v5481_v56 }
0x276d   :  { %v5431_v1 = vpop.xlane.xlu0 %5430 }
0x276e   :  { %v5435_v31 = vmul.f32 %v5431_v1, %v6841_v33 }
0x2770   :  { %v5437_v43 = vsub.f32 %v5427_v14, %v5435_v31  ;;  %v6069_v14 = vld [vmem:[#allocation2 + $0x383] ss:$0 sm:$0xff] }
0x2772   :  { %v5439_v2 = vmul.f32 %v5437_v43, %v5437_v43 }
0x2774   :  { %v5441_v36 = vsel %vm39_vm0, %v5439_v2, 0.0 }
0x2775   :  { %5442 = vadd.xlane.f32.xlu2 %v5441_v36 }
0x27bb   :  { %v5434_v39 = vpop.xlane.xlu1 %5433 }
0x27bc   :  { %v5436_v20 = vmul.f32 %v5434_v39, %v6841_v33 }
0x27be   :  { %v5438_v25 = vsub.f32 %v5428_v10, %v5436_v20 }
0x27c0   :  { %v5440_v58 = vmul.f32 %v5438_v25, %v5438_v25 }
0x27c2   :  { %v5444_v63 = vsel %vm39_vm0, %v5440_v58, 0.0 }
0x27c3   :  { %5445 = vadd.xlane.f32.xlu0 %v5444_v63 }
0x27e8   :  { %v5443_v59 = vpop.xlane.xlu2 %5442 }
0x27e9   :  { %v5447_v13 = vmul.f32 %v5443_v59, %v6841_v33 }
0x27eb   :  { %v5449_v45 = vadd.f32 1e-05, %v5447_v13 }
0x27ed   :  { %6379 = vrsqrt.f32 %v5449_v45  ;;  %vm5457_vm3 = vweird.f32 %v5449_v45 }
0x27f3   :  { %v6380_v60 = vpop.eup %6379 }
0x27f4   :  { %v5452_v32 = vmul.f32 %v6380_v60, %v5449_v45  ;;  %vm5458_vm2 = vweird.f32 %v6380_v60 }
0x27f5   :  { %vm5459_vm4 = vmor %vm5457_vm3, %vm5458_vm2 }
0x27f6   :  { %v5453_v29 = vmul.f32 %v6380_v60, %v5452_v32 }
0x27f8   :  { %v5454_v49 = vmul.f32 0.5, %v5453_v29 }
0x27fa   :  { %v5455_v51 = vsub.f32 1.5, %v5454_v49 }
0x27fc   :  { %v5456_v5 = vmul.f32 %v6380_v60, %v5455_v51 }
0x27fe   :  { %v5460_v38 = vsel %vm5459_vm4, %v6380_v60, %v5456_v5  ;;  %v6070_v5 = vld [vmem:[#allocation2 + $0x388] ss:$0 sm:$0xff] }
0x27ff   :  { %v5471_v42 = vmul.f32 %v5460_v38, %v5437_v43 }
0x2801   :  { %v5475_v41 = vmul.f32 %v6066_v18, %v5471_v42 }
0x2803   :  { %v5479_v21 = vadd.f32 %v6067_v44, %v5475_v41 }
0x2805   :  { %5995 = vmatmul.msk.f32.vlgmr.msrb.gmra.mxu1 %vm39_vm0, %v5479_v21 }
0x2836   :  { %v5446_v24 = vpop.xlane.xlu0 %5445 }
0x2837   :  { %v5448_v62 = vmul.f32 %v5446_v24, %v6841_v33 }
0x2839   :  { %v5450_v19 = vadd.f32 1e-05, %v5448_v62 }
0x283b   :  { %6381 = vrsqrt.f32 %v5450_v19  ;;  %vm5467_vm7 = vweird.f32 %v5450_v19 }
0x2841   :  { %v6382_v30 = vpop.eup %6381 }
0x2842   :  { %v5462_v0 = vmul.f32 %v6382_v30, %v5450_v19  ;;  %vm5468_vm6 = vweird.f32 %v6382_v30 }
0x2843   :  { %vm5469_vm14 = vmor %vm5467_vm7, %vm5468_vm6 }
0x2844   :  { %v5463_v26 = vmul.f32 %v6382_v30, %v5462_v0 }
0x2846   :  { %v5464_v3 = vmul.f32 0.5, %v5463_v26 }
0x2848   :  { %v5465_v23 = vsub.f32 1.5, %v5464_v3 }
0x284a   :  { %v5466_v4 = vmul.f32 %v6382_v30, %v5465_v23 }
0x284c   :  { %v5470_v12 = vsel %vm5469_vm14, %v6382_v30, %v5466_v4 }
0x284d   :  { %v5472_v35 = vmul.f32 %v5470_v12, %v5438_v25 }
0x284f   :  { %v5476_v6 = vmul.f32 %v6066_v18, %v5472_v35 }
0x2851   :  { %v5480_v47 = vadd.f32 %v6067_v44, %v5476_v6  ;;  %v6071_v44 = vld [vmem:[#allocation2 + $0x389] ss:$0 sm:$0xff] }
0x2853   :  { %5996 = vmatmul.msk.f32.gmra.mxu1 %vm39_vm0, %v5480_v47 }
0x2882   :  { %v5510_v53 = vpop.f32.mrf.mxu1 }
0x2883   :  { %v5511_v34 = vadd.f32 %v6068_v8, %v5510_v53 }
0x2885   :  { %v5516_v54 = vmax.f32 %v5511_v34, 0.0 }
0x2887   :  { %5997 = vmatmul.msk.f32.vlgmr.msra.gmra.mxu3 %vm1104_vm12, %v5516_v54  ;;  %v5666_v54 = vld [vmem:[#allocation2 + $0x358] sm:$0xff] }
0x2888   :  { %5687 = vmatpush.msra.mxu2 %v5666_v54 }
0x28d0   :  { %v5513_v9 = vpop.f32.mrf.mxu1 }
0x28d1   :  { %v5514_v46 = vadd.f32 %v6068_v8, %v5513_v9  ;;  %v5665_v9 = vld [vmem:[#allocation2 + $0x350] sm:$0xff] }
0x28d2   :  { %5688 = vmatpush.msra.mxu2 %v5665_v9 }
0x28d3   :  { %v5517_v15 = vmax.f32 %v5514_v46, 0.0  ;;  %v5664_v46 = vld [vmem:[#allocation2 + $0x348] sm:$0xff] }
0x28d4   :  { %5689 = vmatpush.msra.mxu2 %v5664_v46 }
0x28d5   :  { %5998 = vmatmul.msk.f32.gmra.mxu3 %vm1104_vm12, %v5517_v15  ;;  %v5663_v15 = vld [vmem:[#allocation2 + $0x340] sm:$0xff] }
0x28d6   :  { %5690 = vmatpush.msra.mxu2 %v5663_v15 }
0x290a   :  { %v5551_v16 = vpop.f32.mrf.mxu3 }
0x290b   :  { %v5552_v17 = vadd.f32 %v6069_v14, %v5551_v16 }
0x290d   :  { %v5557_v27 = vadd.f32 %v5552_v17, %v5479_v21 }
0x290f   :  { %v5559_v10 = vsel %vm39_vm0, %v5557_v27, 0.0 }
0x2910   :  { %5560 = vadd.xlane.f32.xlu1 %v5559_v10 }
0x2958   :  { %v5554_v11 = vpop.f32.mrf.mxu3 }
0x2959   :  { %v5555_v1 = vadd.f32 %v6069_v14, %v5554_v11 }
0x295b   :  { %v5558_v31 = vadd.f32 %v5555_v1, %v5480_v47 }
0x295d   :  { %v5562_v43 = vsel %vm39_vm0, %v5558_v31, 0.0 }
0x295e   :  { %5563 = vadd.xlane.f32.xlu2 %v5562_v43 }
0x2983   :  { %v5561_v2 = vpop.xlane.xlu1 %5560 }
0x2984   :  { %v5565_v36 = vmul.f32 %v5561_v2, %v6841_v33  ;;  %v6072_v2 = vld [vmem:[#allocation2 + $0x38c] ss:$0 sm:$0xff] }
0x2986   :  { %v5567_v39 = vsub.f32 %v5557_v27, %v5565_v36 }
0x2988   :  { %v5569_v20 = vmul.f32 %v5567_v39, %v5567_v39 }
0x298a   :  { %v5571_v25 = vsel %vm39_vm0, %v5569_v20, 0.0 }
0x298b   :  { %5572 = vadd.xlane.f32.xlu0 %v5571_v25 }
0x29d1   :  { %v5564_v58 = vpop.xlane.xlu2 %5563 }
0x29d2   :  { %v5566_v63 = vmul.f32 %v5564_v58, %v6841_v33 }
0x29d4   :  { %v5568_v48 = vsub.f32 %v5558_v31, %v5566_v63 }
0x29d6   :  { %v5570_v52 = vmul.f32 %v5568_v48, %v5568_v48 }
0x29d8   :  { %v5574_v40 = vsel %vm39_vm0, %v5570_v52, 0.0 }
0x29d9   :  { %5575 = vadd.xlane.f32.xlu1 %v5574_v40 }
0x29fe   :  { %v5573_v56 = vpop.xlane.xlu0 %5572 }
0x29ff   :  { %v5577_v59 = vmul.f32 %v5573_v56, %v6841_v33 }
0x2a01   :  { %v5579_v13 = vadd.f32 1e-05, %v5577_v59 }
0x2a03   :  { %6383 = vrsqrt.f32 %v5579_v13  ;;  %vm5587_vm15 = vweird.f32 %v5579_v13 }
0x2a09   :  { %v6384_v45 = vpop.eup %6383 }
0x2a0a   :  { %v5582_v60 = vmul.f32 %v6384_v45, %v5579_v13  ;;  %vm5588_vm12 = vweird.f32 %v6384_v45 }
0x2a0b   :  { %vm5589_vm5 = vmor %vm5587_vm15, %vm5588_vm12 }
0x2a0c   :  { %v5583_v32 = vmul.f32 %v6384_v45, %v5582_v60 }
0x2a0e   :  { %v5584_v29 = vmul.f32 0.5, %v5583_v32 }
0x2a10   :  { %v5585_v49 = vsub.f32 1.5, %v5584_v29 }
0x2a12   :  { %v5586_v51 = vmul.f32 %v6384_v45, %v5585_v49 }
0x2a14   :  { %v5590_v18 = vsel %vm5589_vm5, %v6384_v45, %v5586_v51 }
0x2a15   :  { %v5601_v38 = vmul.f32 %v5590_v18, %v5567_v39  ;;  %v6073_v39 = vld [vmem:[#allocation2 + $0x38d] ss:$0 sm:$0xff] }
0x2a17   :  { %v5605_v42 = vmul.f32 %v6070_v5, %v5601_v38 }
0x2a19   :  { %v5609_v41 = vadd.f32 %v6071_v44, %v5605_v42 }
0x2a1b   :  { %v5611_v21 = vsel %vm39_vm0, %v5609_v41, 0.0 }
0x2a1c   :  { %5612 = vadd.xlane.f32.xlu2 %v5611_v21 }
0x2a4c   :  { %v5576_v57 = vpop.xlane.xlu1 %5575 }
0x2a4d   :  { %v5578_v28 = vmul.f32 %v5576_v57, %v6841_v33 }
0x2a4f   :  { %v5580_v61 = vadd.f32 1e-05, %v5578_v28 }
0x2a51   :  { %6385 = vrsqrt.f32 %v5580_v61  ;;  %vm5597_vm8 = vweird.f32 %v5580_v61 }
0x2a57   :  { %v6386_v24 = vpop.eup %6385 }
0x2a58   :  { %v5592_v62 = vmul.f32 %v6386_v24, %v5580_v61  ;;  %vm5598_vm9 = vweird.f32 %v6386_v24 }
0x2a59   :  { %vm5599_vm10 = vmor %vm5597_vm8, %vm5598_vm9 }
0x2a5a   :  { %v5593_v55 = vmul.f32 %v6386_v24, %v5592_v62 }
0x2a5c   :  { %v5594_v19 = vmul.f32 0.5, %v5593_v55 }
0x2a5e   :  { %v5595_v50 = vsub.f32 1.5, %v5594_v19 }
0x2a60   :  { %v5596_v30 = vmul.f32 %v6386_v24, %v5595_v50 }
0x2a62   :  { %v5600_v0 = vsel %vm5599_vm10, %v6386_v24, %v5596_v30 }
0x2a63   :  { %v5602_v26 = vmul.f32 %v5600_v0, %v5568_v48 }
0x2a65   :  { %v5606_v3 = vmul.f32 %v6070_v5, %v5602_v26  ;;  %v6074_v5 = vld [vmem:[#allocation2 + $0x38e] ss:$0 sm:$0xff] }
0x2a67   :  { %v5610_v23 = vadd.f32 %v6071_v44, %v5606_v3 }
0x2a69   :  { %v5614_v4 = vsel %vm39_vm0, %v5610_v23, 0.0 }
0x2a6a   :  { %5615 = vadd.xlane.f32.xlu0 %v5614_v4 }
0x2a8f   :  { %v5613_v12 = vpop.xlane.xlu2 %5612 }
0x2a90   :  { %v5617_v35 = vmul.f32 %v5613_v12, %v6841_v33 }
0x2a92   :  { %v5619_v6 = vsub.f32 %v5609_v41, %v5617_v35 }
0x2a94   :  { %v5621_v47 = vmul.f32 %v5619_v6, %v5619_v6 }
0x2a96   :  { %v5623_v37 = vsel %vm39_vm0, %v5621_v47, 0.0 }
0x2a97   :  { %5624 = vadd.xlane.f32.xlu1 %v5623_v37 }
0x2add   :  { %v5616_v22 = vpop.xlane.xlu0 %5615 }
0x2ade   :  { %v5618_v7 = vmul.f32 %v5616_v22, %v6841_v33 }
0x2ae0   :  { %v5620_v8 = vsub.f32 %v5610_v23, %v5618_v7 }
0x2ae2   :  { %v5622_v53 = vmul.f32 %v5620_v8, %v5620_v8 }
0x2ae4   :  { %v5626_v34 = vsel %vm39_vm0, %v5622_v53, 0.0 }
0x2ae5   :  { %5627 = vadd.xlane.f32.xlu2 %v5626_v34 }
0x2b0a   :  { %v5625_v14 = vpop.xlane.xlu1 %5624 }
0x2b0b   :  { %v5629_v16 = vmul.f32 %v5625_v14, %v6841_v33 }
0x2b0d   :  { %v5631_v17 = vadd.f32 1e-05, %v5629_v16 }
0x2b0f   :  { %6387 = vrsqrt.f32 %v5631_v17  ;;  %vm5639_vm1 = vweird.f32 %v5631_v17 }
0x2b15   :  { %v6388_v27 = vpop.eup %6387 }
0x2b16   :  { %v5634_v10 = vmul.f32 %v6388_v27, %v5631_v17  ;;  %vm5640_vm11 = vweird.f32 %v6388_v27 }
0x2b17   :  { %vm5641_vm13 = vmor %vm5639_vm1, %vm5640_vm11 }
0x2b18   :  { %v5635_v11 = vmul.f32 %v6388_v27, %v5634_v10 }
0x2b1a   :  { %v5636_v1 = vmul.f32 0.5, %v5635_v11 }
0x2b1c   :  { %v5637_v31 = vsub.f32 1.5, %v5636_v1 }
0x2b1e   :  { %v5638_v43 = vmul.f32 %v6388_v27, %v5637_v31 }
0x2b20   :  { %v5642_v36 = vsel %vm5641_vm13, %v6388_v27, %v5638_v43 }
0x2b21   :  { %v5653_v20 = vmul.f32 %v5642_v36, %v5619_v6 }
0x2b23   :  { %v5657_v25 = vmul.f32 %v6072_v2, %v5653_v20 }
0x2b25   :  { %v5661_v58 = vadd.f32 %v6073_v39, %v5657_v25 }
0x2b27   :  { %5999 = vmatmul.msk.f32.vlgmr.msra.gmra.mxu2 %vm39_vm0, %v5661_v58 }
0x2b58   :  { %v5628_v63 = vpop.xlane.xlu2 %5627 }
0x2b59   :  { %v5630_v48 = vmul.f32 %v5628_v63, %v6841_v33 }
0x2b5b   :  { %v5632_v52 = vadd.f32 1e-05, %v5630_v48 }
0x2b5d   :  { %6389 = vrsqrt.f32 %v5632_v52  ;;  %vm5649_vm3 = vweird.f32 %v5632_v52 }
0x2b63   :  { %v6390_v40 = vpop.eup %6389 }
0x2b64   :  { %v5644_v56 = vmul.f32 %v6390_v40, %v5632_v52  ;;  %vm5650_vm2 = vweird.f32 %v6390_v40 }
0x2b65   :  { %vm5651_vm4 = vmor %vm5649_vm3, %vm5650_vm2 }
0x2b66   :  { %v5645_v59 = vmul.f32 %v6390_v40, %v5644_v56 }
0x2b68   :  { %v5646_v13 = vmul.f32 0.5, %v5645_v59 }
0x2b6a   :  { %v5647_v45 = vsub.f32 1.5, %v5646_v13 }
0x2b6c   :  { %v5648_v60 = vmul.f32 %v6390_v40, %v5647_v45 }
0x2b6e   :  { %v5652_v32 = vsel %vm5651_vm4, %v6390_v40, %v5648_v60 }
0x2b6f   :  { %v5654_v29 = vmul.f32 %v5652_v32, %v5620_v8 }
0x2b71   :  { %v5658_v49 = vmul.f32 %v6072_v2, %v5654_v29 }
0x2b73   :  { %v5662_v51 = vadd.f32 %v6073_v39, %v5658_v49 }
0x2b75   :  { %6000 = vmatmul.msk.f32.gmra.mxu2 %vm39_vm0, %v5662_v51 }
0x2baa   :  { %v5692_v18 = vpop.f32.mrf.mxu2 }
0x2bab   :  { %v5693_v33 = vadd.f32 %v6074_v5, %v5692_v18 }
0x2bad   :  { %5698 = vst [vmem:[%s8137_s3] sm:$0xff] %v5693_v33 }
0x2bf8   :  { %v5695_v38 = vpop.f32.mrf.mxu2 }
0x2bf9   :  { %v5696_v44 = vadd.f32 %v6074_v5, %v5695_v38 }
0x2bfb   :  { %5699 = vst [vmem:[%s8137_s3 + $0x8] sm:$0xff] %v5696_v44 }
0x2bfc   :  { %5704 = vsyncpa [#allocation3], 1 }

</bundles_post_ra>
